<compile_context>
chip_gen: v5e
topology: v5e:2x2
jax: 0.10.0
libtpu: 0.0.40
codegen_flags: <defaults>
</compile_context>

<pallas_src>
import jax
import jax.numpy as jnp
from jax import lax
from jax.experimental import pallas as pl
from jax.experimental.pallas import tpu as pltpu


def _border_masks(H, W, KS, dtype):
    """(KS*KS, H*W) 0/1 mask: 1 where the zero-padded branch's tap reads a real
    (in-bounds) pixel, 0 where it reads the zero padding."""
    P = KS // 2
    ii = jnp.repeat(jnp.arange(H), W)   # output row index i, per flattened position
    jj = jnp.tile(jnp.arange(W), H)     # output col index j
    masks = []
    for dy in range(KS):
        for dx in range(KS):
            si = ii + dy - P
            sj = jj + dx - P
            valid = (si >= 0) & (si < H) & (sj >= 0) & (sj < W)
            masks.append(valid)
    return jnp.stack(masks).astype(dtype)          # (KS*KS, H*W)


def _make_kernel(H, W, Cin, KS, ipb):
    P = KS // 2
    T = KS * KS
    M = ipb * H * W

    def kernel(xp_ref, w_ref, mask_ref, b_ref, o_ref, slab_ref):
        # xp_ref  : (ipb, H+2P, W+2P, Cin) bf16, circular ("wrap") padded images
        # w_ref   : (2*T*Cin, Cout) bf16  -- rows [0,T*Cin)=donut, [T*Cin,2*T*Cin)=tablet
        # mask_ref: (T, M, Cin) bf16      -- 0/1 border mask for the zero-pad branch
        # b_ref   : (1, Cout) f32         -- summed branch biases (zeros if bias=False)
        # o_ref   : (M, Cout)
        # slab_ref: VMEM (M, 2*T*Cin) bf16 scratch (in-kernel im2col slab)
        xp = xp_ref[...]
        for k in range(T):                             # statically unrolled taps
            dy, dx = divmod(k, KS)
            tap = xp[:, dy:dy + H, dx:dx + W, :].reshape(M, Cin)
            # donut branch: circular padding -> wrapped taps as-is
            slab_ref[:, k * Cin:(k + 1) * Cin] = tap
            # tablet branch: zero padding -> same taps with border reads zeroed
            slab_ref[:, (T + k) * Cin:(T + k + 1) * Cin] = tap * mask_ref[k]
        # Single big MXU matmul: K = 2*T*Cin (both branches folded into the
        # contraction axis), f32 accumulation.
        acc = jnp.dot(slab_ref[...], w_ref[...],
                      preferred_element_type=jnp.float32)
        o_ref[...] = (acc + b_ref[...]).astype(o_ref.dtype)

    return kernel


def two_branch_grid_conv(x_nchw, w_donut, w_tablet, b_donut=None, b_tablet=None,
                         *, compute_dtype=jnp.bfloat16, images_per_block=None):
    """TwoBranchGridConv.forward.

    x_nchw           : (N, Cin, H, W) float32 (NCHW, like the PyTorch module)
    w_donut/w_tablet : (K, K, Cin, Cout) HWIO conv weights
    b_donut/b_tablet : optional (Cout,) biases (module default: bias=False)
    """
    N, Cin, H, W = x_nchw.shape
    KS = w_donut.shape[0]
    Cout = w_donut.shape[-1]
    assert w_donut.shape == (KS, KS, Cin, Cout) and w_tablet.shape == w_donut.shape
    P = KS // 2
    T = KS * KS
    HW = H * W

    # Images per grid step: grow until the matmul M dimension reaches ~256 rows.
    if images_per_block is None:
        ipb = 1
        while N % (2 * ipb) == 0 and ipb * HW < 256:
            ipb *= 2
    else:
        ipb = images_per_block
    assert N % ipb == 0
    M = ipb * HW

    # Single circularly padded bf16 copy of the activations (the only
    # activation tensor that goes to HBM / the kernel).
    x_nhwc = jnp.transpose(x_nchw, (0, 2, 3, 1))
    xp = jnp.pad(x_nhwc, ((0, 0), (P, P), (P, P), (0, 0)), mode="wrap")
    xp = xp.astype(compute_dtype)                       # (N, H+2P, W+2P, Cin)

    # Stack both branches' weights along the contraction axis: (2*T*Cin, Cout).
    w_big = jnp.concatenate(
        [w_donut.reshape(T * Cin, Cout), w_tablet.reshape(T * Cin, Cout)],
        axis=0).astype(compute_dtype)

    # Border mask for the zero-padding branch, tiled per image in the block.
    mask = _border_masks(H, W, KS, compute_dtype)                    # (T, HW)
    mask = jnp.tile(mask[:, None, :], (1, ipb, 1)).reshape(T, M)     # (T, M)
    mask = jnp.broadcast_to(mask[:, :, None], (T, M, Cin))           # (T, M, Cin)

    # Fold both branch biases into a single per-channel f32 add.
    bias = jnp.zeros((Cout,), jnp.float32)
    if b_donut is not None:
        bias = bias + b_donut.astype(jnp.float32)
    if b_tablet is not None:
        bias = bias + b_tablet.astype(jnp.float32)
    bias = bias.reshape(1, Cout)

    kernel = _make_kernel(H, W, Cin, KS, ipb)

    out = pl.pallas_call(
        kernel,
        out_shape=jax.ShapeDtypeStruct((N * HW, Cout), x_nchw.dtype),
        grid=(N // ipb,),
        in_specs=[
            pl.BlockSpec((ipb, H + 2 * P, W + 2 * P, Cin),
                         lambda g: (g, 0, 0, 0)),
            pl.BlockSpec((2 * T * Cin, Cout), lambda g: (0, 0)),      # constant
            pl.BlockSpec((T, M, Cin), lambda g: (0, 0, 0)),           # constant
            pl.BlockSpec((1, Cout), lambda g: (0, 0)),                # constant
        ],
        out_specs=pl.BlockSpec((M, Cout), lambda g: (g, 0)),
        scratch_shapes=[pltpu.VMEM((M, 2 * T * Cin), compute_dtype)],
        compiler_params=pltpu.CompilerParams(
            dimension_semantics=("parallel",)),
    )(xp, w_big, mask, bias)

    out = out.reshape(N, H, W, Cout)
    return jnp.transpose(out, (0, 3, 1, 2))             # NHWC -> NCHW


def _ref_two_branch(x_nchw, w_donut, w_tablet, b_donut=None, b_tablet=None,
                    dtype=jnp.float32):
    """Pure-JAX reference (lax.conv).  `dtype` controls input precision so the
    bf16 kernel inputs can be matched exactly (accumulation stays f32)."""
    KS = w_donut.shape[0]
    P = KS // 2
    x = jnp.transpose(x_nchw, (0, 2, 3, 1)).astype(dtype)
    wd = w_donut.astype(dtype)
    wt = w_tablet.astype(dtype)
    dn = ("NHWC", "HWIO", "NHWC")
    xc = jnp.pad(x, ((0, 0), (P, P), (P, P), (0, 0)), mode="wrap")
    yc = lax.conv_general_dilated(xc, wd, (1, 1), "VALID", dimension_numbers=dn,
                                  preferred_element_type=jnp.float32)
    yz = lax.conv_general_dilated(x, wt, (1, 1), ((P, P), (P, P)),
                                  dimension_numbers=dn,
                                  preferred_element_type=jnp.float32)
    y = yc + yz
    if b_donut is not None:
        y = y + b_donut.astype(jnp.float32)
    if b_tablet is not None:
        y = y + b_tablet.astype(jnp.float32)
    return jnp.transpose(y, (0, 3, 1, 2)).astype(jnp.float32)


if __name__ == "__main__":
    def run_case(key, N, C_in, C_out, H, W, use_bias):
        ks = jax.random.split(key, 5)
        wd = 0.1 * jax.random.normal(ks[0], (3, 3, C_in, C_out), jnp.float32)
        wt = 0.1 * jax.random.normal(ks[1], (3, 3, C_in, C_out), jnp.float32)
        bd = bt = None
        if use_bias:
            bd = 0.1 * jax.random.normal(ks[2], (C_out,), jnp.float32)
            bt = 0.1 * jax.random.normal(ks[3], (C_out,), jnp.float32)
        x = jax.random.normal(ks[4], (N, C_in, H, W), jnp.float32)

        out = jax.block_until_ready(two_branch_grid_conv(x, wd, wt, bd, bt))
        assert out.shape == (N, C_out, H, W)

        # Tight check vs a reference fed the same bf16-cast inputs (f32 accum),
        # loose check vs the full-f32 reference (bf16 input quantization noise).
        ref_bf16 = _ref_two_branch(x, wd, wt, bd, bt, dtype=jnp.bfloat16)
        ref_f32 = _ref_two_branch(x, wd, wt, bd, bt, dtype=jnp.float32)
        err_tight = float(jnp.max(jnp.abs(out - ref_bf16)))
        err_loose = float(jnp.max(jnp.abs(out - ref_f32)))
        assert jnp.allclose(out, ref_bf16, atol=2e-2, rtol=2e-2), err_tight
        assert jnp.allclose(out, ref_f32, atol=1e-1, rtol=1e-1), err_loose
        return err_tight, err_loose

    key = jax.random.PRNGKey(0)
    k1, k2 = jax.random.split(key)
    # Case 1: 16x16 spatial -> M = H*W = 256 rows with 1 image per grid step.
    run_case(k1, N=2, C_in=32, C_out=32, H=16, W=16, use_bias=False)
    # Case 2: 8x8 spatial -> 4 images batched per grid step (M = 256), with bias.
    run_case(k2, N=4, C_in=32, C_out=32, H=8, W=8, use_bias=True)
    print("KERNEL_OK")
</pallas_src>

<mosaic_0001>
module attributes {stable_mosaic.version = 11 : i64} {
  func.func @kernel(%arg0: i32, %arg1: memref<1x18x18x32xbf16, #tpu.memory_space<vmem>>, %arg2: memref<576x32xbf16, #tpu.memory_space<vmem>>, %arg3: memref<9x256x32xbf16, #tpu.memory_space<vmem>>, %arg4: memref<1x32xf32, #tpu.memory_space<vmem>>, %arg5: memref<256x32xf32, #tpu.memory_space<vmem>>, %arg6: memref<256x576xbf16, #tpu.memory_space<vmem>>) attributes {dimension_semantics = [#tpu.dimension_semantics<parallel>], iteration_bounds = array<i64: 2>, scalar_prefetch = 0 : i64, scratch_operands = 1 : i64, tpu.core_type = #tpu.core_type<tc>, window_params = [{transform_indices = @transform_0, window_bounds = array<i64: 1, 18, 18, 32>}, {pipeline_mode = #tpu.pipeline_mode<synchronous>, transform_indices = @transform_1, window_bounds = array<i64: 576, 32>}, {pipeline_mode = #tpu.pipeline_mode<synchronous>, transform_indices = @transform_2, window_bounds = array<i64: 9, 256, 32>}, {pipeline_mode = #tpu.pipeline_mode<synchronous>, transform_indices = @transform_3, window_bounds = array<i64: 1, 32>}, {transform_indices = @transform_4, window_bounds = array<i64: 256, 32>}]} {
    %c0 = arith.constant 0 : index
    %c0_0 = arith.constant 0 : index
    %c0_1 = arith.constant 0 : index
    %c0_2 = arith.constant 0 : index
    %0 = vector.load %arg1[%c0, %c0_0, %c0_1, %c0_2] : memref<1x18x18x32xbf16, #tpu.memory_space<vmem>>, vector<1x18x18x32xbf16>
    %1 = vector.extract_strided_slice %0 {offsets = [0, 0, 0, 0], sizes = [1, 16, 16, 32], strides = [1, 1, 1, 1]} : vector<1x18x18x32xbf16> to vector<1x16x16x32xbf16>
    %2 = vector.shape_cast %1 : vector<1x16x16x32xbf16> to vector<256x32xbf16>
    %c0_3 = arith.constant 0 : index
    %c0_4 = arith.constant 0 : index
    %3 = vector.load %arg6[%c0_3, %c0_4] : memref<256x576xbf16, #tpu.memory_space<vmem>>, vector<256x32xbf16>
    tpu.vector_store %arg6[%c0_3, %c0_4], %2 {strides = array<i32>} : memref<256x576xbf16, #tpu.memory_space<vmem>>, vector<256x32xbf16>,
    %c0_5 = arith.constant 0 : index
    %c0_6 = arith.constant 0 : index
    %c0_7 = arith.constant 0 : index
    %4 = vector.load %arg3[%c0_5, %c0_6, %c0_7] : memref<9x256x32xbf16, #tpu.memory_space<vmem>>, vector<1x256x32xbf16>
    %5 = vector.shape_cast %4 : vector<1x256x32xbf16> to vector<256x32xbf16>
    %6 = arith.mulf %2, %5 : vector<256x32xbf16>
    %c0_8 = arith.constant 0 : index
    %c288 = arith.constant 288 : index
    %7 = vector.load %arg6[%c0_8, %c288] : memref<256x576xbf16, #tpu.memory_space<vmem>>, vector<256x32xbf16>
    tpu.vector_store %arg6[%c0_8, %c288], %6 {strides = array<i32>} : memref<256x576xbf16, #tpu.memory_space<vmem>>, vector<256x32xbf16>,
    %8 = vector.extract_strided_slice %0 {offsets = [0, 0, 1, 0], sizes = [1, 16, 16, 32], strides = [1, 1, 1, 1]} : vector<1x18x18x32xbf16> to vector<1x16x16x32xbf16>
    %9 = vector.shape_cast %8 : vector<1x16x16x32xbf16> to vector<256x32xbf16>
    %c0_9 = arith.constant 0 : index
    %c32 = arith.constant 32 : index
    %10 = vector.load %arg6[%c0_9, %c32] : memref<256x576xbf16, #tpu.memory_space<vmem>>, vector<256x32xbf16>
    tpu.vector_store %arg6[%c0_9, %c32], %9 {strides = array<i32>} : memref<256x576xbf16, #tpu.memory_space<vmem>>, vector<256x32xbf16>,
    %c1 = arith.constant 1 : index
    %c0_10 = arith.constant 0 : index
    %c0_11 = arith.constant 0 : index
    %11 = vector.load %arg3[%c1, %c0_10, %c0_11] : memref<9x256x32xbf16, #tpu.memory_space<vmem>>, vector<1x256x32xbf16>
    %12 = vector.shape_cast %11 : vector<1x256x32xbf16> to vector<256x32xbf16>
    %13 = arith.mulf %9, %12 : vector<256x32xbf16>
    %c0_12 = arith.constant 0 : index
    %c320 = arith.constant 320 : index
    %14 = vector.load %arg6[%c0_12, %c320] : memref<256x576xbf16, #tpu.memory_space<vmem>>, vector<256x32xbf16>
    tpu.vector_store %arg6[%c0_12, %c320], %13 {strides = array<i32>} : memref<256x576xbf16, #tpu.memory_space<vmem>>, vector<256x32xbf16>,
    %15 = vector.extract_strided_slice %0 {offsets = [0, 0, 2, 0], sizes = [1, 16, 16, 32], strides = [1, 1, 1, 1]} : vector<1x18x18x32xbf16> to vector<1x16x16x32xbf16>
    %16 = vector.shape_cast %15 : vector<1x16x16x32xbf16> to vector<256x32xbf16>
    %c0_13 = arith.constant 0 : index
    %c64 = arith.constant 64 : index
    %17 = vector.load %arg6[%c0_13, %c64] : memref<256x576xbf16, #tpu.memory_space<vmem>>, vector<256x32xbf16>
    tpu.vector_store %arg6[%c0_13, %c64], %16 {strides = array<i32>} : memref<256x576xbf16, #tpu.memory_space<vmem>>, vector<256x32xbf16>,
    %c2 = arith.constant 2 : index
    %c0_14 = arith.constant 0 : index
    %c0_15 = arith.constant 0 : index
    %18 = vector.load %arg3[%c2, %c0_14, %c0_15] : memref<9x256x32xbf16, #tpu.memory_space<vmem>>, vector<1x256x32xbf16>
    %19 = vector.shape_cast %18 : vector<1x256x32xbf16> to vector<256x32xbf16>
    %20 = arith.mulf %16, %19 : vector<256x32xbf16>
    %c0_16 = arith.constant 0 : index
    %c352 = arith.constant 352 : index
    %21 = vector.load %arg6[%c0_16, %c352] : memref<256x576xbf16, #tpu.memory_space<vmem>>, vector<256x32xbf16>
    tpu.vector_store %arg6[%c0_16, %c352], %20 {strides = array<i32>} : memref<256x576xbf16, #tpu.memory_space<vmem>>, vector<256x32xbf16>,
    %22 = vector.extract_strided_slice %0 {offsets = [0, 1, 0, 0], sizes = [1, 16, 16, 32], strides = [1, 1, 1, 1]} : vector<1x18x18x32xbf16> to vector<1x16x16x32xbf16>
    %23 = vector.shape_cast %22 : vector<1x16x16x32xbf16> to vector<256x32xbf16>
    %c0_17 = arith.constant 0 : index
    %c96 = arith.constant 96 : index
    %24 = vector.load %arg6[%c0_17, %c96] : memref<256x576xbf16, #tpu.memory_space<vmem>>, vector<256x32xbf16>
    tpu.vector_store %arg6[%c0_17, %c96], %23 {strides = array<i32>} : memref<256x576xbf16, #tpu.memory_space<vmem>>, vector<256x32xbf16>,
    %c3 = arith.constant 3 : index
    %c0_18 = arith.constant 0 : index
    %c0_19 = arith.constant 0 : index
    %25 = vector.load %arg3[%c3, %c0_18, %c0_19] : memref<9x256x32xbf16, #tpu.memory_space<vmem>>, vector<1x256x32xbf16>
    %26 = vector.shape_cast %25 : vector<1x256x32xbf16> to vector<256x32xbf16>
    %27 = arith.mulf %23, %26 : vector<256x32xbf16>
    %c0_20 = arith.constant 0 : index
    %c384 = arith.constant 384 : index
    %28 = vector.load %arg6[%c0_20, %c384] : memref<256x576xbf16, #tpu.memory_space<vmem>>, vector<256x32xbf16>
    tpu.vector_store %arg6[%c0_20, %c384], %27 {strides = array<i32>} : memref<256x576xbf16, #tpu.memory_space<vmem>>, vector<256x32xbf16>,
    %29 = vector.extract_strided_slice %0 {offsets = [0, 1, 1, 0], sizes = [1, 16, 16, 32], strides = [1, 1, 1, 1]} : vector<1x18x18x32xbf16> to vector<1x16x16x32xbf16>
    %30 = vector.shape_cast %29 : vector<1x16x16x32xbf16> to vector<256x32xbf16>
    %c0_21 = arith.constant 0 : index
    %c128 = arith.constant 128 : index
    %31 = vector.load %arg6[%c0_21, %c128] : memref<256x576xbf16, #tpu.memory_space<vmem>>, vector<256x32xbf16>
    tpu.vector_store %arg6[%c0_21, %c128], %30 {strides = array<i32>} : memref<256x576xbf16, #tpu.memory_space<vmem>>, vector<256x32xbf16>,
    %c4 = arith.constant 4 : index
    %c0_22 = arith.constant 0 : index
    %c0_23 = arith.constant 0 : index
    %32 = vector.load %arg3[%c4, %c0_22, %c0_23] : memref<9x256x32xbf16, #tpu.memory_space<vmem>>, vector<1x256x32xbf16>
    %33 = vector.shape_cast %32 : vector<1x256x32xbf16> to vector<256x32xbf16>
    %34 = arith.mulf %30, %33 : vector<256x32xbf16>
    %c0_24 = arith.constant 0 : index
    %c416 = arith.constant 416 : index
    %35 = vector.load %arg6[%c0_24, %c416] : memref<256x576xbf16, #tpu.memory_space<vmem>>, vector<256x32xbf16>
    tpu.vector_store %arg6[%c0_24, %c416], %34 {strides = array<i32>} : memref<256x576xbf16, #tpu.memory_space<vmem>>, vector<256x32xbf16>,
    %36 = vector.extract_strided_slice %0 {offsets = [0, 1, 2, 0], sizes = [1, 16, 16, 32], strides = [1, 1, 1, 1]} : vector<1x18x18x32xbf16> to vector<1x16x16x32xbf16>
    %37 = vector.shape_cast %36 : vector<1x16x16x32xbf16> to vector<256x32xbf16>
    %c0_25 = arith.constant 0 : index
    %c160 = arith.constant 160 : index
    %38 = vector.load %arg6[%c0_25, %c160] : memref<256x576xbf16, #tpu.memory_space<vmem>>, vector<256x32xbf16>
    tpu.vector_store %arg6[%c0_25, %c160], %37 {strides = array<i32>} : memref<256x576xbf16, #tpu.memory_space<vmem>>, vector<256x32xbf16>,
    %c5 = arith.constant 5 : index
    %c0_26 = arith.constant 0 : index
    %c0_27 = arith.constant 0 : index
    %39 = vector.load %arg3[%c5, %c0_26, %c0_27] : memref<9x256x32xbf16, #tpu.memory_space<vmem>>, vector<1x256x32xbf16>
    %40 = vector.shape_cast %39 : vector<1x256x32xbf16> to vector<256x32xbf16>
    %41 = arith.mulf %37, %40 : vector<256x32xbf16>
    %c0_28 = arith.constant 0 : index
    %c448 = arith.constant 448 : index
    %42 = vector.load %arg6[%c0_28, %c448] : memref<256x576xbf16, #tpu.memory_space<vmem>>, vector<256x32xbf16>
    tpu.vector_store %arg6[%c0_28, %c448], %41 {strides = array<i32>} : memref<256x576xbf16, #tpu.memory_space<vmem>>, vector<256x32xbf16>,
    %43 = vector.extract_strided_slice %0 {offsets = [0, 2, 0, 0], sizes = [1, 16, 16, 32], strides = [1, 1, 1, 1]} : vector<1x18x18x32xbf16> to vector<1x16x16x32xbf16>
    %44 = vector.shape_cast %43 : vector<1x16x16x32xbf16> to vector<256x32xbf16>
    %c0_29 = arith.constant 0 : index
    %c192 = arith.constant 192 : index
    %45 = vector.load %arg6[%c0_29, %c192] : memref<256x576xbf16, #tpu.memory_space<vmem>>, vector<256x32xbf16>
    tpu.vector_store %arg6[%c0_29, %c192], %44 {strides = array<i32>} : memref<256x576xbf16, #tpu.memory_space<vmem>>, vector<256x32xbf16>,
    %c6 = arith.constant 6 : index
    %c0_30 = arith.constant 0 : index
    %c0_31 = arith.constant 0 : index
    %46 = vector.load %arg3[%c6, %c0_30, %c0_31] : memref<9x256x32xbf16, #tpu.memory_space<vmem>>, vector<1x256x32xbf16>
    %47 = vector.shape_cast %46 : vector<1x256x32xbf16> to vector<256x32xbf16>
    %48 = arith.mulf %44, %47 : vector<256x32xbf16>
    %c0_32 = arith.constant 0 : index
    %c480 = arith.constant 480 : index
    %49 = vector.load %arg6[%c0_32, %c480] : memref<256x576xbf16, #tpu.memory_space<vmem>>, vector<256x32xbf16>
    tpu.vector_store %arg6[%c0_32, %c480], %48 {strides = array<i32>} : memref<256x576xbf16, #tpu.memory_space<vmem>>, vector<256x32xbf16>,
    %50 = vector.extract_strided_slice %0 {offsets = [0, 2, 1, 0], sizes = [1, 16, 16, 32], strides = [1, 1, 1, 1]} : vector<1x18x18x32xbf16> to vector<1x16x16x32xbf16>
    %51 = vector.shape_cast %50 : vector<1x16x16x32xbf16> to vector<256x32xbf16>
    %c0_33 = arith.constant 0 : index
    %c224 = arith.constant 224 : index
    %52 = vector.load %arg6[%c0_33, %c224] : memref<256x576xbf16, #tpu.memory_space<vmem>>, vector<256x32xbf16>
    tpu.vector_store %arg6[%c0_33, %c224], %51 {strides = array<i32>} : memref<256x576xbf16, #tpu.memory_space<vmem>>, vector<256x32xbf16>,
    %c7 = arith.constant 7 : index
    %c0_34 = arith.constant 0 : index
    %c0_35 = arith.constant 0 : index
    %53 = vector.load %arg3[%c7, %c0_34, %c0_35] : memref<9x256x32xbf16, #tpu.memory_space<vmem>>, vector<1x256x32xbf16>
    %54 = vector.shape_cast %53 : vector<1x256x32xbf16> to vector<256x32xbf16>
    %55 = arith.mulf %51, %54 : vector<256x32xbf16>
    %c0_36 = arith.constant 0 : index
    %c512 = arith.constant 512 : index
    %56 = vector.load %arg6[%c0_36, %c512] : memref<256x576xbf16, #tpu.memory_space<vmem>>, vector<256x32xbf16>
    tpu.vector_store %arg6[%c0_36, %c512], %55 {strides = array<i32>} : memref<256x576xbf16, #tpu.memory_space<vmem>>, vector<256x32xbf16>,
    %57 = vector.extract_strided_slice %0 {offsets = [0, 2, 2, 0], sizes = [1, 16, 16, 32], strides = [1, 1, 1, 1]} : vector<1x18x18x32xbf16> to vector<1x16x16x32xbf16>
    %58 = vector.shape_cast %57 : vector<1x16x16x32xbf16> to vector<256x32xbf16>
    %c0_37 = arith.constant 0 : index
    %c256 = arith.constant 256 : index
    %59 = vector.load %arg6[%c0_37, %c256] : memref<256x576xbf16, #tpu.memory_space<vmem>>, vector<256x32xbf16>
    tpu.vector_store %arg6[%c0_37, %c256], %58 {strides = array<i32>} : memref<256x576xbf16, #tpu.memory_space<vmem>>, vector<256x32xbf16>,
    %c8 = arith.constant 8 : index
    %c0_38 = arith.constant 0 : index
    %c0_39 = arith.constant 0 : index
    %60 = vector.load %arg3[%c8, %c0_38, %c0_39] : memref<9x256x32xbf16, #tpu.memory_space<vmem>>, vector<1x256x32xbf16>
    %61 = vector.shape_cast %60 : vector<1x256x32xbf16> to vector<256x32xbf16>
    %62 = arith.mulf %58, %61 : vector<256x32xbf16>
    %c0_40 = arith.constant 0 : index
    %c544 = arith.constant 544 : index
    %63 = vector.load %arg6[%c0_40, %c544] : memref<256x576xbf16, #tpu.memory_space<vmem>>, vector<256x32xbf16>
    tpu.vector_store %arg6[%c0_40, %c544], %62 {strides = array<i32>} : memref<256x576xbf16, #tpu.memory_space<vmem>>, vector<256x32xbf16>,
    %c0_41 = arith.constant 0 : index
    %c0_42 = arith.constant 0 : index
    %64 = vector.load %arg6[%c0_41, %c0_42] : memref<256x576xbf16, #tpu.memory_space<vmem>>, vector<256x576xbf16>
    %c0_43 = arith.constant 0 : index
    %c0_44 = arith.constant 0 : index
    %65 = vector.load %arg2[%c0_43, %c0_44] : memref<576x32xbf16, #tpu.memory_space<vmem>>, vector<576x32xbf16>
    %cst = arith.constant dense<0.000000e+00> : vector<256x32xf32>
    %66 = tpu.matmul %64, %65, %cst {dimension_numbers = #tpu.dot_dimension_numbers<[1], [0], [0], [1], [0, 0, 1, 1], [], []>} : vector<256x576xbf16>, vector<576x32xbf16>, vector<256x32xf32> -> vector<256x32xf32>
    %c0_45 = arith.constant 0 : index
    %c0_46 = arith.constant 0 : index
    %67 = vector.load %arg4[%c0_45, %c0_46] : memref<1x32xf32, #tpu.memory_space<vmem>>, vector<1x32xf32>
    %68 = vector.broadcast %67 : vector<1x32xf32> to vector<256x32xf32>
    %69 = arith.addf %66, %68 : vector<256x32xf32>
    %c0_47 = arith.constant 0 : index
    %c0_48 = arith.constant 0 : index
    %70 = vector.load %arg5[%c0_47, %c0_48] : memref<256x32xf32, #tpu.memory_space<vmem>>, vector<256x32xf32>
    tpu.vector_store %arg5[%c0_47, %c0_48], %69 {strides = array<i32>} : memref<256x32xf32, #tpu.memory_space<vmem>>, vector<256x32xf32>,
    return
  }
  func.func @transform_0(%arg0: i32) -> (i32, i32, i32, i32) {
    %c0_i32 = arith.constant 0 : i32
    %c0_i32_0 = arith.constant 0 : i32
    %c0_i32_1 = arith.constant 0 : i32
    %c0_i32_2 = arith.constant 0 : i32
    return %arg0, %c0_i32, %c0_i32_0, %c0_i32_1 : i32, i32, i32, i32
  }
  func.func @transform_1(%arg0: i32) -> (i32, i32) {
    %c0_i32 = arith.constant 0 : i32
    %c0_i32_0 = arith.constant 0 : i32
    %c0_i32_1 = arith.constant 0 : i32
    return %c0_i32, %c0_i32_0 : i32, i32
  }
  func.func @transform_2(%arg0: i32) -> (i32, i32, i32) {
    %c0_i32 = arith.constant 0 : i32
    %c0_i32_0 = arith.constant 0 : i32
    %c0_i32_1 = arith.constant 0 : i32
    %c0_i32_2 = arith.constant 0 : i32
    return %c0_i32, %c0_i32_0, %c0_i32_1 : i32, i32, i32
  }
  func.func @transform_3(%arg0: i32) -> (i32, i32) {
    %c0_i32 = arith.constant 0 : i32
    %c0_i32_0 = arith.constant 0 : i32
    %c0_i32_1 = arith.constant 0 : i32
    return %c0_i32, %c0_i32_0 : i32, i32
  }
  func.func @transform_4(%arg0: i32) -> (i32, i32) {
    %c0_i32 = arith.constant 0 : i32
    %c0_i32_0 = arith.constant 0 : i32
    return %arg0, %c0_i32 : i32, i32
  }
}

</mosaic_0001>

<bundles_post_ra>
// kernel: tpu_custom_call.1
= control target key start
LH: loop header
LB: loop body
LE: loop exit
PB: predicated region body
PF: predicated region fallthrough
CT: control target
= control target key end

     0   :  { %s7329_s15 = smov 0   ;;  %s10769_s0 = inlined_call_operand.vmem [shape: bf16[2,18,18,32], index: 0, kind: input, shape index: {}]   ;;  %s10770_s1 = inlined_call_operand.vmem [shape: bf16[576,32], index: 1, kind: input, shape index: {}]   ;;  %s10771_s2 = inlined_call_operand.vmem [shape: bf16[9,256,32], index: 2, kind: input, shape index: {}]   ;;  %s10772_s3 = inlined_call_operand.vmem [shape: f32[1,32], index: 3, kind: input, shape index: {}]   ;;  %s10773_s4 = inlined_call_operand.vmem [shape: f32[512,32], index: 4, kind: output, shape index: {}]  }
   0x1 LB: > { %s7335_s16 = sadd.s32 4294967295, %s7299_s15   ;;  %p5639_p0 = scmp.ge.s32.totalorder %s7299_s15, 1  ;;  %s7299_s15 = sphi %s7329_s15, %s14_s15  }
   0x2   : > { %p162_p1 = scmp.lt.s32.totalorder %s7299_s15, 3 }
   0x4   : > { %p163_p2 = pnand %p5639_p0, %p162_p1 }
   0x6   : > { %166 = sbr.rel (%p163_p2) target bundleno = 1393 (0x571), region = 36 }
   0xb   : > { %p188_p3 = scmp.lt.s32.totalorder %s7335_s16, 1  ;;  %v7091_v0 = vld [vmem:[%s10771_s2 + $0x8] sm:$0xff]   ;;  %v6516_v1 = vld [vmem:[%s10771_s2] sm:$0xff]   ;;  %v7092_v4 = vld [vmem:[%s10771_s2 + $0x10] sm:$0xff]   ;;  %s7301_s28 = smov 32   ;;  %vm575_vm3 = vcmask 519424  }
   0xc   : > { %v6521_v2 = vunpack.c.l.bf16 %v7091_v0  ;;  %v6517_v3 = vunpack.c.l.bf16 %v6516_v1  ;;  %v6522_v11 = vunpack.c.h.bf16 %v7091_v0  ;;  %v6518_v12 = vunpack.c.h.bf16 %v6516_v1  ;;  %v7093_v27 = vld [vmem:[%s10771_s2 + $0x18] sm:$0xff]   ;;  %v7094_v40 = vld [vmem:[%s10771_s2 + $0x20] sm:$0xff]   ;;  %v7095_v46 = vld [vmem:[%s10771_s2 + $0x28] sm:$0xff]   ;;  %s7302_s11 = smov 64   ;;  %s7303_s29 = smov 96  }
   0xd   : > { %s189_s17 = scalar_select %p188_p3, %s7335_s16, 1  ;;  %v6525_v14 = vunpack.c.l.bf16 %v7092_v4  ;;  %v6526_v23 = vunpack.c.h.bf16 %v7092_v4  ;;  %v6530_v32 = vunpack.c.h.bf16 %v7093_v27  ;;  %v6529_v33 = vunpack.c.l.bf16 %v7093_v27  ;;  %v7096_v62 = vld [vmem:[%s10771_s2 + $0x30] sm:$0xff]  }
   0xe   : > { %v6533_v42 = vunpack.c.l.bf16 %v7094_v40  ;;  %v6537_v49 = vunpack.c.l.bf16 %v7095_v46  ;;  %v6534_v50 = vunpack.c.h.bf16 %v7094_v40  ;;  %v6538_v58 = vunpack.c.h.bf16 %v7095_v46  ;;  %s5641_s13 = sshll.u32 %s7335_s16, 5 }
   0xf   : > { %s7258_s22 = smul.u32 216, %s189_s17  ;;  %v6542_v1 = vunpack.c.h.bf16 %v7096_v62  ;;  %vm608_vm0 = vsmask.f32 3328  ;;  %vm609_vm1 = vsmask.f32 7440  ;;  %vm254_vm4 = vcmask 257024  }
  0x10   : > { %vm7655_vm2 = vmor %vm608_vm0, %vm609_vm1  ;;  %vm1525_vm5 = vcmask 1042432   ;;  %vm1526_vm6 = vcmask 1046532   ;;  %vm1444_vm8 = vcmask 781824   ;;  %vm2089_vm9 = vcmask 1044224   ;;  %p10263_p4 = scmp.lt.s32.totalorder %s5641_s13, 63 }
  0x11   : > { %s7350_s25 = scalar_lea.vmem %s10769_s0, %s7258_s22  ;;  %vm8361_vm7 = vmor %vm1525_vm5, %vm1526_vm6  ;;  %vm5052_vm10 = vcmask 523264   ;;  %vm5546_vm11 = vcmask 261120  }
  0x12   : > { %v7356_v5 = vld [vmem:[%s7350_s25 + $0xc] sm:$0xf]  ;;  %v7359_v6 = vld [vmem:[%s7350_s25] sm:$0xf]  ;;  %v7362_v7 = vld [vmem:[%s7350_s25 + $0x10] sm:$0xf] }
  0x13   : > { %v10775_v8 = vunpack.c.l.bf16 %v7356_v5  ;;  %v319_v9 = vunpack.c.l.bf16 %v7359_v6  ;;  %v7367_v10 = vld [vmem:[%s7350_s25 + $0x4] sm:$0xf]  ;;  %v7370_v13 = vld [vmem:[%s7350_s25 + $0x18] sm:$0xf]  ;;  %v10774_v17 = vunpack.c.l.bf16 %v7362_v7  ;;  %v7380_v20 = vld [vmem:[%s7350_s25 + $0x1c] sm:$0xf] }
  0x14   : > { %v320_v18 = vunpack.c.l.bf16 %v7367_v10  ;;  %v7377_v19 = vunpack.c.l.bf16 %v7370_v13  ;;  %v7391_v28 = vunpack.c.l.bf16 %v7380_v20  ;;  %v7394_v29 = vld [vmem:[%s7350_s25 + $0x28] sm:$0xf]  ;;  %v7397_v30 = vld [vmem:[%s7350_s25 + $0x24] sm:$0xf]  ;;  %v7408_v39 = vld [vmem:[%s7350_s25 + $0x30] sm:$0xf] }
  0x15   : > { %v385_v15 = vmul.f32 %v6521_v2, %v10775_v8  ;;  %v383_v16 = vmul.f32 %v6517_v3, %v319_v9  ;;  %v386_v25 = vmul.f32 %v6522_v11, %v10774_v17  ;;  %11076 = vst [vmem:[#allocation5_spill] sm:$0xff] %v7397_v30  ;;  %v7402_v37 = vunpack.c.l.bf16 %v7394_v29  ;;  %v7424_v47 = vld [vmem:[%s7350_s25 + $0x3c] sm:$0xf]  ;;  %v7427_v48 = vld [vmem:[%s7350_s25 + $0x34] sm:$0xf]  ;;  %s11470_s13 = smov (!%p10263_p4, %s5641_s13), 63 }
  0x16   : > { %11074 = vst [vmem:[#allocation3_spill] sm:$0xff] %v7377_v19  ;;  %v387_v24 = vmul.f32 %v6525_v14, %v7377_v19  ;;  %v384_v26 = vmul.f32 %v6518_v12, %v320_v18  ;;  %v388_v34 = vmul.f32 %v6526_v23, %v7391_v28  ;;  %v7405_v38 = vunpack.c.l.bf16 %v7397_v30  ;;  %v7438_v56 = vld [vmem:[%s7350_s25 + $0x40] sm:$0xf]  ;;  %v7451_v63 = vld [vmem:[%s7350_s25 + $0x4c] sm:$0xf]  ;;  %s5642_s22 = sshll.u32 %s11470_s13, 3 }
  0x17   : > { %v417_v21 = vpack.c.bf16 %v385_v15, %v385_v15  ;;  %v415_v22 = vpack.c.bf16 %v383_v16, %v383_v16  ;;  %11075 = vst [vmem:[#allocation4_spill] sm:$0xff] %v7391_v28  ;;  %v418_v35 = vpack.c.bf16 %v386_v25, %v386_v25  ;;  %v7414_v43 = vunpack.c.l.bf16 %v7408_v39  ;;  %v7454_v0 = vld [vmem:[%s7350_s25 + $0x48] sm:$0xf]  ;;  %v7465_v14 = vld [vmem:[%s7350_s25 + $0x54] sm:$0xf]  ;;  %v7097_v15 = vld [vmem:[%s10771_s2 + $0x38] sm:$0xff]   ;;  %s10306_s30 = scalar_lea.vmem %s10773_s4, %s5642_s22 }
  0x18   : > { %v419_v31 = vpack.c.bf16 %v387_v24, %v387_v24  ;;  %v416_v36 = vpack.c.bf16 %v384_v26, %v384_v26  ;;  %11077 = vst [vmem:[#allocation6_spill] sm:$0xff] %v7402_v37  ;;  %v420_v41 = vpack.c.bf16 %v388_v34, %v388_v34  ;;  %v390_v44 = vmul.f32 %v6530_v32, %v7402_v37  ;;  %v7478_v24 = vld [vmem:[%s7350_s25 + $0x60] sm:$0xf]  ;;  %v7484_v26 = vld [vmem:[%s7350_s25 + $0x58] sm:$0xf] }
  0x19   : > { %483 = vrot.lane.b32.xlu1 %v417_v21, %s7301_s28  ;;  %479 = vrot.lane.b32.xlu0 %v415_v22, %s7301_s28  ;;  %11078 = vst [vmem:[#allocation7_spill] sm:$0xff] %v7405_v38  ;;  %v389_v45 = vmul.f32 %v6529_v33, %v7405_v38  ;;  %v391_v51 = vmul.f32 %v6533_v42, %v7414_v43  ;;  %v7432_v54 = vunpack.c.l.bf16 %v7424_v47  ;;  %v7435_v55 = vunpack.c.l.bf16 %v7427_v48  ;;  %v7098_v25 = vld [vmem:[%s10771_s2 + $0x40] sm:$0xff]   ;;  %v7099_v42 = vld [vmem:[%s10771_s2 + $0x48] sm:$0xff]  }
  0x1a   : > { %487 = vrot.lane.b32.xlu2 %v419_v31, %s7301_s28  ;;  %11079 = vst [vmem:[#allocation8_spill] sm:$0xff] %v7408_v39  ;;  %v422_v52 = vpack.c.bf16 %v390_v44, %v390_v44  ;;  %v7441_v59 = vunpack.c.l.bf16 %v7438_v56  ;;  %v6541_v2 = vunpack.c.l.bf16 %v7096_v62  ;;  %v7459_v11 = vunpack.c.l.bf16 %v7451_v63  ;;  %v7495_v40 = vld [vmem:[%s7350_s25 + $0x64] sm:$0xf] }
  0x1b   : > { %11080 = vst [vmem:[#allocation9_spill] sm:$0xff] %v7414_v43  ;;  %v421_v53 = vpack.c.bf16 %v389_v45, %v389_v45  ;;  %v423_v57 = vpack.c.bf16 %v391_v51, %v391_v51  ;;  %v393_v60 = vmul.f32 %v6537_v49, %v7432_v54  ;;  %v392_v61 = vmul.f32 %v6534_v50, %v7435_v55  ;;  %v7511_v51 = vld [vmem:[%s7350_s25 + $0x6c] sm:$0xf] }
  0x1c   : > { %11081 = vst [vmem:[#allocation10_spill] sm:$0xff] %v7424_v47  ;;  %v394_v3 = vmul.f32 %v6538_v58, %v7441_v59  ;;  %v7462_v12 = vunpack.c.l.bf16 %v7454_v0  ;;  %v6545_v18 = vunpack.c.l.bf16 %v7097_v15  ;;  %v7471_v21 = vunpack.c.l.bf16 %v7465_v14 }
  0x1d   : > { %11082 = vst [vmem:[#allocation11_spill] sm:$0xff] %v7427_v48  ;;  %v425_v4 = vpack.c.bf16 %v393_v60, %v393_v60  ;;  %v424_v9 = vpack.c.bf16 %v392_v61, %v392_v61  ;;  %v396_v22 = vmul.f32 %v6542_v1, %v7459_v11  ;;  %v6549_v27 = vunpack.c.l.bf16 %v7098_v25  ;;  %v7522_v1 = vld [vmem:[%s7350_s25 + $0x78] sm:$0xf] }
  0x1e   : > { %11083 = vst [vmem:[#allocation12_spill] sm:$0xff] %v7432_v54  ;;  %v426_v16 = vpack.c.bf16 %v394_v3, %v394_v3  ;;  %v395_v23 = vmul.f32 %v6541_v2, %v7462_v12  ;;  %v7487_v31 = vunpack.c.l.bf16 %v7478_v24  ;;  %v397_v32 = vmul.f32 %v6545_v18, %v7471_v21  ;;  %v7100_v3 = vld [vmem:[%s10771_s2 + $0x50] sm:$0xff]   ;;  %v7535_v18 = vld [vmem:[%s7350_s25 + $0x84] sm:$0xf] }
  0x1f   : > { %11084 = vst [vmem:[#allocation13_spill] sm:$0xff] %v7435_v55  ;;  %v428_v33 = vpack.c.bf16 %v396_v22, %v396_v22  ;;  %v6550_v45 = vunpack.c.h.bf16 %v7098_v25  ;;  %v7504_v46 = vunpack.c.l.bf16 %v7495_v40  ;;  %v7517_v58 = vunpack.c.l.bf16 %v7511_v51  ;;  %v7101_v22 = vld [vmem:[%s10771_s2 + $0x58] sm:$0xff]   ;;  %v202_v55 = vld [vmem:[%s7350_s25 + $0x8] sm:$0x1] }
  0x20   : > { %11085 = vst [vmem:[#allocation14_spill] sm:$0xff] %v7438_v56  ;;  %v427_v34 = vpack.c.bf16 %v395_v23, %v395_v23  ;;  %v429_v44 = vpack.c.bf16 %v397_v32, %v397_v32  ;;  %v399_v49 = vmul.f32 %v6549_v27, %v7487_v31  ;;  %v7541_v23 = vld [vmem:[%s7350_s25 + $0x7c] sm:$0xf] }
  0x21   : > { %485 = vrot.lane.b32.xlu1 %v418_v35, %s7301_s28  ;;  %481 = vrot.lane.b32.xlu0 %v416_v36, %s7301_s28  ;;  %11086 = vst [vmem:[#allocation15_spill] sm:$0xff] %v7441_v59  ;;  %v6546_v35 = vunpack.c.h.bf16 %v7097_v15  ;;  %v7492_v36 = vunpack.c.l.bf16 %v7484_v26  ;;  %v400_v60 = vmul.f32 %v6550_v45, %v7504_v46  ;;  %v6557_v15 = vunpack.c.l.bf16 %v7100_v3  ;;  %v7555_v45 = vld [vmem:[%s7350_s25 + $0x94] sm:$0xf] }
  0x22   : > { %489 = vrot.lane.b32.xlu2 %v420_v41, %s7301_s28  ;;  %11087 = vst [vmem:[#allocation16_spill] sm:$0xff] %v7451_v63  ;;  %v7498_v41 = vld [vmem:[%s7350_s25 + $0x70] sm:$0xf]  ;;  %v431_v61 = vpack.c.bf16 %v399_v49, %v399_v49  ;;  %v7102_v49 = vld [vmem:[%s10771_s2 + $0x60] sm:$0xff]  }
  0x23   : > { %11088 = vst [vmem:[#allocation17_spill] sm:$0xff] %v7454_v0  ;;  %v398_v50 = vmul.f32 %v6546_v35, %v7492_v36  ;;  %v6558_v35 = vunpack.c.h.bf16 %v7100_v3  ;;  %v7571_v3 = vunpack.c.l.bf16 %v7555_v45 }
  0x24   : > { %11089 = vst [vmem:[#allocation18_spill] sm:$0xff] %v7459_v11 }
  0x25   : > { %11090 = vst [vmem:[#allocation19_spill] sm:$0xff] %v7462_v12  ;;  %v430_v62 = vpack.c.bf16 %v398_v50, %v398_v50 }
  0x26   : > { %11091 = vst [vmem:[#allocation20_spill] sm:$0xff] %v7465_v14 }
  0x27   : > { %11092 = vst [vmem:[#allocation21_spill] sm:$0xff] %v7471_v21 }
  0x28   : > { %11093 = vst [vmem:[#allocation22_spill] sm:$0xff] %v7478_v24 }
  0x29   : > { %493 = vrot.lane.b32.xlu1 %v422_v52, %s7301_s28  ;;  %491 = vrot.lane.b32.xlu0 %v421_v53, %s7301_s28  ;;  %11094 = vst [vmem:[#allocation23_spill] sm:$0xff] %v7484_v26  ;;  %v6554_v52 = vunpack.c.h.bf16 %v7099_v42  ;;  %v7514_v53 = vunpack.c.l.bf16 %v7498_v41 }
  0x2a   : > { %495 = vrot.lane.b32.xlu2 %v423_v57, %s7301_s28  ;;  %11095 = vst [vmem:[#allocation24_spill] sm:$0xff] %v7487_v31  ;;  %v6553_v57 = vunpack.c.l.bf16 %v7099_v42  ;;  %v7549_v42 = vunpack.c.l.bf16 %v7541_v23 }
  0x2b   : > { %11096 = vst [vmem:[#allocation25_spill] sm:$0xff] %v7492_v36  ;;  %v402_v2 = vmul.f32 %v6554_v52, %v7514_v53  ;;  %v6562_v52 = vunpack.c.h.bf16 %v7101_v22 }
  0x2c   : > { %11097 = vst [vmem:[#allocation26_spill] sm:$0xff] %v7495_v40 }
  0x2d   : > { %11098 = vst [vmem:[#allocation27_spill] sm:$0xff] %v7498_v41  ;;  %v434_v25 = vpack.c.bf16 %v402_v2, %v402_v2  ;;  %v6566_v2 = vunpack.c.h.bf16 %v7102_v49 }
  0x2e   : > { %11099 = vst [vmem:[#allocation28_spill] sm:$0xff] %v7504_v46 }
  0x2f   : > { %11100 = vst [vmem:[#allocation29_spill] sm:$0xff] %v7511_v51 }
  0x30   : > { %11101 = vst [vmem:[#allocation30_spill] sm:$0xff] %v7514_v53 }
  0x31   : > { %499 = vrot.lane.b32.xlu1 %v425_v4, %s7301_s28  ;;  %497 = vrot.lane.b32.xlu0 %v424_v9, %s7301_s28  ;;  %11102 = vst [vmem:[#allocation31_spill] sm:$0xff] %v7517_v58  ;;  %v401_v4 = vmul.f32 %v6553_v57, %v7517_v58  ;;  %v432_v9 = vpack.c.bf16 %v400_v60, %v400_v60 }
  0x32   : > { %501 = vrot.lane.b32.xlu2 %v426_v16, %s7301_s28  ;;  %11103 = vst [vmem:[#allocation32_spill] sm:$0xff] %v7522_v1  ;;  %v7530_v16 = vunpack.c.l.bf16 %v7522_v1 }
  0x33   : > { %11105 = vst [vmem:[#allocation34_spill] sm:$0xff] %v7535_v18  ;;  %v433_v27 = vpack.c.bf16 %v401_v4, %v401_v4  ;;  %v6565_v4 = vunpack.c.l.bf16 %v7102_v49 }
  0x34   : > { %11104 = vst [vmem:[#allocation33_spill] sm:$0xff] %v7530_v16  ;;  %v403_v32 = vmul.f32 %v6557_v15, %v7530_v16 }
  0x35   : > { %11106 = vst [vmem:[#allocation35_spill] sm:$0xff] %v7541_v23 }
  0x36   : > { %11108 = vst [vmem:[#allocation37_spill] sm:$0xff] %v7549_v42  ;;  %v435_v50 = vpack.c.bf16 %v403_v32, %v403_v32  ;;  %v408_v32 = vmul.f32 %v6566_v2, %v7571_v3 }
  0x37   : > { %11110 = vst [vmem:[#allocation39_spill] sm:$0xff] %v7555_v45 }
  0x38   : > { %11113 = vst [vmem:[#allocation42_spill] sm:$0xff] %v7571_v3  ;;  %v440_v2 = vpack.c.bf16 %v408_v32, %v408_v32  ;;  %v7612_v3 = vld [vmem:[%s7350_s25 + $0xb8] sm:$0xf] }
  0x39   : > { %505 = vrot.lane.b32.xlu1 %v428_v33, %s7301_s28  ;;  %503 = vrot.lane.b32.xlu0 %v427_v34, %s7301_s28  ;;  %v6561_v33 = vunpack.c.l.bf16 %v7101_v22  ;;  %v7546_v34 = vunpack.c.l.bf16 %v7535_v18  ;;  %11122 = vst [vmem:[#allocation51_spill] sm:$0xff] %v7612_v3  ;;  %v7105_v32 = vld [vmem:[%s10771_s2 + $0x78] sm:$0xff]   ;;  %v7630_v46 = vunpack.c.l.bf16 %v7612_v3 }
  0x3a   : > { %507 = vrot.lane.b32.xlu2 %v429_v44, %s7301_s28  ;;  %v7552_v44 = vld [vmem:[%s7350_s25 + $0x88] sm:$0xf]  ;;  %255 = vst.msk [vmem:[#allocation2] sm:$0xf] %vm254_vm4, %v7359_v6 }
  0x3b   : > { %11107 = vst [vmem:[#allocation36_spill] sm:$0xff] %v7546_v34  ;;  %v7561_v57 = vunpack.c.l.bf16 %v7552_v44  ;;  %v405_v60 = vmul.f32 %v6561_v33, %v7546_v34  ;;  %v7103_v33 = vld [vmem:[%s10771_s2 + $0x68] sm:$0xff]   ;;  %v615_v34 = vshll.u32 %v7359_v6, 16 }
  0x3c   : > { %11109 = vst [vmem:[#allocation38_spill] sm:$0xff] %v7552_v44  ;;  %v6569_v17 = vunpack.c.l.bf16 %v7103_v33 }
  0x3d   : > { %11111 = vst [vmem:[#allocation40_spill] sm:$0xff] %v7561_v57  ;;  %v406_v15 = vmul.f32 %v6562_v52, %v7561_v57  ;;  %v437_v22 = vpack.c.bf16 %v405_v60, %v405_v60  ;;  %v7592_v52 = vld [vmem:[%s7350_s25 + $0xa8] sm:$0xf]  ;;  %v7104_v60 = vld [vmem:[%s10771_s2 + $0x70] sm:$0xff]   ;;  %v6570_v57 = vunpack.c.h.bf16 %v7103_v33 }
  0x3e   : > { %11117 = vst [vmem:[#allocation46_spill] sm:$0xff] %v7592_v52  ;;  %v6573_v8 = vunpack.c.l.bf16 %v7104_v60 }
  0x3f   : > { %v438_v49 = vpack.c.bf16 %v406_v15, %v406_v15  ;;  %11125 = vst [vmem:[#allocation54_spill] sm:$0xff] %v7630_v46 }
  0x40   : > { %256 = vst.msk [vmem:[#allocation2 + $0x14] sm:$0xf] %vm254_vm4, %v7367_v10 }
  0x41   : > { %511 = vrot.lane.b32.xlu1 %v431_v61, %s7301_s28  ;;  %509 = vrot.lane.b32.xlu0 %v430_v62, %s7301_s28  ;;  %v404_v61 = vmul.f32 %v6558_v35, %v7549_v42  ;;  %v7568_v62 = vld [vmem:[%s7350_s25 + $0x90] sm:$0xf]  ;;  %v612_v42 = vshrl.u32 %v7359_v6, 16  ;;  %257 = vst.msk [vmem:[#allocation2 + $0x28] sm:$0xf] %vm254_vm4, %v7356_v5 }
  0x42   : > { %513 = vrot.lane.b32.xlu2 %v432_v9, %s7301_s28  ;;  %11112 = vst [vmem:[#allocation41_spill] sm:$0xff] %v7568_v62  ;;  %v7574_v9 = vunpack.c.l.bf16 %v7568_v62 }
  0x43   : > { %v614_v21 = vrot.slane %v612_v42, 4  ;;  %v645_v42 = vshll.u32 %v7362_v7, 16  ;;  %258 = vst.msk [vmem:[#allocation2 + $0x3c] sm:$0xf] %vm254_vm4, %v7362_v7 }
  0x44   : > { %11114 = vst [vmem:[#allocation43_spill] sm:$0xff] %v7574_v9  ;;  %v407_v35 = vmul.f32 %v6565_v4, %v7574_v9  ;;  %v7609_v9 = vld [vmem:[%s7350_s25 + $0xac] sm:$0xf] }
  0x45   : > { %11121 = vst [vmem:[#allocation50_spill] sm:$0xff] %v7609_v9 }
  0x46   : > { %v439_v4 = vpack.c.bf16 %v407_v35, %v407_v35  ;;  %v7618_v35 = vld [vmem:[%s7350_s25 + $0xb4] sm:$0xf]  ;;  %259 = vst.msk [vmem:[#allocation2 + $0x50] sm:$0xf] %vm254_vm4, %v7370_v13 }
  0x47   : > { %11123 = vst [vmem:[#allocation52_spill] sm:$0xff] %v7618_v35  ;;  %v7633_v58 = vunpack.c.l.bf16 %v7618_v35 }
  0x48   : > { %260 = vst.msk [vmem:[#allocation2 + $0x64] sm:$0xf] %vm254_vm4, %v7380_v20 }
  0x49   : > { %517 = vrot.lane.b32.xlu1 %v434_v25, %s7301_s28  ;;  %515 = vrot.lane.b32.xlu0 %v433_v27, %s7301_s28  ;;  %v436_v25 = vpack.c.bf16 %v404_v61, %v404_v61  ;;  %v7579_v27 = vld [vmem:[%s7350_s25 + $0x9c] sm:$0xf]  ;;  %v7598_v61 = vld [vmem:[%s7350_s25 + $0xa0] sm:$0xf]  ;;  %11126 = vst [vmem:[#allocation55_spill] sm:$0xff] %v7633_v58 }
  0x4a   : > { %519 = vrot.lane.b32.xlu2 %v435_v50, %s7301_s28  ;;  %11115 = vst [vmem:[#allocation44_spill] sm:$0xff] %v7579_v27  ;;  %v7587_v50 = vunpack.c.l.bf16 %v7579_v27 }
  0x4b   : > { %11118 = vst [vmem:[#allocation47_spill] sm:$0xff] %v7598_v61 }
  0x4c   : > { %11116 = vst [vmem:[#allocation45_spill] sm:$0xff] %v7587_v50  ;;  %v409_v15 = vmul.f32 %v6569_v17, %v7587_v50  ;;  %v6574_v17 = vunpack.c.h.bf16 %v7104_v60  ;;  %v7621_v50 = vunpack.c.l.bf16 %v7609_v9  ;;  %v6577_v60 = vunpack.c.l.bf16 %v7105_v32 }
  0x4d   : > { %261 = vst.msk [vmem:[#allocation2 + $0x78] sm:$0xf] %vm254_vm4, %v7397_v30 }
  0x4e   : > { %11124 = vst [vmem:[#allocation53_spill] sm:$0xff] %v7621_v50  ;;  %v413_v31 = vmul.f32 %v6577_v60, %v7633_v58  ;;  %v631_v60 = vshll.u32 %v202_v55, 16 }
  0x4f   : > { %262 = vst.msk [vmem:[#allocation2 + $0x8c] sm:$0xf] %vm254_vm4, %v7394_v29 }
  0x50   : > { %263 = vst.msk [vmem:[#allocation2 + $0xa0] sm:$0xf] %vm254_vm4, %v7408_v39 }
  0x51   : > { %523 = vrot.lane.b32.xlu1 %v437_v22, %s7301_s28  ;;  %521 = vrot.lane.b32.xlu0 %v436_v25, %s7301_s28  ;;  %v7603_v22 = vunpack.c.l.bf16 %v7592_v52  ;;  %v7606_v25 = vunpack.c.l.bf16 %v7598_v61  ;;  %264 = vst.msk [vmem:[#allocation2 + $0xb4] sm:$0xf] %vm254_vm4, %v7427_v48 }
  0x52   : > { %525 = vrot.lane.b32.xlu2 %v438_v49, %s7301_s28  ;;  %v441_v49 = vpack.c.bf16 %v409_v15, %v409_v15  ;;  %v6578_v15 = vunpack.c.h.bf16 %v7105_v32  ;;  %v617_v32 = vrot.slane %v615_v34, 5  ;;  %v445_v34 = vpack.c.bf16 %v413_v31, %v413_v31  ;;  %v205_v31 = vld [vmem:[%s7350_s25 + $0x14] sm:$0x1]  ;;  %265 = vst.msk [vmem:[#allocation2 + $0xc8] sm:$0xf] %vm254_vm4, %v7424_v47 }
  0x53   : > { %11119 = vst [vmem:[#allocation48_spill] sm:$0xff] %v7603_v22  ;;  %v411_v33 = vmul.f32 %v6573_v8, %v7603_v22  ;;  %v410_v16 = vmul.f32 %v6570_v57, %v7606_v25  ;;  %v639_v8 = vshll.u32 %v7356_v5, 16  ;;  %v621_v57 = vshll.u32 %v7367_v10, 16 }
  0x54   : > { %11120 = vst [vmem:[#allocation49_spill] sm:$0xff] %v7606_v25  ;;  %v412_v25 = vmul.f32 %v6574_v17, %v7621_v50  ;;  %v414_v36 = vmul.f32 %v6578_v15, %v7630_v46  ;;  %v618_v54 = vor.u32 %v617_v32, %v614_v21  ;;  %v649_v17 = vshrl.u32 %v7362_v7, 16 }
  0x55   : > { %v443_v22 = vpack.c.bf16 %v411_v33, %v411_v33  ;;  %v442_v53 = vpack.c.bf16 %v410_v16, %v410_v16  ;;  %v641_v12 = vrot.slane %v639_v8, 5  ;;  %v647_v8 = vrot.slane %v645_v42, 5  ;;  %266 = vst.msk [vmem:[#allocation2 + $0xdc] sm:$0xf] %vm254_vm4, %v7438_v56 }
  0x56   : > { %v444_v43 = vpack.c.bf16 %v412_v25, %v412_v25  ;;  %v446_v16 = vpack.c.bf16 %v414_v36, %v414_v36  ;;  %v669_v25 = vshll.u32 %v7380_v20, 16  ;;  %v651_v21 = vrot.slane %v649_v17, 4  ;;  %273 = vst.msk [vmem:[#allocation2 + $0x168] sm:$0xf] %vm254_vm4, %v7511_v51 }
  0x57   : > { %v663_v36 = vshll.u32 %v7370_v13, 16  ;;  %v655_v32 = vshll.u32 %v205_v31, 16  ;;  %v708_v50 = vshrl.u32 %v7408_v39, 16  ;;  %274 = vst.msk [vmem:[#allocation2 + $0x17c] sm:$0xf] %vm254_vm4, %v7498_v41 }
  0x58   : > { %275 = vst.msk [vmem:[#allocation2 + $0x190] sm:$0xf] %vm254_vm4, %v7522_v1 }
  0x59   : > { %529 = vrot.lane.b32.xlu1 %v440_v2, %s7301_s28  ;;  %527 = vrot.lane.b32.xlu0 %v439_v4, %s7301_s28  ;;  %v636_v2 = vshrl.u32 %v7356_v5, 16  ;;  %v625_v4 = vshrl.u32 %v7367_v10, 16  ;;  %v665_v42 = vrot.slane %v663_v36, 5  ;;  %v710_v28 = vrot.slane %v708_v50, 4  ;;  %276 = vst.msk [vmem:[#allocation2 + $0x1a4] sm:$0xf] %vm254_vm4, %v7541_v23 }
  0x5a   : > { %531 = vrot.lane.b32.xlu2 %v441_v49, %s7301_s28  ;;  %v623_v49 = vrot.slane %v621_v57, 5  ;;  %277 = vst.msk [vmem:[#allocation2 + $0x1b8] sm:$0xf] %vm254_vm4, %v7535_v18 }
  0x5b   : > { %v638_v59 = vrot.slane %v636_v2, 4  ;;  %v627_v11 = vrot.slane %v625_v4, 4  ;;  %v660_v2 = vshrl.u32 %v7370_v13, 16  ;;  %v652_v4 = vor.u32 %v651_v21, %v647_v8  ;;  %278 = vst.msk [vmem:[#allocation2 + $0x1cc] sm:$0xf] %vm254_vm4, %v7552_v44 }
  0x5c   : > { %279 = vst.msk [vmem:[#allocation2 + $0x1e0] sm:$0xf] %vm254_vm4, %v7568_v62 }
  0x5d   : > { %v642_v33 = vor.u32 %v641_v12, %v638_v59  ;;  %v628_v15 = vor.u32 %v627_v11, %v623_v49  ;;  %v11127_v59 = vmov 0  ;;  %v633_v11 = vrot.slane %v631_v60, 5  ;;  %282 = vst.msk [vmem:[#allocation2 + $0x21c] sm:$0xf] %vm254_vm4, %v7598_v61 }
  0x5e   : > { %v11128_v59 = vsel %vm7655_vm2, 4294967295, %v11127_v59  ;;  %v671_v12 = vrot.slane %v669_v25, 5  ;;  %v662_v17 = vrot.slane %v660_v2, 4  ;;  %v693_v60 = vshll.u32 %v7394_v29, 16  ;;  %283 = vst.msk [vmem:[#allocation2 + $0x230] sm:$0xf] %vm254_vm4, %v7592_v52 }
  0x5f   : > { %11129 = vst [vmem:[#allocation56_spill] sm:$0xff] %v11128_v59  ;;  %v629_v55 = vrot.slane %v628_v15, 4  ;;  %v208_v15 = vld [vmem:[%s7350_s25 + $0x20] sm:$0x1]  ;;  %v687_v25 = vshll.u32 %v7397_v30, 16 }
  0x60   : > { %v679_v58 = vshll.u32 %v208_v15, 16  ;;  %v666_v46 = vor.u32 %v665_v42, %v662_v17  ;;  %v695_v37 = vrot.slane %v693_v60, 5  ;;  %v717_v17 = vshll.u32 %v7427_v48, 16  ;;  %284 = vst.msk [vmem:[#allocation2 + $0x244] sm:$0xf] %vm254_vm4, %v7609_v9 }
  0x61   : > { %535 = vrot.lane.b32.xlu1 %v443_v22, %s7301_s28  ;;  %533 = vrot.lane.b32.xlu0 %v442_v53, %s7301_s28  ;;  %v673_v53 = vshrl.u32 %v7380_v20, 16  ;;  %v619_v22 = vrot.slane %v618_v54, 4  ;;  %v689_v2 = vrot.slane %v687_v25, 5  ;;  %v7680_v36 = vsel %vm7655_vm2, %v629_v55, %v633_v11  ;;  %285 = vst.msk [vmem:[#allocation2 + $0x258] sm:$0xf] %vm254_vm4, %v7618_v35 }
  0x62   : > { %537 = vrot.lane.b32.xlu2 %v444_v43, %s7301_s28  ;;  %v643_v43 = vrot.slane %v642_v33, 4  ;;  %v711_v33 = vshll.u32 %v7408_v39, 16  ;;  %v721_v11 = vshrl.u32 %v7427_v48, 16  ;;  %v667_v50 = vrot.slane %v666_v46, 4  ;;  %v214_v46 = vld [vmem:[%s7350_s25 + $0x38] sm:$0x1] }
  0x63   : > { %v675_v54 = vrot.slane %v673_v53, 4  ;;  %v7663_v57 = vsel %vm7655_vm2, %v619_v22, %v623_v49  ;;  %v653_v53 = vrot.slane %v652_v4, 4  ;;  %v657_v22 = vrot.slane %v655_v32, 5  ;;  %286 = vst.msk [vmem:[#allocation2 + $0x26c] sm:$0xf] %vm254_vm4, %v7612_v3 }
  0x64   : > { %v7674_v49 = vsel %vm7655_vm2, %v643_v43, %v647_v8  ;;  %v713_v38 = vrot.slane %v711_v33, 5  ;;  %v211_v8 = vld [vmem:[%s7350_s25 + $0x2c] sm:$0x1]  ;;  %v681_v4 = vrot.slane %v679_v58, 5  ;;  %v741_v15 = vshll.u32 %v7438_v56, 16 }
  0x65   : > { %11130 = vst [vmem:[#allocation57_spill] sm:$0xff] %v7674_v49  ;;  %v676_v31 = vor.u32 %v675_v54, %v671_v12  ;;  %v7689_v43 = vsel %vm7655_vm2, %v653_v53, %v657_v22  ;;  %v703_v33 = vshll.u32 %v211_v8, 16  ;;  %v745_v60 = vshrl.u32 %v7438_v56, 16 }
  0x66   : > { %11131 = vst [vmem:[#allocation58_spill] sm:$0xff] %v7689_v43  ;;  %v714_v32 = vor.u32 %v713_v38, %v710_v28  ;;  %v723_v58 = vrot.slane %v721_v11, 4  ;;  %v719_v22 = vrot.slane %v717_v17, 5  ;;  %v759_v17 = vshll.u32 %v7454_v0, 16 }
  0x67   : > { %v677_v54 = vrot.slane %v676_v31, 4  ;;  %v743_v31 = vrot.slane %v741_v15, 5  ;;  %v747_v8 = vrot.slane %v745_v60, 4  ;;  %2441 = vst.msk [vmem:[#allocation2 + $0x4] sm:$0xf] %vm254_vm4, %v7674_v49 }
  0x68   : > { %v715_v53 = vrot.slane %v714_v32, 4  ;;  %v756_v32 = vshrl.u32 %v7454_v0, 16  ;;  %2442 = vst.msk [vmem:[#allocation2 + $0x18] sm:$0xf] %vm254_vm4, %v7689_v43 }
  0x69   : > { %541 = vrot.lane.b32.xlu1 %v446_v16, %s7301_s28  ;;  %539 = vrot.lane.b32.xlu0 %v445_v34, %s7301_s28  ;;  %v697_v16 = vshrl.u32 %v7394_v29, 16  ;;  %v684_v34 = vshrl.u32 %v7397_v30, 16  ;;  %v7701_v28 = vsel %vm7655_vm2, %v677_v54, %v681_v4  ;;  %v724_v4 = vor.u32 %v723_v58, %v719_v22 }
  0x6a   : > { %1027 = vrot.lane.b32.xlu2 %v7663_v57, %s7301_s28  ;;  %11132 = vst [vmem:[#allocation59_spill] sm:$0xff] %v7701_v28  ;;  %v748_v15 = vor.u32 %v747_v8, %v743_v31  ;;  %v761_v58 = vrot.slane %v759_v17, 5 }
  0x6b   : > { %v686_v21 = vrot.slane %v684_v34, 4  ;;  %v699_v19 = vrot.slane %v697_v16, 4  ;;  %v732_v16 = vshrl.u32 %v7424_v47, 16  ;;  %v735_v34 = vshll.u32 %v7424_v47, 16  ;;  %2444 = vst.msk [vmem:[#allocation2 + $0x40] sm:$0xf] %vm254_vm4, %v7701_v28 }
  0x6d   : > { %v690_v55 = vor.u32 %v689_v2, %v686_v21  ;;  %v700_v42 = vor.u32 %v699_v19, %v695_v37  ;;  %v7705_v19 = vsel %vm7655_vm2, %v667_v50, %v671_v12  ;;  %v705_v2 = vrot.slane %v703_v33, 5  ;;  %v217_v12 = vld [vmem:[%s7350_s25 + $0x44] sm:$0x1] }
  0x6e   : > { %11133 = vst [vmem:[#allocation60_spill] sm:$0xff] %v7705_v19  ;;  %v737_v11 = vrot.slane %v735_v34, 5  ;;  %v727_v50 = vshll.u32 %v214_v46, 16  ;;  %v751_v60 = vshll.u32 %v217_v12, 16  ;;  %v783_v46 = vshll.u32 %v7465_v14, 16 }
  0x6f   : > { %v691_v25 = vrot.slane %v690_v55, 4  ;;  %v701_v21 = vrot.slane %v700_v42, 4  ;;  %v734_v55 = vrot.slane %v732_v16, 4  ;;  %v7722_v42 = vsel %vm7655_vm2, %v715_v53, %v719_v22 }
  0x70   : > { %11135 = vst [vmem:[#allocation62_spill] sm:$0xff] %v7722_v42  ;;  %v729_v34 = vrot.slane %v727_v50, 5  ;;  %v765_v53 = vshll.u32 %v7451_v63, 16  ;;  %v769_v22 = vshrl.u32 %v7451_v63, 16  ;;  %v753_v8 = vrot.slane %v751_v60, 5 }
  0x71   : > { %1031 = vrot.lane.b32.xlu1 %v7674_v49, %s7301_s28  ;;  %1029 = vrot.lane.b32.xlu0 %v7680_v36, %s7301_s28  ;;  %v7716_v54 = vsel %vm7655_vm2, %v691_v25, %v695_v37  ;;  %v7726_v33 = vsel %vm7655_vm2, %v701_v21, %v705_v2  ;;  %v738_v16 = vor.u32 %v737_v11, %v734_v55  ;;  %v725_v37 = vrot.slane %v724_v4, 4  ;;  %v220_v60 = vld [vmem:[%s7350_s25 + $0x50] sm:$0x1] }
  0x72   : > { %1033 = vrot.lane.b32.xlu2 %v7689_v43, %s7301_s28  ;;  %11134 = vst [vmem:[#allocation61_spill] sm:$0xff] %v7716_v54  ;;  %v758_v25 = vrot.slane %v756_v32, 4  ;;  %v749_v2 = vrot.slane %v748_v15, 4  ;;  %v793_v4 = vshrl.u32 %v7484_v26, 16  ;;  %v785_v32 = vrot.slane %v783_v46, 5 }
  0x73   : > { %11136 = vst [vmem:[#allocation63_spill] sm:$0xff] %v7726_v33  ;;  %v739_v55 = vrot.slane %v738_v16, 4  ;;  %v7741_v11 = vsel %vm7655_vm2, %v725_v37, %v729_v34  ;;  %v767_v17 = vrot.slane %v765_v53, 5  ;;  %v789_v15 = vshll.u32 %v7484_v26, 16  ;;  %v223_v26 = vld [vmem:[%s7350_s25 + $0x5c] sm:$0x1] }
  0x74   : > { %v488_v38 = vpop.permute.xlu2 %487  ;;  %11137 = vst [vmem:[#allocation64_spill] sm:$0xff] %v7741_v11  ;;  %v762_v12 = vor.u32 %v761_v58, %v758_v25  ;;  %v804_v16 = vshrl.u32 %v7478_v24, 16  ;;  %v807_v37 = vshll.u32 %v7478_v24, 16  ;;  %v7754_v34 = vsel %vm7655_vm2, %v749_v2, %v753_v8 }
  0x75   : > { %580 = vst.msk [vmem:[#allocation2 + $0x58] sm:$0xf] %vm575_vm3, %v488_v38  ;;  %v780_v38 = vshrl.u32 %v7465_v14, 16  ;;  %v795_v58 = vrot.slane %v793_v4, 4  ;;  %v791_v14 = vrot.slane %v789_v15, 5 }
  0x76   : > { %11138 = vst [vmem:[#allocation65_spill] sm:$0xff] %v7754_v34  ;;  %v763_v25 = vrot.slane %v762_v12, 4  ;;  %v806_v24 = vrot.slane %v804_v16, 4  ;;  %v809_v2 = vrot.slane %v807_v37, 5  ;;  %v828_v12 = vshrl.u32 %v7511_v51, 16 }
  0x77   : > { %v782_v50 = vrot.slane %v780_v38, 4  ;;  %v7758_v38 = vsel %vm7655_vm2, %v739_v55, %v743_v31  ;;  %v796_v8 = vor.u32 %v795_v58, %v791_v14  ;;  %v799_v55 = vshll.u32 %v223_v26, 16  ;;  %2445 = vst.msk [vmem:[#allocation2 + $0x54] sm:$0xf] %vm254_vm4, %v7716_v54 }
  0x78   : > { %11139 = vst [vmem:[#allocation66_spill] sm:$0xff] %v7758_v38  ;;  %v7768_v31 = vsel %vm7655_vm2, %v763_v25, %v767_v17  ;;  %v855_v16 = vshll.u32 %v7522_v1, 16  ;;  %v837_v26 = vshll.u32 %v7498_v41, 16  ;;  %v830_v37 = vrot.slane %v828_v12, 4 }
  0x79   : > { %1037 = vrot.lane.b32.xlu1 %v7701_v28, %s7301_s28  ;;  %1035 = vrot.lane.b32.xlu0 %v7705_v19, %s7301_s28  ;;  %v813_v19 = vshll.u32 %v7495_v40, 16  ;;  %v786_v46 = vor.u32 %v785_v32, %v782_v50  ;;  %11140 = vst [vmem:[#allocation67_spill] sm:$0xff] %v7768_v31  ;;  %v831_v50 = vshll.u32 %v7511_v51, 16 }
  0x7a   : > { %1039 = vrot.lane.b32.xlu2 %v7716_v54, %s7301_s28  ;;  %v857_v12 = vrot.slane %v855_v16, 5  ;;  %2447 = vst.msk [vmem:[#allocation2 + $0x7c] sm:$0xf] %vm254_vm4, %v7722_v42 }
  0x7b   : > { %v815_v63 = vrot.slane %v813_v19, 5  ;;  %v787_v19 = vrot.slane %v786_v46, 4  ;;  %v833_v25 = vrot.slane %v831_v50, 5  ;;  %v810_v46 = vor.u32 %v809_v2, %v806_v24  ;;  %2448 = vst.msk [vmem:[#allocation2 + $0x90] sm:$0xf] %vm254_vm4, %v7741_v11 }
  0x7c   : > { %v490_v21 = vpop.permute.xlu2 %489  ;;  %v839_v50 = vrot.slane %v837_v26, 5 }
  0x7d   : > { %581 = vst.msk [vmem:[#allocation2 + $0x6c] sm:$0xf] %vm575_vm3, %v490_v21  ;;  %v771_v21 = vrot.slane %v769_v22, 4  ;;  %v775_v22 = vshll.u32 %v220_v60, 16  ;;  %v852_v60 = vshrl.u32 %v7522_v1, 16  ;;  %v811_v2 = vrot.slane %v810_v46, 4 }
  0x7e   : > { %v876_v46 = vshrl.u32 %v7535_v18, 16  ;;  %v11179_v1 = vld [vmem:[#allocation63_spill] sm:$0xff] }
  0x7f   : > { %v772_v53 = vor.u32 %v771_v21, %v767_v17  ;;  %v777_v4 = vrot.slane %v775_v22, 5  ;;  %v841_v17 = vshrl.u32 %v7498_v41, 16  ;;  %v7783_v22 = vsel %vm7655_vm2, %v787_v19, %v791_v14  ;;  %2446 = vst.msk [vmem:[#allocation2 + $0x68] sm:$0xf] %vm254_vm4, %v11179_v1 }
  0x80   : > { %11141 = vst [vmem:[#allocation68_spill] sm:$0xff] %v7783_v22  ;;  %v11177_v59 = vld [vmem:[#allocation67_spill] sm:$0xff] }
  0x81   : > { %1043 = vrot.lane.b32.xlu1 %v7722_v42, %s7301_s28  ;;  %1041 = vrot.lane.b32.xlu0 %v7726_v33, %s7301_s28  ;;  %v817_v33 = vshrl.u32 %v7495_v40, 16  ;;  %2451 = vst.msk [vmem:[#allocation2 + $0xcc] sm:$0xf] %vm254_vm4, %v11177_v59 }
  0x82   : > { %1045 = vrot.lane.b32.xlu2 %v7741_v11, %s7301_s28 }
  0x83   : > { %v819_v0 = vrot.slane %v817_v33, 4  ;;  %v773_v33 = vrot.slane %v772_v53, 4  ;;  %v801_v53 = vrot.slane %v799_v55, 5 }
  0x84   : > { %v496_v40 = vpop.permute.xlu2 %495 }
  0x85   : > { %584 = vst.msk [vmem:[#allocation2 + $0xa8] sm:$0xf] %vm575_vm3, %v496_v40  ;;  %v226_v40 = vld [vmem:[%s7350_s25 + $0x68] sm:$0x1]  ;;  %v820_v15 = vor.u32 %v819_v0, %v815_v63  ;;  %v797_v0 = vrot.slane %v796_v8, 4 }
  0x86   : > { %v823_v58 = vshll.u32 %v226_v40, 16  ;;  %v834_v40 = vor.u32 %v833_v25, %v830_v37  ;;  %v229_v8 = vld [vmem:[%s7350_s25 + $0x74] sm:$0x1]  ;;  %v7811_v37 = vsel %vm7655_vm2, %v811_v2, %v815_v63 }
  0x87   : > { %v821_v14 = vrot.slane %v820_v15, 4  ;;  %v7797_v55 = vsel %vm7655_vm2, %v797_v0, %v801_v53  ;;  %v847_v26 = vshll.u32 %v229_v8, 16  ;;  %11145 = vst [vmem:[#allocation72_spill] sm:$0xff] %v7811_v37  ;;  %v879_v0 = vshll.u32 %v7535_v18, 16 }
  0x88   : > { %v825_v24 = vrot.slane %v823_v58, 5  ;;  %11143 = vst [vmem:[#allocation70_spill] sm:$0xff] %v7797_v55  ;;  %v835_v15 = vrot.slane %v834_v40, 4  ;;  %v885_v58 = vshll.u32 %v7552_v44, 16 }
  0x89   : > { %1049 = vrot.lane.b32.xlu1 %v7754_v34, %s7301_s28  ;;  %1047 = vrot.lane.b32.xlu0 %v7758_v38, %s7301_s28 }
  0x8a   : > { %1051 = vrot.lane.b32.xlu2 %v7768_v31, %s7301_s28  ;;  %v854_v31 = vrot.slane %v852_v60, 4  ;;  %v7821_v63 = vsel %vm7655_vm2, %v835_v15, %v839_v50  ;;  %v924_v15 = vshrl.u32 %v7579_v27, 16 }
  0x8b   : > { %v484_v32 = vpop.permute.xlu1 %483  ;;  %v480_v21 = vpop.permute.xlu0 %479  ;;  %11146 = vst [vmem:[#allocation73_spill] sm:$0xff] %v7821_v63 }
  0x8c   : > { %578 = vst.msk [vmem:[#allocation2 + $0x30] sm:$0xf] %vm575_vm3, %v484_v32  ;;  %v7787_v32 = vsel %vm7655_vm2, %v773_v33, %v777_v4  ;;  %v502_v38 = vpop.permute.xlu2 %501  ;;  %v861_v4 = vshll.u32 %v7541_v23, 16  ;;  %v858_v60 = vor.u32 %v857_v12, %v854_v31  ;;  %v889_v31 = vshrl.u32 %v7552_v44, 16  ;;  %v232_v12 = vld [vmem:[%s7350_s25 + $0x80] sm:$0x1] }
  0x8d   : > { %576 = vst.msk [vmem:[#allocation2 + $0x8] sm:$0xf] %vm575_vm3, %v480_v21  ;;  %v843_v21 = vrot.slane %v841_v17, 4  ;;  %v7807_v17 = vsel %vm7655_vm2, %v821_v14, %v825_v24  ;;  %v849_v24 = vrot.slane %v847_v26, 5  ;;  %v871_v8 = vshll.u32 %v232_v12, 16  ;;  %v11181_v44 = vld [vmem:[#allocation68_spill] sm:$0xff] }
  0x8e   : > { %11142 = vst [vmem:[#allocation69_spill] sm:$0xff] %v7787_v32  ;;  %v859_v40 = vrot.slane %v858_v60, 4  ;;  %v878_v60 = vrot.slane %v876_v46, 4  ;;  %v926_v34 = vrot.slane %v924_v15, 4  ;;  %v951_v15 = vshll.u32 %v7592_v52, 16 }
  0x8f   : > { %587 = vst.msk [vmem:[#allocation2 + $0xe4] sm:$0xf] %vm575_vm3, %v502_v38  ;;  %v865_v38 = vshrl.u32 %v7541_v23, 16  ;;  %v844_v16 = vor.u32 %v843_v21, %v839_v50  ;;  %v863_v21 = vrot.slane %v861_v4, 5  ;;  %v891_v4 = vrot.slane %v889_v31, 4 }
  0x90   : > { %11144 = vst [vmem:[#allocation71_spill] sm:$0xff] %v7807_v17  ;;  %v235_v50 = vld [vmem:[%s7350_s25 + $0x8c] sm:$0x1]  ;;  %v8103_v18 = vunpack.c.l.bf16 %v11181_v44 }
  0x91   : > { %1055 = vrot.lane.b32.xlu1 %v7783_v22, %s7301_s28  ;;  %1053 = vrot.lane.b32.xlu0 %v7787_v32, %s7301_s28  ;;  %v867_v25 = vrot.slane %v865_v38, 4  ;;  %v845_v14 = vrot.slane %v844_v16, 4  ;;  %v900_v38 = vshrl.u32 %v7568_v62, 16  ;;  %v881_v16 = vrot.slane %v879_v0, 5  ;;  %2453 = vst.msk [vmem:[#allocation2 + $0xf4] sm:$0xf] %vm254_vm4, %v11181_v44 }
  0x92   : > { %1057 = vrot.lane.b32.xlu2 %v7797_v55, %s7301_s28  ;;  %v927_v32 = vshll.u32 %v7579_v27, 16  ;;  %v7840_v0 = vsel %vm7655_vm2, %v859_v40, %v863_v21  ;;  %v937_v40 = vshrl.u32 %v7598_v61, 16  ;;  %11182 = vst [vmem:[#allocation96_spill] sm:$0xff] %v8103_v18 }
  0x93   : > { %v486_v19 = vpop.permute.xlu1 %485  ;;  %v482_v33 = vpop.permute.xlu0 %481  ;;  %v868_v2 = vor.u32 %v867_v25, %v863_v21  ;;  %v909_v25 = vshll.u32 %v7555_v45, 16  ;;  %v902_v31 = vrot.slane %v900_v38, 4  ;;  %11147 = vst [vmem:[#allocation74_spill] sm:$0xff] %v7840_v0  ;;  %v882_v55 = vor.u32 %v881_v16, %v878_v60  ;;  %v238_v38 = vld [vmem:[%s7350_s25 + $0x98] sm:$0x1] }
  0x94   : > { %579 = vst.msk [vmem:[#allocation2 + $0x44] sm:$0xf] %vm575_vm3, %v486_v19  ;;  %v508_v53 = vpop.permute.xlu2 %507  ;;  %v903_v19 = vshll.u32 %v7568_v62, 16  ;;  %v929_v27 = vrot.slane %v927_v32, 5  ;;  %v919_v60 = vshll.u32 %v238_v38, 16 }
  0x95   : > { %577 = vst.msk [vmem:[#allocation2 + $0x1c] sm:$0xf] %vm575_vm3, %v482_v33  ;;  %v887_v33 = vrot.slane %v885_v58, 5  ;;  %v913_v58 = vshrl.u32 %v7555_v45, 16  ;;  %v869_v12 = vrot.slane %v868_v2, 4 }
  0x96   : > { %590 = vst.msk [vmem:[#allocation2 + $0x120] sm:$0xf] %vm575_vm3, %v508_v53  ;;  %v905_v46 = vrot.slane %v903_v19, 5  ;;  %v911_v19 = vrot.slane %v909_v25, 5 }
  0x97   : > { %2459 = vst.msk [vmem:[#allocation2 + $0x16c] sm:$0xf] %vm254_vm4, %v7840_v0 }
  0x98   : > { %v906_v45 = vor.u32 %v905_v46, %v902_v31 }
  0x99   : > { %1061 = vrot.lane.b32.xlu1 %v7807_v17, %s7301_s28  ;;  %1059 = vrot.lane.b32.xlu0 %v7811_v37, %s7301_s28  ;;  %v873_v37 = vrot.slane %v871_v8, 5  ;;  %v892_v17 = vor.u32 %v891_v4, %v887_v33  ;;  %v930_v8 = vor.u32 %v929_v27, %v926_v34  ;;  %v933_v4 = vshll.u32 %v7598_v61, 16 }
  0x9a   : > { %1063 = vrot.lane.b32.xlu2 %v7821_v63, %s7301_s28  ;;  %v895_v63 = vshll.u32 %v235_v50, 16  ;;  %v957_v50 = vshll.u32 %v7609_v9, 16  ;;  %v8093_v61 = vunpack.c.l.bf16 %v11179_v1 }
  0x9b   : > { %v494_v26 = vpop.permute.xlu1 %493  ;;  %v492_v53 = vpop.permute.xlu0 %491  ;;  %v7854_v21 = vsel %vm7655_vm2, %v869_v12, %v873_v37  ;;  %v961_v37 = vshrl.u32 %v7609_v9, 16  ;;  %v931_v31 = vrot.slane %v930_v8, 4  ;;  %v935_v46 = vrot.slane %v933_v4, 5 }
  0x9c   : > { %583 = vst.msk [vmem:[#allocation2 + $0x94] sm:$0xf] %vm575_vm3, %v494_v26  ;;  %v7844_v26 = vsel %vm7655_vm2, %v845_v14, %v849_v24  ;;  %v514_v22 = vpop.permute.xlu2 %513  ;;  %v893_v14 = vrot.slane %v892_v17, 4  ;;  %v897_v32 = vrot.slane %v895_v63, 5  ;;  %v883_v24 = vrot.slane %v882_v55, 4 }
  0x9d   : > { %582 = vst.msk [vmem:[#allocation2 + $0x80] sm:$0xf] %vm575_vm3, %v492_v53  ;;  %v915_v53 = vrot.slane %v913_v58, 4  ;;  %v907_v17 = vrot.slane %v906_v45, 4  ;;  %v939_v55 = vrot.slane %v937_v40, 4  ;;  %v948_v63 = vshrl.u32 %v7592_v52, 16 }
  0x9e   : > { %11148 = vst [vmem:[#allocation75_spill] sm:$0xff] %v7844_v26  ;;  %v7866_v27 = vsel %vm7655_vm2, %v893_v14, %v897_v32  ;;  %v7870_v34 = vsel %vm7655_vm2, %v883_v24, %v887_v33  ;;  %v241_v58 = vld [vmem:[%s7350_s25 + $0xa4] sm:$0x1]  ;;  %v921_v45 = vrot.slane %v919_v60, 5  ;;  %v959_v38 = vrot.slane %v957_v50, 5 }
  0x9f   : > { %593 = vst.msk [vmem:[#allocation2 + $0x15c] sm:$0xf] %vm575_vm3, %v514_v22  ;;  %v916_v16 = vor.u32 %v915_v53, %v911_v19  ;;  %v963_v53 = vrot.slane %v961_v37, 4  ;;  %v7878_v40 = vsel %vm7655_vm2, %v907_v17, %v911_v19  ;;  %v940_v33 = vor.u32 %v939_v55, %v935_v46  ;;  %v244_v60 = vld [vmem:[%s7350_s25 + $0xb0] sm:$0x1] }
  0xa0   : > { %11149 = vst [vmem:[#allocation76_spill] sm:$0xff] %v7854_v21  ;;  %v943_v14 = vshll.u32 %v241_v58, 16  ;;  %v972_v32 = vshrl.u32 %v7618_v35, 16  ;;  %v975_v24 = vshll.u32 %v7618_v35, 16  ;;  %v7890_v19 = vsel %vm7655_vm2, %v931_v31, %v935_v46  ;;  %v11183_v35 = vld [vmem:[#allocation70_spill] sm:$0xff] }
  0xa1   : > { %1067 = vrot.lane.b32.xlu1 %v7840_v0, %s7301_s28  ;;  %1065 = vrot.lane.b32.xlu0 %v7844_v26, %s7301_s28  ;;  %11150 = vst [vmem:[#allocation77_spill] sm:$0xff] %v7866_v27  ;;  %v917_v12 = vrot.slane %v916_v16, 4  ;;  %v964_v50 = vor.u32 %v963_v53, %v959_v38  ;;  %v941_v37 = vrot.slane %v940_v33, 4  ;;  %v981_v58 = vshll.u32 %v7612_v3, 16 }
  0xa2   : > { %1069 = vrot.lane.b32.xlu2 %v7854_v21, %s7301_s28  ;;  %11151 = vst [vmem:[#allocation78_spill] sm:$0xff] %v7870_v34  ;;  %v945_v17 = vrot.slane %v943_v14, 5  ;;  %v974_v55 = vrot.slane %v972_v32, 4  ;;  %v985_v31 = vshrl.u32 %v7612_v3, 16  ;;  %v7106_v32 = vld [vmem:[%s10771_s2 + $0x80] sm:$0xff]  }
  0xa3   : > { %v500_v22 = vpop.permute.xlu1 %499  ;;  %v498_v2 = vpop.permute.xlu0 %497  ;;  %11152 = vst [vmem:[#allocation79_spill] sm:$0xff] %v7878_v40  ;;  %v7894_v16 = vsel %vm7655_vm2, %v917_v12, %v921_v45  ;;  %v965_v45 = vrot.slane %v964_v50, 4  ;;  %v6581_v50 = vunpack.c.l.bf16 %v7106_v32 }
  0xa4   : > { %586 = vst.msk [vmem:[#allocation2 + $0xd0] sm:$0xf] %vm575_vm3, %v500_v22  ;;  %v520_v25 = vpop.permute.xlu2 %519  ;;  %v950_v22 = vrot.slane %v948_v63, 4  ;;  %v977_v63 = vrot.slane %v975_v24, 5  ;;  %v7908_v12 = vsel %vm7655_vm2, %v941_v37, %v945_v17  ;;  %v983_v24 = vrot.slane %v981_v58, 5 }
  0xa5   : > { %585 = vst.msk [vmem:[#allocation2 + $0xbc] sm:$0xf] %vm575_vm3, %v498_v2  ;;  %v953_v2 = vrot.slane %v951_v15, 5  ;;  %v967_v15 = vshll.u32 %v244_v60, 16  ;;  %v1188_v60 = vunpack.c.l.bf16 %v7663_v57  ;;  %v1189_v57 = vunpack.c.l.bf16 %v7680_v36 }
  0xa6   : > { %596 = vst.msk [vmem:[#allocation2 + $0x198] sm:$0xf] %vm575_vm3, %v520_v25  ;;  %v978_v53 = vor.u32 %v977_v63, %v974_v55  ;;  %v6582_v58 = vunpack.c.h.bf16 %v7106_v32 }
  0xa7   : > { %11153 = vst [vmem:[#allocation80_spill] sm:$0xff] %v7890_v19  ;;  %v954_v25 = vor.u32 %v953_v2, %v950_v22  ;;  %v969_v33 = vrot.slane %v967_v15, 5  ;;  %v987_v22 = vrot.slane %v985_v31, 4  ;;  %v1252_v31 = vmul.f32 %v6581_v50, %v1188_v60 }
  0xa8   : > { %11154 = vst [vmem:[#allocation81_spill] sm:$0xff] %v7894_v16  ;;  %v979_v37 = vrot.slane %v978_v53, 4  ;;  %v7107_v53 = vld [vmem:[%s10771_s2 + $0x88] sm:$0xff]   ;;  %v1253_v32 = vmul.f32 %v6582_v58, %v1189_v57  ;;  %v7975_v57 = vld [vmem:[%s10771_s2 + $0x90] sm:$0xff]  }
  0xa9   : > { %1073 = vrot.lane.b32.xlu1 %v7866_v27, %s7301_s28  ;;  %1071 = vrot.lane.b32.xlu0 %v7870_v34, %s7301_s28  ;;  %11155 = vst [vmem:[#allocation82_spill] sm:$0xff] %v7908_v12  ;;  %v955_v14 = vrot.slane %v954_v25, 4  ;;  %v7923_v17 = vsel %vm7655_vm2, %v965_v45, %v969_v33  ;;  %v988_v63 = vor.u32 %v987_v22, %v983_v24 }
  0xaa   : > { %1075 = vrot.lane.b32.xlu2 %v7878_v40, %s7301_s28  ;;  %11157 = vst [vmem:[#allocation84_spill] sm:$0xff] %v7923_v17  ;;  %v1284_v22 = vpack.c.bf16 %v1252_v31, %v1252_v31 }
  0xab   : > { %v506_v8 = vpop.permute.xlu1 %505  ;;  %v504_v4 = vpop.permute.xlu0 %503  ;;  %v7927_v55 = vsel %vm7655_vm2, %v955_v14, %v959_v38  ;;  %v7938_v38 = vsel %vm7655_vm2, %v979_v37, %v983_v24  ;;  %v10870_v14 = vunpack.c.l.bf16 %v7674_v49  ;;  %v10871_v24 = vunpack.c.l.bf16 %v7689_v43  ;;  %11180 = vst [vmem:[#allocation95_spill] sm:$0xff] %v8093_v61 }
  0xac   : > { %589 = vst.msk [vmem:[#allocation2 + $0x10c] sm:$0xf] %vm575_vm3, %v506_v8  ;;  %v526_v46 = vpop.permute.xlu2 %525  ;;  %v1285_v37 = vpack.c.bf16 %v1253_v32, %v1253_v32  ;;  %v6590_v32 = vunpack.c.h.bf16 %v7975_v57 }
  0xad   : > { %588 = vst.msk [vmem:[#allocation2 + $0xf8] sm:$0xf] %vm575_vm3, %v504_v4  ;;  %v7914_v4 = vld [vmem:[%s7350_s25 + $0xbc] sm:$0x1] }
  0xae   : > { %599 = vst.msk [vmem:[#allocation2 + $0x1d4] sm:$0xf] %vm575_vm3, %v526_v46  ;;  %v991_v15 = vshll.u32 %v7914_v4, 16  ;;  %v989_v46 = vrot.slane %v988_v63, 4 }
  0xaf   : > { %11156 = vst [vmem:[#allocation83_spill] sm:$0xff] %v7914_v4 }
  0xb0   : > { %11158 = vst [vmem:[#allocation85_spill] sm:$0xff] %v7927_v55  ;;  %v993_v45 = vrot.slane %v991_v15, 5 }
  0xb1   : > { %1079 = vrot.lane.b32.xlu1 %v7890_v19, %s7301_s28  ;;  %1077 = vrot.lane.b32.xlu0 %v7894_v16, %s7301_s28  ;;  %11159 = vst [vmem:[#allocation86_spill] sm:$0xff] %v7938_v38 }
  0xb2   : > { %1081 = vrot.lane.b32.xlu2 %v7908_v12, %s7301_s28  ;;  %v7951_v60 = vsel %vm7655_vm2, %v989_v46, %v993_v45  ;;  %v7982_v46 = vunpack.c.l.bf16 %v7701_v28  ;;  %v7985_v45 = vunpack.c.l.bf16 %v7716_v54  ;;  %2454 = vst.msk [vmem:[#allocation2 + $0x108] sm:$0xf] %vm254_vm4, %v11183_v35 }
  0xb3   : > { %v512_v2 = vpop.permute.xlu1 %511  ;;  %v510_v8 = vpop.permute.xlu0 %509  ;;  %11160 = vst [vmem:[#allocation87_spill] sm:$0xff] %v7951_v60 }
  0xb4   : > { %592 = vst.msk [vmem:[#allocation2 + $0x148] sm:$0xf] %vm575_vm3, %v512_v2  ;;  %v532_v25 = vpop.permute.xlu2 %531  ;;  %v6586_v2 = vunpack.c.h.bf16 %v7107_v53 }
  0xb5   : > { %591 = vst.msk [vmem:[#allocation2 + $0x134] sm:$0xf] %vm575_vm3, %v510_v8  ;;  %v6585_v8 = vunpack.c.l.bf16 %v7107_v53 }
  0xb6   : > { %602 = vst.msk [vmem:[#allocation2 + $0x210] sm:$0xf] %vm575_vm3, %v532_v25  ;;  %v1255_v63 = vmul.f32 %v6586_v2, %v10871_v24  ;;  %v7970_v25 = vld [vmem:[%s10771_s2 + $0x98] sm:$0xff]  }
  0xb7   : > { %v1254_v15 = vmul.f32 %v6585_v8, %v10870_v14  ;;  %11161 = vst [vmem:[#allocation88_spill] sm:$0xff] %v7982_v46  ;;  %v1257_v8 = vmul.f32 %v6590_v32, %v7982_v46  ;;  %v11165_v32 = vld [vmem:[#allocation17_spill] sm:$0xff]  ;;  %v11168_v14 = vld [vmem:[#allocation23_spill] sm:$0xff]  ;;  %v7111_v46 = vld [vmem:[%s10771_s2 + $0xa8] sm:$0xff]  }
  0xb8   : > { %11162 = vst [vmem:[#allocation89_spill] sm:$0xff] %v7985_v45  ;;  %v1287_v53 = vpack.c.bf16 %v1255_v63, %v1255_v63  ;;  %v6602_v4 = vunpack.c.h.bf16 %v7111_v46 }
  0xb9   : > { %1085 = vrot.lane.b32.xlu1 %v7923_v17, %s7301_s28  ;;  %1083 = vrot.lane.b32.xlu0 %v7927_v55, %s7301_s28  ;;  %267 = vst.msk [vmem:[#allocation2 + $0xf0] sm:$0xf] %vm254_vm4, %v11165_v32 }
  0xba   : > { %1087 = vrot.lane.b32.xlu2 %v7938_v38, %s7301_s28  ;;  %270 = vst.msk [vmem:[#allocation2 + $0x12c] sm:$0xf] %vm254_vm4, %v11168_v14 }
  0xbb   : > { %v518_v33 = vpop.permute.xlu1 %517  ;;  %v516_v36 = vpop.permute.xlu0 %515  ;;  %2458 = vst.msk [vmem:[#allocation2 + $0x158] sm:$0xf] %vm254_vm4, %v7844_v26 }
  0xbc   : > { %595 = vst.msk [vmem:[#allocation2 + $0x184] sm:$0xf] %vm575_vm3, %v518_v33  ;;  %v538_v50 = vpop.permute.xlu2 %537  ;;  %v1286_v33 = vpack.c.bf16 %v1254_v15, %v1254_v15  ;;  %v8011_v15 = vunpack.c.l.bf16 %v7722_v42 }
  0xbd   : > { %594 = vst.msk [vmem:[#allocation2 + $0x170] sm:$0xf] %vm575_vm3, %v516_v36  ;;  %v6593_v36 = vunpack.c.l.bf16 %v7970_v25 }
  0xbe   : > { %605 = vst.msk [vmem:[#allocation2 + $0x24c] sm:$0xf] %vm575_vm3, %v538_v50  ;;  %v7110_v50 = vld [vmem:[%s10771_s2 + $0xa0] sm:$0xff]  }
  0xbf   : > { %v1258_v2 = vmul.f32 %v6593_v36, %v7985_v45  ;;  %11163 = vst [vmem:[#allocation90_spill] sm:$0xff] %v8011_v15  ;;  %v6597_v36 = vunpack.c.l.bf16 %v7110_v50  ;;  %v6589_v45 = vunpack.c.l.bf16 %v7975_v57 }
  0xc0   : > { %2460 = vst.msk [vmem:[#allocation2 + $0x180] sm:$0xf] %vm254_vm4, %v7854_v21 }
  0xc1   : > { %1348 = vrot.lane.b32.xlu1 %v1284_v22, %s7302_s11  ;;  %1089 = vrot.lane.b32.xlu0 %v7951_v60, %s7301_s28  ;;  %2461 = vst.msk [vmem:[#allocation2 + $0x194] sm:$0xf] %vm254_vm4, %v7870_v34 }
  0xc2   : > { %1350 = vrot.lane.b32.xlu2 %v1285_v37, %s7302_s11  ;;  %2462 = vst.msk [vmem:[#allocation2 + $0x1a8] sm:$0xf] %vm254_vm4, %v7866_v27 }
  0xc3   : > { %v524_v58 = vpop.permute.xlu1 %523  ;;  %v522_v31 = vpop.permute.xlu0 %521  ;;  %2463 = vst.msk [vmem:[#allocation2 + $0x1bc] sm:$0xf] %vm254_vm4, %v7878_v40 }
  0xc4   : > { %598 = vst.msk [vmem:[#allocation2 + $0x1c0] sm:$0xf] %vm575_vm3, %v524_v58  ;;  %v1028_v22 = vpop.permute.xlu2 %1027  ;;  %v8014_v58 = vunpack.c.l.bf16 %v7741_v11 }
  0xc5   : > { %597 = vst.msk [vmem:[#allocation2 + $0x1ac] sm:$0xf] %vm575_vm3, %v522_v31  ;;  %v1290_v31 = vpack.c.bf16 %v1258_v2, %v1258_v2  ;;  %v1260_v2 = vmul.f32 %v6597_v36, %v8011_v15  ;;  %v11170_v36 = vld [vmem:[#allocation26_spill] sm:$0xff]  ;;  %v8070_v15 = vunpack.c.l.bf16 %v11177_v59  ;;  %v7116_v59 = vld [vmem:[%s10771_s2 + $0xd0] sm:$0xff]  }
  0xc6   : > { %1123 = vst.msk [vmem:[#allocation2] sm:$0xf] %vm575_vm3, %v1028_v22 }
  0xc7   : > { %11164 = vst [vmem:[#allocation91_spill] sm:$0xff] %v8014_v58 }
  0xc8   : > { %272 = vst.msk [vmem:[#allocation2 + $0x154] sm:$0xf] %vm254_vm4, %v11170_v36 }
  0xc9   : > { %1354 = vrot.lane.b32.xlu1 %v1287_v53, %s7302_s11  ;;  %1352 = vrot.lane.b32.xlu0 %v1286_v33, %s7302_s11  ;;  %v1289_v53 = vpack.c.bf16 %v1257_v8, %v1257_v8  ;;  %v6598_v33 = vunpack.c.h.bf16 %v7110_v50  ;;  %v11166_v8 = vld [vmem:[#allocation16_spill] sm:$0xff]  ;;  %11178 = vst [vmem:[#allocation94_spill] sm:$0xff] %v8070_v15 }
  0xca   : > { %268 = vst.msk [vmem:[#allocation2 + $0x104] sm:$0xf] %vm254_vm4, %v11166_v8  ;;  %v11167_v50 = vld [vmem:[#allocation20_spill] sm:$0xff] }
  0xcb   : > { %v530_v37 = vpop.permute.xlu1 %529  ;;  %v528_v63 = vpop.permute.xlu0 %527  ;;  %v1261_v22 = vmul.f32 %v6598_v33, %v8014_v58  ;;  %269 = vst.msk [vmem:[#allocation2 + $0x118] sm:$0xf] %vm254_vm4, %v11167_v50  ;;  %v11169_v33 = vld [vmem:[#allocation22_spill] sm:$0xff]  ;;  %v8079_v58 = vld [vmem:[%s10771_s2 + $0xb0] sm:$0xff]   ;;  %v8106_v50 = vunpack.c.l.bf16 %v11183_v35 }
  0xcc   : > { %601 = vst.msk [vmem:[#allocation2 + $0x1fc] sm:$0xf] %vm575_vm3, %v530_v37  ;;  %v6606_v35 = vunpack.c.h.bf16 %v8079_v58 }
  0xcd   : > { %600 = vst.msk [vmem:[#allocation2 + $0x1e8] sm:$0xf] %vm575_vm3, %v528_v63 }
  0xce   : > { %271 = vst.msk [vmem:[#allocation2 + $0x140] sm:$0xf] %vm254_vm4, %v11169_v33 }
  0xcf   : > { %11184 = vst [vmem:[#allocation97_spill] sm:$0xff] %v8106_v50 }
  0xd0   : > { %2464 = vst.msk [vmem:[#allocation2 + $0x1d0] sm:$0xf] %vm254_vm4, %v7894_v16 }
  0xd1   : > { %1360 = vrot.lane.b32.xlu1 %v1290_v31, %s7302_s11  ;;  %1358 = vrot.lane.b32.xlu0 %v1289_v53, %s7302_s11  ;;  %v1293_v31 = vpack.c.bf16 %v1261_v22, %v1261_v22  ;;  %v1292_v53 = vpack.c.bf16 %v1260_v2, %v1260_v2  ;;  %2465 = vst.msk [vmem:[#allocation2 + $0x1e4] sm:$0xf] %vm254_vm4, %v7890_v19 }
  0xd2   : > { %2466 = vst.msk [vmem:[#allocation2 + $0x1f8] sm:$0xf] %vm254_vm4, %v7908_v12 }
  0xd3   : > { %v536_v37 = vpop.permute.xlu1 %535  ;;  %v534_v63 = vpop.permute.xlu0 %533  ;;  %2467 = vst.msk [vmem:[#allocation2 + $0x20c] sm:$0xf] %vm254_vm4, %v7927_v55 }
  0xd4   : > { %604 = vst.msk [vmem:[#allocation2 + $0x238] sm:$0xf] %vm575_vm3, %v536_v37  ;;  %v11171_v37 = vld [vmem:[#allocation39_spill] sm:$0xff] }
  0xd5   : > { %603 = vst.msk [vmem:[#allocation2 + $0x224] sm:$0xf] %vm575_vm3, %v534_v63  ;;  %v11172_v63 = vld [vmem:[#allocation44_spill] sm:$0xff] }
  0xd6   : > { %280 = vst.msk [vmem:[#allocation2 + $0x1f4] sm:$0xf] %vm254_vm4, %v11171_v37  ;;  %v8100_v37 = vpop.permute.xlu2 %1033 }
  0xd7   : > { %281 = vst.msk [vmem:[#allocation2 + $0x208] sm:$0xf] %vm254_vm4, %v11172_v63  ;;  %v6605_v63 = vunpack.c.l.bf16 %v8079_v58 }
  0xd8   : > { %2468 = vst.msk [vmem:[#allocation2 + $0x220] sm:$0xf] %vm254_vm4, %v7923_v17 }
  0xd9   : > { %1366 = vrot.lane.b32.xlu1 %v1293_v31, %s7302_s11  ;;  %1364 = vrot.lane.b32.xlu0 %v1292_v53, %s7302_s11  ;;  %v11173_v31 = vld [vmem:[#allocation60_spill] sm:$0xff]  ;;  %v1264_v9 = vmul.f32 %v6605_v63, %v8070_v15  ;;  %2469 = vst.msk [vmem:[#allocation2 + $0x234] sm:$0xf] %vm254_vm4, %v7938_v38 }
  0xda   : > { %v8064_v53 = vunpack.c.l.bf16 %v11173_v31  ;;  %2443 = vst.msk [vmem:[#allocation2 + $0x2c] sm:$0xf] %vm254_vm4, %v11173_v31  ;;  %v6601_v31 = vunpack.c.l.bf16 %v7111_v46  ;;  %v11191_v46 = vld [vmem:[#allocation69_spill] sm:$0xff] }
  0xdb   : > { %v542_v22 = vpop.permute.xlu1 %541  ;;  %v8053_v2 = vpop.permute.xlu0 %539  ;;  %v1296_v63 = vpack.c.bf16 %v1264_v9, %v1264_v9  ;;  %2452 = vst.msk [vmem:[#allocation2 + $0xe0] sm:$0xf] %vm254_vm4, %v11191_v46 }
  0xdc   : > { %607 = vst.msk [vmem:[#allocation2 + $0x274] sm:$0xf] %vm575_vm3, %v542_v22  ;;  %v11175_v22 = vld [vmem:[#allocation65_spill] sm:$0xff]  ;;  %v1256_v62 = vmul.f32 %v6589_v45, %v8064_v53 }
  0xdd   : > { %11174 = vst [vmem:[#allocation92_spill] sm:$0xff] %v8064_v53  ;;  %v8067_v24 = vunpack.c.l.bf16 %v11175_v22 }
  0xde   : > { %v1288_v45 = vpack.c.bf16 %v1256_v62, %v1256_v62  ;;  %v8154_v1 = vpop.permute.xlu2 %1039  ;;  %2450 = vst.msk [vmem:[#allocation2 + $0xb8] sm:$0xf] %vm254_vm4, %v11175_v22 }
  0xdf   : > { %11176 = vst [vmem:[#allocation93_spill] sm:$0xff] %v8067_v24  ;;  %v1263_v57 = vmul.f32 %v6602_v4, %v8067_v24  ;;  %v6594_v4 = vunpack.c.h.bf16 %v7970_v25  ;;  %v7113_v24 = vld [vmem:[%s10771_s2 + $0xb8] sm:$0xff]  }
  0xe0   : > { %v6610_v53 = vunpack.c.h.bf16 %v7113_v24  ;;  %v6609_v3 = vunpack.c.l.bf16 %v7113_v24  ;;  %1356 = vrot.lane.b32.xlu2 %v1288_v45, %s7302_s11  ;;  %v8133_v24 = vld [vmem:[%s10771_s2 + $0xc8] sm:$0xff]   ;;  %v11185_v45 = vld [vmem:[#allocation66_spill] sm:$0xff]  ;;  %2470 = vst.msk [vmem:[#allocation2 + $0x248] sm:$0xf] %vm254_vm4, %v7951_v60 }
  0xe1   : > { %v1295_v15 = vpack.c.bf16 %v1263_v57, %v1263_v57  ;;  %1372 = vrot.lane.b32.xlu1 %v1296_v63, %s7302_s11  ;;  %v1259_v62 = vmul.f32 %v6594_v4, %v8093_v61  ;;  %v8140_v57 = vld [vmem:[%s10771_s2 + $0xc0] sm:$0xff]   ;;  %v8143_v63 = vunpack.c.l.bf16 %v11185_v45  ;;  %v6617_v28 = vunpack.c.l.bf16 %v8133_v24  ;;  %2449 = vst.msk [vmem:[#allocation2 + $0xa4] sm:$0xf] %vm254_vm4, %v11185_v45 }
  0xe2   : > { %v1267_v9 = vmul.f32 %v6610_v53, %v8106_v50  ;;  %v1266_v25 = vmul.f32 %v6609_v3, %v8103_v18  ;;  %v11189_v18 = vld [vmem:[#allocation71_spill] sm:$0xff]  ;;  %v6614_v49 = vunpack.c.h.bf16 %v8140_v57  ;;  %v6622_v45 = vunpack.c.h.bf16 %v7116_v59  ;;  %606 = vst.msk [vmem:[#allocation2 + $0x260] sm:$0xf] %vm575_vm3, %v8053_v2 }
  0xe3   : > { %v8090_v52 = vpop.permute.xlu1 %1031  ;;  %v8110_v23 = vpop.permute.xlu0 %1029  ;;  %1370 = vrot.lane.b32.xlu0 %v1295_v15, %s7302_s11  ;;  %11186 = vst [vmem:[#allocation98_spill] sm:$0xff] %v8143_v63  ;;  %v11187_v15 = vld [vmem:[#allocation73_spill] sm:$0xff]  ;;  %v1291_v4 = vpack.c.bf16 %v1259_v62, %v1259_v62  ;;  %v8158_v50 = vunpack.c.l.bf16 %v11189_v18  ;;  %v1262_v62 = vmul.f32 %v6601_v31, %v8143_v63  ;;  %v8188_v31 = vunpack.c.l.bf16 %v7854_v21 }
  0xe4   : > { %v8146_v53 = vunpack.c.l.bf16 %v11187_v15  ;;  %v1299_v54 = vpack.c.bf16 %v1267_v9, %v1267_v9  ;;  %v1298_v61 = vpack.c.bf16 %v1266_v25, %v1266_v25  ;;  %2456 = vst.msk [vmem:[#allocation2 + $0x130] sm:$0xf] %vm254_vm4, %v11189_v18 }
  0xe5   : > { %11190 = vst [vmem:[#allocation100_spill] sm:$0xff] %v8158_v50  ;;  %v1269_v25 = vmul.f32 %v6614_v49, %v8158_v50  ;;  %v6621_v50 = vunpack.c.l.bf16 %v7116_v59 }
  0xe6   : > { %11188 = vst [vmem:[#allocation99_spill] sm:$0xff] %v8146_v53  ;;  %v1270_v9 = vmul.f32 %v6617_v28, %v8146_v53  ;;  %v11194_v28 = vld [vmem:[#allocation72_spill] sm:$0xff]  ;;  %v8196_v44 = vpop.permute.xlu2 %1045  ;;  %v7283_v53 = vld [vmem:[%s7350_s25 + $0xa4] sm:$0x1] }
  0xe7   : > { %11193 = vst [vmem:[#allocation102_spill] sm:$0xff] %v8188_v31  ;;  %v1301_v22 = vpack.c.bf16 %v1269_v25, %v1269_v25  ;;  %v1624_v63 = vrot.slane %v7283_v53, 5 }
  0xe8   : > { %1362 = vrot.lane.b32.xlu2 %v1291_v4, %s7302_s11  ;;  %2455 = vst.msk [vmem:[#allocation2 + $0x11c] sm:$0xf] %vm254_vm4, %v11194_v28  ;;  %v1302_v49 = vpack.c.bf16 %v1270_v9, %v1270_v9  ;;  %v8223_v9 = vld [vmem:[%s10771_s2 + $0xe0] sm:$0xff]  }
  0xe9   : > { %1378 = vrot.lane.b32.xlu1 %v1299_v54, %s7302_s11  ;;  %v8185_v54 = vunpack.c.l.bf16 %v11191_v46  ;;  %v8200_v46 = vunpack.c.l.bf16 %v7840_v0  ;;  %2457 = vst.msk [vmem:[#allocation2 + $0x144] sm:$0xf] %vm254_vm4, %v11187_v15  ;;  %v6613_v0 = vunpack.c.l.bf16 %v8140_v57  ;;  %v6629_v21 = vunpack.c.l.bf16 %v8223_v9 }
  0xea   : > { %v8249_v15 = vunpack.c.l.bf16 %v7866_v27  ;;  %1125 = vst.msk [vmem:[#allocation2 + $0x28] sm:$0xf] %vm575_vm3, %v8090_v52  ;;  %v6618_v27 = vunpack.c.h.bf16 %v8133_v24 }
  0xeb   : > { %v8150_v3 = vpop.permute.xlu1 %1037  ;;  %v8162_v42 = vpop.permute.xlu0 %1035  ;;  %1376 = vrot.lane.b32.xlu0 %v1298_v61, %s7302_s11  ;;  %11192 = vst [vmem:[#allocation101_spill] sm:$0xff] %v8185_v54  ;;  %v1294_v61 = vpack.c.bf16 %v1262_v62, %v1262_v62  ;;  %v1265_v58 = vmul.f32 %v6606_v35, %v8185_v54  ;;  %v1273_v62 = vmul.f32 %v6622_v45, %v8188_v31  ;;  %v8230_v35 = vld [vmem:[%s10771_s2 + $0xd8] sm:$0xff]   ;;  %v8233_v45 = vunpack.c.l.bf16 %v11194_v28  ;;  %v11218_v31 = vld [vmem:[#allocation47_spill] sm:$0xff] }
  0xec   : > { %11195 = vst [vmem:[#allocation103_spill] sm:$0xff] %v8200_v46  ;;  %v1272_v59 = vmul.f32 %v6621_v50, %v8200_v46  ;;  %v6626_v18 = vunpack.c.h.bf16 %v8230_v35  ;;  %v11217_v46 = vld [vmem:[#allocation41_spill] sm:$0xff] }
  0xed   : > { %11196 = vst [vmem:[#allocation104_spill] sm:$0xff] %v8233_v45  ;;  %v1297_v25 = vpack.c.bf16 %v1265_v58, %v1265_v58  ;;  %v1268_v57 = vmul.f32 %v6613_v0, %v8233_v45  ;;  %v8277_v0 = vunpack.c.l.bf16 %v7908_v12 }
  0xee   : > { %11198 = vst [vmem:[#allocation106_spill] sm:$0xff] %v8249_v15 }
  0xef   : > { %11200 = vst [vmem:[#allocation108_spill] sm:$0xff] %v8277_v0 }
  0xf0   : > { %1368 = vrot.lane.b32.xlu2 %v1294_v61, %s7302_s11  ;;  %v1305_v61 = vpack.c.bf16 %v1273_v62, %v1273_v62  ;;  %v1275_v62 = vmul.f32 %v6626_v18, %v8249_v15  ;;  %v1300_v18 = vpack.c.bf16 %v1268_v57, %v1268_v57  ;;  %1126 = vst.msk [vmem:[#allocation2 + $0x3c] sm:$0xf] %vm575_vm3, %v8100_v37  ;;  %v8306_v37 = vld [vmem:[%s10771_s2 + $0xf8] sm:$0xff]   ;;  %v8328_v57 = vunpack.c.l.bf16 %v7923_v17 }
  0xf1   : > { %1384 = vrot.lane.b32.xlu1 %v1302_v49, %s7302_s11  ;;  %v8244_v49 = vpop.permute.xlu2 %1051  ;;  %1124 = vst.msk [vmem:[#allocation2 + $0x14] sm:$0xf] %vm575_vm3, %v8110_v23  ;;  %v1593_v17 = vrot.slane %v7498_v41, 5 }
  0xf2   : > { %v1307_v12 = vpack.c.bf16 %v1275_v62, %v1275_v62  ;;  %1128 = vst.msk [vmem:[#allocation2 + $0x64] sm:$0xf] %vm575_vm3, %v8150_v3 }
  0xf3   : > { %v8192_v4 = vpop.permute.xlu1 %1043  ;;  %v8204_v11 = vpop.permute.xlu0 %1041  ;;  %1382 = vrot.lane.b32.xlu0 %v1301_v22, %s7302_s11  ;;  %v8236_v22 = vunpack.c.l.bf16 %v7878_v40  ;;  %v1304_v40 = vpack.c.bf16 %v1272_v59, %v1272_v59  ;;  %v7119_v59 = vld [vmem:[%s10771_s2 + $0xe8] sm:$0xff]   ;;  %1129 = vst.msk [vmem:[#allocation2 + $0x78] sm:$0xf] %vm575_vm3, %v8154_v1  ;;  %v8313_v1 = vld [vmem:[%s10771_s2 + $0xf0] sm:$0xff]  }
  0xf4   : > { %v6634_v15 = vunpack.c.h.bf16 %v7119_v59  ;;  %v6633_v45 = vunpack.c.l.bf16 %v7119_v59  ;;  %1127 = vst.msk [vmem:[#allocation2 + $0x50] sm:$0xf] %vm575_vm3, %v8162_v42  ;;  %v8319_v42 = vunpack.c.l.bf16 %v7938_v38 }
  0xf5   : > { %11197 = vst [vmem:[#allocation105_spill] sm:$0xff] %v8236_v22  ;;  %v1276_v58 = vmul.f32 %v6629_v21, %v8236_v22  ;;  %v8285_v22 = vunpack.c.l.bf16 %v7890_v19 }
  0xf6   : > { %v1279_v2 = vmul.f32 %v6634_v15, %v8277_v0  ;;  %1131 = vst.msk [vmem:[#allocation2 + $0xa0] sm:$0xf] %vm575_vm3, %v8192_v4  ;;  %v6625_v4 = vunpack.c.l.bf16 %v8230_v35 }
  0xf7   : > { %11201 = vst [vmem:[#allocation109_spill] sm:$0xff] %v8285_v22  ;;  %v1278_v23 = vmul.f32 %v6633_v45, %v8285_v22  ;;  %v6641_v45 = vunpack.c.l.bf16 %v8306_v37 }
  0xf8   : > { %1374 = vrot.lane.b32.xlu2 %v1297_v25, %s7302_s11  ;;  %v8274_v25 = vunpack.c.l.bf16 %v7844_v26  ;;  %11203 = vst [vmem:[#allocation111_spill] sm:$0xff] %v8319_v42  ;;  %v1311_v15 = vpack.c.bf16 %v1279_v2, %v1279_v2 }
  0xf9   : > { %1390 = vrot.lane.b32.xlu1 %v1305_v61, %s7302_s11  ;;  %v1058_v61 = vpop.permute.xlu2 %1057  ;;  %1132 = vst.msk [vmem:[#allocation2 + $0xb4] sm:$0xf] %vm575_vm3, %v8196_v44  ;;  %v6638_v44 = vunpack.c.h.bf16 %v8313_v1  ;;  %v1282_v35 = vmul.f32 %v6641_v45, %v8319_v42 }
  0xfa   : > { %11199 = vst [vmem:[#allocation107_spill] sm:$0xff] %v8274_v25  ;;  %v1271_v52 = vmul.f32 %v6618_v27, %v8274_v25  ;;  %v8316_v27 = vunpack.c.l.bf16 %v7870_v34  ;;  %v7280_v34 = vld [vmem:[%s7350_s25 + $0x80] sm:$0x1] }
  0xfb   : > { %v8240_v50 = vpop.permute.xlu1 %1049  ;;  %v1048_v28 = vpop.permute.xlu0 %1047  ;;  %1388 = vrot.lane.b32.xlu0 %v1304_v40, %s7302_s11  ;;  %v1308_v40 = vpack.c.bf16 %v1276_v58, %v1276_v58  ;;  %1130 = vst.msk [vmem:[#allocation2 + $0x8c] sm:$0xf] %vm575_vm3, %v8204_v11  ;;  %v1310_v58 = vpack.c.bf16 %v1278_v23, %v1278_v23  ;;  %v7271_v23 = vld [vmem:[%s7350_s25 + $0x8] sm:$0x1] }
  0xfc   : > { %11202 = vst [vmem:[#allocation110_spill] sm:$0xff] %v8316_v27  ;;  %v1303_v24 = vpack.c.bf16 %v1271_v52, %v1271_v52  ;;  %v1274_v11 = vmul.f32 %v6625_v4, %v8316_v27 }
  0xfd   : > { %11204 = vst [vmem:[#allocation112_spill] sm:$0xff] %v8328_v57 }
  0xfe   : > { %1134 = vst.msk [vmem:[#allocation2 + $0xdc] sm:$0xf] %vm575_vm3, %v8240_v50  ;;  %v1281_v50 = vmul.f32 %v6638_v44, %v8328_v57  ;;  %v1306_v59 = vpack.c.bf16 %v1274_v11, %v1274_v11  ;;  %v1537_v11 = vrot.slane %v7362_v7, 5  ;;  %v11216_v57 = vld [vmem:[#allocation39_spill] sm:$0xff] }
  0xff   : > { %1135 = vst.msk [vmem:[#allocation2 + $0xf0] sm:$0xf] %vm575_vm3, %v8244_v49  ;;  %v8347_v49 = vunpack.c.l.bf16 %v7894_v16  ;;  %v1614_v42 = vrot.slane %v11216_v57, 5 }
 0x100   : > { %1380 = vrot.lane.b32.xlu2 %v1300_v18, %s7302_s11  ;;  %1133 = vst.msk [vmem:[#allocation2 + $0xc8] sm:$0xf] %vm575_vm3, %v1048_v28 }
 0x101   : > { %1396 = vrot.lane.b32.xlu1 %v1308_v40, %s7302_s11  ;;  %v1064_v3 = vpop.permute.xlu2 %1063  ;;  %1138 = vst.msk [vmem:[#allocation2 + $0x12c] sm:$0xf] %vm575_vm3, %v1058_v61  ;;  %v6630_v40 = vunpack.c.h.bf16 %v8223_v9  ;;  %v1313_v61 = vpack.c.bf16 %v1281_v50, %v1281_v50  ;;  %v1544_v50 = vrot.slane %v7380_v20, 5 }
 0x102   : > { %11205 = vst [vmem:[#allocation113_spill] sm:$0xff] %v8347_v49 }
 0x103   : > { %v1056_v21 = vpop.permute.xlu1 %1055  ;;  %v1054_v26 = vpop.permute.xlu0 %1053  ;;  %1394 = vrot.lane.b32.xlu0 %v1307_v12, %s7302_s11  ;;  %1141 = vst.msk [vmem:[#allocation2 + $0x168] sm:$0xf] %vm575_vm3, %v1064_v3  ;;  %v1277_v9 = vmul.f32 %v6630_v40, %v8347_v49  ;;  %v8367_v3 = vunpack.c.l.bf16 %v7927_v55  ;;  %v8392_v40 = vunpack.c.l.bf16 %v7951_v60 }
 0x104   : > { %1137 = vst.msk [vmem:[#allocation2 + $0x118] sm:$0xf] %vm575_vm3, %v1056_v21  ;;  %v1314_v21 = vpack.c.bf16 %v1282_v35, %v1282_v35  ;;  %v5677_v35 = vrot.slane %v7370_v13, 9 }
 0x105   : > { %1136 = vst.msk [vmem:[#allocation2 + $0x104] sm:$0xf] %vm575_vm3, %v1054_v26  ;;  %v1530_v26 = vrot.slane %v7367_v10, 5  ;;  %v11206_v10 = vmov 0  ;;  %v1309_v4 = vpack.c.bf16 %v1277_v9, %v1277_v9 }
 0x106   : > { %v11207_v10 = vsel %vm8361_vm7, 4294967295, %v11206_v10  ;;  %11209 = vst [vmem:[#allocation115_spill] sm:$0xff] %v8367_v3  ;;  %v8398_v9 = vsel %vm8361_vm7, %v5677_v35, %v1544_v50 }
 0x107   : > { %v1532_v2 = vrot.slane %v1530_v26, 4  ;;  %11208 = vst [vmem:[#allocation114_spill] sm:$0xff] %v11207_v10 }
 0x108   : > { %1386 = vrot.lane.b32.xlu2 %v1303_v24, %s7302_s11  ;;  %v5675_v24 = vrot.slane %v7359_v6, 9  ;;  %11210 = vst [vmem:[#allocation116_spill] sm:$0xff] %v8392_v40 }
 0x109   : > { %1402 = vrot.lane.b32.xlu1 %v1311_v15, %s7302_s11  ;;  %v1070_v18 = vpop.permute.xlu2 %1069 }
 0x10a   : > { %1144 = vst.msk [vmem:[#allocation2 + $0x1a4] sm:$0xf] %vm575_vm3, %v1070_v18  ;;  %v8378_v6 = vsel %vm8361_vm7, %v5675_v24, %v1530_v26  ;;  %v6642_v26 = vunpack.c.h.bf16 %v8306_v37 }
 0x10b   : > { %v1062_v12 = vpop.permute.xlu1 %1061  ;;  %v1060_v62 = vpop.permute.xlu0 %1059  ;;  %1400 = vrot.lane.b32.xlu0 %v1310_v58, %s7302_s11  ;;  %v6637_v58 = vunpack.c.l.bf16 %v8313_v1 }
 0x10c   : > { %1140 = vst.msk [vmem:[#allocation2 + $0x154] sm:$0xf] %vm575_vm3, %v1062_v12  ;;  %v1533_v12 = vrot.slane %v7271_v23, 5  ;;  %v1551_v23 = vrot.slane %v7394_v29, 5  ;;  %v1283_v37 = vmul.f32 %v6642_v26, %v8392_v40  ;;  %v1603_v40 = vrot.slane %v7280_v34, 5 }
 0x10d   : > { %1139 = vst.msk [vmem:[#allocation2 + $0x140] sm:$0xf] %vm575_vm3, %v1060_v62  ;;  %v1280_v1 = vmul.f32 %v6637_v58, %v8367_v3 }
 0x10e   : > { %v8373_v62 = vsel %vm8361_vm7, %v1532_v2, %v1533_v12  ;;  %v1553_v24 = vrot.slane %v1551_v23, 4 }
 0x110   : > { %1392 = vrot.lane.b32.xlu2 %v1306_v59, %s7302_s11  ;;  %v7272_v59 = vld [vmem:[%s7350_s25 + $0x14] sm:$0x1] }
 0x111   : > { %1408 = vrot.lane.b32.xlu1 %v1314_v21, %s7302_s11  ;;  %v1076_v45 = vpop.permute.xlu2 %1075  ;;  %v1540_v21 = vrot.slane %v7272_v59, 5 }
 0x112   : > { %1147 = vst.msk [vmem:[#allocation2 + $0x1e0] sm:$0xf] %vm575_vm3, %v1076_v45  ;;  %v5678_v45 = vrot.slane %v7397_v30, 9 }
 0x113   : > { %v1068_v28 = vpop.permute.xlu1 %1067  ;;  %v1066_v52 = vpop.permute.xlu0 %1065  ;;  %1406 = vrot.lane.b32.xlu0 %v1313_v61, %s7302_s11  ;;  %v1312_v61 = vpack.c.bf16 %v1280_v1, %v1280_v1 }
 0x114   : > { %1143 = vst.msk [vmem:[#allocation2 + $0x190] sm:$0xf] %vm575_vm3, %v1068_v28  ;;  %v1539_v28 = vrot.slane %v1537_v11, 4  ;;  %v8423_v59 = vsel %vm8361_vm7, %v5678_v45, %v1551_v23 }
 0x115   : > { %1142 = vst.msk [vmem:[#allocation2 + $0x17c] sm:$0xf] %vm575_vm3, %v1066_v52 }
 0x116   : > { %v8404_v12 = vsel %vm8361_vm7, %v1539_v28, %v1540_v21  ;;  %v1558_v21 = vrot.slane %v7427_v48, 5 }
 0x118   : > { %1398 = vrot.lane.b32.xlu2 %v1309_v4, %s7302_s11  ;;  %v1560_v26 = vrot.slane %v1558_v21, 4 }
 0x119   : > { %1674 = vrot.lane.b32.xlu1 %v8373_v62, %s7302_s11  ;;  %v1082_v52 = vpop.permute.xlu2 %1081 }
 0x11a   : > { %1150 = vst.msk [vmem:[#allocation2 + $0x21c] sm:$0xf] %vm575_vm3, %v1082_v52  ;;  %v1565_v52 = vrot.slane %v7438_v56, 5 }
 0x11b   : > { %v1074_v15 = vpop.permute.xlu1 %1073  ;;  %v1072_v44 = vpop.permute.xlu0 %1071  ;;  %1672 = vrot.lane.b32.xlu0 %v8378_v6, %s7302_s11 }
 0x11c   : > { %1146 = vst.msk [vmem:[#allocation2 + $0x1cc] sm:$0xf] %vm575_vm3, %v1074_v15  ;;  %v7273_v15 = vld [vmem:[%s7350_s25 + $0x2c] sm:$0x1] }
 0x11d   : > { %1145 = vst.msk [vmem:[#allocation2 + $0x1b8] sm:$0xf] %vm575_vm3, %v1072_v44  ;;  %v1554_v4 = vrot.slane %v7273_v15, 5  ;;  %v1315_v44 = vpack.c.bf16 %v1283_v37, %v1283_v37 }
 0x11f   : > { %v8418_v35 = vsel %vm8361_vm7, %v1553_v24, %v1554_v4 }
 0x120   : > { %1404 = vrot.lane.b32.xlu2 %v1312_v61, %s7302_s11  ;;  %v5680_v61 = vrot.slane %v7424_v47, 9 }
 0x121   : > { %1680 = vrot.lane.b32.xlu1 %v8398_v9, %s7302_s11  ;;  %v1088_v1 = vpop.permute.xlu2 %1087 }
 0x122   : > { %1153 = vst.msk [vmem:[#allocation2 + $0x258] sm:$0xf] %vm575_vm3, %v1088_v1  ;;  %v8443_v4 = vsel %vm8361_vm7, %v5680_v61, %v1565_v52  ;;  %v7275_v1 = vld [vmem:[%s7350_s25 + $0x20] sm:$0x1]  ;;  %v7276_v61 = vld [vmem:[%s7350_s25 + $0x50] sm:$0x1] }
 0x123   : > { %v1080_v18 = vpop.permute.xlu1 %1079  ;;  %v1078_v2 = vpop.permute.xlu0 %1077  ;;  %1678 = vrot.lane.b32.xlu0 %v8404_v12, %s7302_s11 }
 0x124   : > { %1149 = vst.msk [vmem:[#allocation2 + $0x208] sm:$0xf] %vm575_vm3, %v1080_v18  ;;  %v5676_v18 = vrot.slane %v7356_v5, 9 }
 0x125   : > { %1148 = vst.msk [vmem:[#allocation2 + $0x1f4] sm:$0xf] %vm575_vm3, %v1078_v2  ;;  %v7274_v2 = vld [vmem:[%s7350_s25 + $0x38] sm:$0x1] }
 0x126   : > { %v1561_v23 = vrot.slane %v7274_v2, 5  ;;  %v8439_v15 = vsel %vm8361_vm7, %v5676_v18, %v1537_v11  ;;  %v1546_v11 = vrot.slane %v1544_v50, 4  ;;  %v1575_v2 = vrot.slane %v7276_v61, 5 }
 0x127   : > { %11211 = vst [vmem:[#allocation117_spill] sm:$0xff] %v8439_v15 }
 0x128   : > { %1410 = vrot.lane.b32.xlu2 %v1315_v44, %s7302_s11  ;;  %v8449_v44 = vsel %vm8361_vm7, %v1560_v26, %v1561_v23  ;;  %v5681_v26 = vrot.slane %v11165_v32, 9 }
 0x129   : > { %1686 = vrot.lane.b32.xlu1 %v8418_v35, %s7302_s11  ;;  %v1351_v24 = vpop.permute.xlu2 %1350 }
 0x12a   : > { %1446 = vst.msk [vmem:[#allocation2 + $0x1c] sm:$0xf] %vm1444_vm8, %v1351_v24 }
 0x12b   : > { %v1086_v58 = vpop.permute.xlu1 %1085  ;;  %v1084_v28 = vpop.permute.xlu0 %1083  ;;  %1684 = vrot.lane.b32.xlu0 %v8423_v59, %s7302_s11 }
 0x12c   : > { %1152 = vst.msk [vmem:[#allocation2 + $0x244] sm:$0xf] %vm575_vm3, %v1086_v58  ;;  %v1572_v58 = vrot.slane %v11166_v8, 5 }
 0x12d   : > { %1151 = vst.msk [vmem:[#allocation2 + $0x230] sm:$0xf] %vm575_vm3, %v1084_v28  ;;  %v1547_v28 = vrot.slane %v7275_v1, 5  ;;  %v1579_v1 = vrot.slane %v11168_v14, 5 }
 0x12e   : > { %v1574_v18 = vrot.slane %v1572_v58, 4 }
 0x12f   : > { %v1581_v61 = vrot.slane %v1579_v1, 4 }
 0x130   : > { %1676 = vrot.lane.b32.xlu2 %v8439_v15, %s7302_s11  ;;  %v8468_v24 = vsel %vm8361_vm7, %v1574_v18, %v1575_v2  ;;  %v7277_v2 = vld [vmem:[%s7350_s25 + $0x5c] sm:$0x1] }
 0x131   : > { %1692 = vrot.lane.b32.xlu1 %v8443_v4, %s7302_s11 }
 0x133   : > { %v1349_v37 = vpop.permute.xlu1 %1348  ;;  %v1090_v45 = vpop.permute.xlu0 %1089  ;;  %1690 = vrot.lane.b32.xlu0 %v8449_v44, %s7302_s11 }
 0x134   : > { %1445 = vst.msk [vmem:[#allocation2 + $0x8] sm:$0xf] %vm1444_vm8, %v1349_v37  ;;  %v8464_v37 = vsel %vm8361_vm7, %v1546_v11, %v1547_v28  ;;  %v5679_v11 = vrot.slane %v7408_v39, 9  ;;  %v5683_v28 = vrot.slane %v11169_v33, 9 }
 0x135   : > { %1154 = vst.msk [vmem:[#allocation2 + $0x26c] sm:$0xf] %vm575_vm3, %v1090_v45  ;;  %v8472_v45 = vsel %vm8361_vm7, %v5681_v26, %v1572_v58  ;;  %v1586_v58 = vrot.slane %v11170_v36, 5  ;;  %v1582_v26 = vrot.slane %v7277_v2, 5  ;;  %v8651_v14 = vunpack.c.l.bf16 %v8464_v37 }
 0x137   : > { %v8494_v38 = vsel %vm8361_vm7, %v5683_v28, %v1586_v58  ;;  %v8499_v2 = vsel %vm8361_vm7, %v1581_v61, %v1582_v26  ;;  %v5684_v61 = vrot.slane %v7511_v51, 9  ;;  %v1588_v34 = vrot.slane %v1586_v58, 4  ;;  %v7122_v51 = vld [vmem:[%s10771_s2 + $0x100] sm:$0xff]  }
 0x138   : > { %1682 = vrot.lane.b32.xlu2 %v8464_v37, %s7302_s11 }
 0x139   : > { %1698 = vrot.lane.b32.xlu1 %v8468_v24, %s7302_s11 }
 0x13a   : > { %v1357_v18 = vpop.permute.xlu2 %1356 }
 0x13b   : > { %v1355_v23 = vpop.permute.xlu1 %1354  ;;  %v1353_v50 = vpop.permute.xlu0 %1352  ;;  %1696 = vrot.lane.b32.xlu0 %v8472_v45, %s7302_s11  ;;  %1449 = vst.msk [vmem:[#allocation2 + $0x58] sm:$0xf] %vm1444_vm8, %v1357_v18  ;;  %v1595_v18 = vrot.slane %v1593_v17, 4 }
 0x13c   : > { %1448 = vst.msk [vmem:[#allocation2 + $0x44] sm:$0xf] %vm1444_vm8, %v1355_v23 }
 0x13d   : > { %1447 = vst.msk [vmem:[#allocation2 + $0x30] sm:$0xf] %vm1444_vm8, %v1353_v50  ;;  %v8490_v50 = vsel %vm8361_vm7, %v5679_v11, %v1558_v21  ;;  %v1567_v21 = vrot.slane %v1565_v52, 4  ;;  %v7278_v11 = vld [vmem:[%s7350_s25 + $0x44] sm:$0x1] }
 0x13e   : > { %v1568_v28 = vrot.slane %v7278_v11, 5 }
 0x140   : > { %1688 = vrot.lane.b32.xlu2 %v8490_v50, %s7302_s11  ;;  %v8515_v26 = vsel %vm8361_vm7, %v1567_v21, %v1568_v28  ;;  %v11214_v28 = vld [vmem:[#allocation34_spill] sm:$0xff] }
 0x141   : > { %1704 = vrot.lane.b32.xlu1 %v8494_v38, %s7302_s11  ;;  %v8703_v10 = vunpack.c.l.bf16 %v8515_v26 }
 0x142   : > { %v1363_v19 = vpop.permute.xlu2 %1362 }
 0x143   : > { %v1361_v23 = vpop.permute.xlu1 %1360  ;;  %v1359_v60 = vpop.permute.xlu0 %1358  ;;  %1702 = vrot.lane.b32.xlu0 %v8499_v2, %s7302_s11  ;;  %1452 = vst.msk [vmem:[#allocation2 + $0x94] sm:$0xf] %vm1444_vm8, %v1363_v19  ;;  %v11212_v19 = vld [vmem:[#allocation35_spill] sm:$0xff] }
 0x144   : > { %1451 = vst.msk [vmem:[#allocation2 + $0x80] sm:$0xf] %vm1444_vm8, %v1361_v23  ;;  %v7279_v23 = vld [vmem:[%s7350_s25 + $0x74] sm:$0x1]  ;;  %v1600_v16 = vrot.slane %v11212_v19, 5  ;;  %v11224_v19 = vld [vmem:[#allocation52_spill] sm:$0xff] }
 0x145   : > { %1450 = vst.msk [vmem:[#allocation2 + $0x6c] sm:$0xf] %vm1444_vm8, %v1359_v60  ;;  %v1596_v55 = vrot.slane %v7279_v23, 5  ;;  %v8523_v23 = vsel %vm8361_vm7, %v5684_v61, %v1593_v17  ;;  %v11215_v17 = vld [vmem:[#allocation38_spill] sm:$0xff]  ;;  %v5690_v57 = vrot.slane %v11224_v19, 9 }
 0x146   : > { %v1607_v61 = vrot.slane %v11215_v17, 5  ;;  %11231 = vst [vmem:[#allocation121_spill] sm:$0xff] %v8703_v10 }
 0x147   : > { %v8519_v52 = vsel %vm8361_vm7, %v1595_v18, %v1596_v55  ;;  %v11213_v55 = vld [vmem:[#allocation20_spill] sm:$0xff]  ;;  %v5686_v18 = vrot.slane %v11214_v28, 9  ;;  %v1834_v28 = vunpack.c.l.bf16 %v8373_v62  ;;  %v11225_v62 = vunpack.c.l.bf16 %v8439_v15 }
 0x148   : > { %1694 = vrot.lane.b32.xlu2 %v8515_v26, %s7302_s11  ;;  %v5682_v21 = vrot.slane %v11213_v55, 9  ;;  %v8655_v15 = vunpack.c.l.bf16 %v8398_v9 }
 0x149   : > { %1710 = vrot.lane.b32.xlu1 %v8519_v52, %s7302_s11  ;;  %v8544_v49 = vsel %vm8361_vm7, %v5686_v18, %v1607_v61  ;;  %v1616_v18 = vrot.slane %v1614_v42, 4 }
 0x14a   : > { %v8540_v3 = vsel %vm8361_vm7, %v5682_v21, %v1579_v1  ;;  %v7281_v1 = vld [vmem:[%s7350_s25 + $0x68] sm:$0x1]  ;;  %11228 = vst [vmem:[#allocation118_spill] sm:$0xff] %v8655_v15 }
 0x14b   : > { %v1367_v60 = vpop.permute.xlu1 %1366  ;;  %v1365_v11 = vpop.permute.xlu0 %1364  ;;  %1708 = vrot.lane.b32.xlu0 %v8523_v23, %s7302_s11  ;;  %v1589_v21 = vrot.slane %v7281_v1, 5 }
 0x14c   : > { %1454 = vst.msk [vmem:[#allocation2 + $0xbc] sm:$0xf] %vm1444_vm8, %v1367_v60  ;;  %v1369_v60 = vpop.permute.xlu2 %1368 }
 0x14d   : > { %1453 = vst.msk [vmem:[#allocation2 + $0xa8] sm:$0xf] %vm1444_vm8, %v1365_v11  ;;  %v1602_v11 = vrot.slane %v1600_v16, 4  ;;  %v8565_v58 = vsel %vm8361_vm7, %v1588_v34, %v1589_v21  ;;  %v11220_v21 = vld [vmem:[#allocation46_spill] sm:$0xff] }
 0x14e   : > { %1455 = vst.msk [vmem:[#allocation2 + $0xd0] sm:$0xf] %vm1444_vm8, %v1369_v60  ;;  %v7282_v60 = vld [vmem:[%s7350_s25 + $0x98] sm:$0x1] }
 0x14f   : > { %v8549_v27 = vsel %vm8361_vm7, %v1602_v11, %v1603_v40  ;;  %v1617_v22 = vrot.slane %v7282_v60, 5  ;;  %v5687_v40 = vrot.slane %v11217_v46, 9 }
 0x150   : > { %1700 = vrot.lane.b32.xlu2 %v8540_v3, %s7302_s11 }
 0x151   : > { %1716 = vrot.lane.b32.xlu1 %v8544_v49, %s7302_s11  ;;  %v8569_v1 = vsel %vm8361_vm7, %v1616_v18, %v1617_v22  ;;  %v8573_v60 = vsel %vm8361_vm7, %v5687_v40, %v1614_v42  ;;  %v5689_v22 = vrot.slane %v11220_v21, 9  ;;  %v11221_v18 = vld [vmem:[#allocation50_spill] sm:$0xff]  ;;  %v11222_v21 = vld [vmem:[#allocation51_spill] sm:$0xff] }
 0x153   : > { %1714 = vrot.lane.b32.xlu0 %v8549_v27, %s7302_s11  ;;  %v1373_v25 = vpop.permute.xlu1 %1372 }
 0x154   : > { %v1375_v0 = vpop.permute.xlu2 %1374  ;;  %1457 = vst.msk [vmem:[#allocation2 + $0xf8] sm:$0xf] %vm1444_vm8, %v1373_v25  ;;  %v11219_v25 = vld [vmem:[#allocation32_spill] sm:$0xff] }
 0x155   : > { %1458 = vst.msk [vmem:[#allocation2 + $0x10c] sm:$0xf] %vm1444_vm8, %v1375_v0  ;;  %v1371_v11 = vpop.permute.xlu0 %1370  ;;  %v1621_v0 = vrot.slane %v11218_v31, 5  ;;  %v5685_v34 = vrot.slane %v11219_v25, 9 }
 0x156   : > { %1456 = vst.msk [vmem:[#allocation2 + $0xe4] sm:$0xf] %vm1444_vm8, %v1371_v11  ;;  %v1628_v11 = vrot.slane %v11221_v18, 5  ;;  %v1635_v18 = vrot.slane %v11222_v21, 5 }
 0x157   : > { %v1623_v40 = vrot.slane %v1621_v0, 4  ;;  %v8591_v46 = vsel %vm8361_vm7, %v5685_v34, %v1600_v16  ;;  %v1609_v16 = vrot.slane %v1607_v61, 4 }
 0x158   : > { %1706 = vrot.lane.b32.xlu2 %v8565_v58, %s7302_s11  ;;  %v8595_v43 = vsel %vm8361_vm7, %v5689_v22, %v1628_v11  ;;  %v1637_v34 = vrot.slane %v1635_v18, 4  ;;  %v11223_v22 = vld [vmem:[#allocation83_spill] sm:$0xff] }
 0x159   : > { %1722 = vrot.lane.b32.xlu1 %v8569_v1, %s7302_s11  ;;  %v8600_v53 = vsel %vm8361_vm7, %v1623_v40, %v1624_v63  ;;  %v8613_v63 = vld [vmem:[%s10771_s2 + $0x108] sm:$0xff]   ;;  %11227 = vst [vmem:[#allocation83_spill] sm:$0xff] %v8651_v14 }
 0x15b   : > { %1720 = vrot.lane.b32.xlu0 %v8573_v60, %s7302_s11  ;;  %v1379_v42 = vpop.permute.xlu1 %1378 }
 0x15c   : > { %v1381_v54 = vpop.permute.xlu2 %1380  ;;  %1460 = vst.msk [vmem:[#allocation2 + $0x134] sm:$0xf] %vm1444_vm8, %v1379_v42  ;;  %v1638_v42 = vrot.slane %v11223_v22, 5  ;;  %v6649_v22 = vunpack.c.l.bf16 %v8613_v63 }
 0x15d   : > { %1461 = vst.msk [vmem:[#allocation2 + $0x148] sm:$0xf] %vm1444_vm8, %v1381_v54  ;;  %v1377_v31 = vpop.permute.xlu0 %1376  ;;  %v7284_v54 = vld [vmem:[%s7350_s25 + $0x8c] sm:$0x1] }
 0x15e   : > { %1459 = vst.msk [vmem:[#allocation2 + $0x120] sm:$0xf] %vm1444_vm8, %v1377_v31  ;;  %v1610_v31 = vrot.slane %v7284_v54, 5  ;;  %v8631_v17 = vsel %vm8361_vm7, %v1637_v34, %v1638_v42  ;;  %v8635_v54 = vsel %vm8361_vm7, %v5690_v57, %v1635_v18  ;;  %v7124_v57 = vld [vmem:[%s10771_s2 + $0x110] sm:$0xff]  }
 0x160   : > { %1712 = vrot.lane.b32.xlu2 %v8591_v46, %s7302_s11  ;;  %v8627_v19 = vsel %vm8361_vm7, %v1609_v16, %v1610_v31  ;;  %v11226_v16 = vld [vmem:[#allocation44_spill] sm:$0xff] }
 0x161   : > { %1728 = vrot.lane.b32.xlu1 %v8595_v43, %s7302_s11  ;;  %v5688_v31 = vrot.slane %v11226_v16, 9  ;;  %v7285_v16 = vld [vmem:[%s7350_s25 + $0xb0] sm:$0x1] }
 0x162   : > { %v1631_v41 = vrot.slane %v7285_v16, 5  ;;  %v8680_v16 = vunpack.c.l.bf16 %v8490_v50 }
 0x163   : > { %1726 = vrot.lane.b32.xlu0 %v8600_v53, %s7302_s11  ;;  %v1385_v21 = vpop.permute.xlu1 %1384 }
 0x164   : > { %v1387_v40 = vpop.permute.xlu2 %1386  ;;  %1463 = vst.msk [vmem:[#allocation2 + $0x170] sm:$0xf] %vm1444_vm8, %v1385_v21  ;;  %v1899_v21 = vmul.f32 %v6649_v22, %v11225_v62  ;;  %v6654_v62 = vunpack.c.h.bf16 %v7124_v57 }
 0x165   : > { %1464 = vst.msk [vmem:[#allocation2 + $0x184] sm:$0xf] %vm1444_vm8, %v1387_v40  ;;  %v1383_v61 = vpop.permute.xlu0 %1382  ;;  %v6646_v40 = vunpack.c.h.bf16 %v7122_v51 }
 0x166   : > { %1462 = vst.msk [vmem:[#allocation2 + $0x15c] sm:$0xf] %vm1444_vm8, %v1383_v61  ;;  %v1931_v22 = vpack.c.bf16 %v1899_v21, %v1899_v21  ;;  %v1902_v21 = vmul.f32 %v6654_v62, %v8651_v14 }
 0x167   : > { %v1898_v34 = vmul.f32 %v6646_v40, %v1834_v28  ;;  %v8660_v28 = vsel %vm8361_vm7, %v5688_v31, %v1621_v0  ;;  %v8672_v0 = vld [vmem:[%s10771_s2 + $0x120] sm:$0xff]   ;;  %11229 = vst [vmem:[#allocation119_spill] sm:$0xff] %v8680_v16 }
 0x168   : > { %1718 = vrot.lane.b32.xlu2 %v8627_v19, %s7302_s11  ;;  %v1934_v62 = vpack.c.bf16 %v1902_v21, %v1902_v21 }
 0x169   : > { %1734 = vrot.lane.b32.xlu1 %v8631_v17, %s7302_s11  ;;  %v1930_v40 = vpack.c.bf16 %v1898_v34, %v1898_v34 }
 0x16b   : > { %1732 = vrot.lane.b32.xlu0 %v8635_v54, %s7302_s11  ;;  %v1391_v42 = vpop.permute.xlu1 %1390 }
 0x16c   : > { %v1393_v18 = vpop.permute.xlu2 %1392  ;;  %1466 = vst.msk [vmem:[#allocation2 + $0x1ac] sm:$0xf] %vm1444_vm8, %v1391_v42  ;;  %v1630_v42 = vrot.slane %v1628_v11, 4 }
 0x16d   : > { %1467 = vst.msk [vmem:[#allocation2 + $0x1c0] sm:$0xf] %vm1444_vm8, %v1393_v18  ;;  %v1389_v61 = vpop.permute.xlu0 %1388  ;;  %v6653_v18 = vunpack.c.l.bf16 %v7124_v57  ;;  %v7125_v57 = vld [vmem:[%s10771_s2 + $0x118] sm:$0xff]  }
 0x16e   : > { %1465 = vst.msk [vmem:[#allocation2 + $0x198] sm:$0xf] %vm1444_vm8, %v1389_v61  ;;  %v6658_v14 = vunpack.c.h.bf16 %v7125_v57 }
 0x16f   : > { %v1901_v61 = vmul.f32 %v6653_v18, %v8655_v15  ;;  %v6661_v18 = vunpack.c.l.bf16 %v8672_v0  ;;  %v8685_v15 = vunpack.c.l.bf16 %v8418_v35 }
 0x170   : > { %1724 = vrot.lane.b32.xlu2 %v8660_v28, %s7302_s11 }
 0x171   : > { %1997 = vrot.lane.b32.xlu1 %v1931_v22, %s7303_s29  ;;  %v1833_v22 = vunpack.c.l.bf16 %v8378_v6  ;;  %11230 = vst [vmem:[#allocation120_spill] sm:$0xff] %v8685_v15  ;;  %v8690_v6 = vsel %vm8361_vm7, %v1630_v42, %v1631_v41 }
 0x173   : > { %1995 = vrot.lane.b32.xlu0 %v1930_v40, %s7303_s29  ;;  %v1397_v34 = vpop.permute.xlu1 %1396  ;;  %v6645_v40 = vunpack.c.l.bf16 %v7122_v51  ;;  %v1905_v51 = vmul.f32 %v6661_v18, %v8680_v16 }
 0x174   : > { %v1399_v31 = vpop.permute.xlu2 %1398  ;;  %1469 = vst.msk [vmem:[#allocation2 + $0x1e8] sm:$0xf] %vm1444_vm8, %v1397_v34  ;;  %v1904_v34 = vmul.f32 %v6658_v14, %v8685_v15  ;;  %v6650_v14 = vunpack.c.h.bf16 %v8613_v63 }
 0x175   : > { %1470 = vst.msk [vmem:[#allocation2 + $0x1fc] sm:$0xf] %vm1444_vm8, %v1399_v31  ;;  %v1395_v11 = vpop.permute.xlu0 %1394  ;;  %v1933_v31 = vpack.c.bf16 %v1901_v61, %v1901_v61  ;;  %v1897_v21 = vmul.f32 %v6645_v40, %v1833_v22  ;;  %v1937_v40 = vpack.c.bf16 %v1905_v51, %v1905_v51  ;;  %v8722_v51 = vld [vmem:[%s10771_s2 + $0x138] sm:$0xff]  }
 0x176   : > { %1468 = vst.msk [vmem:[#allocation2 + $0x1d4] sm:$0xf] %vm1444_vm8, %v1395_v11  ;;  %v7127_v11 = vld [vmem:[%s10771_s2 + $0x128] sm:$0xff]   ;;  %v1936_v15 = vpack.c.bf16 %v1904_v34, %v1904_v34 }
 0x177   : > { %v6666_v18 = vunpack.c.h.bf16 %v7127_v11  ;;  %v6665_v61 = vunpack.c.l.bf16 %v7127_v11 }
 0x178   : > { %1730 = vrot.lane.b32.xlu2 %v8690_v6, %s7302_s11 }
 0x179   : > { %2003 = vrot.lane.b32.xlu1 %v1934_v62, %s7303_s29  ;;  %v1929_v62 = vpack.c.bf16 %v1897_v21, %v1897_v21  ;;  %v1908_v21 = vmul.f32 %v6666_v18, %v8703_v10  ;;  %v6673_v18 = vunpack.c.l.bf16 %v8722_v51 }
 0x17b   : > { %2001 = vrot.lane.b32.xlu0 %v1933_v31, %s7303_s29  ;;  %v1403_v42 = vpop.permute.xlu1 %1402  ;;  %v8709_v31 = vunpack.c.l.bf16 %v8443_v4 }
 0x17c   : > { %v1405_v41 = vpop.permute.xlu2 %1404  ;;  %1472 = vst.msk [vmem:[#allocation2 + $0x224] sm:$0xf] %vm1444_vm8, %v1403_v42  ;;  %v7128_v42 = vld [vmem:[%s10771_s2 + $0x130] sm:$0xff]  }
 0x17d   : > { %1473 = vst.msk [vmem:[#allocation2 + $0x238] sm:$0xf] %vm1444_vm8, %v1405_v41  ;;  %v1401_v22 = vpop.permute.xlu0 %1400  ;;  %v11233_v41 = vunpack.c.l.bf16 %v8404_v12  ;;  %v1907_v63 = vmul.f32 %v6665_v61, %v8709_v31  ;;  %v6670_v10 = vunpack.c.h.bf16 %v7128_v42 }
 0x17e   : > { %11232 = vst [vmem:[#allocation122_spill] sm:$0xff] %v8709_v31 }
 0x17f   : > { %1471 = vst.msk [vmem:[#allocation2 + $0x210] sm:$0xf] %vm1444_vm8, %v1401_v22  ;;  %v1900_v16 = vmul.f32 %v6650_v14, %v11233_v41  ;;  %v8728_v22 = vunpack.c.l.bf16 %v8423_v59  ;;  %v6657_v14 = vunpack.c.l.bf16 %v7125_v57  ;;  %v8737_v41 = vunpack.c.l.bf16 %v8468_v24 }
 0x180   : > { %1993 = vrot.lane.b32.xlu2 %v1929_v62, %s7303_s29  ;;  %v8731_v62 = vunpack.c.l.bf16 %v8540_v3  ;;  %v1939_v31 = vpack.c.bf16 %v1907_v63, %v1907_v63  ;;  %v8750_v63 = vunpack.c.l.bf16 %v8449_v44 }
 0x181   : > { %2009 = vrot.lane.b32.xlu1 %v1937_v40, %s7303_s29  ;;  %11234 = vst [vmem:[#allocation123_spill] sm:$0xff] %v8728_v22  ;;  %v1932_v61 = vpack.c.bf16 %v1900_v16, %v1900_v16  ;;  %v1940_v40 = vpack.c.bf16 %v1908_v21, %v1908_v21  ;;  %v1910_v57 = vmul.f32 %v6670_v10, %v8737_v41  ;;  %v7130_v16 = vld [vmem:[%s10771_s2 + $0x140] sm:$0xff]   ;;  %v6662_v10 = vunpack.c.h.bf16 %v8672_v0 }
 0x182   : > { %11235 = vst [vmem:[#allocation124_spill] sm:$0xff] %v8731_v62 }
 0x183   : > { %2007 = vrot.lane.b32.xlu0 %v1936_v15, %s7303_s29  ;;  %v1409_v11 = vpop.permute.xlu1 %1408  ;;  %11236 = vst [vmem:[#allocation125_spill] sm:$0xff] %v8737_v41  ;;  %v8759_v41 = vunpack.c.l.bf16 %v8494_v38 }
 0x184   : > { %v1411_v34 = vpop.permute.xlu2 %1410  ;;  %1475 = vst.msk [vmem:[#allocation2 + $0x260] sm:$0xf] %vm1444_vm8, %v1409_v11  ;;  %v1911_v11 = vmul.f32 %v6673_v18, %v8731_v62  ;;  %v6678_v18 = vunpack.c.h.bf16 %v7130_v16  ;;  %v1942_v62 = vpack.c.bf16 %v1910_v57, %v1910_v57 }
 0x185   : > { %1476 = vst.msk [vmem:[#allocation2 + $0x274] sm:$0xf] %vm1444_vm8, %v1411_v34  ;;  %v1407_v15 = vpop.permute.xlu0 %1406  ;;  %v1903_v34 = vmul.f32 %v6657_v14, %v8728_v22  ;;  %v6677_v22 = vunpack.c.l.bf16 %v7130_v16  ;;  %v7131_v16 = vld [vmem:[%s10771_s2 + $0x148] sm:$0xff]  }
 0x186   : > { %1474 = vst.msk [vmem:[#allocation2 + $0x24c] sm:$0xf] %vm1444_vm8, %v1407_v15  ;;  %v1943_v14 = vpack.c.bf16 %v1911_v11, %v1911_v11 }
 0x187   : > { %11237 = vst [vmem:[#allocation126_spill] sm:$0xff] %v8750_v63  ;;  %v1913_v0 = vmul.f32 %v6677_v22, %v8759_v41 }
 0x188   : > { %1999 = vrot.lane.b32.xlu2 %v1932_v61, %s7303_s29  ;;  %v8753_v61 = vunpack.c.l.bf16 %v8565_v58  ;;  %11239 = vst [vmem:[#allocation128_spill] sm:$0xff] %v8759_v41  ;;  %v8786_v41 = vunpack.c.l.bf16 %v8519_v52 }
 0x189   : > { %2015 = vrot.lane.b32.xlu1 %v1940_v40, %s7303_s29 }
 0x18a   : > { %11238 = vst [vmem:[#allocation127_spill] sm:$0xff] %v8753_v61 }
 0x18b   : > { %2013 = vrot.lane.b32.xlu0 %v1939_v31, %s7303_s29  ;;  %v1675_v15 = vpop.permute.xlu1 %1674  ;;  %v1935_v31 = vpack.c.bf16 %v1903_v34, %v1903_v34  ;;  %v8771_v34 = vld [vmem:[%s10771_s2 + $0x150] sm:$0xff]   ;;  %11242 = vst [vmem:[#allocation131_spill] sm:$0xff] %v8786_v41 }
 0x18c   : > { %v1677_v21 = vpop.permute.xlu2 %1676  ;;  %1769 = vst.msk [vmem:[#allocation2 + $0x14] sm:$0xf] %vm1444_vm8, %v1675_v15  ;;  %v1914_v15 = vmul.f32 %v6678_v18, %v8753_v61  ;;  %v6685_v18 = vunpack.c.l.bf16 %v8771_v34  ;;  %v1945_v61 = vpack.c.bf16 %v1913_v0, %v1913_v0  ;;  %v8799_v0 = vunpack.c.l.bf16 %v8499_v2 }
 0x18d   : > { %1770 = vst.msk [vmem:[#allocation2 + $0x28] sm:$0xf] %vm1444_vm8, %v1677_v21  ;;  %v1673_v40 = vpop.permute.xlu0 %1672  ;;  %v1906_v21 = vmul.f32 %v6662_v10, %v8750_v63  ;;  %v6669_v10 = vunpack.c.l.bf16 %v7128_v42  ;;  %v6682_v63 = vunpack.c.h.bf16 %v7131_v16 }
 0x18e   : > { %1768 = vst.msk [vmem:[#allocation2] sm:$0xf] %vm1444_vm8, %v1673_v40  ;;  %v8777_v40 = vunpack.c.l.bf16 %v8472_v45 }
 0x18f   : > { %v1916_v42 = vmul.f32 %v6682_v63, %v8786_v41  ;;  %11243 = vst [vmem:[#allocation132_spill] sm:$0xff] %v8799_v0  ;;  %v6674_v63 = vunpack.c.h.bf16 %v8722_v51 }
 0x190   : > { %2005 = vrot.lane.b32.xlu2 %v1935_v31, %s7303_s29  ;;  %11240 = vst [vmem:[#allocation129_spill] sm:$0xff] %v8777_v40  ;;  %v8780_v31 = vunpack.c.l.bf16 %v8591_v46 }
 0x191   : > { %2021 = vrot.lane.b32.xlu1 %v1943_v14, %s7303_s29  ;;  %v1946_v14 = vpack.c.bf16 %v1914_v15, %v1914_v15  ;;  %v1948_v41 = vpack.c.bf16 %v1916_v42, %v1916_v42 }
 0x192   : > { %11241 = vst [vmem:[#allocation130_spill] sm:$0xff] %v8780_v31 }
 0x193   : > { %2019 = vrot.lane.b32.xlu0 %v1942_v62, %s7303_s29  ;;  %v1681_v57 = vpop.permute.xlu1 %1680  ;;  %v1938_v62 = vpack.c.bf16 %v1906_v21, %v1906_v21  ;;  %v7133_v21 = vld [vmem:[%s10771_s2 + $0x158] sm:$0xff]  }
 0x194   : > { %v1683_v11 = vpop.permute.xlu2 %1682  ;;  %1772 = vst.msk [vmem:[#allocation2 + $0x50] sm:$0xf] %vm1444_vm8, %v1681_v57  ;;  %v1917_v57 = vmul.f32 %v6685_v18, %v8780_v31  ;;  %v6690_v18 = vunpack.c.h.bf16 %v7133_v21  ;;  %v8808_v31 = vunpack.c.l.bf16 %v8544_v49 }
 0x195   : > { %1773 = vst.msk [vmem:[#allocation2 + $0x64] sm:$0xf] %vm1444_vm8, %v1683_v11  ;;  %v1679_v22 = vpop.permute.xlu0 %1678  ;;  %v1909_v11 = vmul.f32 %v6669_v10, %v8777_v40  ;;  %v6689_v40 = vunpack.c.l.bf16 %v7133_v21  ;;  %v7134_v21 = vld [vmem:[%s10771_s2 + $0x160] sm:$0xff]  }
 0x196   : > { %1771 = vst.msk [vmem:[#allocation2 + $0x3c] sm:$0xf] %vm1444_vm8, %v1679_v22  ;;  %v1949_v10 = vpack.c.bf16 %v1917_v57, %v1917_v57 }
 0x197   : > { %11245 = vst [vmem:[#allocation134_spill] sm:$0xff] %v8808_v31  ;;  %v1919_v51 = vmul.f32 %v6689_v40, %v8808_v31  ;;  %v8835_v31 = vunpack.c.l.bf16 %v8569_v1 }
 0x198   : > { %2011 = vrot.lane.b32.xlu2 %v1938_v62, %s7303_s29  ;;  %v8802_v62 = vunpack.c.l.bf16 %v8627_v19 }
 0x199   : > { %2027 = vrot.lane.b32.xlu1 %v1946_v14, %s7303_s29  ;;  %11248 = vst [vmem:[#allocation137_spill] sm:$0xff] %v8835_v31 }
 0x19a   : > { %11244 = vst [vmem:[#allocation133_spill] sm:$0xff] %v8802_v62 }
 0x19b   : > { %2025 = vrot.lane.b32.xlu0 %v1945_v61, %s7303_s29  ;;  %v1687_v22 = vpop.permute.xlu1 %1686  ;;  %v1941_v61 = vpack.c.bf16 %v1909_v11, %v1909_v11  ;;  %v8820_v11 = vld [vmem:[%s10771_s2 + $0x168] sm:$0xff]  }
 0x19c   : > { %v1689_v15 = vpop.permute.xlu2 %1688  ;;  %1775 = vst.msk [vmem:[#allocation2 + $0x8c] sm:$0xf] %vm1444_vm8, %v1687_v22  ;;  %v1920_v22 = vmul.f32 %v6690_v18, %v8802_v62  ;;  %v6697_v18 = vunpack.c.l.bf16 %v8820_v11  ;;  %v1951_v62 = vpack.c.bf16 %v1919_v51, %v1919_v51  ;;  %v8848_v51 = vunpack.c.l.bf16 %v8549_v27 }
 0x19d   : > { %1776 = vst.msk [vmem:[#allocation2 + $0xa0] sm:$0xf] %vm1444_vm8, %v1689_v15  ;;  %v1685_v14 = vpop.permute.xlu0 %1684  ;;  %v1912_v15 = vmul.f32 %v6674_v63, %v8799_v0  ;;  %v6681_v63 = vunpack.c.l.bf16 %v7131_v16  ;;  %v6694_v0 = vunpack.c.h.bf16 %v7134_v21 }
 0x19e   : > { %1774 = vst.msk [vmem:[#allocation2 + $0x78] sm:$0xf] %vm1444_vm8, %v1685_v14  ;;  %v8826_v14 = vunpack.c.l.bf16 %v8523_v23 }
 0x19f   : > { %v1944_v40 = vpack.c.bf16 %v1912_v15, %v1912_v15  ;;  %v1922_v16 = vmul.f32 %v6694_v0, %v8835_v31  ;;  %v7136_v15 = vld [vmem:[%s10771_s2 + $0x170] sm:$0xff]   ;;  %11249 = vst [vmem:[#allocation138_spill] sm:$0xff] %v8848_v51  ;;  %v6686_v0 = vunpack.c.h.bf16 %v8771_v34 }
 0x1a0   : > { %2017 = vrot.lane.b32.xlu2 %v1941_v61, %s7303_s29  ;;  %11246 = vst [vmem:[#allocation135_spill] sm:$0xff] %v8826_v14  ;;  %v8829_v61 = vunpack.c.l.bf16 %v8660_v28 }
 0x1a1   : > { %2033 = vrot.lane.b32.xlu1 %v1949_v10, %s7303_s29  ;;  %v1952_v10 = vpack.c.bf16 %v1920_v22, %v1920_v22  ;;  %v1954_v31 = vpack.c.bf16 %v1922_v16, %v1922_v16 }
 0x1a2   : > { %11247 = vst [vmem:[#allocation136_spill] sm:$0xff] %v8829_v61 }
 0x1a3   : > { %2031 = vrot.lane.b32.xlu0 %v1948_v41, %s7303_s29  ;;  %v1693_v42 = vpop.permute.xlu1 %1692 }
 0x1a4   : > { %v1695_v57 = vpop.permute.xlu2 %1694  ;;  %1778 = vst.msk [vmem:[#allocation2 + $0xc8] sm:$0xf] %vm1444_vm8, %v1693_v42  ;;  %v1923_v42 = vmul.f32 %v6697_v18, %v8829_v61  ;;  %v6702_v18 = vunpack.c.h.bf16 %v7136_v15  ;;  %v8857_v61 = vunpack.c.l.bf16 %v8595_v43 }
 0x1a5   : > { %1779 = vst.msk [vmem:[#allocation2 + $0xdc] sm:$0xf] %vm1444_vm8, %v1695_v57  ;;  %v1691_v41 = vpop.permute.xlu0 %1690  ;;  %v1915_v57 = vmul.f32 %v6681_v63, %v8826_v14  ;;  %v6701_v14 = vunpack.c.l.bf16 %v7136_v15  ;;  %v8871_v15 = vunpack.c.l.bf16 %v8573_v60 }
 0x1a6   : > { %1777 = vst.msk [vmem:[#allocation2 + $0xb4] sm:$0xf] %vm1444_vm8, %v1691_v41  ;;  %v1955_v63 = vpack.c.bf16 %v1923_v42, %v1923_v42 }
 0x1a7   : > { %11251 = vst [vmem:[#allocation140_spill] sm:$0xff] %v8857_v61  ;;  %v1925_v34 = vmul.f32 %v6701_v14, %v8857_v61  ;;  %v8885_v61 = vunpack.c.l.bf16 %v8600_v53 }
 0x1a8   : > { %2023 = vrot.lane.b32.xlu2 %v1944_v40, %s7303_s29  ;;  %v8851_v40 = vunpack.c.l.bf16 %v8690_v6  ;;  %11252 = vst [vmem:[#allocation141_spill] sm:$0xff] %v8871_v15 }
 0x1a9   : > { %2039 = vrot.lane.b32.xlu1 %v1952_v10, %s7303_s29  ;;  %v1957_v14 = vpack.c.bf16 %v1925_v34, %v1925_v34  ;;  %11254 = vst [vmem:[#allocation143_spill] sm:$0xff] %v8885_v61 }
 0x1aa   : > { %11250 = vst [vmem:[#allocation139_spill] sm:$0xff] %v8851_v40 }
 0x1ab   : > { %2037 = vrot.lane.b32.xlu0 %v1951_v62, %s7303_s29  ;;  %v1699_v41 = vpop.permute.xlu1 %1698  ;;  %v1947_v62 = vpack.c.bf16 %v1915_v57, %v1915_v57 }
 0x1ac   : > { %v1701_v22 = vpop.permute.xlu2 %1700  ;;  %1781 = vst.msk [vmem:[#allocation2 + $0x104] sm:$0xf] %vm1444_vm8, %v1699_v41  ;;  %v1926_v41 = vmul.f32 %v6702_v18, %v8851_v40 }
 0x1ad   : > { %1782 = vst.msk [vmem:[#allocation2 + $0x118] sm:$0xf] %vm1444_vm8, %v1701_v22  ;;  %v1697_v10 = vpop.permute.xlu0 %1696  ;;  %v1918_v22 = vmul.f32 %v6686_v0, %v8848_v51  ;;  %v6693_v0 = vunpack.c.l.bf16 %v7134_v21 }
 0x1ae   : > { %1780 = vst.msk [vmem:[#allocation2 + $0xf0] sm:$0xf] %vm1444_vm8, %v1697_v10  ;;  %v7137_v10 = vld [vmem:[%s10771_s2 + $0x178] sm:$0xff]  }
 0x1af   : > { %v6706_v18 = vunpack.c.h.bf16 %v7137_v10 }
 0x1b0   : > { %2029 = vrot.lane.b32.xlu2 %v1947_v62, %s7303_s29  ;;  %v1950_v62 = vpack.c.bf16 %v1918_v22, %v1918_v22 }
 0x1b1   : > { %2045 = vrot.lane.b32.xlu1 %v1955_v63, %s7303_s29  ;;  %v1958_v63 = vpack.c.bf16 %v1926_v41, %v1926_v41 }
 0x1b3   : > { %2043 = vrot.lane.b32.xlu0 %v1954_v31, %s7303_s29  ;;  %v1705_v42 = vpop.permute.xlu1 %1704  ;;  %v8875_v31 = vunpack.c.l.bf16 %v8631_v17 }
 0x1b4   : > { %v1707_v57 = vpop.permute.xlu2 %1706  ;;  %1784 = vst.msk [vmem:[#allocation2 + $0x140] sm:$0xf] %vm1444_vm8, %v1705_v42 }
 0x1b5   : > { %1785 = vst.msk [vmem:[#allocation2 + $0x154] sm:$0xf] %vm1444_vm8, %v1707_v57  ;;  %v1703_v16 = vpop.permute.xlu0 %1702  ;;  %v1921_v57 = vmul.f32 %v6693_v0, %v8871_v15  ;;  %v1928_v42 = vmul.f32 %v6706_v18, %v8875_v31  ;;  %v11269_v15 = vld [vmem:[#allocation57_spill] sm:$0xff] }
 0x1b6   : > { %11253 = vst [vmem:[#allocation142_spill] sm:$0xff] %v8875_v31 }
 0x1b7   : > { %1783 = vst.msk [vmem:[#allocation2 + $0x12c] sm:$0xf] %vm1444_vm8, %v1703_v16  ;;  %v1953_v34 = vpack.c.bf16 %v1921_v57, %v1921_v57  ;;  %v6698_v16 = vunpack.c.h.bf16 %v8820_v11  ;;  %v8897_v57 = vunpack.c.l.bf16 %v8635_v54 }
 0x1b8   : > { %2035 = vrot.lane.b32.xlu2 %v1950_v62, %s7303_s29  ;;  %v1960_v62 = vpack.c.bf16 %v1928_v42, %v1928_v42  ;;  %v6705_v42 = vunpack.c.l.bf16 %v7137_v10 }
 0x1b9   : > { %2051 = vrot.lane.b32.xlu1 %v1958_v63, %s7303_s29  ;;  %v1924_v63 = vmul.f32 %v6698_v16, %v8885_v61  ;;  %11255 = vst [vmem:[#allocation144_spill] sm:$0xff] %v8897_v57 }
 0x1bb   : > { %2049 = vrot.lane.b32.xlu0 %v1957_v14, %s7303_s29  ;;  %v1711_v41 = vpop.permute.xlu1 %1710  ;;  %v1956_v11 = vpack.c.bf16 %v1924_v63, %v1924_v63 }
 0x1bc   : > { %v1713_v22 = vpop.permute.xlu2 %1712  ;;  %1787 = vst.msk [vmem:[#allocation2 + $0x17c] sm:$0xf] %vm1444_vm8, %v1711_v41 }
 0x1bd   : > { %1788 = vst.msk [vmem:[#allocation2 + $0x190] sm:$0xf] %vm1444_vm8, %v1713_v22  ;;  %v1709_v21 = vpop.permute.xlu0 %1708  ;;  %v1927_v22 = vmul.f32 %v6705_v42, %v8897_v57  ;;  %v6483_v57 = vld [vmem:[%s10770_s1 + $0x20] sm:$0xff] }
 0x1be   : > { %1786 = vst.msk [vmem:[#allocation2 + $0x168] sm:$0xf] %vm1444_vm8, %v1709_v21 }
 0x1bf   : > { %v1959_v10 = vpack.c.bf16 %v1927_v22, %v1927_v22 }
 0x1c0   : > { %2041 = vrot.lane.b32.xlu2 %v1953_v34, %s7303_s29 }
 0x1c1   : > { %2124 = vrot.lane.b32.xlu1 %v7356_v5, %s7303_s29 }
 0x1c3   : > { %2055 = vrot.lane.b32.xlu0 %v1960_v62, %s7303_s29  ;;  %v1717_v14 = vpop.permute.xlu1 %1716 }
 0x1c4   : > { %v1719_v0 = vpop.permute.xlu2 %1718  ;;  %1790 = vst.msk [vmem:[#allocation2 + $0x1b8] sm:$0xf] %vm1444_vm8, %v1717_v14 }
 0x1c5   : > { %1791 = vst.msk [vmem:[#allocation2 + $0x1cc] sm:$0xf] %vm1444_vm8, %v1719_v0  ;;  %v1715_v18 = vpop.permute.xlu0 %1714 }
 0x1c6   : > { %1789 = vst.msk [vmem:[#allocation2 + $0x1a4] sm:$0xf] %vm1444_vm8, %v1715_v18 }
 0x1c8   : > { %2047 = vrot.lane.b32.xlu2 %v1956_v11, %s7303_s29 }
 0x1c9   : > { %2130 = vrot.lane.b32.xlu1 %v7380_v20, %s7303_s29 }
 0x1cb   : > { %2128 = vrot.lane.b32.xlu0 %v7370_v13, %s7303_s29  ;;  %v1723_v21 = vpop.permute.xlu1 %1722 }
 0x1cc   : > { %v1725_v41 = vpop.permute.xlu2 %1724  ;;  %1793 = vst.msk [vmem:[#allocation2 + $0x1f4] sm:$0xf] %vm1444_vm8, %v1723_v21 }
 0x1cd   : > { %1794 = vst.msk [vmem:[#allocation2 + $0x208] sm:$0xf] %vm1444_vm8, %v1725_v41  ;;  %v1721_v34 = vpop.permute.xlu0 %1720 }
 0x1ce   : > { %1792 = vst.msk [vmem:[#allocation2 + $0x1e0] sm:$0xf] %vm1444_vm8, %v1721_v34 }
 0x1d0   : > { %2053 = vrot.lane.b32.xlu2 %v1959_v10, %s7303_s29  ;;  %v11256_v10 = vld [vmem:[#allocation27_spill] sm:$0xff] }
 0x1d1   : > { %2136 = vrot.lane.b32.xlu1 %v7408_v39, %s7303_s29 }
 0x1d3   : > { %2134 = vrot.lane.b32.xlu0 %v7394_v29, %s7303_s29  ;;  %v1729_v62 = vpop.permute.xlu1 %1728 }
 0x1d4   : > { %v1731_v16 = vpop.permute.xlu2 %1730  ;;  %1796 = vst.msk [vmem:[#allocation2 + $0x230] sm:$0xf] %vm1444_vm8, %v1729_v62 }
 0x1d5   : > { %1797 = vst.msk [vmem:[#allocation2 + $0x244] sm:$0xf] %vm1444_vm8, %v1731_v16  ;;  %v1727_v63 = vpop.permute.xlu0 %1726 }
 0x1d6   : > { %1795 = vst.msk [vmem:[#allocation2 + $0x21c] sm:$0xf] %vm1444_vm8, %v1727_v63 }
 0x1d8   : > { %2126 = vrot.lane.b32.xlu2 %v7362_v7, %s7303_s29 }
 0x1d9   : > { %2142 = vrot.lane.b32.xlu1 %v7438_v56, %s7303_s29 }
 0x1db   : > { %2140 = vrot.lane.b32.xlu0 %v7424_v47, %s7303_s29  ;;  %v1735_v14 = vpop.permute.xlu1 %1734 }
 0x1dc   : > { %v1994_v0 = vpop.permute.xlu2 %1993  ;;  %1799 = vst.msk [vmem:[#allocation2 + $0x26c] sm:$0xf] %vm1444_vm8, %v1735_v14  ;;  %v11258_v14 = vld [vmem:[#allocation38_spill] sm:$0xff] }
 0x1dd   : > { %2090 = vst.msk [vmem:[#allocation2 + $0x8] sm:$0xf] %vm2089_vm9, %v1994_v0  ;;  %v1733_v18 = vpop.permute.xlu0 %1732  ;;  %v11257_v0 = vld [vmem:[#allocation23_spill] sm:$0xff] }
 0x1de   : > { %3941 = vst.msk [vmem:[#allocation2 + $0x8] sm:$0xf] %vm254_vm4, %v8398_v9 }
 0x1df   : > { %1798 = vst.msk [vmem:[#allocation2 + $0x258] sm:$0xf] %vm1444_vm8, %v1733_v18  ;;  %v11259_v18 = vld [vmem:[#allocation34_spill] sm:$0xff] }
 0x1e0   : > { %2132 = vrot.lane.b32.xlu2 %v7397_v30, %s7303_s29 }
 0x1e1   : > { %2148 = vrot.lane.b32.xlu1 %v11213_v55, %s7303_s29  ;;  %v11281_v55 = vld [vmem:[#allocation93_spill] sm:$0xff] }
 0x1e3   : > { %2146 = vrot.lane.b32.xlu0 %v11166_v8, %s7303_s29  ;;  %v1998_v42 = vpop.permute.xlu1 %1997 }
 0x1e4   : > { %v2000_v11 = vpop.permute.xlu2 %1999  ;;  %2092 = vst.msk [vmem:[#allocation2 + $0x30] sm:$0xf] %vm2089_vm9, %v1998_v42 }
 0x1e5   : > { %2093 = vst.msk [vmem:[#allocation2 + $0x44] sm:$0xf] %vm2089_vm9, %v2000_v11  ;;  %v1996_v22 = vpop.permute.xlu0 %1995 }
 0x1e6   : > { %3944 = vst.msk [vmem:[#allocation2 + $0x44] sm:$0xf] %vm254_vm4, %v8418_v35 }
 0x1e7   : > { %3943 = vst.msk [vmem:[#allocation2 + $0x30] sm:$0xf] %vm254_vm4, %v8423_v59 }
 0x1e8   : > { %2091 = vst.msk [vmem:[#allocation2 + $0x1c] sm:$0xf] %vm2089_vm9, %v1996_v22  ;;  %2138 = vrot.lane.b32.xlu2 %v7427_v48, %s7303_s29 }
 0x1e9   : > { %3942 = vst.msk [vmem:[#allocation2 + $0x1c] sm:$0xf] %vm254_vm4, %v8464_v37  ;;  %2154 = vrot.lane.b32.xlu1 %v11170_v36, %s7303_s29 }
 0x1eb   : > { %2152 = vrot.lane.b32.xlu0 %v11169_v33, %s7303_s29  ;;  %v2004_v21 = vpop.permute.xlu1 %2003 }
 0x1ec   : > { %v2006_v41 = vpop.permute.xlu2 %2005  ;;  %2095 = vst.msk [vmem:[#allocation2 + $0x6c] sm:$0xf] %vm2089_vm9, %v2004_v21  ;;  %v11261_v21 = vld [vmem:[#allocation44_spill] sm:$0xff] }
 0x1ed   : > { %2096 = vst.msk [vmem:[#allocation2 + $0x80] sm:$0xf] %vm2089_vm9, %v2006_v41  ;;  %v2002_v34 = vpop.permute.xlu0 %2001  ;;  %v11260_v41 = vld [vmem:[#allocation29_spill] sm:$0xff] }
 0x1ee   : > { %3947 = vst.msk [vmem:[#allocation2 + $0x80] sm:$0xf] %vm254_vm4, %v8443_v4 }
 0x1ef   : > { %3946 = vst.msk [vmem:[#allocation2 + $0x6c] sm:$0xf] %vm254_vm4, %v8449_v44 }
 0x1f0   : > { %2094 = vst.msk [vmem:[#allocation2 + $0x58] sm:$0xf] %vm2089_vm9, %v2002_v34  ;;  %2144 = vrot.lane.b32.xlu2 %v11165_v32, %s7303_s29  ;;  %v6486_v34 = vld [vmem:[%s10770_s1 + $0x38] sm:$0xff]  ;;  %v11285_v32 = vld [vmem:[#allocation97_spill] sm:$0xff] }
 0x1f1   : > { %3945 = vst.msk [vmem:[#allocation2 + $0x58] sm:$0xf] %vm254_vm4, %v8490_v50  ;;  %2160 = vrot.lane.b32.xlu1 %v11219_v25, %s7303_s29  ;;  %5101 = vmatpush.bf16.msra.mxu0 %v6486_v34  ;;  %v6479_v25 = vld [vmem:[%s10770_s1] sm:$0xff] }
 0x1f2   : > { %7234 = vmatpush.bf16.msra.mxu1 %v6486_v34  ;;  %7235 = vmatpush.bf16.msra.mxu2 %v6486_v34 }
 0x1f3   : > { %2158 = vrot.lane.b32.xlu0 %v11256_v10, %s7303_s29  ;;  %v2010_v62 = vpop.permute.xlu1 %2009  ;;  %7236 = vmatpush.bf16.msra.mxu3 %v6486_v34  ;;  %v11264_v34 = vld [vmem:[#allocation50_spill] sm:$0xff] }
 0x1f4   : > { %v2012_v16 = vpop.permute.xlu2 %2011  ;;  %2098 = vst.msk [vmem:[#allocation2 + $0xa8] sm:$0xf] %vm2089_vm9, %v2010_v62 }
 0x1f5   : > { %2099 = vst.msk [vmem:[#allocation2 + $0xbc] sm:$0xf] %vm2089_vm9, %v2012_v16  ;;  %v2008_v63 = vpop.permute.xlu0 %2007  ;;  %v11262_v16 = vld [vmem:[#allocation39_spill] sm:$0xff] }
 0x1f6   : > { %3950 = vst.msk [vmem:[#allocation2 + $0xbc] sm:$0xf] %vm254_vm4, %v8468_v24 }
 0x1f7   : > { %3949 = vst.msk [vmem:[#allocation2 + $0xa8] sm:$0xf] %vm254_vm4, %v8472_v45 }
 0x1f8   : > { %2097 = vst.msk [vmem:[#allocation2 + $0x94] sm:$0xf] %vm2089_vm9, %v2008_v63  ;;  %2150 = vrot.lane.b32.xlu2 %v11257_v0, %s7303_s29 }
 0x1f9   : > { %3948 = vst.msk [vmem:[#allocation2 + $0x94] sm:$0xf] %vm254_vm4, %v8515_v26  ;;  %2166 = vrot.lane.b32.xlu1 %v11258_v14, %s7303_s29  ;;  %v11271_v14 = vld [vmem:[#allocation51_spill] sm:$0xff] }
 0x1fb   : > { %2164 = vrot.lane.b32.xlu0 %v11259_v18, %s7303_s29  ;;  %v2016_v42 = vpop.permute.xlu1 %2015 }
 0x1fc   : > { %v2018_v11 = vpop.permute.xlu2 %2017  ;;  %2101 = vst.msk [vmem:[#allocation2 + $0xe4] sm:$0xf] %vm2089_vm9, %v2016_v42 }
 0x1fd   : > { %2102 = vst.msk [vmem:[#allocation2 + $0xf8] sm:$0xf] %vm2089_vm9, %v2018_v11  ;;  %v2014_v22 = vpop.permute.xlu0 %2013  ;;  %v6485_v11 = vld [vmem:[%s10770_s1 + $0x30] sm:$0xff] }
 0x1fe   : > { %3953 = vst.msk [vmem:[#allocation2 + $0xf8] sm:$0xf] %vm254_vm4, %v8494_v38  ;;  %5102 = vmatpush.bf16.msra.mxu0 %v6485_v11  ;;  %7237 = vmatpush.bf16.msra.mxu1 %v6485_v11 }
 0x1ff   : > { %3952 = vst.msk [vmem:[#allocation2 + $0xe4] sm:$0xf] %vm254_vm4, %v8499_v2  ;;  %7238 = vmatpush.bf16.msra.mxu2 %v6485_v11  ;;  %7239 = vmatpush.bf16.msra.mxu3 %v6485_v11  ;;  %v11265_v11 = vld [vmem:[#allocation46_spill] sm:$0xff] }
 0x200   : > { %2100 = vst.msk [vmem:[#allocation2 + $0xd0] sm:$0xf] %vm2089_vm9, %v2014_v22  ;;  %2156 = vrot.lane.b32.xlu2 %v11260_v41, %s7303_s29  ;;  %v11263_v22 = vld [vmem:[#allocation35_spill] sm:$0xff] }
 0x201   : > { %3951 = vst.msk [vmem:[#allocation2 + $0xd0] sm:$0xf] %vm254_vm4, %v8540_v3  ;;  %2172 = vrot.lane.b32.xlu1 %v11261_v21, %s7303_s29  ;;  %v9121_v41 = vld [vmem:[%s7350_s25 + $0xc4] sm:$0xf] }
 0x203   : > { %2170 = vrot.lane.b32.xlu0 %v11262_v16, %s7303_s29  ;;  %v2022_v63 = vpop.permute.xlu1 %2021  ;;  %v11270_v16 = vunpack.c.l.bf16 %v11269_v15 }
 0x204   : > { %v2024_v62 = vpop.permute.xlu2 %2023  ;;  %2104 = vst.msk [vmem:[#allocation2 + $0x120] sm:$0xf] %vm2089_vm9, %v2022_v63  ;;  %v7154_v63 = vld [vmem:[%s10771_s2 + $0x200] sm:$0xff]  }
 0x205   : > { %2105 = vst.msk [vmem:[#allocation2 + $0x134] sm:$0xf] %vm2089_vm9, %v2024_v62  ;;  %v2020_v42 = vpop.permute.xlu0 %2019  ;;  %v6484_v62 = vld [vmem:[%s10770_s1 + $0x28] sm:$0xff]  ;;  %v6773_v61 = vunpack.c.l.bf16 %v7154_v63 }
 0x206   : > { %3956 = vst.msk [vmem:[#allocation2 + $0x134] sm:$0xf] %vm254_vm4, %v8519_v52  ;;  %5103 = vmatpush.bf16.msra.mxu0 %v6484_v62  ;;  %7240 = vmatpush.bf16.msra.mxu1 %v6484_v62 }
 0x207   : > { %3955 = vst.msk [vmem:[#allocation2 + $0x120] sm:$0xf] %vm254_vm4, %v8523_v23  ;;  %7241 = vmatpush.bf16.msra.mxu2 %v6484_v62  ;;  %7242 = vmatpush.bf16.msra.mxu3 %v6484_v62  ;;  %v11266_v62 = vld [vmem:[#allocation58_spill] sm:$0xff]  ;;  %v2540_v18 = vmul.f32 %v6773_v61, %v11270_v16  ;;  %v6481_v61 = vld [vmem:[%s10770_s1 + $0x10] sm:$0xff] }
 0x208   : > { %2103 = vst.msk [vmem:[#allocation2 + $0x10c] sm:$0xf] %vm2089_vm9, %v2020_v42  ;;  %2162 = vrot.lane.b32.xlu2 %v11263_v22, %s7303_s29  ;;  %v11267_v21 = vunpack.c.l.bf16 %v11266_v62 }
 0x209   : > { %3954 = vst.msk [vmem:[#allocation2 + $0x10c] sm:$0xf] %vm254_vm4, %v8565_v58  ;;  %2178 = vrot.lane.b32.xlu1 %v11264_v34, %s7303_s29  ;;  %v6774_v34 = vunpack.c.h.bf16 %v7154_v63 }
 0x20a   : > { %5104 = vmatpush.bf16.msra.mxu0 %v6483_v57  ;;  %7243 = vmatpush.bf16.msra.mxu1 %v6483_v57  ;;  %11278 = vst [vmem:[#allocation58_spill] sm:$0xff] %v9121_v41 }
 0x20b   : > { %2176 = vrot.lane.b32.xlu0 %v11265_v11, %s7303_s29  ;;  %v2028_v31 = vpop.permute.xlu1 %2027  ;;  %v9030_v11 = vld [vmem:[%s7350_s25 + $0xc0] sm:$0xf]  ;;  %7244 = vmatpush.bf16.msra.mxu2 %v6483_v57  ;;  %v2541_v63 = vmul.f32 %v6774_v34, %v11267_v21  ;;  %v9058_v34 = vld [vmem:[%s10771_s2 + $0x208] sm:$0xff]  }
 0x20c   : > { %v2030_v42 = vpop.permute.xlu2 %2029  ;;  %2107 = vst.msk [vmem:[#allocation2 + $0x15c] sm:$0xf] %vm2089_vm9, %v2028_v31  ;;  %7245 = vmatpush.bf16.msra.mxu3 %v6483_v57  ;;  %v11268_v31 = vld [vmem:[#allocation41_spill] sm:$0xff] }
 0x20d   : > { %2108 = vst.msk [vmem:[#allocation2 + $0x170] sm:$0xf] %vm2089_vm9, %v2030_v42  ;;  %v2026_v40 = vpop.permute.xlu0 %2025  ;;  %v6482_v42 = vld [vmem:[%s10770_s1 + $0x18] sm:$0xff]  ;;  %v2573_v16 = vpack.c.bf16 %v2541_v63, %v2541_v63 }
 0x20e   : > { %3959 = vst.msk [vmem:[#allocation2 + $0x170] sm:$0xf] %vm254_vm4, %v8544_v49  ;;  %5105 = vmatpush.bf16.msra.mxu0 %v6482_v42  ;;  %7246 = vmatpush.bf16.msra.mxu1 %v6482_v42 }
 0x20f   : > { %3958 = vst.msk [vmem:[#allocation2 + $0x15c] sm:$0xf] %vm254_vm4, %v8549_v27  ;;  %7247 = vmatpush.bf16.msra.mxu2 %v6482_v42 }
 0x210   : > { %2106 = vst.msk [vmem:[#allocation2 + $0x148] sm:$0xf] %vm2089_vm9, %v2026_v40  ;;  %2168 = vrot.lane.b32.xlu2 %v11268_v31, %s7303_s29  ;;  %v9053_v40 = vld [vmem:[%s10771_s2 + $0x210] sm:$0xff]   ;;  %7248 = vmatpush.bf16.msra.mxu3 %v6482_v42  ;;  %v6778_v31 = vunpack.c.h.bf16 %v9058_v34 }
 0x211   : > { %3957 = vst.msk [vmem:[#allocation2 + $0x148] sm:$0xf] %vm254_vm4, %v8591_v46  ;;  %2184 = vrot.lane.b32.xlu1 %v9030_v11, %s7303_s29  ;;  %v6781_v62 = vunpack.c.l.bf16 %v9053_v40  ;;  %v11273_v42 = vld [vmem:[#allocation89_spill] sm:$0xff] }
 0x212   : > { %5106 = vmatpush.bf16.msra.mxu0 %v6481_v61  ;;  %7249 = vmatpush.bf16.msra.mxu1 %v6481_v61 }
 0x213   : > { %2182 = vrot.lane.b32.xlu0 %v11271_v14, %s7303_s29  ;;  %v2034_v21 = vpop.permute.xlu1 %2033  ;;  %v2572_v14 = vpack.c.bf16 %v2540_v18, %v2540_v18  ;;  %7250 = vmatpush.bf16.msra.mxu2 %v6481_v61  ;;  %v11272_v18 = vld [vmem:[#allocation47_spill] sm:$0xff]  ;;  %v2544_v63 = vmul.f32 %v6781_v62, %v11273_v42 }
 0x214   : > { %v2036_v57 = vpop.permute.xlu2 %2035  ;;  %2110 = vst.msk [vmem:[#allocation2 + $0x198] sm:$0xf] %vm2089_vm9, %v2034_v21  ;;  %7251 = vmatpush.bf16.msra.mxu3 %v6481_v61  ;;  %v11274_v21 = vld [vmem:[#allocation88_spill] sm:$0xff] }
 0x215   : > { %2111 = vst.msk [vmem:[#allocation2 + $0x1ac] sm:$0xf] %vm2089_vm9, %v2036_v57  ;;  %v2032_v15 = vpop.permute.xlu0 %2031  ;;  %v6480_v57 = vld [vmem:[%s10770_s1 + $0x8] sm:$0xff]  ;;  %v2543_v22 = vmul.f32 %v6778_v31, %v11274_v21 }
 0x216   : > { %3962 = vst.msk [vmem:[#allocation2 + $0x1ac] sm:$0xf] %vm254_vm4, %v8569_v1  ;;  %5107 = vmatpush.bf16.msra.mxu0 %v6480_v57  ;;  %7252 = vmatpush.bf16.msra.mxu1 %v6480_v57 }
 0x217   : > { %3961 = vst.msk [vmem:[#allocation2 + $0x198] sm:$0xf] %vm254_vm4, %v8573_v60  ;;  %7253 = vmatpush.bf16.msra.mxu2 %v6480_v57  ;;  %v2575_v62 = vpack.c.bf16 %v2543_v22, %v2543_v22  ;;  %v11276_v22 = vld [vmem:[#allocation91_spill] sm:$0xff] }
 0x218   : > { %2109 = vst.msk [vmem:[#allocation2 + $0x184] sm:$0xf] %vm2089_vm9, %v2032_v15  ;;  %2174 = vrot.lane.b32.xlu2 %v11272_v18, %s7303_s29  ;;  %v7157_v15 = vld [vmem:[%s10771_s2 + $0x218] sm:$0xff]   ;;  %7254 = vmatpush.bf16.msra.mxu3 %v6480_v57 }
 0x219   : > { %3960 = vst.msk [vmem:[#allocation2 + $0x184] sm:$0xf] %vm254_vm4, %v8627_v19  ;;  %2638 = vrot.lane.b32.xlu1 %v2573_v16, %s7301_s28  ;;  %v6786_v31 = vunpack.c.h.bf16 %v7157_v15  ;;  %v6785_v18 = vunpack.c.l.bf16 %v7157_v15 }
 0x21a   : > { %5108 = vmatpush.bf16.msra.mxu0 %v6479_v25  ;;  %7255 = vmatpush.bf16.msra.mxu1 %v6479_v25 }
 0x21b   : > { %2636 = vrot.lane.b32.xlu0 %v2572_v14, %s7301_s28  ;;  %v2040_v61 = vpop.permute.xlu1 %2039  ;;  %v2576_v14 = vpack.c.bf16 %v2544_v63, %v2544_v63  ;;  %7256 = vmatpush.bf16.msra.mxu2 %v6479_v25  ;;  %v2547_v57 = vmul.f32 %v6786_v31, %v11276_v22  ;;  %v11277_v63 = vld [vmem:[#allocation90_spill] sm:$0xff]  ;;  %v6777_v31 = vunpack.c.l.bf16 %v9058_v34  ;;  %v252_v34 = vld [vmem:[%s7350_s25 + $0xd0] sm:$0xf] }
 0x21c   : > { %v2042_v51 = vpop.permute.xlu2 %2041  ;;  %2113 = vst.msk [vmem:[#allocation2 + $0x1d4] sm:$0xf] %vm2089_vm9, %v2040_v61  ;;  %7257 = vmatpush.bf16.msra.mxu3 %v6479_v25  ;;  %v2546_v15 = vmul.f32 %v6785_v18, %v11277_v63  ;;  %v9107_v25 = vld [vmem:[%s10771_s2 + $0x228] sm:$0xff]   ;;  %v3934_v33 = vrot.slane %v252_v34, 5 }
 0x21d   : > { %2114 = vst.msk [vmem:[#allocation2 + $0x1e8] sm:$0xf] %vm2089_vm9, %v2042_v51  ;;  %v2038_v16 = vpop.permute.xlu0 %2037  ;;  %v11275_v51 = vld [vmem:[#allocation52_spill] sm:$0xff]  ;;  %v2579_v18 = vpack.c.bf16 %v2547_v57, %v2547_v57 }
 0x21e   : > { %3965 = vst.msk [vmem:[#allocation2 + $0x1e8] sm:$0xf] %vm254_vm4, %v8595_v43  ;;  %v2578_v10 = vpack.c.bf16 %v2546_v15, %v2546_v15  ;;  %v11279_v57 = vld [vmem:[#allocation92_spill] sm:$0xff] }
 0x21f   : > { %3964 = vst.msk [vmem:[#allocation2 + $0x1d4] sm:$0xf] %vm254_vm4, %v8600_v53  ;;  %v2542_v15 = vmul.f32 %v6777_v31, %v11279_v57  ;;  %v253_v57 = vld [vmem:[%s7350_s25 + $0xd4] sm:$0x1] }
 0x220   : > { %2112 = vst.msk [vmem:[#allocation2 + $0x1c0] sm:$0xf] %vm2089_vm9, %v2038_v16  ;;  %2180 = vrot.lane.b32.xlu2 %v11275_v51, %s7303_s29  ;;  %v9112_v51 = vld [vmem:[%s10771_s2 + $0x220] sm:$0xff]  }
 0x221   : > { %3963 = vst.msk [vmem:[#allocation2 + $0x1c0] sm:$0xf] %vm254_vm4, %v8660_v28  ;;  %2644 = vrot.lane.b32.xlu1 %v2576_v14, %s7301_s28  ;;  %v6790_v36 = vunpack.c.h.bf16 %v9112_v51 }
 0x223   : > { %2642 = vrot.lane.b32.xlu0 %v2575_v62, %s7301_s28  ;;  %v2046_v16 = vpop.permute.xlu1 %2045  ;;  %v6793_v62 = vunpack.c.l.bf16 %v9107_v25  ;;  %v2549_v42 = vmul.f32 %v6790_v36, %v11281_v55  ;;  %v6782_v36 = vunpack.c.h.bf16 %v9053_v40  ;;  %v3937_v40 = vrot.slane %v253_v57, 5 }
 0x224   : > { %v2048_v61 = vpop.permute.xlu2 %2047  ;;  %2116 = vst.msk [vmem:[#allocation2 + $0x210] sm:$0xf] %vm2089_vm9, %v2046_v16  ;;  %v11280_v16 = vld [vmem:[#allocation94_spill] sm:$0xff] }
 0x225   : > { %2117 = vst.msk [vmem:[#allocation2 + $0x224] sm:$0xf] %vm2089_vm9, %v2048_v61  ;;  %v2044_v14 = vpop.permute.xlu0 %2043  ;;  %v251_v61 = vld [vmem:[%s7350_s25 + $0xcc] sm:$0xf]  ;;  %v2550_v22 = vmul.f32 %v6793_v62, %v11280_v16  ;;  %v2581_v16 = vpack.c.bf16 %v2549_v42, %v2549_v42 }
 0x226   : > { %3968 = vst.msk [vmem:[#allocation2 + $0x224] sm:$0xf] %vm254_vm4, %v8631_v17  ;;  %v5884_v63 = vrot.slane %v251_v61, 9 }
 0x227   : > { %3967 = vst.msk [vmem:[#allocation2 + $0x210] sm:$0xf] %vm254_vm4, %v8635_v54  ;;  %v2582_v62 = vpack.c.bf16 %v2550_v22, %v2550_v22  ;;  %v3936_v22 = vrot.slane %v3934_v33, 4 }
 0x228   : > { %2115 = vst.msk [vmem:[#allocation2 + $0x1fc] sm:$0xf] %vm2089_vm9, %v2044_v14  ;;  %2186 = vrot.lane.b32.xlu2 %v9121_v41, %s7303_s29  ;;  %v7160_v14 = vld [vmem:[%s10771_s2 + $0x230] sm:$0xff]  }
 0x229   : > { %3966 = vst.msk [vmem:[#allocation2 + $0x1fc] sm:$0xf] %vm254_vm4, %v8690_v6  ;;  %2650 = vrot.lane.b32.xlu1 %v2579_v18, %s7301_s28  ;;  %v9143_v18 = vsel %vm8361_vm7, %v5884_v63, %v3934_v33  ;;  %v6798_v34 = vunpack.c.h.bf16 %v7160_v14  ;;  %v6797_v55 = vunpack.c.l.bf16 %v7160_v14  ;;  %v11284_v63 = vld [vmem:[#allocation95_spill] sm:$0xff]  ;;  %v6789_v33 = vunpack.c.l.bf16 %v9112_v51 }
 0x22a   : > { %11283 = vst [vmem:[#allocation57_spill] sm:$0xff] %v9143_v18 }
 0x22b   : > { %2648 = vrot.lane.b32.xlu0 %v2578_v10, %s7301_s28  ;;  %v2052_v0 = vpop.permute.xlu1 %2051  ;;  %v2574_v10 = vpack.c.bf16 %v2542_v15, %v2542_v15  ;;  %v11286_v15 = vld [vmem:[#allocation96_spill] sm:$0xff] }
 0x22c   : > { %v2054_v61 = vpop.permute.xlu2 %2053  ;;  %2119 = vst.msk [vmem:[#allocation2 + $0x24c] sm:$0xf] %vm2089_vm9, %v2052_v0  ;;  %v2552_v8 = vmul.f32 %v6797_v55, %v11286_v15  ;;  %v9161_v0 = vld [vmem:[%s10771_s2 + $0x240] sm:$0xff]  }
 0x22d   : > { %2120 = vst.msk [vmem:[#allocation2 + $0x260] sm:$0xf] %vm2089_vm9, %v2054_v61  ;;  %v2050_v31 = vpop.permute.xlu0 %2049  ;;  %v2545_v61 = vmul.f32 %v6782_v36, %v11284_v63 }
 0x22e   : > { %3971 = vst.msk [vmem:[#allocation2 + $0x260] sm:$0xf] %vm254_vm4, %v9143_v18  ;;  %v2553_v18 = vmul.f32 %v6798_v34, %v11285_v32  ;;  %v2584_v36 = vpack.c.bf16 %v2552_v8, %v2552_v8  ;;  %v7163_v8 = vld [vmem:[%s10771_s2 + $0x248] sm:$0xff]   ;;  %v2416_v32 = vshrl.u32 %v9030_v11, 16 }
 0x22f   : > { %2118 = vst.msk [vmem:[#allocation2 + $0x238] sm:$0xf] %vm2089_vm9, %v2050_v31  ;;  %v9166_v31 = vld [vmem:[%s10771_s2 + $0x238] sm:$0xff]   ;;  %v2577_v55 = vpack.c.bf16 %v2545_v61, %v2545_v61 }
 0x230   : > { %2640 = vrot.lane.b32.xlu2 %v2574_v10, %s7301_s28  ;;  %v2585_v57 = vpack.c.bf16 %v2553_v18, %v2553_v18  ;;  %v6802_v34 = vunpack.c.h.bf16 %v9166_v31  ;;  %v11289_v18 = vld [vmem:[#allocation99_spill] sm:$0xff] }
 0x231   : > { %2656 = vrot.lane.b32.xlu1 %v2582_v62, %s7301_s28  ;;  %v9174_v62 = vsel %vm8361_vm7, %v3936_v22, %v3937_v40  ;;  %v11290_v22 = vld [vmem:[#allocation100_spill] sm:$0xff] }
 0x232   : > { %11287 = vst [vmem:[#allocation114_spill] sm:$0xff] %v9174_v62  ;;  %v2555_v40 = vmul.f32 %v6802_v34, %v11290_v22  ;;  %v6809_v22 = vunpack.c.l.bf16 %v7163_v8 }
 0x233   : > { %2654 = vrot.lane.b32.xlu0 %v2581_v16, %s7301_s28  ;;  %v2125_v14 = vpop.permute.xlu1 %2124  ;;  %v6805_v16 = vunpack.c.l.bf16 %v9161_v0 }
 0x234   : > { %v2127_v42 = vpop.permute.xlu2 %2126  ;;  %2220 = vst.msk [vmem:[#allocation2] sm:$0xf] %vm2089_vm9, %v2125_v14  ;;  %v2587_v34 = vpack.c.bf16 %v2555_v40, %v2555_v40  ;;  %v11293_v40 = vld [vmem:[#allocation103_spill] sm:$0xff] }
 0x235   : > { %2221 = vst.msk [vmem:[#allocation2 + $0x14] sm:$0xf] %vm2089_vm9, %v2127_v42  ;;  %v2056_v10 = vpop.permute.xlu0 %2055  ;;  %v11288_v42 = vld [vmem:[#allocation98_spill] sm:$0xff]  ;;  %v2556_v61 = vmul.f32 %v6805_v16, %v11289_v18  ;;  %v6810_v18 = vunpack.c.h.bf16 %v7163_v8  ;;  %v2558_v8 = vmul.f32 %v6809_v22, %v11293_v40  ;;  %v6801_v22 = vunpack.c.l.bf16 %v9166_v31 }
 0x236   : > { %2121 = vst.msk [vmem:[#allocation2 + $0x274] sm:$0xf] %vm2089_vm9, %v2056_v10  ;;  %v2548_v51 = vmul.f32 %v6789_v33, %v11288_v42  ;;  %v2419_v42 = vshll.u32 %v9030_v11, 16  ;;  %v9206_v11 = vld [vmem:[%s10771_s2 + $0x258] sm:$0xff]  }
 0x237   : > { %3972 = vst.msk [vmem:[#allocation2 + $0x274] sm:$0xf] %vm254_vm4, %v9174_v62  ;;  %v2588_v16 = vpack.c.bf16 %v2556_v61, %v2556_v61  ;;  %v2590_v63 = vpack.c.bf16 %v2558_v8, %v2558_v8 }
 0x238   : > { %2646 = vrot.lane.b32.xlu2 %v2577_v55, %s7301_s28  ;;  %v2580_v55 = vpack.c.bf16 %v2548_v51, %v2548_v51  ;;  %v2429_v51 = vshrl.u32 %v9121_v41, 16 }
 0x239   : > { %2662 = vrot.lane.b32.xlu1 %v2585_v57, %s7301_s28 }
 0x23b   : > { %2660 = vrot.lane.b32.xlu0 %v2584_v36, %s7301_s28  ;;  %v2131_v10 = vpop.permute.xlu1 %2130  ;;  %v5919_v62 = vld [vmem:[#allocation2] sm:$0xf]  ;;  %v6794_v36 = vunpack.c.h.bf16 %v9107_v25 }
 0x23c   : > { %v2133_v14 = vpop.permute.xlu2 %2132  ;;  %v6401_v15 = vld [vmem:[#allocation2 + $0x10] sm:$0xf0]  ;;  %2223 = vst.msk [vmem:[#allocation2 + $0x3c] sm:$0xf] %vm2089_vm9, %v2131_v10 }
 0x23d   : > { %2224 = vst.msk [vmem:[#allocation2 + $0x50] sm:$0xf] %vm2089_vm9, %v2133_v14  ;;  %v2129_v33 = vpop.permute.xlu0 %2128  ;;  %v5920_v57 = vor.u32 %v6401_v15, %v5919_v62  ;;  %v2425_v14 = vshll.u32 %v9121_v41, 16  ;;  %v11291_v15 = vld [vmem:[#allocation101_spill] sm:$0xff]  ;;  %v11292_v62 = vld [vmem:[#allocation102_spill] sm:$0xff] }
 0x23e   : > { %2222 = vst.msk [vmem:[#allocation2 + $0x28] sm:$0xf] %vm2089_vm9, %v2129_v33  ;;  %v2551_v25 = vmul.f32 %v6794_v36, %v11291_v15  ;;  %v2559_v61 = vmul.f32 %v6810_v18, %v11292_v62  ;;  %v6817_v15 = vunpack.c.l.bf16 %v9206_v11 }
 0x23f   : > { %5109 = vmatmul.bf16.vlgmr.msra.gmra.mxu0 %v5920_v57  ;;  %v2418_v57 = vrot.slane %v2416_v32, 4  ;;  %v2427_v36 = vrot.slane %v2425_v14, 5 }
 0x240   : > { %2652 = vrot.lane.b32.xlu2 %v2580_v55, %s7301_s28  ;;  %v9211_v55 = vld [vmem:[%s10771_s2 + $0x250] sm:$0xff]   ;;  %v2583_v62 = vpack.c.bf16 %v2551_v25, %v2551_v25  ;;  %v2591_v40 = vpack.c.bf16 %v2559_v61, %v2559_v61 }
 0x241   : > { %2668 = vrot.lane.b32.xlu1 %v2588_v16, %s7301_s28  ;;  %v2421_v16 = vrot.slane %v2419_v42, 5  ;;  %v6814_v32 = vunpack.c.h.bf16 %v9211_v55  ;;  %v11294_v42 = vld [vmem:[#allocation104_spill] sm:$0xff] }
 0x242   : > { %v2554_v14 = vmul.f32 %v6801_v22, %v11294_v42  ;;  %v7166_v22 = vld [vmem:[%s10771_s2 + $0x260] sm:$0xff]  }
 0x243   : > { %2666 = vrot.lane.b32.xlu0 %v2587_v34, %s7301_s28  ;;  %v2137_v33 = vpop.permute.xlu1 %2136  ;;  %v2431_v34 = vrot.slane %v2429_v51, 4  ;;  %v9224_v51 = vld [vmem:[%s7350_s25 + $0xc8] sm:$0x1]  ;;  %v2422_v25 = vor.u32 %v2421_v16, %v2418_v57  ;;  %v6406_v56 = vld [vmem:[#allocation2 + $0x38] sm:$0xf0]  ;;  %v6821_v48 = vunpack.c.l.bf16 %v7166_v22 }
 0x244   : > { %v2139_v10 = vpop.permute.xlu2 %2138  ;;  %2226 = vst.msk [vmem:[#allocation2 + $0x78] sm:$0xf] %vm2089_vm9, %v2137_v33  ;;  %v2586_v57 = vpack.c.bf16 %v2554_v14, %v2554_v14  ;;  %v11301_v14 = vld [vmem:[#allocation108_spill] sm:$0xff] }
 0x245   : > { %2227 = vst.msk [vmem:[#allocation2 + $0x8c] sm:$0xf] %vm2089_vm9, %v2139_v10  ;;  %v2135_v18 = vpop.permute.xlu0 %2134  ;;  %v11295_v10 = vld [vmem:[#allocation105_spill] sm:$0xff]  ;;  %v2432_v33 = vor.u32 %v2431_v34, %v2427_v36  ;;  %v5939_v61 = vld [vmem:[#allocation2 + $0x28] sm:$0xf] }
 0x246   : > { %2225 = vst.msk [vmem:[#allocation2 + $0x64] sm:$0xf] %vm2089_vm9, %v2135_v18  ;;  %v2562_v31 = vmul.f32 %v6817_v15, %v11295_v10  ;;  %v11296_v18 = vld [vmem:[#allocation106_spill] sm:$0xff]  ;;  %v2423_v15 = vrot.slane %v2422_v25, 4 }
 0x247   : > { %v2561_v8 = vmul.f32 %v6814_v32, %v11296_v18  ;;  %v2433_v47 = vrot.slane %v2432_v33, 4  ;;  %v6806_v32 = vunpack.c.h.bf16 %v9161_v0  ;;  %v6822_v18 = vunpack.c.h.bf16 %v7166_v22  ;;  %v9262_v22 = vld [vmem:[%s10771_s2 + $0x268] sm:$0xff]  }
 0x248   : > { %2658 = vrot.lane.b32.xlu2 %v2583_v62, %s7301_s28  ;;  %v2435_v62 = vshll.u32 %v9224_v51, 16  ;;  %v2594_v10 = vpack.c.bf16 %v2562_v31, %v2562_v31  ;;  %v9255_v31 = vld [vmem:[%s10771_s2 + $0x270] sm:$0xff]  }
 0x249   : > { %2674 = vrot.lane.b32.xlu1 %v2591_v40, %s7301_s28  ;;  %v2593_v39 = vpack.c.bf16 %v2561_v8, %v2561_v8 }
 0x24a   : > { %v2437_v16 = vrot.slane %v2435_v62, 5  ;;  %v6813_v62 = vunpack.c.l.bf16 %v9211_v55 }
 0x24b   : > { %2672 = vrot.lane.b32.xlu0 %v2590_v63, %s7301_s28  ;;  %v2143_v40 = vpop.permute.xlu1 %2142  ;;  %v5940_v63 = vor.u32 %v6406_v56, %v5939_v61  ;;  %v11300_v56 = vld [vmem:[#allocation107_spill] sm:$0xff] }
 0x24c   : > { %v2145_v42 = vpop.permute.xlu2 %2144  ;;  %2229 = vst.msk [vmem:[#allocation2 + $0xb4] sm:$0xf] %vm2089_vm9, %v2143_v40  ;;  %v9238_v33 = vsel %vm7655_vm2, %v2433_v47, %v2437_v16  ;;  %v2557_v0 = vmul.f32 %v6806_v32, %v11300_v56  ;;  %v2565_v47 = vmul.f32 %v6822_v18, %v11301_v14  ;;  %v6829_v40 = vunpack.c.l.bf16 %v9255_v31 }
 0x24d   : > { %2230 = vst.msk [vmem:[#allocation2 + $0xc8] sm:$0xf] %vm2089_vm9, %v2145_v42  ;;  %v2141_v34 = vpop.permute.xlu0 %2140  ;;  %v9244_v42 = vsel %vm7655_vm2, %v2423_v15, %v2427_v36  ;;  %v11302_v36 = vld [vmem:[#allocation109_spill] sm:$0xff]  ;;  %v6826_v16 = vunpack.c.h.bf16 %v9262_v22  ;;  %v6411_v55 = vld [vmem:[#allocation2 + $0x60] sm:$0xf0] }
 0x24e   : > { %2228 = vst.msk [vmem:[#allocation2 + $0xa0] sm:$0xf] %vm2089_vm9, %v2141_v34  ;;  %v2564_v25 = vmul.f32 %v6821_v48, %v11302_v36  ;;  %v2589_v15 = vpack.c.bf16 %v2557_v0, %v2557_v0  ;;  %v2597_v48 = vpack.c.bf16 %v2565_v47, %v2565_v47  ;;  %v11305_v0 = vld [vmem:[#allocation112_spill] sm:$0xff] }
 0x24f   : > { %11298 = vst [vmem:[#allocation145_spill] sm:$0xff] %v9238_v33  ;;  %5114 = vmatmul.bf16.gmra.mxu0 %v5940_v63  ;;  %v11303_v63 = vld [vmem:[#allocation110_spill] sm:$0xff]  ;;  %v2567_v47 = vmul.f32 %v6826_v16, %v11305_v0  ;;  %v11061_v0 = vunpack.c.l.bf16 %v9244_v42 }
 0x250   : > { %2472 = vst.msk [vmem:[#allocation2 + $0x270] sm:$0xf] %vm254_vm4, %v9238_v33  ;;  %2664 = vrot.lane.b32.xlu2 %v2586_v57, %s7301_s28  ;;  %v2596_v57 = vpack.c.bf16 %v2564_v25, %v2564_v25  ;;  %v2560_v32 = vmul.f32 %v6813_v62, %v11303_v63  ;;  %v7169_v25 = vld [vmem:[%s10771_s2 + $0x278] sm:$0xff]   ;;  %v5959_v62 = vld [vmem:[#allocation2 + $0x50] sm:$0xf] }
 0x251   : > { %11299 = vst [vmem:[#allocation146_spill] sm:$0xff] %v9244_v42  ;;  %2680 = vrot.lane.b32.xlu1 %v2594_v10, %s7301_s28  ;;  %v2599_v16 = vpack.c.bf16 %v2567_v47, %v2567_v47 }
 0x252   : > { %2471 = vst.msk [vmem:[#allocation2 + $0x25c] sm:$0xf] %vm254_vm4, %v9244_v42  ;;  %v11352_v42 = vld [vmem:[#allocation124_spill] sm:$0xff] }
 0x253   : > { %2678 = vrot.lane.b32.xlu0 %v2593_v39, %s7301_s28  ;;  %v2149_v8 = vpop.permute.xlu1 %2148  ;;  %v6421_v18 = vld [vmem:[#allocation2 + $0xb0] sm:$0xf0] }
 0x254   : > { %v2151_v61 = vpop.permute.xlu2 %2150  ;;  %2232 = vst.msk [vmem:[#allocation2 + $0xf0] sm:$0xf] %vm2089_vm9, %v2149_v8 }
 0x255   : > { %2233 = vst.msk [vmem:[#allocation2 + $0x104] sm:$0xf] %vm2089_vm9, %v2151_v61  ;;  %v2147_v10 = vpop.permute.xlu0 %2146  ;;  %v5999_v39 = vld [vmem:[#allocation2 + $0xa0] sm:$0xf] }
 0x256   : > { %2231 = vst.msk [vmem:[#allocation2 + $0xdc] sm:$0xf] %vm2089_vm9, %v2147_v10  ;;  %v6000_v34 = vor.u32 %v6421_v18, %v5999_v39  ;;  %v11304_v61 = vld [vmem:[#allocation111_spill] sm:$0xff] }
 0x257   : > { %v2568_v30 = vmul.f32 %v6829_v40, %v11304_v61  ;;  %v2592_v40 = vpack.c.bf16 %v2560_v32, %v2560_v32  ;;  %v6833_v61 = vunpack.c.l.bf16 %v7169_v25 }
 0x258   : > { %5129 = vmatmul.bf16.vlgmr.msra.gmra.mxu1 %v6000_v34  ;;  %2670 = vrot.lane.b32.xlu2 %v2589_v15, %s7301_s28  ;;  %v5960_v15 = vor.u32 %v6411_v55, %v5959_v62  ;;  %v6834_v34 = vunpack.c.h.bf16 %v7169_v25 }
 0x259   : > { %2686 = vrot.lane.b32.xlu1 %v2597_v48, %s7301_s28  ;;  %v2600_v39 = vpack.c.bf16 %v2568_v30, %v2568_v30  ;;  %v6818_v48 = vunpack.c.h.bf16 %v9206_v11  ;;  %v11306_v30 = vld [vmem:[#allocation113_spill] sm:$0xff]  ;;  %v7138_v11 = vld [vmem:[%s10771_s2 + $0x180] sm:$0xff]   ;;  %v2570_v47 = vmul.f32 %v6833_v61, %v11061_v0  ;;  %v11307_v61 = vunpack.c.l.bf16 %v7356_v5  ;;  %v6416_v0 = vld [vmem:[#allocation2 + $0x88] sm:$0xf0] }
 0x25a   : > { %v6709_v62 = vunpack.c.l.bf16 %v7138_v11 }
 0x25b   : > { %2684 = vrot.lane.b32.xlu0 %v2596_v57, %s7301_s28  ;;  %v2155_v10 = vpop.permute.xlu1 %2154  ;;  %v11060_v57 = vunpack.c.l.bf16 %v9238_v33  ;;  %v2563_v32 = vmul.f32 %v6818_v48, %v11306_v30  ;;  %v6825_v48 = vunpack.c.l.bf16 %v9262_v22  ;;  %v7139_v22 = vld [vmem:[%s10771_s2 + $0x188] sm:$0xff]   ;;  %v11354_v33 = vld [vmem:[#allocation126_spill] sm:$0xff] }
 0x25c   : > { %v2157_v8 = vpop.permute.xlu2 %2156  ;;  %2235 = vst.msk [vmem:[#allocation2 + $0x12c] sm:$0xf] %vm2089_vm9, %v2155_v10 }
 0x25d   : > { %2236 = vst.msk [vmem:[#allocation2 + $0x140] sm:$0xf] %vm2089_vm9, %v2157_v8  ;;  %v2153_v18 = vpop.permute.xlu0 %2152  ;;  %v2571_v55 = vmul.f32 %v6834_v34, %v11060_v57  ;;  %v6426_v10 = vld [vmem:[#allocation2 + $0xd8] sm:$0xf0]  ;;  %v2319_v57 = vmul.f32 %v6709_v62, %v11307_v61 }
 0x25e   : > { %2234 = vst.msk [vmem:[#allocation2 + $0x118] sm:$0xf] %vm2089_vm9, %v2153_v18 }
 0x25f   : > { %5119 = vmatmul.bf16.gmra.mxu0 %v5960_v15  ;;  %v2603_v15 = vpack.c.bf16 %v2571_v55, %v2571_v55 }
 0x260   : > { %2676 = vrot.lane.b32.xlu2 %v2592_v40, %s7301_s28  ;;  %v6019_v40 = vld [vmem:[#allocation2 + $0xc8] sm:$0xf] }
 0x261   : > { %2692 = vrot.lane.b32.xlu1 %v2600_v39, %s7301_s28  ;;  %v2595_v39 = vpack.c.bf16 %v2563_v32, %v2563_v32  ;;  %v6020_v34 = vor.u32 %v6426_v10, %v6019_v40 }
 0x263   : > { %2690 = vrot.lane.b32.xlu0 %v2599_v16, %s7301_s28  ;;  %v2161_v8 = vpop.permute.xlu1 %2160  ;;  %v2602_v16 = vpack.c.bf16 %v2570_v47, %v2570_v47  ;;  %v6713_v47 = vunpack.c.l.bf16 %v7139_v22 }
 0x264   : > { %v2163_v25 = vpop.permute.xlu2 %2162  ;;  %2238 = vst.msk [vmem:[#allocation2 + $0x168] sm:$0xf] %vm2089_vm9, %v2161_v8  ;;  %v11308_v8 = vld [vmem:[#allocation115_spill] sm:$0xff] }
 0x265   : > { %2239 = vst.msk [vmem:[#allocation2 + $0x17c] sm:$0xf] %vm2089_vm9, %v2163_v25  ;;  %v2159_v18 = vpop.permute.xlu0 %2158  ;;  %v5979_v25 = vld [vmem:[#allocation2 + $0x78] sm:$0xf]  ;;  %v2566_v14 = vmul.f32 %v6825_v48, %v11308_v8  ;;  %v6079_v62 = vld [vmem:[#allocation2 + $0x140] sm:$0xf]  ;;  %v11310_v8 = vunpack.c.l.bf16 %v7362_v7 }
 0x266   : > { %2237 = vst.msk [vmem:[#allocation2 + $0x154] sm:$0xf] %vm2089_vm9, %v2159_v18  ;;  %v5980_v10 = vor.u32 %v6416_v0, %v5979_v25  ;;  %v6710_v18 = vunpack.c.h.bf16 %v7138_v11  ;;  %v11309_v48 = vld [vmem:[#allocation3_spill] sm:$0xff]  ;;  %v7140_v7 = vld [vmem:[%s10771_s2 + $0x190] sm:$0xff]  }
 0x267   : > { %v6039_v11 = vld [vmem:[#allocation2 + $0xf0] sm:$0xf]  ;;  %v6431_v25 = vld [vmem:[#allocation2 + $0x100] sm:$0xf0] }
 0x268   : > { %5134 = vmatmul.bf16.gmra.mxu1 %v6020_v34  ;;  %2682 = vrot.lane.b32.xlu2 %v2595_v39, %s7301_s28  ;;  %v2598_v39 = vpack.c.bf16 %v2566_v14, %v2566_v14  ;;  %v2321_v34 = vmul.f32 %v6713_v47, %v11309_v48  ;;  %v2320_v36 = vmul.f32 %v6710_v18, %v11310_v8  ;;  %v11311_v14 = vld [vmem:[#allocation116_spill] sm:$0xff]  ;;  %v6718_v8 = vunpack.c.h.bf16 %v7140_v7 }
 0x269   : > { %2698 = vrot.lane.b32.xlu1 %v2603_v15, %s7301_s28  ;;  %v6830_v15 = vunpack.c.h.bf16 %v9255_v31  ;;  %v6714_v18 = vunpack.c.h.bf16 %v7139_v22 }
 0x26a   : > { %v2352_v0 = vpack.c.bf16 %v2320_v36, %v2320_v36 }
 0x26b   : > { %2696 = vrot.lane.b32.xlu0 %v2602_v16, %s7301_s28  ;;  %v2167_v55 = vpop.permute.xlu1 %2166  ;;  %v2351_v16 = vpack.c.bf16 %v2319_v57, %v2319_v57  ;;  %v2569_v31 = vmul.f32 %v6830_v15, %v11311_v14 }
 0x26c   : > { %v2169_v32 = vpop.permute.xlu2 %2168  ;;  %2241 = vst.msk [vmem:[#allocation2 + $0x1a4] sm:$0xf] %vm2089_vm9, %v2167_v55  ;;  %v6717_v55 = vunpack.c.l.bf16 %v7140_v7  ;;  %v6446_v22 = vld [vmem:[#allocation2 + $0x178] sm:$0xf0] }
 0x26d   : > { %2242 = vst.msk [vmem:[#allocation2 + $0x1b8] sm:$0xf] %vm2089_vm9, %v2169_v32  ;;  %v2165_v5 = vpop.permute.xlu0 %2164  ;;  %v6441_v40 = vld [vmem:[#allocation2 + $0x150] sm:$0xf0]  ;;  %v2353_v32 = vpack.c.bf16 %v2321_v34, %v2321_v34  ;;  %v2601_v47 = vpack.c.bf16 %v2569_v31, %v2569_v31  ;;  %v11314_v34 = vld [vmem:[#allocation4_spill] sm:$0xff] }
 0x26e   : > { %2240 = vst.msk [vmem:[#allocation2 + $0x190] sm:$0xf] %vm2089_vm9, %v2165_v5  ;;  %v6080_v61 = vor.u32 %v6441_v40, %v6079_v62  ;;  %v11312_v5 = vld [vmem:[#allocation6_spill] sm:$0xff]  ;;  %v6040_v62 = vor.u32 %v6431_v25, %v6039_v11  ;;  %v11313_v40 = vld [vmem:[#allocation7_spill] sm:$0xff] }
 0x26f   : > { %5124 = vmatmul.bf16.gmra.mxu0 %v5980_v10  ;;  %2383 = vst.msk [vmem:[#allocation2 + $0xc] sm:$0xf] %vm254_vm4, %v2351_v16  ;;  %v2324_v10 = vmul.f32 %v6718_v8, %v11312_v5  ;;  %v2322_v16 = vmul.f32 %v6714_v18, %v11314_v34 }
 0x270   : > { %5149 = vmatmul.bf16.vlgmr.msra.gmra.mxu2 %v6080_v61  ;;  %2688 = vrot.lane.b32.xlu2 %v2598_v39, %s7301_s28  ;;  %2385 = vst.msk [vmem:[#allocation2 + $0x34] sm:$0xf] %vm254_vm4, %v2353_v32  ;;  %v2323_v39 = vmul.f32 %v6717_v55, %v11313_v40 }
 0x271   : > { %2778 = vrot.lane.b32.xlu1 %v8398_v9, %s7301_s28  ;;  %2384 = vst.msk [vmem:[#allocation2 + $0x20] sm:$0xf] %vm254_vm4, %v2352_v0  ;;  %v2356_v15 = vpack.c.bf16 %v2324_v10, %v2324_v10  ;;  %v2354_v32 = vpack.c.bf16 %v2322_v16, %v2322_v16  ;;  %v7142_v0 = vld [vmem:[%s10771_s2 + $0x1a0] sm:$0xff]   ;;  %v11317_v16 = vld [vmem:[#allocation9_spill] sm:$0xff] }
 0x272   : > { %v2355_v61 = vpack.c.bf16 %v2323_v39, %v2323_v39  ;;  %v11316_v39 = vld [vmem:[#allocation13_spill] sm:$0xff] }
 0x273   : > { %2776 = vrot.lane.b32.xlu0 %v8404_v12, %s7301_s28  ;;  %v2173_v36 = vpop.permute.xlu1 %2172  ;;  %2388 = vst.msk [vmem:[#allocation2 + $0x70] sm:$0xf] %vm254_vm4, %v2356_v15 }
 0x274   : > { %v2175_v57 = vpop.permute.xlu2 %2174  ;;  %2244 = vst.msk [vmem:[#allocation2 + $0x1e0] sm:$0xf] %vm2089_vm9, %v2173_v36 }
 0x275   : > { %2245 = vst.msk [vmem:[#allocation2 + $0x1f4] sm:$0xf] %vm2089_vm9, %v2175_v57  ;;  %v2171_v9 = vpop.permute.xlu0 %2170  ;;  %v6099_v57 = vld [vmem:[#allocation2 + $0x168] sm:$0xf] }
 0x276   : > { %2243 = vst.msk [vmem:[#allocation2 + $0x1cc] sm:$0xf] %vm2089_vm9, %v2171_v9  ;;  %v11315_v9 = vld [vmem:[#allocation12_spill] sm:$0xff]  ;;  %v6100_v18 = vor.u32 %v6446_v22, %v6099_v57 }
 0x277   : > { %2387 = vst.msk [vmem:[#allocation2 + $0x5c] sm:$0xf] %vm254_vm4, %v2355_v61  ;;  %v7143_v22 = vld [vmem:[%s10771_s2 + $0x1a8] sm:$0xff]  }
 0x278   : > { %5139 = vmatmul.bf16.gmra.mxu1 %v6040_v62  ;;  %2694 = vrot.lane.b32.xlu2 %v2601_v47, %s7301_s28  ;;  %2386 = vst.msk [vmem:[#allocation2 + $0x48] sm:$0xf] %vm254_vm4, %v2354_v32  ;;  %v11318_v32 = vld [vmem:[#allocation117_spill] sm:$0xff] }
 0x279   : > { %2784 = vrot.lane.b32.xlu1 %v8418_v35, %s7301_s28  ;;  %v6725_v35 = vunpack.c.l.bf16 %v7142_v0 }
 0x27b   : > { %2782 = vrot.lane.b32.xlu0 %v8423_v59, %s7301_s28  ;;  %v2179_v7 = vpop.permute.xlu1 %2178  ;;  %v6159_v25 = vld [vmem:[#allocation2 + $0x1e0] sm:$0xf]  ;;  %v7141_v59 = vld [vmem:[%s10771_s2 + $0x198] sm:$0xff]   ;;  %v2327_v55 = vmul.f32 %v6725_v35, %v11315_v9  ;;  %v6436_v35 = vld [vmem:[#allocation2 + $0x128] sm:$0xf0] }
 0x27c   : > { %v2181_v31 = vpop.permute.xlu2 %2180  ;;  %v6461_v36 = vld [vmem:[#allocation2 + $0x1f0] sm:$0xf0]  ;;  %2247 = vst.msk [vmem:[#allocation2 + $0x21c] sm:$0xf] %vm2089_vm9, %v2179_v7  ;;  %v6722_v47 = vunpack.c.h.bf16 %v7141_v59  ;;  %v6721_v10 = vunpack.c.l.bf16 %v7141_v59  ;;  %v6729_v59 = vunpack.c.l.bf16 %v7143_v22 }
 0x27d   : > { %2248 = vst.msk [vmem:[#allocation2 + $0x230] sm:$0xf] %vm2089_vm9, %v2181_v31  ;;  %v2177_v11 = vpop.permute.xlu0 %2176  ;;  %v6160_v8 = vor.u32 %v6461_v36, %v6159_v25  ;;  %v2359_v62 = vpack.c.bf16 %v2327_v55, %v2327_v55  ;;  %v6059_v36 = vld [vmem:[#allocation2 + $0x118] sm:$0xf]  ;;  %v6730_v25 = vunpack.c.h.bf16 %v7143_v22  ;;  %v6726_v55 = vunpack.c.h.bf16 %v7142_v0 }
 0x27e   : > { %2246 = vst.msk [vmem:[#allocation2 + $0x208] sm:$0xf] %vm2089_vm9, %v2177_v11  ;;  %v2326_v15 = vmul.f32 %v6722_v47, %v11316_v39  ;;  %v2325_v61 = vmul.f32 %v6721_v10, %v11317_v16  ;;  %v6060_v47 = vor.u32 %v6436_v35, %v6059_v36  ;;  %v11320_v10 = vld [vmem:[#allocation19_spill] sm:$0xff] }
 0x27f   : > { %5169 = vmatmul.bf16.vlgmr.msra.gmra.mxu3 %v6160_v8  ;;  %2391 = vst.msk [vmem:[#allocation2 + $0xac] sm:$0xf] %vm254_vm4, %v2359_v62  ;;  %v11319_v8 = vld [vmem:[#allocation18_spill] sm:$0xff] }
 0x280   : > { %5154 = vmatmul.bf16.gmra.mxu2 %v6100_v18  ;;  %2774 = vrot.lane.b32.xlu2 %v11318_v32, %s7301_s28  ;;  %v2358_v31 = vpack.c.bf16 %v2326_v15, %v2326_v15  ;;  %v2357_v11 = vpack.c.bf16 %v2325_v61, %v2325_v61  ;;  %v2329_v18 = vmul.f32 %v6729_v59, %v11320_v10  ;;  %v11321_v15 = vld [vmem:[#allocation15_spill] sm:$0xff]  ;;  %v11322_v59 = vld [vmem:[#allocation24_spill] sm:$0xff] }
 0x281   : > { %2790 = vrot.lane.b32.xlu1 %v8443_v4, %s7301_s28  ;;  %v2328_v61 = vmul.f32 %v6726_v55, %v11321_v15 }
 0x282   : > { %2390 = vst.msk [vmem:[#allocation2 + $0x98] sm:$0xf] %vm254_vm4, %v2358_v31  ;;  %v2361_v31 = vpack.c.bf16 %v2329_v18, %v2329_v18 }
 0x283   : > { %2788 = vrot.lane.b32.xlu0 %v8449_v44, %s7301_s28  ;;  %v2185_v57 = vpop.permute.xlu1 %2184  ;;  %v2330_v44 = vmul.f32 %v6730_v25, %v11319_v8  ;;  %2389 = vst.msk [vmem:[#allocation2 + $0x84] sm:$0xf] %vm254_vm4, %v2357_v11  ;;  %v6466_v22 = vld [vmem:[#allocation2 + $0x218] sm:$0xf0]  ;;  %v2360_v0 = vpack.c.bf16 %v2328_v61, %v2328_v61  ;;  %v6451_v11 = vld [vmem:[#allocation2 + $0x1a0] sm:$0xf0] }
 0x284   : > { %v2187_v7 = vpop.permute.xlu2 %2186  ;;  %2250 = vst.msk [vmem:[#allocation2 + $0x258] sm:$0xf] %vm2089_vm9, %v2185_v57  ;;  %v7145_v57 = vld [vmem:[%s10771_s2 + $0x1b8] sm:$0xff]   ;;  %v11323_v61 = vld [vmem:[#allocation25_spill] sm:$0xff] }
 0x285   : > { %2251 = vst.msk [vmem:[#allocation2 + $0x26c] sm:$0xf] %vm2089_vm9, %v2187_v7  ;;  %v2183_v4 = vpop.permute.xlu0 %2182  ;;  %v2362_v62 = vpack.c.bf16 %v2330_v44, %v2330_v44  ;;  %v6179_v7 = vld [vmem:[#allocation2 + $0x208] sm:$0xf] }
 0x286   : > { %2249 = vst.msk [vmem:[#allocation2 + $0x244] sm:$0xf] %vm2089_vm9, %v2183_v4  ;;  %v6180_v4 = vor.u32 %v6466_v22, %v6179_v7  ;;  %v7146_v7 = vld [vmem:[%s10771_s2 + $0x1c0] sm:$0xff]  }
 0x287   : > { %2394 = vst.msk [vmem:[#allocation2 + $0xe8] sm:$0xf] %vm254_vm4, %v2362_v62 }
 0x288   : > { %5144 = vmatmul.bf16.gmra.mxu1 %v6060_v47  ;;  %2780 = vrot.lane.b32.xlu2 %v8464_v37, %s7301_s28  ;;  %2393 = vst.msk [vmem:[#allocation2 + $0xd4] sm:$0xf] %vm254_vm4, %v2361_v31  ;;  %v6119_v37 = vld [vmem:[#allocation2 + $0x190] sm:$0xf] }
 0x289   : > { %2796 = vrot.lane.b32.xlu1 %v8468_v24, %s7301_s28  ;;  %2392 = vst.msk [vmem:[#allocation2 + $0xc0] sm:$0xf] %vm254_vm4, %v2360_v0  ;;  %v6737_v24 = vunpack.c.l.bf16 %v7145_v57  ;;  %v6120_v18 = vor.u32 %v6451_v11, %v6119_v37  ;;  %v11324_v0 = vld [vmem:[#allocation21_spill] sm:$0xff] }
 0x28b   : > { %2794 = vrot.lane.b32.xlu0 %v8472_v45, %s7301_s28  ;;  %v2639_v35 = vpop.permute.xlu1 %2638  ;;  %v7144_v45 = vld [vmem:[%s10771_s2 + $0x1b0] sm:$0xff]   ;;  %v2333_v44 = vmul.f32 %v6737_v24, %v11322_v59  ;;  %v6742_v24 = vunpack.c.h.bf16 %v7146_v7 }
 0x28c   : > { %v2641_v36 = vpop.permute.xlu2 %2640  ;;  %2733 = vst.msk [vmem:[#allocation2 + $0x20] sm:$0xf] %vm575_vm3, %v2639_v35  ;;  %v6734_v55 = vunpack.c.h.bf16 %v7144_v45  ;;  %v6733_v47 = vunpack.c.l.bf16 %v7144_v45 }
 0x28d   : > { %2734 = vst.msk [vmem:[#allocation2 + $0x34] sm:$0xf] %vm575_vm3, %v2641_v36  ;;  %v2637_v25 = vpop.permute.xlu0 %2636  ;;  %v2365_v62 = vpack.c.bf16 %v2333_v44, %v2333_v44 }
 0x28e   : > { %2732 = vst.msk [vmem:[#allocation2 + $0xc] sm:$0xf] %vm575_vm3, %v2637_v25  ;;  %v2332_v31 = vmul.f32 %v6734_v55, %v11323_v61  ;;  %v2331_v36 = vmul.f32 %v6733_v47, %v11324_v0  ;;  %v11325_v25 = vld [vmem:[#allocation30_spill] sm:$0xff]  ;;  %v11327_v47 = vld [vmem:[#allocation28_spill] sm:$0xff] }
 0x28f   : > { %5174 = vmatmul.bf16.gmra.mxu3 %v6180_v4  ;;  %2397 = vst.msk [vmem:[#allocation2 + $0x124] sm:$0xf] %vm254_vm4, %v2365_v62  ;;  %v2336_v45 = vmul.f32 %v6742_v24, %v11325_v25  ;;  %v6738_v4 = vunpack.c.h.bf16 %v7145_v57  ;;  %v6471_v57 = vld [vmem:[#allocation2 + $0x240] sm:$0xf0] }
 0x290   : > { %5159 = vmatmul.bf16.gmra.mxu2 %v6120_v18  ;;  %2786 = vrot.lane.b32.xlu2 %v8490_v50, %s7301_s28  ;;  %v2364_v22 = vpack.c.bf16 %v2332_v31, %v2332_v31  ;;  %v2363_v11 = vpack.c.bf16 %v2331_v36, %v2331_v36  ;;  %v7148_v36 = vld [vmem:[%s10771_s2 + $0x1d0] sm:$0xff]  }
 0x291   : > { %2802 = vrot.lane.b32.xlu1 %v8494_v38, %s7301_s28  ;;  %v6741_v38 = vunpack.c.l.bf16 %v7146_v7  ;;  %v2368_v55 = vpack.c.bf16 %v2336_v45, %v2336_v45  ;;  %v2334_v18 = vmul.f32 %v6738_v4, %v11327_v47 }
 0x292   : > { %2396 = vst.msk [vmem:[#allocation2 + $0x110] sm:$0xf] %vm254_vm4, %v2364_v22 }
 0x293   : > { %2800 = vrot.lane.b32.xlu0 %v8499_v2, %s7301_s28  ;;  %v2645_v37 = vpop.permute.xlu1 %2644  ;;  %v11326_v2 = vld [vmem:[#allocation31_spill] sm:$0xff]  ;;  %2395 = vst.msk [vmem:[#allocation2 + $0xfc] sm:$0xf] %vm254_vm4, %v2363_v11  ;;  %v2366_v31 = vpack.c.bf16 %v2334_v18, %v2334_v18  ;;  %v6139_v11 = vld [vmem:[#allocation2 + $0x1b8] sm:$0xf]  ;;  %v11329_v18 = vld [vmem:[#allocation37_spill] sm:$0xff] }
 0x294   : > { %v2647_v35 = vpop.permute.xlu2 %2646  ;;  %2736 = vst.msk [vmem:[#allocation2 + $0x5c] sm:$0xf] %vm575_vm3, %v2645_v37  ;;  %v2335_v44 = vmul.f32 %v6741_v38, %v11326_v2  ;;  %v6199_v37 = vld [vmem:[#allocation2 + $0x230] sm:$0xf] }
 0x295   : > { %2737 = vst.msk [vmem:[#allocation2 + $0x70] sm:$0xf] %vm575_vm3, %v2647_v35  ;;  %v2643_v50 = vpop.permute.xlu0 %2642  ;;  %v6456_v35 = vld [vmem:[#allocation2 + $0x1c8] sm:$0xf0]  ;;  %v6200_v24 = vor.u32 %v6471_v57, %v6199_v37 }
 0x296   : > { %2735 = vst.msk [vmem:[#allocation2 + $0x48] sm:$0xf] %vm575_vm3, %v2643_v50  ;;  %v2367_v62 = vpack.c.bf16 %v2335_v44, %v2335_v44  ;;  %v11328_v50 = vld [vmem:[#allocation36_spill] sm:$0xff]  ;;  %v6140_v44 = vor.u32 %v6456_v35, %v6139_v11  ;;  %v7149_v35 = vld [vmem:[%s10771_s2 + $0x1d8] sm:$0xff]  }
 0x297   : > { %2400 = vst.msk [vmem:[#allocation2 + $0x160] sm:$0xf] %vm254_vm4, %v2368_v55 }
 0x298   : > { %2792 = vrot.lane.b32.xlu2 %v8515_v26, %s7301_s28  ;;  %2399 = vst.msk [vmem:[#allocation2 + $0x14c] sm:$0xf] %vm254_vm4, %v2367_v62  ;;  %v6749_v26 = vunpack.c.l.bf16 %v7148_v36 }
 0x299   : > { %2808 = vrot.lane.b32.xlu1 %v8519_v52, %s7301_s28  ;;  %2398 = vst.msk [vmem:[#allocation2 + $0x138] sm:$0xf] %vm254_vm4, %v2366_v31  ;;  %v11330_v31 = vld [vmem:[#allocation33_spill] sm:$0xff] }
 0x29a   : > { %v2339_v38 = vmul.f32 %v6749_v26, %v11328_v50 }
 0x29b   : > { %2806 = vrot.lane.b32.xlu0 %v8523_v23, %s7301_s28  ;;  %v2651_v7 = vpop.permute.xlu1 %2650  ;;  %v7147_v23 = vld [vmem:[%s10771_s2 + $0x1c8] sm:$0xff]  }
 0x29c   : > { %v2653_v22 = vpop.permute.xlu2 %2652  ;;  %2739 = vst.msk [vmem:[#allocation2 + $0x98] sm:$0xf] %vm575_vm3, %v2651_v7  ;;  %v6746_v45 = vunpack.c.h.bf16 %v7147_v23  ;;  %v6745_v4 = vunpack.c.l.bf16 %v7147_v23  ;;  %v2371_v55 = vpack.c.bf16 %v2339_v38, %v2339_v38  ;;  %v2767_v7 = vrot.slane %v9121_v41, 5 }
 0x29d   : > { %2740 = vst.msk [vmem:[#allocation2 + $0xac] sm:$0xf] %vm575_vm3, %v2653_v22  ;;  %v2649_v52 = vpop.permute.xlu0 %2648  ;;  %v6754_v23 = vunpack.c.h.bf16 %v7149_v35 }
 0x29e   : > { %2738 = vst.msk [vmem:[#allocation2 + $0x84] sm:$0xf] %vm575_vm3, %v2649_v52  ;;  %v2338_v62 = vmul.f32 %v6746_v45, %v11329_v18  ;;  %v2337_v22 = vmul.f32 %v6745_v4, %v11330_v31  ;;  %v2769_v37 = vrot.slane %v2767_v7, 4  ;;  %v6750_v45 = vunpack.c.h.bf16 %v7148_v36  ;;  %v11332_v4 = vld [vmem:[#allocation43_spill] sm:$0xff]  ;;  %v6476_v36 = vld [vmem:[#allocation2 + $0x268] sm:$0xf0] }
 0x29f   : > { %5179 = vmatmul.bf16.gmra.mxu3 %v6200_v24  ;;  %2403 = vst.msk [vmem:[#allocation2 + $0x19c] sm:$0xf] %vm254_vm4, %v2371_v55  ;;  %v6753_v24 = vunpack.c.l.bf16 %v7149_v35 }
 0x2a0   : > { %5164 = vmatmul.bf16.gmra.mxu2 %v6140_v44  ;;  %2798 = vrot.lane.b32.xlu2 %v8540_v3, %s7301_s28  ;;  %v2370_v57 = vpack.c.bf16 %v2338_v62, %v2338_v62  ;;  %v2369_v3 = vpack.c.bf16 %v2337_v22, %v2337_v22  ;;  %v11334_v62 = vld [vmem:[#allocation40_spill] sm:$0xff] }
 0x2a1   : > { %2814 = vrot.lane.b32.xlu1 %v8544_v49, %s7301_s28  ;;  %v2770_v49 = vrot.slane %v9224_v51, 5  ;;  %v2341_v44 = vmul.f32 %v6753_v24, %v11332_v4  ;;  %v2340_v22 = vmul.f32 %v6750_v45, %v11334_v62  ;;  %v9478_v45 = vld [vmem:[%s7350_s25 + $0xc0] sm:$0xf] }
 0x2a2   : > { %2402 = vst.msk [vmem:[#allocation2 + $0x188] sm:$0xf] %vm254_vm4, %v2370_v57 }
 0x2a3   : > { %2812 = vrot.lane.b32.xlu0 %v8549_v27, %s7301_s28  ;;  %v2657_v52 = vpop.permute.xlu1 %2656  ;;  %v11331_v27 = vld [vmem:[#allocation42_spill] sm:$0xff]  ;;  %2401 = vst.msk [vmem:[#allocation2 + $0x174] sm:$0xf] %vm254_vm4, %v2369_v3  ;;  %v9453_v55 = vsel %vm8361_vm7, %v2769_v37, %v2770_v49  ;;  %v2373_v57 = vpack.c.bf16 %v2341_v44, %v2341_v44  ;;  %v2372_v35 = vpack.c.bf16 %v2340_v22, %v2340_v22  ;;  %v5787_v44 = vrot.slane %v9478_v45, 9  ;;  %v11337_v22 = vld [vmem:[#allocation49_spill] sm:$0xff] }
 0x2a4   : > { %v2659_v26 = vpop.permute.xlu2 %2658  ;;  %2742 = vst.msk [vmem:[#allocation2 + $0xd4] sm:$0xf] %vm575_vm3, %v2657_v52  ;;  %v2342_v38 = vmul.f32 %v6754_v23, %v11331_v27  ;;  %v7151_v52 = vld [vmem:[%s10771_s2 + $0x1e8] sm:$0xff]  }
 0x2a5   : > { %2743 = vst.msk [vmem:[#allocation2 + $0xe8] sm:$0xf] %vm575_vm3, %v2659_v26  ;;  %v2655_v11 = vpop.permute.xlu0 %2654  ;;  %v6219_v26 = vld [vmem:[#allocation2 + $0x258] sm:$0xf]  ;;  %v11335_v23 = vld [vmem:[#allocation48_spill] sm:$0xff] }
 0x2a6   : > { %2741 = vst.msk [vmem:[#allocation2 + $0xc0] sm:$0xf] %vm575_vm3, %v2655_v11  ;;  %v2374_v51 = vpack.c.bf16 %v2342_v38, %v2342_v38  ;;  %v6220_v49 = vor.u32 %v6476_v36, %v6219_v26  ;;  %v9490_v26 = vsel %vm8361_vm7, %v5787_v44, %v2767_v7  ;;  %v6762_v44 = vunpack.c.h.bf16 %v7151_v52 }
 0x2a7   : > { %11333 = vst [vmem:[#allocation107_spill] sm:$0xff] %v9453_v55 }
 0x2a8   : > { %3970 = vst.msk [vmem:[#allocation2 + $0x24c] sm:$0xf] %vm254_vm4, %v9453_v55  ;;  %2804 = vrot.lane.b32.xlu2 %v8565_v58, %s7301_s28 }
 0x2a9   : > { %2820 = vrot.lane.b32.xlu1 %v8569_v1, %s7301_s28  ;;  %2406 = vst.msk [vmem:[#allocation2 + $0x1d8] sm:$0xf] %vm254_vm4, %v2374_v51  ;;  %v6761_v1 = vunpack.c.l.bf16 %v7151_v52  ;;  %v7171_v52 = vld [vmem:[%s10771_s2 + $0x288] sm:$0xff]  }
 0x2aa   : > { %2405 = vst.msk [vmem:[#allocation2 + $0x1c4] sm:$0xf] %vm254_vm4, %v2373_v57 }
 0x2ab   : > { %2818 = vrot.lane.b32.xlu0 %v8573_v60, %s7301_s28  ;;  %v2663_v58 = vpop.permute.xlu1 %2662  ;;  %2404 = vst.msk [vmem:[#allocation2 + $0x1b0] sm:$0xf] %vm254_vm4, %v2372_v35  ;;  %v7150_v60 = vld [vmem:[%s10771_s2 + $0x1e0] sm:$0xff]   ;;  %v2345_v11 = vmul.f32 %v6761_v1, %v11335_v23  ;;  %v11338_v35 = vld [vmem:[#allocation45_spill] sm:$0xff] }
 0x2ac   : > { %v2665_v3 = vpop.permute.xlu2 %2664  ;;  %2745 = vst.msk [vmem:[#allocation2 + $0x110] sm:$0xf] %vm575_vm3, %v2663_v58  ;;  %v6758_v24 = vunpack.c.h.bf16 %v7150_v60  ;;  %v6757_v38 = vunpack.c.l.bf16 %v7150_v60  ;;  %v9495_v58 = vld [vmem:[%s10771_s2 + $0x280] sm:$0xff]  }
 0x2ad   : > { %2746 = vst.msk [vmem:[#allocation2 + $0x124] sm:$0xf] %vm575_vm3, %v2665_v3  ;;  %v2661_v37 = vpop.permute.xlu0 %2660  ;;  %v2377_v51 = vpack.c.bf16 %v2345_v11, %v2345_v11 }
 0x2ae   : > { %2744 = vst.msk [vmem:[#allocation2 + $0xfc] sm:$0xf] %vm575_vm3, %v2661_v37  ;;  %v2344_v57 = vmul.f32 %v6758_v24, %v11337_v22  ;;  %v2343_v3 = vmul.f32 %v6757_v38, %v11338_v35  ;;  %v11341_v24 = vld [vmem:[#allocation55_spill] sm:$0xff] }
 0x2af   : > { %11336 = vst [vmem:[#allocation110_spill] sm:$0xff] %v9478_v45  ;;  %5184 = vmatmul.bf16.gmra.mxu3 %v6220_v49  ;;  %v6837_v49 = vunpack.c.l.bf16 %v9495_v58 }
 0x2b0   : > { %2810 = vrot.lane.b32.xlu2 %v8591_v46, %s7301_s28  ;;  %2409 = vst.msk [vmem:[#allocation2 + $0x214] sm:$0xf] %vm254_vm4, %v2377_v51  ;;  %v2376_v36 = vpack.c.bf16 %v2344_v57, %v2344_v57  ;;  %v2375_v21 = vpack.c.bf16 %v2343_v3, %v2343_v3  ;;  %v11342_v3 = vld [vmem:[#allocation53_spill] sm:$0xff] }
 0x2b1   : > { %2826 = vrot.lane.b32.xlu1 %v8595_v43, %s7301_s28  ;;  %11339 = vst [vmem:[#allocation113_spill] sm:$0xff] %v9490_v26  ;;  %v7152_v43 = vld [vmem:[%s10771_s2 + $0x1f0] sm:$0xff]  }
 0x2b2   : > { %3969 = vst.msk [vmem:[#allocation2 + $0x238] sm:$0xf] %vm254_vm4, %v9490_v26  ;;  %v6766_v7 = vunpack.c.h.bf16 %v7152_v43  ;;  %v6765_v60 = vunpack.c.l.bf16 %v7152_v43 }
 0x2b3   : > { %2824 = vrot.lane.b32.xlu0 %v8600_v53, %s7301_s28  ;;  %v2669_v1 = vpop.permute.xlu1 %2668  ;;  %2408 = vst.msk [vmem:[#allocation2 + $0x200] sm:$0xf] %vm254_vm4, %v2376_v36  ;;  %v11340_v53 = vld [vmem:[#allocation54_spill] sm:$0xff]  ;;  %v2346_v36 = vmul.f32 %v6762_v44, %v11342_v3 }
 0x2b4   : > { %v2671_v46 = vpop.permute.xlu2 %2670  ;;  %2748 = vst.msk [vmem:[#allocation2 + $0x14c] sm:$0xf] %vm575_vm3, %v2669_v1  ;;  %v2348_v11 = vmul.f32 %v6766_v7, %v11340_v53  ;;  %v2347_v38 = vmul.f32 %v6765_v60, %v11341_v24  ;;  %v11063_v7 = vunpack.c.l.bf16 %v9121_v41 }
 0x2b5   : > { %2749 = vst.msk [vmem:[#allocation2 + $0x160] sm:$0xf] %vm575_vm3, %v2671_v46  ;;  %v2667_v37 = vpop.permute.xlu0 %2666  ;;  %v11343_v46 = vunpack.c.l.bf16 %v11318_v32 }
 0x2b6   : > { %2747 = vst.msk [vmem:[#allocation2 + $0x138] sm:$0xf] %vm575_vm3, %v2667_v37  ;;  %v2380_v51 = vpack.c.bf16 %v2348_v11, %v2348_v11  ;;  %v2379_v57 = vpack.c.bf16 %v2347_v38, %v2347_v38  ;;  %v11062_v38 = vunpack.c.l.bf16 %v9478_v45 }
 0x2b7   : > { %2407 = vst.msk [vmem:[#allocation2 + $0x1ec] sm:$0xf] %vm254_vm4, %v2375_v21  ;;  %v2969_v43 = vmul.f32 %v6837_v49, %v11343_v46  ;;  %v2378_v21 = vpack.c.bf16 %v2346_v36, %v2346_v36  ;;  %v6841_v49 = vunpack.c.l.bf16 %v7171_v52 }
 0x2b8   : > { %2816 = vrot.lane.b32.xlu2 %v8627_v19, %s7301_s28  ;;  %2412 = vst.msk [vmem:[#allocation2 + $0x250] sm:$0xf] %vm254_vm4, %v2380_v51 }
 0x2b9   : > { %2832 = vrot.lane.b32.xlu1 %v8631_v17, %s7301_s28  ;;  %2411 = vst.msk [vmem:[#allocation2 + $0x23c] sm:$0xf] %vm254_vm4, %v2379_v57  ;;  %v7153_v17 = vld [vmem:[%s10771_s2 + $0x1f8] sm:$0xff]   ;;  %v3001_v37 = vpack.c.bf16 %v2969_v43, %v2969_v43  ;;  %v11344_v57 = vld [vmem:[#allocation83_spill] sm:$0xff] }
 0x2ba   : > { %v6770_v60 = vunpack.c.h.bf16 %v7153_v17  ;;  %v6769_v11 = vunpack.c.l.bf16 %v7153_v17  ;;  %2410 = vst.msk [vmem:[#allocation2 + $0x228] sm:$0xf] %vm254_vm4, %v2378_v21  ;;  %v11345_v43 = vld [vmem:[#allocation118_spill] sm:$0xff] }
 0x2bb   : > { %2830 = vrot.lane.b32.xlu0 %v8635_v54, %s7301_s28  ;;  %v2675_v32 = vpop.permute.xlu1 %2674  ;;  %v6842_v54 = vunpack.c.h.bf16 %v7171_v52  ;;  %v2971_v52 = vmul.f32 %v6841_v49, %v11345_v43 }
 0x2bc   : > { %v2677_v1 = vpop.permute.xlu2 %2676  ;;  %2751 = vst.msk [vmem:[#allocation2 + $0x188] sm:$0xf] %vm575_vm3, %v2675_v32  ;;  %v2350_v44 = vmul.f32 %v6770_v60, %v11063_v7  ;;  %v2349_v51 = vmul.f32 %v6769_v11, %v11062_v38  ;;  %v11346_v11 = vld [vmem:[#allocation119_spill] sm:$0xff] }
 0x2bd   : > { %2752 = vst.msk [vmem:[#allocation2 + $0x19c] sm:$0xf] %vm575_vm3, %v2677_v1  ;;  %v2673_v19 = vpop.permute.xlu0 %2672  ;;  %v2972_v36 = vmul.f32 %v6842_v54, %v11344_v57  ;;  %v9549_v1 = vld [vmem:[%s10771_s2 + $0x298] sm:$0xff]   ;;  %v3003_v60 = vpack.c.bf16 %v2971_v52, %v2971_v52  ;;  %v11351_v7 = vld [vmem:[#allocation123_spill] sm:$0xff] }
 0x2be   : > { %2750 = vst.msk [vmem:[#allocation2 + $0x174] sm:$0xf] %vm575_vm3, %v2673_v19  ;;  %v2382_v46 = vpack.c.bf16 %v2350_v44, %v2350_v44  ;;  %v2381_v19 = vpack.c.bf16 %v2349_v51, %v2349_v51  ;;  %v6849_v54 = vunpack.c.l.bf16 %v9549_v1  ;;  %v11347_v51 = vld [vmem:[#allocation120_spill] sm:$0xff] }
 0x2c0   : > { %2822 = vrot.lane.b32.xlu2 %v8660_v28, %s7301_s28  ;;  %v7172_v28 = vld [vmem:[%s10771_s2 + $0x290] sm:$0xff]   ;;  %2414 = vst.msk [vmem:[#allocation2 + $0x278] sm:$0xf] %vm254_vm4, %v2382_v46  ;;  %v2975_v44 = vmul.f32 %v6849_v54, %v11346_v11 }
 0x2c1   : > { %3065 = vrot.lane.b32.xlu1 %v3001_v37, %s7302_s11  ;;  %v3004_v37 = vpack.c.bf16 %v2972_v36, %v2972_v36  ;;  %v6846_v49 = vunpack.c.h.bf16 %v7172_v28  ;;  %2413 = vst.msk [vmem:[#allocation2 + $0x264] sm:$0xf] %vm254_vm4, %v2381_v19  ;;  %v7174_v36 = vld [vmem:[%s10771_s2 + $0x2a0] sm:$0xff]   ;;  %v6838_v19 = vunpack.c.h.bf16 %v9495_v58  ;;  %v11350_v58 = vld [vmem:[#allocation122_spill] sm:$0xff] }
 0x2c2   : > { %v6853_v54 = vunpack.c.l.bf16 %v7174_v36 }
 0x2c3   : > { %2836 = vrot.lane.b32.xlu0 %v9453_v55, %s7301_s28  ;;  %v2681_v21 = vpop.permute.xlu1 %2680  ;;  %v2974_v46 = vmul.f32 %v6846_v49, %v11347_v51  ;;  %v11355_v55 = vld [vmem:[#allocation127_spill] sm:$0xff] }
 0x2c4   : > { %v2683_v32 = vpop.permute.xlu2 %2682  ;;  %2754 = vst.msk [vmem:[#allocation2 + $0x1c4] sm:$0xf] %vm575_vm3, %v2681_v21 }
 0x2c5   : > { %2755 = vst.msk [vmem:[#allocation2 + $0x1d8] sm:$0xf] %vm575_vm3, %v2683_v32  ;;  %v2679_v17 = vpop.permute.xlu0 %2678 }
 0x2c6   : > { %2753 = vst.msk [vmem:[#allocation2 + $0x1b0] sm:$0xf] %vm575_vm3, %v2679_v17  ;;  %v6854_v17 = vunpack.c.h.bf16 %v7174_v36 }
 0x2c8   : > { %2828 = vrot.lane.b32.xlu2 %v8690_v6, %s7301_s28  ;;  %v3007_v6 = vpack.c.bf16 %v2975_v44, %v2975_v44  ;;  %v9584_v44 = vld [vmem:[%s10771_s2 + $0x2b0] sm:$0xff]  }
 0x2c9   : > { %3071 = vrot.lane.b32.xlu1 %v3004_v37, %s7302_s11  ;;  %v3006_v37 = vpack.c.bf16 %v2974_v46, %v2974_v46 }
 0x2cb   : > { %3069 = vrot.lane.b32.xlu0 %v3003_v60, %s7302_s11  ;;  %v2687_v52 = vpop.permute.xlu1 %2686  ;;  %v11348_v60 = vunpack.c.l.bf16 %v8404_v12  ;;  %v7175_v12 = vld [vmem:[%s10771_s2 + $0x2a8] sm:$0xff]  }
 0x2cc   : > { %v2689_v32 = vpop.permute.xlu2 %2688  ;;  %2757 = vst.msk [vmem:[#allocation2 + $0x200] sm:$0xf] %vm575_vm3, %v2687_v52  ;;  %v2977_v52 = vmul.f32 %v6853_v54, %v11350_v58 }
 0x2cd   : > { %2758 = vst.msk [vmem:[#allocation2 + $0x214] sm:$0xf] %vm575_vm3, %v2689_v32  ;;  %v2685_v21 = vpop.permute.xlu0 %2684  ;;  %v2970_v49 = vmul.f32 %v6838_v19, %v11348_v60  ;;  %v11349_v32 = vld [vmem:[#allocation121_spill] sm:$0xff]  ;;  %v6858_v60 = vunpack.c.h.bf16 %v7175_v12 }
 0x2ce   : > { %2756 = vst.msk [vmem:[#allocation2 + $0x1ec] sm:$0xf] %vm575_vm3, %v2685_v21  ;;  %v2978_v38 = vmul.f32 %v6854_v17, %v11349_v32  ;;  %v6845_v17 = vunpack.c.l.bf16 %v7172_v28  ;;  %v3009_v54 = vpack.c.bf16 %v2977_v52, %v2977_v52 }
 0x2cf   : > { %v3002_v19 = vpack.c.bf16 %v2970_v49, %v2970_v49  ;;  %v11353_v49 = vld [vmem:[#allocation125_spill] sm:$0xff] }
 0x2d0   : > { %2834 = vrot.lane.b32.xlu2 %v9490_v26, %s7301_s28  ;;  %v2973_v14 = vmul.f32 %v6845_v17, %v11351_v7  ;;  %v6850_v17 = vunpack.c.h.bf16 %v9549_v1  ;;  %v7186_v1 = vld [vmem:[%s10771_s2 + $0x300] sm:$0xff]  }
 0x2d1   : > { %3077 = vrot.lane.b32.xlu1 %v3007_v6, %s7302_s11  ;;  %v3010_v6 = vpack.c.bf16 %v2978_v38, %v2978_v38  ;;  %v7177_v38 = vld [vmem:[%s10771_s2 + $0x2b8] sm:$0xff]  }
 0x2d2   : > { %v2976_v45 = vmul.f32 %v6850_v17, %v11354_v33  ;;  %v6902_v17 = vunpack.c.h.bf16 %v7186_v1 }
 0x2d3   : > { %3075 = vrot.lane.b32.xlu0 %v3006_v37, %s7302_s11  ;;  %v2693_v36 = vpop.permute.xlu1 %2692  ;;  %v6861_v37 = vunpack.c.l.bf16 %v9584_v44 }
 0x2d4   : > { %v2695_v46 = vpop.permute.xlu2 %2694  ;;  %2760 = vst.msk [vmem:[#allocation2 + $0x23c] sm:$0xf] %vm575_vm3, %v2693_v36  ;;  %v2980_v36 = vmul.f32 %v6858_v60, %v11353_v49  ;;  %v6865_v60 = vunpack.c.l.bf16 %v7177_v38 }
 0x2d5   : > { %2761 = vst.msk [vmem:[#allocation2 + $0x250] sm:$0xf] %vm575_vm3, %v2695_v46  ;;  %v2691_v21 = vpop.permute.xlu0 %2690  ;;  %v2981_v46 = vmul.f32 %v6861_v37, %v11352_v42  ;;  %v6866_v37 = vunpack.c.h.bf16 %v7177_v38  ;;  %v3008_v38 = vpack.c.bf16 %v2976_v45, %v2976_v45 }
 0x2d6   : > { %2759 = vst.msk [vmem:[#allocation2 + $0x228] sm:$0xf] %vm575_vm3, %v2691_v21 }
 0x2d8   : > { %3067 = vrot.lane.b32.xlu2 %v3002_v19, %s7302_s11  ;;  %v3005_v19 = vpack.c.bf16 %v2973_v14, %v2973_v14 }
 0x2d9   : > { %3083 = vrot.lane.b32.xlu1 %v3010_v6, %s7302_s11  ;;  %v3013_v6 = vpack.c.bf16 %v2981_v46, %v2981_v46 }
 0x2db   : > { %3081 = vrot.lane.b32.xlu0 %v3009_v54, %s7302_s11  ;;  %v2699_v21 = vpop.permute.xlu1 %2698  ;;  %v3012_v54 = vpack.c.bf16 %v2980_v36, %v2980_v36 }
 0x2dc   : > { %v2775_v28 = vpop.permute.xlu2 %2774  ;;  %2763 = vst.msk [vmem:[#allocation2 + $0x278] sm:$0xf] %vm575_vm3, %v2699_v21  ;;  %v11356_v21 = vld [vmem:[#allocation128_spill] sm:$0xff] }
 0x2dd   : > { %2870 = vst.msk [vmem:[#allocation2 + $0x4] sm:$0xf] %vm575_vm3, %v2775_v28  ;;  %v2697_v52 = vpop.permute.xlu0 %2696  ;;  %v2984_v28 = vmul.f32 %v6866_v37, %v11355_v55  ;;  %v2983_v14 = vmul.f32 %v6865_v60, %v11356_v21  ;;  %v11357_v37 = vld [vmem:[#allocation129_spill] sm:$0xff]  ;;  %v3391_v60 = vmul.f32 %v6902_v17, %v11314_v34 }
 0x2de   : > { %2762 = vst.msk [vmem:[#allocation2 + $0x264] sm:$0xf] %vm575_vm3, %v2697_v52 }
 0x2df   : > { %v3016_v52 = vpack.c.bf16 %v2984_v28, %v2984_v28  ;;  %v3423_v28 = vpack.c.bf16 %v3391_v60, %v3391_v60 }
 0x2e0   : > { %3073 = vrot.lane.b32.xlu2 %v3005_v19, %s7302_s11  ;;  %v6857_v19 = vunpack.c.l.bf16 %v7175_v12  ;;  %v6862_v12 = vunpack.c.h.bf16 %v9584_v44  ;;  %v7218_v44 = vld [vmem:[%s10771_s2 + $0x400] sm:$0xff]  }
 0x2e1   : > { %3089 = vrot.lane.b32.xlu1 %v3013_v6, %s7302_s11  ;;  %v3015_v6 = vpack.c.bf16 %v2983_v14, %v2983_v14  ;;  %v11358_v14 = vld [vmem:[#allocation132_spill] sm:$0xff]  ;;  %v7030_v17 = vunpack.c.h.bf16 %v7218_v44 }
 0x2e2   : > { %v2982_v34 = vmul.f32 %v6862_v12, %v11358_v14 }
 0x2e3   : > { %3087 = vrot.lane.b32.xlu0 %v3012_v54, %s7302_s11  ;;  %v2779_v26 = vpop.permute.xlu1 %2778  ;;  %v2979_v54 = vmul.f32 %v6857_v19, %v11357_v37  ;;  %v6901_v19 = vunpack.c.l.bf16 %v7186_v1 }
 0x2e4   : > { %v2781_v46 = vpop.permute.xlu2 %2780  ;;  %2872 = vst.msk [vmem:[#allocation2 + $0x2c] sm:$0xf] %vm575_vm3, %v2779_v26 }
 0x2e5   : > { %2873 = vst.msk [vmem:[#allocation2 + $0x40] sm:$0xf] %vm575_vm3, %v2781_v46  ;;  %v2777_v36 = vpop.permute.xlu0 %2776  ;;  %v3011_v26 = vpack.c.bf16 %v2979_v54, %v2979_v54  ;;  %v11359_v54 = vld [vmem:[#allocation59_spill] sm:$0xff]  ;;  %v3390_v60 = vmul.f32 %v6901_v19, %v11309_v48  ;;  %v7219_v48 = vld [vmem:[%s10771_s2 + $0x408] sm:$0xff]  }
 0x2e6   : > { %2871 = vst.msk [vmem:[#allocation2 + $0x18] sm:$0xf] %vm575_vm3, %v2777_v36  ;;  %v7187_v36 = vld [vmem:[%s10771_s2 + $0x308] sm:$0xff]   ;;  %v7033_v19 = vunpack.c.l.bf16 %v7219_v48 }
 0x2e8   : > { %3079 = vrot.lane.b32.xlu2 %v3008_v38, %s7302_s11 }
 0x2e9   : > { %3095 = vrot.lane.b32.xlu1 %v3016_v52, %s7302_s11 }
 0x2eb   : > { %3093 = vrot.lane.b32.xlu0 %v3015_v6, %s7302_s11  ;;  %v2785_v41 = vpop.permute.xlu1 %2784  ;;  %v6905_v6 = vunpack.c.l.bf16 %v7187_v36 }
 0x2ec   : > { %v2787_v46 = vpop.permute.xlu2 %2786  ;;  %2875 = vst.msk [vmem:[#allocation2 + $0x68] sm:$0xf] %vm575_vm3, %v2785_v41 }
 0x2ed   : > { %2876 = vst.msk [vmem:[#allocation2 + $0x7c] sm:$0xf] %vm575_vm3, %v2787_v46  ;;  %v2783_v45 = vpop.permute.xlu0 %2782  ;;  %v3392_v46 = vmul.f32 %v6905_v6, %v11313_v40 }
 0x2ee   : > { %2874 = vst.msk [vmem:[#allocation2 + $0x54] sm:$0xf] %vm575_vm3, %v2783_v45  ;;  %v11360_v45 = vld [vmem:[#allocation60_spill] sm:$0xff] }
 0x2f0   : > { %3085 = vrot.lane.b32.xlu2 %v3011_v26, %s7302_s11  ;;  %v4041_v26 = vmul.f32 %v7030_v17, %v11344_v57  ;;  %v4042_v17 = vmul.f32 %v7033_v19, %v11351_v7  ;;  %v7034_v19 = vunpack.c.h.bf16 %v7219_v48 }
 0x2f1   : > { %3195 = vrot.lane.b32.xlu1 %v7370_v13, %s7302_s11  ;;  %v3014_v13 = vpack.c.bf16 %v2982_v34, %v2982_v34  ;;  %v3422_v34 = vpack.c.bf16 %v3390_v60, %v3390_v60 }
 0x2f3   : > { %3488 = vrot.lane.b32.xlu0 %v3423_v28, %s7303_s29  ;;  %v2791_v38 = vpop.permute.xlu1 %2790 }
 0x2f4   : > { %v2793_v41 = vpop.permute.xlu2 %2792  ;;  %2878 = vst.msk [vmem:[#allocation2 + $0xa4] sm:$0xf] %vm575_vm3, %v2791_v38  ;;  %v4073_v38 = vpack.c.bf16 %v4041_v26, %v4041_v26  ;;  %v6906_v26 = vunpack.c.h.bf16 %v7187_v36 }
 0x2f5   : > { %2879 = vst.msk [vmem:[#allocation2 + $0xb8] sm:$0xf] %vm575_vm3, %v2793_v41  ;;  %v2789_v52 = vpop.permute.xlu0 %2788  ;;  %v3424_v41 = vpack.c.bf16 %v3392_v46, %v3392_v46 }
 0x2f6   : > { %2877 = vst.msk [vmem:[#allocation2 + $0x90] sm:$0xf] %vm575_vm3, %v2789_v52 }
 0x2f8   : > { %3091 = vrot.lane.b32.xlu2 %v3014_v13, %s7302_s11  ;;  %v7029_v13 = vunpack.c.l.bf16 %v7218_v44  ;;  %v7188_v44 = vld [vmem:[%s10771_s2 + $0x310] sm:$0xff]  }
 0x2f9   : > { %3642 = vrot.lane.b32.xlu1 %v11359_v54, %s7303_s29  ;;  %v11361_v54 = vld [vmem:[#allocation5_spill] sm:$0xff]  ;;  %v6909_v7 = vunpack.c.l.bf16 %v7188_v44 }
 0x2fa   : > { %v4040_v6 = vmul.f32 %v7029_v13, %v11345_v43  ;;  %v6910_v43 = vunpack.c.h.bf16 %v7188_v44  ;;  %v11364_v44 = vld [vmem:[#allocation62_spill] sm:$0xff] }
 0x2fb   : > { %3640 = vrot.lane.b32.xlu0 %v11360_v45, %s7303_s29  ;;  %v2797_v1 = vpop.permute.xlu1 %2796 }
 0x2fc   : > { %v2799_v12 = vpop.permute.xlu2 %2798  ;;  %2881 = vst.msk [vmem:[#allocation2 + $0xe0] sm:$0xf] %vm575_vm3, %v2797_v1  ;;  %v3395_v1 = vmul.f32 %v6910_v43, %v11316_v39 }
 0x2fd   : > { %2882 = vst.msk [vmem:[#allocation2 + $0xf4] sm:$0xf] %vm575_vm3, %v2799_v12  ;;  %v2795_v28 = vpop.permute.xlu0 %2794  ;;  %v3393_v12 = vmul.f32 %v6906_v26, %v11312_v5  ;;  %v7220_v5 = vld [vmem:[%s10771_s2 + $0x410] sm:$0xff]  }
 0x2fe   : > { %2880 = vst.msk [vmem:[#allocation2 + $0xcc] sm:$0xf] %vm575_vm3, %v2795_v28  ;;  %v11362_v28 = vld [vmem:[#allocation63_spill] sm:$0xff] }
 0x300   : > { %3486 = vrot.lane.b32.xlu2 %v3422_v34, %s7303_s29  ;;  %v3394_v34 = vmul.f32 %v6909_v7, %v11317_v16 }
 0x301   : > { %3490 = vrot.lane.b32.xlu1 %v3424_v41, %s7303_s29 }
 0x303   : > { %4138 = vrot.lane.b32.xlu0 %v4073_v38, %s7301_s28  ;;  %v2803_v57 = vpop.permute.xlu1 %2802 }
 0x304   : > { %v2805_v40 = vpop.permute.xlu2 %2804  ;;  %2884 = vst.msk [vmem:[#allocation2 + $0x11c] sm:$0xf] %vm575_vm3, %v2803_v57  ;;  %v3427_v57 = vpack.c.bf16 %v3395_v1, %v3395_v1 }
 0x305   : > { %2885 = vst.msk [vmem:[#allocation2 + $0x130] sm:$0xf] %vm575_vm3, %v2805_v40  ;;  %v2801_v52 = vpop.permute.xlu0 %2800  ;;  %v3425_v40 = vpack.c.bf16 %v3393_v12, %v3393_v12 }
 0x306   : > { %2883 = vst.msk [vmem:[#allocation2 + $0x108] sm:$0xf] %vm575_vm3, %v2801_v52  ;;  %v3426_v52 = vpack.c.bf16 %v3394_v34, %v3394_v34 }
 0x308   : > { %3197 = vrot.lane.b32.xlu2 %v7380_v20, %s7302_s11  ;;  %v4072_v20 = vpack.c.bf16 %v4040_v6, %v4040_v6  ;;  %v7038_v6 = vunpack.c.h.bf16 %v7220_v5 }
 0x309   : > { %3201 = vrot.lane.b32.xlu1 %v7394_v29, %s7302_s11  ;;  %v4074_v29 = vpack.c.bf16 %v4042_v17, %v4042_v17  ;;  %v7037_v17 = vunpack.c.l.bf16 %v7220_v5 }
 0x30b   : > { %3199 = vrot.lane.b32.xlu0 %v11361_v54, %s7302_s11  ;;  %v2809_v46 = vpop.permute.xlu1 %2808  ;;  %v11363_v54 = vld [vmem:[#allocation61_spill] sm:$0xff] }
 0x30c   : > { %v2811_v60 = vpop.permute.xlu2 %2810  ;;  %2887 = vst.msk [vmem:[#allocation2 + $0x158] sm:$0xf] %vm575_vm3, %v2809_v46  ;;  %v4045_v46 = vmul.f32 %v7038_v6, %v11354_v33 }
 0x30d   : > { %2888 = vst.msk [vmem:[#allocation2 + $0x16c] sm:$0xf] %vm575_vm3, %v2811_v60  ;;  %v2807_v45 = vpop.permute.xlu0 %2806  ;;  %v4043_v60 = vmul.f32 %v7034_v19, %v11347_v51 }
 0x30e   : > { %2886 = vst.msk [vmem:[#allocation2 + $0x144] sm:$0xf] %vm575_vm3, %v2807_v45  ;;  %v11365_v45 = vld [vmem:[#allocation11_spill] sm:$0xff]  ;;  %v4077_v51 = vpack.c.bf16 %v4045_v46, %v4045_v46  ;;  %v11368_v46 = vld [vmem:[#allocation64_spill] sm:$0xff] }
 0x30f   : > { %v4075_v7 = vpack.c.bf16 %v4043_v60, %v4043_v60  ;;  %v6508_v60 = vld [vmem:[%s10770_s1 + $0xe8] sm:$0xff] }
 0x310   : > { %4136 = vrot.lane.b32.xlu2 %v4072_v20, %s7301_s28  ;;  %v4044_v20 = vmul.f32 %v7037_v17, %v11346_v11 }
 0x311   : > { %4140 = vrot.lane.b32.xlu1 %v4074_v29, %s7301_s28  ;;  %v7189_v29 = vld [vmem:[%s10771_s2 + $0x318] sm:$0xff]  }
 0x312   : > { %v4076_v33 = vpack.c.bf16 %v4044_v20, %v4044_v20  ;;  %v6914_v12 = vunpack.c.h.bf16 %v7189_v29  ;;  %v6913_v19 = vunpack.c.l.bf16 %v7189_v29  ;;  %v11370_v29 = vld [vmem:[#allocation66_spill] sm:$0xff] }
 0x313   : > { %3646 = vrot.lane.b32.xlu0 %v11362_v28, %s7303_s29  ;;  %v2815_v36 = vpop.permute.xlu1 %2814 }
 0x314   : > { %v2817_v41 = vpop.permute.xlu2 %2816  ;;  %2890 = vst.msk [vmem:[#allocation2 + $0x194] sm:$0xf] %vm575_vm3, %v2815_v36  ;;  %v3397_v11 = vmul.f32 %v6914_v12, %v11321_v15  ;;  %v6510_v36 = vld [vmem:[%s10770_s1 + $0xf8] sm:$0xff]  ;;  %v3396_v20 = vmul.f32 %v6913_v19, %v11315_v9  ;;  %v6507_v9 = vld [vmem:[%s10770_s1 + $0xe0] sm:$0xff] }
 0x315   : > { %2891 = vst.msk [vmem:[#allocation2 + $0x1a8] sm:$0xf] %vm575_vm3, %v2817_v41  ;;  %v2813_v38 = vpop.permute.xlu0 %2812  ;;  %5368 = vmatpush.bf16.msrb.mxu3 %v6510_v36  ;;  %v11367_v15 = vld [vmem:[#allocation10_spill] sm:$0xff]  ;;  %v6491_v36 = vld [vmem:[%s10770_s1 + $0x60] sm:$0xff] }
 0x316   : > { %2889 = vst.msk [vmem:[#allocation2 + $0x180] sm:$0xf] %vm575_vm3, %v2813_v38  ;;  %v3429_v41 = vpack.c.bf16 %v3397_v11, %v3397_v11  ;;  %v11366_v38 = vld [vmem:[#allocation8_spill] sm:$0xff]  ;;  %v6490_v19 = vld [vmem:[%s10770_s1 + $0x58] sm:$0xff] }
 0x318   : > { %3492 = vrot.lane.b32.xlu2 %v3425_v40, %s7303_s29  ;;  %v9727_v40 = vld [vmem:[%s10771_s2 + $0x320] sm:$0xff]  }
 0x319   : > { %3496 = vrot.lane.b32.xlu1 %v3427_v57, %s7303_s29  ;;  %v6502_v57 = vld [vmem:[%s10770_s1 + $0xb8] sm:$0xff]  ;;  %v6917_v6 = vunpack.c.l.bf16 %v9727_v40 }
 0x31a   : > { %5279 = vmatpush.bf16.msrb.mxu2 %v6502_v57 }
 0x31b   : > { %3494 = vrot.lane.b32.xlu0 %v3426_v52, %s7303_s29  ;;  %v2821_v16 = vpop.permute.xlu1 %2820  ;;  %v6509_v52 = vld [vmem:[%s10770_s1 + $0xf0] sm:$0xff] }
 0x31c   : > { %v2823_v39 = vpop.permute.xlu2 %2822  ;;  %2893 = vst.msk [vmem:[#allocation2 + $0x1d0] sm:$0xf] %vm575_vm3, %v2821_v16  ;;  %5369 = vmatpush.bf16.msrb.mxu3 %v6509_v52 }
 0x31d   : > { %2894 = vst.msk [vmem:[#allocation2 + $0x1e4] sm:$0xf] %vm575_vm3, %v2823_v39  ;;  %v2819_v13 = vpop.permute.xlu0 %2818  ;;  %v9738_v39 = vld [vmem:[%s10771_s2 + $0x418] sm:$0xff]  }
 0x31e   : > { %2892 = vst.msk [vmem:[#allocation2 + $0x1bc] sm:$0xf] %vm575_vm3, %v2819_v13  ;;  %v7042_v17 = vunpack.c.h.bf16 %v9738_v39 }
 0x320   : > { %3644 = vrot.lane.b32.xlu2 %v11363_v54, %s7303_s29  ;;  %v6494_v54 = vld [vmem:[%s10770_s1 + $0x78] sm:$0xff]  ;;  %5370 = vmatpush.bf16.msrb.mxu3 %v6508_v60 }
 0x321   : > { %3648 = vrot.lane.b32.xlu1 %v11364_v44, %s7303_s29  ;;  %v6501_v44 = vld [vmem:[%s10770_s1 + $0xb0] sm:$0xff]  ;;  %5190 = vmatpush.bf16.msrb.mxu1 %v6494_v54  ;;  %v11372_v54 = vld [vmem:[#allocation16_spill] sm:$0xff] }
 0x322   : > { %5280 = vmatpush.bf16.msrb.mxu2 %v6501_v44 }
 0x323   : > { %3205 = vrot.lane.b32.xlu0 %v11365_v45, %s7302_s11  ;;  %v2827_v26 = vpop.permute.xlu1 %2826  ;;  %v11369_v45 = vld [vmem:[#allocation65_spill] sm:$0xff] }
 0x324   : > { %v2829_v48 = vpop.permute.xlu2 %2828  ;;  %2896 = vst.msk [vmem:[#allocation2 + $0x20c] sm:$0xf] %vm575_vm3, %v2827_v26  ;;  %v4047_v26 = vmul.f32 %v7042_v17, %v11349_v32  ;;  %v3428_v32 = vpack.c.bf16 %v3396_v20, %v3396_v20  ;;  %5371 = vmatpush.bf16.msrb.mxu3 %v6507_v9  ;;  %v6504_v17 = vld [vmem:[%s10770_s1 + $0xc8] sm:$0xff]  ;;  %v6489_v20 = vld [vmem:[%s10770_s1 + $0x50] sm:$0xff] }
 0x325   : > { %2897 = vst.msk [vmem:[#allocation2 + $0x220] sm:$0xf] %vm575_vm3, %v2829_v48  ;;  %v2825_v43 = vpop.permute.xlu0 %2824  ;;  %v3398_v48 = vmul.f32 %v6917_v6, %v11320_v10  ;;  %v6497_v6 = vld [vmem:[%s10770_s1 + $0x90] sm:$0xff] }
 0x326   : > { %2895 = vst.msk [vmem:[#allocation2 + $0x1f8] sm:$0xf] %vm575_vm3, %v2825_v43  ;;  %v6493_v43 = vld [vmem:[%s10770_s1 + $0x70] sm:$0xff]  ;;  %v4079_v11 = vpack.c.bf16 %v4047_v26, %v4047_v26 }
 0x327   : > { %5191 = vmatpush.bf16.msrb.mxu1 %v6493_v43  ;;  %v3430_v12 = vpack.c.bf16 %v3398_v48, %v3398_v48  ;;  %v6496_v48 = vld [vmem:[%s10770_s1 + $0x88] sm:$0xff] }
 0x328   : > { %4142 = vrot.lane.b32.xlu2 %v4075_v7, %s7301_s28  ;;  %v6500_v7 = vld [vmem:[%s10770_s1 + $0xa8] sm:$0xff] }
 0x329   : > { %4146 = vrot.lane.b32.xlu1 %v4077_v51, %s7301_s28  ;;  %5281 = vmatpush.bf16.msrb.mxu2 %v6500_v7 }
 0x32b   : > { %4144 = vrot.lane.b32.xlu0 %v4076_v33, %s7301_s28  ;;  %v2833_v28 = vpop.permute.xlu1 %2832 }
 0x32c   : > { %v2835_v1 = vpop.permute.xlu2 %2834  ;;  %2899 = vst.msk [vmem:[#allocation2 + $0x248] sm:$0xf] %vm575_vm3, %v2833_v28  ;;  %v6499_v28 = vld [vmem:[%s10770_s1 + $0xa0] sm:$0xff] }
 0x32d   : > { %2900 = vst.msk [vmem:[#allocation2 + $0x25c] sm:$0xf] %vm575_vm3, %v2835_v1  ;;  %v2831_v34 = vpop.permute.xlu0 %2830  ;;  %v6492_v1 = vld [vmem:[%s10770_s1 + $0x68] sm:$0xff]  ;;  %5282 = vmatpush.bf16.msrb.mxu2 %v6499_v28 }
 0x32e   : > { %2898 = vst.msk [vmem:[#allocation2 + $0x234] sm:$0xf] %vm575_vm3, %v2831_v34  ;;  %v6506_v34 = vld [vmem:[%s10770_s1 + $0xd8] sm:$0xff]  ;;  %5192 = vmatpush.bf16.msrb.mxu1 %v6492_v1  ;;  %v6488_v28 = vld [vmem:[%s10770_s1 + $0x48] sm:$0xff] }
 0x32f   : > { %5372 = vmatpush.bf16.msrb.mxu3 %v6506_v34  ;;  %v6495_v34 = vld [vmem:[%s10770_s1 + $0x80] sm:$0xff] }
 0x330   : > { %3203 = vrot.lane.b32.xlu2 %v11366_v38, %s7302_s11  ;;  %v6498_v38 = vld [vmem:[%s10770_s1 + $0x98] sm:$0xff] }
 0x331   : > { %3207 = vrot.lane.b32.xlu1 %v11367_v15, %s7302_s11  ;;  %v6505_v15 = vld [vmem:[%s10770_s1 + $0xd0] sm:$0xff]  ;;  %5283 = vmatpush.bf16.msrb.mxu2 %v6498_v38 }
 0x332   : > { %5193 = vmatpush.bf16.msrb.mxu1 %v6491_v36 }
 0x333   : > { %3500 = vrot.lane.b32.xlu0 %v3429_v41, %s7303_s29  ;;  %v3066_v16 = vpop.permute.xlu1 %3065  ;;  %v9789_v41 = vld [vmem:[%s10771_s2 + $0x420] sm:$0xff]   ;;  %5373 = vmatpush.bf16.msrb.mxu3 %v6505_v15  ;;  %v11375_v15 = vld [vmem:[#allocation69_spill] sm:$0xff] }
 0x334   : > { %v3068_v5 = vpop.permute.xlu2 %3067  ;;  %3161 = vst.msk [vmem:[#allocation2 + $0xc] sm:$0xf] %vm1444_vm8, %v3066_v16  ;;  %v7041_v16 = vunpack.c.l.bf16 %v9738_v39  ;;  %v11371_v39 = vld [vmem:[#allocation14_spill] sm:$0xff] }
 0x335   : > { %3162 = vst.msk [vmem:[#allocation2 + $0x20] sm:$0xf] %vm1444_vm8, %v3068_v5  ;;  %v2837_v13 = vpop.permute.xlu0 %2836  ;;  %5284 = vmatpush.bf16.msrb.mxu2 %v6497_v6 }
 0x336   : > { %2901 = vst.msk [vmem:[#allocation2 + $0x270] sm:$0xf] %vm575_vm3, %v2837_v13  ;;  %v7045_v13 = vunpack.c.l.bf16 %v9789_v41  ;;  %5194 = vmatpush.bf16.msrb.mxu1 %v6490_v19  ;;  %v4046_v44 = vmul.f32 %v7041_v16, %v11350_v58  ;;  %v6503_v58 = vld [vmem:[%s10770_s1 + $0xc0] sm:$0xff] }
 0x337   : > { %5374 = vmatpush.bf16.msrb.mxu3 %v6504_v17 }
 0x338   : > { %3650 = vrot.lane.b32.xlu2 %v11368_v46, %s7303_s29  ;;  %v4048_v60 = vmul.f32 %v7045_v13, %v11357_v37  ;;  %v7191_v46 = vld [vmem:[%s10771_s2 + $0x328] sm:$0xff]   ;;  %v4078_v9 = vpack.c.bf16 %v4046_v44, %v4046_v44 }
 0x339   : > { %3654 = vrot.lane.b32.xlu1 %v11369_v45, %s7303_s29  ;;  %v11373_v45 = vld [vmem:[#allocation17_spill] sm:$0xff]  ;;  %5285 = vmatpush.bf16.msrb.mxu2 %v6496_v48  ;;  %v11376_v44 = vld [vmem:[#allocation88_spill] sm:$0xff] }
 0x33a   : > { %5195 = vmatpush.bf16.msrb.mxu1 %v6489_v20  ;;  %v7223_v20 = vld [vmem:[%s10771_s2 + $0x428] sm:$0xff]  }
 0x33b   : > { %3652 = vrot.lane.b32.xlu0 %v11370_v29, %s7303_s29  ;;  %v3072_v10 = vpop.permute.xlu1 %3071  ;;  %v7202_v29 = vld [vmem:[%s10771_s2 + $0x380] sm:$0xff]   ;;  %5375 = vmatpush.bf16.msrb.mxu3 %v6503_v58 }
 0x33c   : > { %v3074_v51 = vpop.permute.xlu2 %3073  ;;  %3164 = vst.msk [vmem:[#allocation2 + $0x48] sm:$0xf] %vm1444_vm8, %v3072_v10  ;;  %v6965_v7 = vunpack.c.l.bf16 %v7202_v29  ;;  %v6918_v10 = vunpack.c.h.bf16 %v9727_v40  ;;  %v6514_v40 = vld [vmem:[%s10770_s1 + $0x118] sm:$0xff]  ;;  %v6511_v58 = vld [vmem:[%s10770_s1 + $0x100] sm:$0xff] }
 0x33d   : > { %3165 = vst.msk [vmem:[#allocation2 + $0x5c] sm:$0xf] %vm1444_vm8, %v3074_v51  ;;  %v3070_v33 = vpop.permute.xlu0 %3069  ;;  %v4080_v51 = vpack.c.bf16 %v4048_v60, %v4048_v60  ;;  %5286 = vmatpush.bf16.msrb.mxu2 %v6495_v34  ;;  %5461 = vmatpush.bf16.msrb.mxu0 %v6514_v40 }
 0x33e   : > { %3163 = vst.msk [vmem:[#allocation2 + $0x34] sm:$0xf] %vm1444_vm8, %v3070_v33  ;;  %v6922_v33 = vunpack.c.h.bf16 %v7191_v46  ;;  %v3399_v36 = vmul.f32 %v6918_v10, %v11319_v8  ;;  %5196 = vmatpush.bf16.msrb.mxu1 %v6488_v28  ;;  %v6487_v8 = vld [vmem:[%s10770_s1 + $0x40] sm:$0xff] }
 0x340   : > { %3498 = vrot.lane.b32.xlu2 %v3428_v32, %s7303_s29  ;;  %v6921_v32 = vunpack.c.l.bf16 %v7191_v46  ;;  %v3401_v38 = vmul.f32 %v6922_v33, %v11323_v61  ;;  %v6513_v61 = vld [vmem:[%s10770_s1 + $0x110] sm:$0xff]  ;;  %v3431_v6 = vpack.c.bf16 %v3399_v36, %v3399_v36  ;;  %v6512_v46 = vld [vmem:[%s10770_s1 + $0x108] sm:$0xff] }
 0x341   : > { %3502 = vrot.lane.b32.xlu1 %v3430_v12, %s7303_s29  ;;  %v11374_v12 = vld [vmem:[#allocation92_spill] sm:$0xff]  ;;  %5462 = vmatpush.bf16.msrb.mxu0 %v6513_v61  ;;  %v5947_v61 = vld [vmem:[#allocation2 + $0x30] sm:$0xf] }
 0x342   : > { %v3433_v17 = vpack.c.bf16 %v3401_v38, %v3401_v38  ;;  %5197 = vmatpush.bf16.msrb.mxu1 %v6487_v8 }
 0x343   : > { %4150 = vrot.lane.b32.xlu0 %v4079_v11, %s7301_s28  ;;  %v3078_v52 = vpop.permute.xlu1 %3077  ;;  %v3835_v11 = vmul.f32 %v6965_v7, %v11374_v12  ;;  %v7049_v7 = vunpack.c.l.bf16 %v7223_v20  ;;  %v7203_v12 = vld [vmem:[%s10771_s2 + $0x388] sm:$0xff]  }
 0x344   : > { %v3080_v57 = vpop.permute.xlu2 %3079  ;;  %3167 = vst.msk [vmem:[#allocation2 + $0x84] sm:$0xf] %vm1444_vm8, %v3078_v52  ;;  %v5927_v52 = vld [vmem:[#allocation2 + $0x8] sm:$0xf]  ;;  %v6970_v28 = vunpack.c.h.bf16 %v7203_v12 }
 0x345   : > { %3168 = vst.msk [vmem:[#allocation2 + $0x98] sm:$0xf] %vm1444_vm8, %v3080_v57  ;;  %v3076_v5 = vpop.permute.xlu0 %3075  ;;  %v3867_v1 = vpack.c.bf16 %v3835_v11, %v3835_v11  ;;  %v3400_v57 = vmul.f32 %v6921_v32, %v11324_v0  ;;  %5463 = vmatpush.bf16.msrb.mxu0 %v6512_v46  ;;  %v11379_v32 = vld [vmem:[#allocation23_spill] sm:$0xff] }
 0x346   : > { %3166 = vst.msk [vmem:[#allocation2 + $0x70] sm:$0xf] %vm1444_vm8, %v3076_v5  ;;  %v6402_v5 = vld [vmem:[#allocation2 + $0x18] sm:$0xf0] }
 0x347   : > { %3899 = vst.msk [vmem:[#allocation2 + $0x10] sm:$0xf] %vm254_vm4, %v3867_v1  ;;  %v5928_v13 = vor.u32 %v6402_v5, %v5927_v52  ;;  %v7192_v1 = vld [vmem:[%s10771_s2 + $0x330] sm:$0xff]  }
 0x348   : > { %3209 = vrot.lane.b32.xlu2 %v11371_v39, %s7302_s11  ;;  %v6966_v39 = vunpack.c.h.bf16 %v7202_v29  ;;  %v11381_v52 = vld [vmem:[#allocation89_spill] sm:$0xff] }
 0x349   : > { %3213 = vrot.lane.b32.xlu1 %v11372_v54, %s7302_s11  ;;  %v3432_v54 = vpack.c.bf16 %v3400_v57, %v3400_v57  ;;  %5287 = vmatmul.bf16.vlgmr.msrb.gmra.mxu2 %v5928_v13  ;;  %v6926_v57 = vunpack.c.h.bf16 %v7192_v1 }
 0x34a   : > { %v3836_v60 = vmul.f32 %v6966_v39, %v11376_v44  ;;  %5464 = vmatpush.bf16.msrb.mxu0 %v6511_v58  ;;  %v9929_v58 = vld [vmem:[%s10771_s2 + $0x430] sm:$0xff]  }
 0x34b   : > { %3211 = vrot.lane.b32.xlu0 %v11373_v45, %s7302_s11  ;;  %v3084_v26 = vpop.permute.xlu1 %3083  ;;  %v3403_v8 = vmul.f32 %v6926_v57, %v11327_v47  ;;  %v11382_v47 = vld [vmem:[#allocation20_spill] sm:$0xff] }
 0x34c   : > { %v3086_v37 = vpop.permute.xlu2 %3085  ;;  %3170 = vst.msk [vmem:[#allocation2 + $0xc0] sm:$0xf] %vm1444_vm8, %v3084_v26  ;;  %v3868_v45 = vpack.c.bf16 %v3836_v60, %v3836_v60  ;;  %v7046_v26 = vunpack.c.h.bf16 %v9789_v41  ;;  %v4050_v41 = vmul.f32 %v7049_v7, %v11352_v42  ;;  %v11380_v42 = vld [vmem:[#allocation95_spill] sm:$0xff] }
 0x34d   : > { %3171 = vst.msk [vmem:[#allocation2 + $0xd4] sm:$0xf] %vm1444_vm8, %v3086_v37  ;;  %v3082_v43 = vpop.permute.xlu0 %3081  ;;  %v3838_v38 = vmul.f32 %v6970_v28, %v11380_v42  ;;  %v3435_v46 = vpack.c.bf16 %v3403_v8, %v3403_v8  ;;  %v7204_v42 = vld [vmem:[%s10771_s2 + $0x390] sm:$0xff]   ;;  %v11387_v8 = vld [vmem:[#allocation91_spill] sm:$0xff] }
 0x34e   : > { %3169 = vst.msk [vmem:[#allocation2 + $0xac] sm:$0xf] %vm1444_vm8, %v3082_v43  ;;  %v7050_v43 = vunpack.c.h.bf16 %v7223_v20  ;;  %v4049_v10 = vmul.f32 %v7046_v26, %v11353_v49  ;;  %v9924_v20 = vld [vmem:[%s10771_s2 + $0x338] sm:$0xff]   ;;  %v6974_v57 = vunpack.c.h.bf16 %v7204_v42 }
 0x34f   : > { %3900 = vst.msk [vmem:[#allocation2 + $0x24] sm:$0xf] %vm254_vm4, %v3868_v45  ;;  %v11383_v45 = vld [vmem:[#allocation22_spill] sm:$0xff] }
 0x350   : > { %4148 = vrot.lane.b32.xlu2 %v4078_v9, %s7301_s28  ;;  %v11377_v9 = vld [vmem:[#allocation67_spill] sm:$0xff]  ;;  %v4051_v33 = vmul.f32 %v7050_v43, %v11358_v14  ;;  %v6969_v14 = vunpack.c.l.bf16 %v7203_v12  ;;  %v4081_v40 = vpack.c.bf16 %v4049_v10, %v4049_v10  ;;  %v6925_v43 = vunpack.c.l.bf16 %v7192_v1 }
 0x351   : > { %4152 = vrot.lane.b32.xlu1 %v4080_v51, %s7301_s28  ;;  %v11378_v51 = vld [vmem:[#allocation68_spill] sm:$0xff]  ;;  %v7054_v10 = vunpack.c.h.bf16 %v9929_v58 }
 0x352   : > { %v4083_v36 = vpack.c.bf16 %v4051_v33, %v4051_v33  ;;  %v3837_v5 = vmul.f32 %v6969_v14, %v11381_v52  ;;  %v3402_v33 = vmul.f32 %v6925_v43, %v11322_v59  ;;  %v5967_v52 = vld [vmem:[#allocation2 + $0x58] sm:$0xf]  ;;  %v11391_v43 = vld [vmem:[#allocation27_spill] sm:$0xff] }
 0x353   : > { %3658 = vrot.lane.b32.xlu0 %v11375_v15, %s7303_s29  ;;  %v3090_v0 = vpop.permute.xlu1 %3089  ;;  %v4082_v15 = vpack.c.bf16 %v4050_v41, %v4050_v41  ;;  %v11385_v41 = vld [vmem:[#allocation71_spill] sm:$0xff]  ;;  %v4053_v1 = vmul.f32 %v7054_v10, %v11355_v55  ;;  %v6973_v55 = vunpack.c.l.bf16 %v7204_v42 }
 0x354   : > { %v3092_v16 = vpop.permute.xlu2 %3091  ;;  %3173 = vst.msk [vmem:[#allocation2 + $0xfc] sm:$0xf] %vm1444_vm8, %v3090_v0  ;;  %v3869_v13 = vpack.c.bf16 %v3837_v5, %v3837_v5  ;;  %v6407_v0 = vld [vmem:[#allocation2 + $0x40] sm:$0xf0]  ;;  %v3434_v59 = vpack.c.bf16 %v3402_v33, %v3402_v33 }
 0x355   : > { %3174 = vst.msk [vmem:[#allocation2 + $0x110] sm:$0xf] %vm1444_vm8, %v3092_v16  ;;  %v3088_v19 = vpop.permute.xlu0 %3087  ;;  %v3870_v16 = vpack.c.bf16 %v3838_v38, %v3838_v38 }
 0x356   : > { %3172 = vst.msk [vmem:[#allocation2 + $0xe8] sm:$0xf] %vm1444_vm8, %v3088_v19 }
 0x357   : > { %3902 = vst.msk [vmem:[#allocation2 + $0x4c] sm:$0xf] %vm254_vm4, %v3870_v16  ;;  %v4085_v16 = vpack.c.bf16 %v4053_v1, %v4053_v1 }
 0x358   : > { %3504 = vrot.lane.b32.xlu2 %v3431_v6, %s7303_s29  ;;  %3901 = vst.msk [vmem:[#allocation2 + $0x38] sm:$0xf] %vm254_vm4, %v3869_v13  ;;  %v5948_v6 = vor.u32 %v6407_v0, %v5947_v61  ;;  %v6412_v13 = vld [vmem:[#allocation2 + $0x68] sm:$0xf0]  ;;  %v3840_v61 = vmul.f32 %v6974_v57, %v11387_v8 }
 0x359   : > { %3508 = vrot.lane.b32.xlu1 %v3433_v17, %s7303_s29  ;;  %v5968_v0 = vor.u32 %v6412_v13, %v5967_v52  ;;  %v10000_v13 = vld [vmem:[%s10771_s2 + $0x340] sm:$0xff]  }
 0x35a   : > { %5292 = vmatmul.bf16.gmra.mxu2 %v5948_v6 }
 0x35b   : > { %3506 = vrot.lane.b32.xlu0 %v3432_v54, %s7303_s29  ;;  %v3096_v37 = vpop.permute.xlu1 %3095 }
 0x35c   : > { %v3487_v48 = vpop.permute.xlu2 %3486  ;;  %3176 = vst.msk [vmem:[#allocation2 + $0x138] sm:$0xf] %vm1444_vm8, %v3096_v37 }
 0x35d   : > { %3582 = vst.msk [vmem:[#allocation2 + $0xc] sm:$0xf] %vm2089_vm9, %v3487_v48  ;;  %v3094_v29 = vpop.permute.xlu0 %3093 }
 0x35e   : > { %3175 = vst.msk [vmem:[#allocation2 + $0x124] sm:$0xf] %vm1444_vm8, %v3094_v29 }
 0x360   : > { %3656 = vrot.lane.b32.xlu2 %v11377_v9, %s7303_s29  ;;  %v6929_v9 = vunpack.c.l.bf16 %v9924_v20 }
 0x361   : > { %3660 = vrot.lane.b32.xlu1 %v11378_v51, %s7303_s29 }
 0x362   : > { %v3404_v12 = vmul.f32 %v6929_v9, %v11326_v2  ;;  %v7205_v9 = vld [vmem:[%s10771_s2 + $0x398] sm:$0xff]  }
 0x363   : > { %3217 = vrot.lane.b32.xlu0 %v11379_v32, %s7302_s11  ;;  %v3196_v49 = vpop.permute.xlu1 %3195  ;;  %v11384_v32 = vld [vmem:[#allocation70_spill] sm:$0xff]  ;;  %v6977_v10 = vunpack.c.l.bf16 %v7205_v9 }
 0x364   : > { %v3198_v11 = vpop.permute.xlu2 %3197  ;;  %3291 = vst.msk [vmem:[#allocation2 + $0x4] sm:$0xf] %vm1444_vm8, %v3196_v49  ;;  %v6400_v54 = vld [vmem:[#allocation2 + $0xc] sm:$0xf] }
 0x365   : > { %3292 = vst.msk [vmem:[#allocation2 + $0x18] sm:$0xf] %vm1444_vm8, %v3198_v11  ;;  %v3489_v34 = vpop.permute.xlu0 %3488  ;;  %v11386_v11 = vld [vmem:[#allocation72_spill] sm:$0xff] }
 0x366   : > { %3583 = vst.msk [vmem:[#allocation2 + $0x20] sm:$0xf] %vm2089_vm9, %v3489_v34 }
 0x368   : > { %4154 = vrot.lane.b32.xlu2 %v4081_v40, %s7301_s28 }
 0x369   : > { %4158 = vrot.lane.b32.xlu1 %v4083_v36, %s7301_s28 }
 0x36a   : > { %5297 = vmatmul.bf16.gmra.mxu2 %v5968_v0 }
 0x36b   : > { %4156 = vrot.lane.b32.xlu0 %v4082_v15, %s7301_s28  ;;  %v3643_v17 = vpop.permute.xlu1 %3642  ;;  %v3436_v15 = vpack.c.bf16 %v3404_v12, %v3404_v12 }
 0x36c   : > { %v4137_v19 = vpop.permute.xlu2 %4136  ;;  %3737 = vst.msk [vmem:[#allocation2 + $0x18] sm:$0xf] %vm2089_vm9, %v3643_v17  ;;  %v9959_v17 = vld [vmem:[%s10771_s2 + $0x438] sm:$0xff]  }
 0x36d   : > { %4232 = vst.msk [vmem:[#allocation2 + $0x10] sm:$0xf] %vm575_vm3, %v4137_v19  ;;  %v3641_v39 = vpop.permute.xlu0 %3640  ;;  %v5929_v44 = vld [vmem:[#allocation2 + $0x1c] sm:$0xf0]  ;;  %v11388_v19 = vld [vmem:[#allocation90_spill] sm:$0xff] }
 0x36e   : > { %3736 = vst.msk [vmem:[#allocation2 + $0x4] sm:$0xf] %vm2089_vm9, %v3641_v39  ;;  %v5932_v60 = vor.u32 %v6400_v54, %v5929_v44  ;;  %v3839_v6 = vmul.f32 %v6973_v55, %v11388_v19  ;;  %v3872_v39 = vpack.c.bf16 %v3840_v61, %v3840_v61  ;;  %v5987_v55 = vld [vmem:[#allocation2 + $0x80] sm:$0xf] }
 0x370   : > { %5376 = vmatmul.bf16.vlgmr.msrb.gmra.mxu3 %v5932_v60  ;;  %3215 = vrot.lane.b32.xlu2 %v11382_v47, %s7302_s11  ;;  %3904 = vst.msk [vmem:[#allocation2 + $0x74] sm:$0xf] %vm254_vm4, %v3872_v39  ;;  %v3871_v44 = vpack.c.bf16 %v3839_v6, %v3839_v6  ;;  %v7053_v47 = vunpack.c.l.bf16 %v9929_v58  ;;  %v11392_v58 = vld [vmem:[#allocation29_spill] sm:$0xff] }
 0x371   : > { %3219 = vrot.lane.b32.xlu1 %v11383_v45, %s7302_s11  ;;  %v7057_v45 = vunpack.c.l.bf16 %v9959_v17 }
 0x372   : > { %3903 = vst.msk [vmem:[#allocation2 + $0x60] sm:$0xf] %vm254_vm4, %v3871_v44 }
 0x373   : > { %3512 = vrot.lane.b32.xlu0 %v3435_v46, %s7303_s29  ;;  %v3491_v37 = vpop.permute.xlu1 %3490  ;;  %v5921_v26 = vld [vmem:[#allocation2 + $0x14] sm:$0xf0] }
 0x374   : > { %v3493_v48 = vpop.permute.xlu2 %3492  ;;  %3584 = vst.msk [vmem:[#allocation2 + $0x34] sm:$0xf] %vm2089_vm9, %v3491_v37  ;;  %v5935_v36 = vld [vmem:[#allocation2 + $0x10] sm:$0xf]  ;;  %v11389_v37 = vld [vmem:[#allocation135_spill] sm:$0xff] }
 0x375   : > { %3585 = vst.msk [vmem:[#allocation2 + $0x48] sm:$0xf] %vm2089_vm9, %v3493_v48  ;;  %v4139_v29 = vpop.permute.xlu0 %4138  ;;  %v6399_v7 = vld [vmem:[#allocation2 + $0x4] sm:$0xf]  ;;  %v4052_v48 = vmul.f32 %v7053_v47, %v11356_v21  ;;  %v11396_v47 = vld [vmem:[#allocation93_spill] sm:$0xff] }
 0x376   : > { %4233 = vst.msk [vmem:[#allocation2 + $0x24] sm:$0xf] %vm575_vm3, %v4139_v29  ;;  %v5924_v51 = vor.u32 %v6399_v7, %v5921_v26  ;;  %v4054_v29 = vmul.f32 %v7057_v45, %v11389_v37  ;;  %v11390_v26 = vld [vmem:[#allocation26_spill] sm:$0xff]  ;;  %v7178_v7 = vld [vmem:[%s10771_s2 + $0x2c0] sm:$0xff]  }
 0x377   : > { %v4084_v12 = vpack.c.bf16 %v4052_v48, %v4052_v48  ;;  %v6869_v42 = vunpack.c.l.bf16 %v7178_v7 }
 0x378   : > { %5198 = vmatmul.bf16.vlgmr.msrb.gmra.mxu1 %v5924_v51  ;;  %3662 = vrot.lane.b32.xlu2 %v11384_v32, %s7303_s29 }
 0x379   : > { %3666 = vrot.lane.b32.xlu1 %v11385_v41, %s7303_s29  ;;  %v2985_v52 = vmul.f32 %v6869_v42, %v11389_v37 }
 0x37b   : > { %3664 = vrot.lane.b32.xlu0 %v11386_v11, %s7303_s29  ;;  %v3202_v34 = vpop.permute.xlu1 %3201  ;;  %v6405_v40 = vld [vmem:[#allocation2 + $0x34] sm:$0xf]  ;;  %v4086_v11 = vpack.c.bf16 %v4054_v29, %v4054_v29 }
 0x37c   : > { %v3645_v28 = vpop.permute.xlu2 %3644  ;;  %v5949_v49 = vld [vmem:[#allocation2 + $0x44] sm:$0xf0]  ;;  %3294 = vst.msk [vmem:[#allocation2 + $0x40] sm:$0xf] %vm1444_vm8, %v3202_v34  ;;  %v6930_v34 = vunpack.c.h.bf16 %v9924_v20  ;;  %v11395_v20 = vld [vmem:[#allocation75_spill] sm:$0xff] }
 0x37d   : > { %v3200_v14 = vpop.permute.xlu0 %3199  ;;  %v5952_v2 = vor.u32 %v6405_v40, %v5949_v49  ;;  %v6403_v38 = vld [vmem:[#allocation2 + $0x20] sm:$0xf0]  ;;  %v11393_v40 = vld [vmem:[#allocation98_spill] sm:$0xff] }
 0x37e   : > { %3293 = vst.msk [vmem:[#allocation2 + $0x2c] sm:$0xf] %vm1444_vm8, %v3200_v14  ;;  %v5936_v5 = vor.u32 %v6403_v38, %v5935_v36  ;;  %v6870_v14 = vunpack.c.h.bf16 %v7178_v7  ;;  %v3841_v36 = vmul.f32 %v6977_v10, %v11393_v40  ;;  %v3405_v38 = vmul.f32 %v6930_v34, %v11325_v25 }
 0x37f   : > { %3738 = vst.msk [vmem:[#allocation2 + $0x2c] sm:$0xf] %vm2089_vm9, %v3645_v28  ;;  %v7058_v7 = vunpack.c.h.bf16 %v9959_v17  ;;  %v10025_v17 = vld [vmem:[%s10771_s2 + $0x2c8] sm:$0xff]  }
 0x380   : > { %5381 = vmatmul.bf16.gmra.mxu3 %v5952_v2  ;;  %6381 = vmatmul.msk.bf16.vlgmr.msrb.gmra.mxu0 %vm5052_vm10, %v5936_v5  ;;  %v3873_v2 = vpack.c.bf16 %v3841_v36, %v3841_v36  ;;  %v6417_v5 = vld [vmem:[#allocation2 + $0x90] sm:$0xf0]  ;;  %v3437_v6 = vpack.c.bf16 %v3405_v38, %v3405_v38  ;;  %v6873_v42 = vunpack.c.l.bf16 %v10025_v17 }
 0x381   : > { %3510 = vrot.lane.b32.xlu2 %v3434_v59, %s7303_s29  ;;  %3514 = vrot.lane.b32.xlu1 %v3436_v15, %s7303_s29  ;;  %v11394_v15 = vld [vmem:[#allocation131_spill] sm:$0xff]  ;;  %v5988_v8 = vor.u32 %v6417_v5, %v5987_v55  ;;  %v10045_v55 = vpop.f32.mrf.mxu1 }
 0x382   : > { %v2986_v57 = vmul.f32 %v6870_v14, %v11394_v15  ;;  %3905 = vst.msk [vmem:[#allocation2 + $0x88] sm:$0xf] %vm254_vm4, %v3873_v2  ;;  %v4055_v10 = vmul.f32 %v7058_v7, %v11394_v15  ;;  %v11399_v2 = vld [vmem:[#allocation101_spill] sm:$0xff] }
 0x383   : > { %4162 = vrot.lane.b32.xlu0 %v4085_v16, %s7301_s28  ;;  %v4141_v60 = vpop.permute.xlu1 %4140  ;;  %5302 = vmatmul.bf16.gmra.mxu2 %v5988_v8  ;;  %v11401_v8 = vld [vmem:[#allocation130_spill] sm:$0xff] }
 0x384   : > { %v4143_v54 = vpop.permute.xlu2 %4142  ;;  %4234 = vst.msk [vmem:[#allocation2 + $0x38] sm:$0xf] %vm575_vm3, %v4141_v60  ;;  %v3018_v39 = vpack.c.bf16 %v2986_v57, %v2986_v57  ;;  %v3017_v60 = vpack.c.bf16 %v2985_v52, %v2985_v52  ;;  %v4087_v36 = vpack.c.bf16 %v4055_v10, %v4055_v10 }
 0x385   : > { %4235 = vst.msk [vmem:[#allocation2 + $0x4c] sm:$0xf] %vm575_vm3, %v4143_v54  ;;  %v3647_v46 = vpop.permute.xlu0 %3646  ;;  %v6978_v54 = vunpack.c.h.bf16 %v7205_v9 }
 0x386   : > { %3739 = vst.msk [vmem:[#allocation2 + $0x40] sm:$0xf] %vm2089_vm9, %v3647_v46  ;;  %v6404_v1 = vld [vmem:[#allocation2 + $0x2c] sm:$0xf]  ;;  %v6934_v46 = vunpack.c.h.bf16 %v10000_v13 }
 0x387   : > { %v3842_v45 = vmul.f32 %v6978_v54, %v11396_v47  ;;  %v6422_v54 = vld [vmem:[#allocation2 + $0xb8] sm:$0xf0] }
 0x388   : > { %v3407_v37 = vmul.f32 %v6934_v46, %v11329_v18  ;;  %v11397_v18 = vld [vmem:[#allocation73_spill] sm:$0xff] }
 0x389   : > { %3221 = vrot.lane.b32.xlu2 %v11390_v26, %s7302_s11  ;;  %3225 = vrot.lane.b32.xlu1 %v11391_v43, %s7302_s11  ;;  %v3874_v48 = vpack.c.bf16 %v3842_v45, %v3842_v45 }
 0x38b   : > { %3223 = vrot.lane.b32.xlu0 %v11392_v58, %s7302_s11  ;;  %v3497_v33 = vpop.permute.xlu1 %3496  ;;  %v5955_v41 = vld [vmem:[#allocation2 + $0x38] sm:$0xf]  ;;  %3906 = vst.msk [vmem:[#allocation2 + $0x9c] sm:$0xf] %vm254_vm4, %v3874_v48 }
 0x38c   : > { %v3204_v21 = vpop.permute.xlu2 %3203  ;;  %v6408_v51 = vld [vmem:[#allocation2 + $0x48] sm:$0xf0]  ;;  %3587 = vst.msk [vmem:[#allocation2 + $0x70] sm:$0xf] %vm2089_vm9, %v3497_v33 }
 0x38d   : > { %3295 = vst.msk [vmem:[#allocation2 + $0x54] sm:$0xf] %vm1444_vm8, %v3204_v21  ;;  %v3495_v32 = vpop.permute.xlu0 %3494  ;;  %v5941_v28 = vld [vmem:[#allocation2 + $0x3c] sm:$0xf0]  ;;  %v5956_v49 = vor.u32 %v6408_v51, %v5955_v41  ;;  %v3439_v21 = vpack.c.bf16 %v3407_v37, %v3407_v37  ;;  %v11398_v33 = vld [vmem:[#allocation32_spill] sm:$0xff]  ;;  %v10030_v41 = vpop.f32.mrf.mxu2 }
 0x38e   : > { %3586 = vst.msk [vmem:[#allocation2 + $0x5c] sm:$0xf] %vm2089_vm9, %v3495_v32  ;;  %v5944_v59 = vor.u32 %v6404_v1, %v5941_v28  ;;  %v7206_v32 = vld [vmem:[%s10771_s2 + $0x3a0] sm:$0xff]  }
 0x38f   : > { %v6982_v1 = vunpack.c.h.bf16 %v7206_v32  ;;  %v6981_v14 = vunpack.c.l.bf16 %v7206_v32 }
 0x390   : > { %5203 = vmatmul.bf16.gmra.mxu1 %v5944_v59  ;;  %6382 = vmatmul.msk.bf16.gmra.mxu0 %vm5052_vm10, %v5956_v49  ;;  %v6933_v59 = vunpack.c.l.bf16 %v10000_v13 }
 0x391   : > { %4160 = vrot.lane.b32.xlu2 %v4084_v12, %s7301_s28  ;;  %4164 = vrot.lane.b32.xlu1 %v4086_v11, %s7301_s28  ;;  %v10035_v11 = vld [vmem:[%s10771_s2 + $0x440] sm:$0xff]   ;;  %v3844_v38 = vmul.f32 %v6982_v1, %v11399_v2 }
 0x392   : > { %v7062_v57 = vunpack.c.h.bf16 %v10035_v11  ;;  %v3406_v13 = vmul.f32 %v6933_v59, %v11330_v31  ;;  %v7195_v31 = vld [vmem:[%s10771_s2 + $0x348] sm:$0xff]   ;;  %v11405_v2 = vld [vmem:[#allocation35_spill] sm:$0xff] }
 0x393   : > { %3670 = vrot.lane.b32.xlu0 %v11395_v20, %s7303_s29  ;;  %v3649_v61 = vpop.permute.xlu1 %3648  ;;  %v5969_v0 = vld [vmem:[#allocation2 + $0x6c] sm:$0xf0]  ;;  %v11400_v20 = vld [vmem:[#allocation94_spill] sm:$0xff]  ;;  %v3876_v5 = vpack.c.bf16 %v3844_v38, %v3844_v38 }
 0x394   : > { %v3651_v16 = vpop.permute.xlu2 %3650  ;;  %3740 = vst.msk [vmem:[#allocation2 + $0x54] sm:$0xf] %vm2089_vm9, %v3649_v61  ;;  %v3843_v52 = vmul.f32 %v6981_v14, %v11400_v20  ;;  %v2987_v61 = vmul.f32 %v6873_v42, %v11401_v8 }
 0x395   : > { %v3206_v25 = vpop.permute.xlu0 %3205  ;;  %v6410_v19 = vld [vmem:[#allocation2 + $0x5c] sm:$0xf]  ;;  %3908 = vst.msk [vmem:[#allocation2 + $0xc4] sm:$0xf] %vm254_vm4, %v3876_v5  ;;  %v10064_v48 = vpop.f32.mrf.mxu2 }
 0x396   : > { %3296 = vst.msk [vmem:[#allocation2 + $0x68] sm:$0xf] %vm1444_vm8, %v3206_v25  ;;  %v5972_v44 = vor.u32 %v6410_v19, %v5969_v0  ;;  %v11402_v25 = vld [vmem:[#allocation76_spill] sm:$0xff]  ;;  %v11403_v0 = vld [vmem:[#allocation74_spill] sm:$0xff] }
 0x397   : > { %3741 = vst.msk [vmem:[#allocation2 + $0x68] sm:$0xf] %vm2089_vm9, %v3651_v16  ;;  %v3875_v16 = vpack.c.bf16 %v3843_v52, %v3843_v52  ;;  %v11404_v19 = vld [vmem:[#allocation138_spill] sm:$0xff] }
 0x398   : > { %5386 = vmatmul.bf16.gmra.mxu3 %v5972_v44  ;;  %v10058_v44 = vpop.f32.mrf.mxu3 }
 0x399   : > { %3516 = vrot.lane.b32.xlu2 %v3437_v6, %s7303_s29  ;;  %3099 = vrot.lane.b32.xlu1 %v3018_v39, %s7302_s11  ;;  %v4057_v6 = vmul.f32 %v7062_v57, %v11404_v19  ;;  %3907 = vst.msk [vmem:[#allocation2 + $0xb0] sm:$0xf] %vm254_vm4, %v3875_v16  ;;  %v6007_v39 = vld [vmem:[#allocation2 + $0xa8] sm:$0xf] }
 0x39a   : > { %v6008_v46 = vor.u32 %v6422_v54, %v6007_v39  ;;  %v7227_v57 = vld [vmem:[%s10771_s2 + $0x448] sm:$0xff]   ;;  %v6027_v39 = vld [vmem:[#allocation2 + $0xd0] sm:$0xf] }
 0x39b   : > { %3097 = vrot.lane.b32.xlu0 %v3017_v60, %s7302_s11  ;;  %v4147_v26 = vpop.permute.xlu1 %4146  ;;  %v6409_v58 = vld [vmem:[#allocation2 + $0x54] sm:$0xf]  ;;  %v4089_v7 = vpack.c.bf16 %v4057_v6, %v4057_v6 }
 0x39c   : > { %v3499_v29 = vpop.permute.xlu2 %3498  ;;  %4237 = vst.msk [vmem:[#allocation2 + $0x74] sm:$0xf] %vm575_vm3, %v4147_v26  ;;  %v3438_v26 = vpack.c.bf16 %v3406_v13, %v3406_v13  ;;  %5307 = vmatmul.bf16.gmra.mxu2 %v6008_v46  ;;  %v7065_v46 = vunpack.c.l.bf16 %v7227_v57 }
 0x39d   : > { %3588 = vst.msk [vmem:[#allocation2 + $0x84] sm:$0xf] %vm2089_vm9, %v3499_v29  ;;  %v4145_v43 = vpop.permute.xlu0 %4144  ;;  %v10083_v59 = vpop.f32.mrf.mxu2 }
 0x39e   : > { %4236 = vst.msk [vmem:[#allocation2 + $0x60] sm:$0xf] %vm575_vm3, %v4145_v43  ;;  %v5961_v9 = vld [vmem:[#allocation2 + $0x64] sm:$0xf0]  ;;  %v3019_v43 = vpack.c.bf16 %v2987_v61, %v2987_v61 }
 0x39f   : > { %v5964_v51 = vor.u32 %v6409_v58, %v5961_v9  ;;  %v6938_v9 = vunpack.c.h.bf16 %v7195_v31 }
 0x3a1   : > { %5208 = vmatmul.bf16.gmra.mxu1 %v5964_v51  ;;  %3668 = vrot.lane.b32.xlu2 %v11397_v18, %s7303_s29  ;;  %v10068_v51 = vpop.f32.mrf.mxu0  ;;  %v10070_v18 = vpop.f32.mrf.mxu1  ;;  %v3409_v10 = vmul.f32 %v6938_v9, %v11334_v62 }
 0x3a2   : > { %3227 = vrot.lane.b32.xlu1 %v11398_v33, %s7302_s11 }
 0x3a3   : > { %3520 = vrot.lane.b32.xlu0 %v3439_v21, %s7303_s29  ;;  %v3208_v28 = vpop.permute.xlu1 %3207  ;;  %v6413_v34 = vld [vmem:[#allocation2 + $0x70] sm:$0xf0]  ;;  %v6937_v21 = vunpack.c.l.bf16 %v7195_v31  ;;  %v7066_v31 = vunpack.c.h.bf16 %v7227_v57 }
 0x3a4   : > { %v3210_v12 = vpop.permute.xlu2 %3209  ;;  %3297 = vst.msk [vmem:[#allocation2 + $0x7c] sm:$0xf] %vm1444_vm8, %v3208_v28  ;;  %v6415_v37 = vld [vmem:[#allocation2 + $0x84] sm:$0xf] }
 0x3a5   : > { %3298 = vst.msk [vmem:[#allocation2 + $0x90] sm:$0xf] %vm1444_vm8, %v3210_v12  ;;  %v3501_v49 = vpop.permute.xlu0 %3500  ;;  %v5975_v40 = vld [vmem:[#allocation2 + $0x60] sm:$0xf]  ;;  %v3408_v33 = vmul.f32 %v6937_v21, %v11328_v50  ;;  %v11408_v21 = vld [vmem:[#allocation78_spill] sm:$0xff] }
 0x3a6   : > { %3589 = vst.msk [vmem:[#allocation2 + $0x98] sm:$0xf] %vm2089_vm9, %v3501_v49  ;;  %v5976_v15 = vor.u32 %v6413_v34, %v5975_v40  ;;  %v7061_v49 = vunpack.c.l.bf16 %v10035_v11  ;;  %v10079_v34 = vpop.f32.mrf.mxu3 }
 0x3a7   : > { %v3440_v62 = vpack.c.bf16 %v3408_v33, %v3408_v33  ;;  %v11410_v33 = vld [vmem:[#allocation133_spill] sm:$0xff] }
 0x3a8   : > { %6383 = vmatmul.msk.bf16.gmra.mxu0 %vm5052_vm10, %v5976_v15  ;;  %v4056_v50 = vmul.f32 %v7061_v49, %v11401_v8  ;;  %v7207_v8 = vld [vmem:[%s10771_s2 + $0x3a8] sm:$0xff]  }
 0x3a9   : > { %4166 = vrot.lane.b32.xlu2 %v4087_v36, %s7301_s28  ;;  %v3441_v36 = vpack.c.bf16 %v3409_v10, %v3409_v10  ;;  %v10086_v42 = vpop.f32.mrf.mxu0  ;;  %v10092_v11 = vpop.f32.mrf.mxu1  ;;  %v6986_v6 = vunpack.c.h.bf16 %v7207_v8  ;;  %v6985_v54 = vunpack.c.l.bf16 %v7207_v8  ;;  %v11409_v10 = vld [vmem:[#allocation38_spill] sm:$0xff] }
 0x3aa   : > { %3674 = vrot.lane.b32.xlu1 %v11402_v25, %s7303_s29  ;;  %v4088_v13 = vpack.c.bf16 %v4056_v50, %v4056_v50 }
 0x3ab   : > { %3672 = vrot.lane.b32.xlu0 %v11403_v0, %s7303_s29  ;;  %v3655_v47 = vpop.permute.xlu1 %3654  ;;  %v6874_v0 = vunpack.c.h.bf16 %v10025_v17  ;;  %v10109_v17 = vpop.f32.mrf.mxu2 }
 0x3ac   : > { %v4149_v60 = vpop.permute.xlu2 %4148  ;;  %3743 = vst.msk [vmem:[#allocation2 + $0x90] sm:$0xf] %vm2089_vm9, %v3655_v47  ;;  %v6427_v47 = vld [vmem:[#allocation2 + $0xe0] sm:$0xf0] }
 0x3ad   : > { %4238 = vst.msk [vmem:[#allocation2 + $0x88] sm:$0xf] %vm575_vm3, %v4149_v60  ;;  %v3653_v45 = vpop.permute.xlu0 %3652  ;;  %v5989_v29 = vld [vmem:[#allocation2 + $0x94] sm:$0xf0] }
 0x3ae   : > { %3742 = vst.msk [vmem:[#allocation2 + $0x7c] sm:$0xf] %vm2089_vm9, %v3653_v45  ;;  %v5992_v58 = vor.u32 %v6415_v37, %v5989_v29  ;;  %v10103_v45 = vpop.f32.mrf.mxu3  ;;  %v11406_v37 = vld [vmem:[#allocation97_spill] sm:$0xff] }
 0x3af   : > { %v3846_v29 = vmul.f32 %v6986_v6, %v11406_v37 }
 0x3b0   : > { %5391 = vmatmul.bf16.gmra.mxu3 %v5992_v58 }
 0x3b1   : > { %3518 = vrot.lane.b32.xlu2 %v3438_v26, %s7303_s29  ;;  %v6028_v26 = vor.u32 %v6427_v47, %v6027_v39  ;;  %v3878_v9 = vpack.c.bf16 %v3846_v29, %v3846_v29  ;;  %v10133_v50 = vpop.f32.mrf.mxu1  ;;  %v11412_v47 = vld [vmem:[#allocation104_spill] sm:$0xff] }
 0x3b2   : > { %3101 = vrot.lane.b32.xlu1 %v3019_v43, %s7302_s11  ;;  %v11407_v43 = vld [vmem:[#allocation96_spill] sm:$0xff] }
 0x3b3   : > { %4170 = vrot.lane.b32.xlu0 %v4089_v7, %s7301_s28  ;;  %v3503_v12 = vpop.permute.xlu1 %3502  ;;  %v5981_v28 = vld [vmem:[#allocation2 + $0x8c] sm:$0xf0]  ;;  %v3845_v58 = vmul.f32 %v6985_v54, %v11407_v43  ;;  %v2988_v7 = vmul.f32 %v6874_v0, %v11404_v19  ;;  %5312 = vmatmul.bf16.gmra.mxu2 %v6028_v26  ;;  %3910 = vst.msk [vmem:[#allocation2 + $0xec] sm:$0xf] %vm254_vm4, %v3878_v9  ;;  %v10150_v8 = vpop.f32.mrf.mxu2  ;;  %v11413_v9 = vld [vmem:[#allocation34_spill] sm:$0xff] }
 0x3b4   : > { %v3505_v32 = vpop.permute.xlu2 %3504  ;;  %3590 = vst.msk [vmem:[#allocation2 + $0xac] sm:$0xf] %vm2089_vm9, %v3503_v12  ;;  %v5995_v16 = vld [vmem:[#allocation2 + $0x88] sm:$0xf]  ;;  %v11411_v12 = vld [vmem:[#allocation134_spill] sm:$0xff]  ;;  %v10129_v19 = vld [vmem:[%s10771_s2 + $0x2d0] sm:$0xff]  }
 0x3b5   : > { %3591 = vst.msk [vmem:[#allocation2 + $0xc0] sm:$0xf] %vm2089_vm9, %v3505_v32  ;;  %v4151_v1 = vpop.permute.xlu0 %4150  ;;  %v6414_v14 = vld [vmem:[#allocation2 + $0x7c] sm:$0xf]  ;;  %v4059_v32 = vmul.f32 %v7066_v31, %v11410_v33 }
 0x3b6   : > { %4239 = vst.msk [vmem:[#allocation2 + $0x9c] sm:$0xf] %vm575_vm3, %v4151_v1  ;;  %v5984_v40 = vor.u32 %v6414_v14, %v5981_v28  ;;  %v4058_v1 = vmul.f32 %v7065_v46, %v11411_v12  ;;  %v10119_v28 = vpop.f32.mrf.mxu0  ;;  %v10124_v14 = vld [vmem:[%s10771_s2 + $0x350] sm:$0xff]  }
 0x3b7   : > { %v6941_v57 = vunpack.c.l.bf16 %v10124_v14 }
 0x3b8   : > { %5213 = vmatmul.bf16.gmra.mxu1 %v5984_v40  ;;  %v3877_v40 = vpack.c.bf16 %v3845_v58, %v3845_v58 }
 0x3b9   : > { %3229 = vrot.lane.b32.xlu2 %v11405_v2, %s7302_s11  ;;  %v3020_v2 = vpack.c.bf16 %v2988_v7, %v2988_v7  ;;  %v10158_v58 = vpop.f32.mrf.mxu1 }
 0x3ba   : > { %3524 = vrot.lane.b32.xlu1 %v3441_v36, %s7303_s29  ;;  %3909 = vst.msk [vmem:[#allocation2 + $0xd8] sm:$0xf] %vm254_vm4, %v3877_v40 }
 0x3bb   : > { %3522 = vrot.lane.b32.xlu0 %v3440_v62, %s7303_s29  ;;  %v3214_v20 = vpop.permute.xlu1 %3213  ;;  %v6420_v5 = vld [vmem:[#allocation2 + $0xac] sm:$0xf] }
 0x3bc   : > { %v3657_v38 = vpop.permute.xlu2 %3656  ;;  %v6009_v15 = vld [vmem:[#allocation2 + $0xbc] sm:$0xf0]  ;;  %3300 = vst.msk [vmem:[#allocation2 + $0xb8] sm:$0xf] %vm1444_vm8, %v3214_v20  ;;  %v6878_v20 = vunpack.c.h.bf16 %v10129_v19 }
 0x3bd   : > { %v3212_v52 = vpop.permute.xlu0 %3211  ;;  %v6012_v61 = vor.u32 %v6420_v5, %v6009_v15  ;;  %v6418_v25 = vld [vmem:[#allocation2 + $0x98] sm:$0xf0]  ;;  %v4090_v15 = vpack.c.bf16 %v4058_v1, %v4058_v1  ;;  %v3410_v5 = vmul.f32 %v6941_v57, %v11332_v4  ;;  %v6432_v1 = vld [vmem:[#allocation2 + $0x108] sm:$0xf0] }
 0x3be   : > { %3299 = vst.msk [vmem:[#allocation2 + $0xa4] sm:$0xf] %vm1444_vm8, %v3212_v52  ;;  %v5996_v60 = vor.u32 %v6418_v25, %v5995_v16  ;;  %v10140_v52 = vpop.f32.mrf.mxu3  ;;  %v2990_v16 = vmul.f32 %v6878_v20, %v11410_v33  ;;  %v10171_v33 = vld [vmem:[%s10771_s2 + $0x450] sm:$0xff]  }
 0x3bf   : > { %3744 = vst.msk [vmem:[#allocation2 + $0xa4] sm:$0xf] %vm2089_vm9, %v3657_v38  ;;  %v4091_v38 = vpack.c.bf16 %v4059_v32, %v4059_v32  ;;  %v3442_v26 = vpack.c.bf16 %v3410_v5, %v3410_v5  ;;  %v6047_v32 = vld [vmem:[#allocation2 + $0xf8] sm:$0xf]  ;;  %v7069_v20 = vunpack.c.l.bf16 %v10171_v33 }
 0x3c0   : > { %5396 = vmatmul.bf16.gmra.mxu3 %v6012_v61  ;;  %6384 = vmatmul.msk.bf16.gmra.mxu0 %vm5052_vm10, %v5996_v60  ;;  %v10153_v60 = vpop.f32.mrf.mxu0  ;;  %v3022_v43 = vpack.c.bf16 %v2990_v16, %v2990_v16 }
 0x3c1   : > { %4168 = vrot.lane.b32.xlu2 %v4088_v13, %s7301_s28  ;;  %v7208_v13 = vld [vmem:[%s10771_s2 + $0x3b0] sm:$0xff]  }
 0x3c2   : > { %3676 = vrot.lane.b32.xlu1 %v11408_v21, %s7303_s29  ;;  %v6989_v0 = vunpack.c.l.bf16 %v7208_v13  ;;  %v6990_v5 = vunpack.c.h.bf16 %v7208_v13  ;;  %v11418_v13 = vld [vmem:[#allocation141_spill] sm:$0xff] }
 0x3c3   : > { %3233 = vrot.lane.b32.xlu0 %v11409_v10, %s7302_s11  ;;  %v4153_v36 = vpop.permute.xlu1 %4152 }
 0x3c4   : > { %v4155_v49 = vpop.permute.xlu2 %4154  ;;  %4240 = vst.msk [vmem:[#allocation2 + $0xb0] sm:$0xf] %vm575_vm3, %v4153_v36  ;;  %v3847_v37 = vmul.f32 %v6989_v0, %v11412_v47  ;;  %v10183_v0 = vpop.f32.mrf.mxu1 }
 0x3c5   : > { %4241 = vst.msk [vmem:[#allocation2 + $0xc4] sm:$0xf] %vm575_vm3, %v4155_v49  ;;  %v3659_v62 = vpop.permute.xlu0 %3658 }
 0x3c6   : > { %3745 = vst.msk [vmem:[#allocation2 + $0xb8] sm:$0xf] %vm2089_vm9, %v3659_v62  ;;  %v6419_v4 = vld [vmem:[#allocation2 + $0xa4] sm:$0xf]  ;;  %v3879_v7 = vpack.c.bf16 %v3847_v37, %v3847_v37  ;;  %v10166_v21 = vpop.f32.mrf.mxu3  ;;  %v6048_v62 = vor.u32 %v6432_v1, %v6047_v32 }
 0x3c8   : > { %3911 = vst.msk [vmem:[#allocation2 + $0x100] sm:$0xf] %vm254_vm4, %v3879_v7  ;;  %5317 = vmatmul.bf16.gmra.mxu2 %v6048_v62  ;;  %v10179_v16 = vpop.f32.mrf.mxu0  ;;  %v6942_v7 = vunpack.c.h.bf16 %v10124_v14 }
 0x3c9   : > { %3103 = vrot.lane.b32.xlu2 %v3020_v2, %s7302_s11  ;;  %v10173_v2 = vpop.f32.mrf.mxu2 }
 0x3ca   : > { %4174 = vrot.lane.b32.xlu1 %v4091_v38, %s7301_s28  ;;  %v3411_v62 = vmul.f32 %v6942_v7, %v11331_v27  ;;  %v7209_v27 = vld [vmem:[%s10771_s2 + $0x3b8] sm:$0xff]  }
 0x3cb   : > { %4172 = vrot.lane.b32.xlu0 %v4090_v15, %s7301_s28  ;;  %v3509_v6 = vpop.permute.xlu1 %3508  ;;  %v6015_v54 = vld [vmem:[#allocation2 + $0xb0] sm:$0xf]  ;;  %v6877_v15 = vunpack.c.l.bf16 %v10129_v19 }
 0x3cc   : > { %v3216_v61 = vpop.permute.xlu2 %3215  ;;  %v6423_v25 = vld [vmem:[#allocation2 + $0xc0] sm:$0xf0]  ;;  %3593 = vst.msk [vmem:[#allocation2 + $0xe8] sm:$0xf] %vm2089_vm9, %v3509_v6  ;;  %v11415_v6 = vld [vmem:[#allocation77_spill] sm:$0xff] }
 0x3cd   : > { %3301 = vst.msk [vmem:[#allocation2 + $0xcc] sm:$0xf] %vm1444_vm8, %v3216_v61  ;;  %v3507_v39 = vpop.permute.xlu0 %3506  ;;  %v6001_v31 = vld [vmem:[#allocation2 + $0xb4] sm:$0xf0]  ;;  %v6016_v46 = vor.u32 %v6423_v25, %v6015_v54  ;;  %v11414_v61 = vld [vmem:[#allocation100_spill] sm:$0xff]  ;;  %v2989_v19 = vmul.f32 %v6877_v15, %v11411_v12  ;;  %v11417_v54 = vld [vmem:[#allocation41_spill] sm:$0xff] }
 0x3ce   : > { %3592 = vst.msk [vmem:[#allocation2 + $0xd4] sm:$0xf] %vm2089_vm9, %v3507_v39  ;;  %v6004_v29 = vor.u32 %v6419_v4, %v6001_v31  ;;  %v3848_v25 = vmul.f32 %v6990_v5, %v11414_v61  ;;  %v11416_v39 = vld [vmem:[#allocation39_spill] sm:$0xff]  ;;  %v4060_v4 = vmul.f32 %v7069_v20, %v11418_v13  ;;  %v7181_v31 = vld [vmem:[%s10771_s2 + $0x2d8] sm:$0xff]   ;;  %v10197_v12 = vpop.f32.mrf.mxu3  ;;  %v10214_v20 = vpop.f32.mrf.mxu1 }
 0x3cf   : > { %v10219_v61 = vld [vmem:[%s10771_s2 + $0x358] sm:$0xff]  }
 0x3d0   : > { %5218 = vmatmul.bf16.gmra.mxu1 %v6004_v29  ;;  %6385 = vmatmul.msk.bf16.gmra.mxu0 %vm5052_vm10, %v6016_v46  ;;  %v3880_v47 = vpack.c.bf16 %v3848_v25, %v3848_v25  ;;  %v4092_v1 = vpack.c.bf16 %v4060_v4, %v4060_v4  ;;  %v3443_v4 = vpack.c.bf16 %v3411_v62, %v3411_v62  ;;  %v6067_v62 = vld [vmem:[#allocation2 + $0x120] sm:$0xf] }
 0x3d1   : > { %3231 = vrot.lane.b32.xlu2 %v11413_v9, %s7302_s11  ;;  %v6882_v9 = vunpack.c.h.bf16 %v7181_v31 }
 0x3d2   : > { %3526 = vrot.lane.b32.xlu1 %v3442_v26, %s7303_s29  ;;  %3912 = vst.msk [vmem:[#allocation2 + $0x114] sm:$0xf] %vm254_vm4, %v3880_v47 }
 0x3d3   : > { %3107 = vrot.lane.b32.xlu0 %v3022_v43, %s7302_s11  ;;  %v3661_v49 = vpop.permute.xlu1 %3660  ;;  %v6029_v36 = vld [vmem:[#allocation2 + $0xe4] sm:$0xf0]  ;;  %v3021_v43 = vpack.c.bf16 %v2989_v19, %v2989_v19 }
 0x3d4   : > { %v3663_v10 = vpop.permute.xlu2 %3662  ;;  %3746 = vst.msk [vmem:[#allocation2 + $0xcc] sm:$0xf] %vm2089_vm9, %v3661_v49  ;;  %v10202_v49 = vpop.f32.mrf.mxu2 }
 0x3d5   : > { %v3218_v40 = vpop.permute.xlu0 %3217  ;;  %v6425_v38 = vld [vmem:[#allocation2 + $0xd4] sm:$0xf] }
 0x3d6   : > { %3302 = vst.msk [vmem:[#allocation2 + $0xe0] sm:$0xf] %vm1444_vm8, %v3218_v40  ;;  %v6032_v57 = vor.u32 %v6425_v38, %v6029_v36  ;;  %v10205_v36 = vpop.f32.mrf.mxu0  ;;  %v11419_v38 = vld [vmem:[#allocation137_spill] sm:$0xff]  ;;  %v10230_v7 = vpop.f32.mrf.mxu3 }
 0x3d7   : > { %3747 = vst.msk [vmem:[#allocation2 + $0xe0] sm:$0xf] %vm2089_vm9, %v3663_v10  ;;  %v6881_v10 = vunpack.c.l.bf16 %v7181_v31  ;;  %v2992_v14 = vmul.f32 %v6882_v9, %v11419_v38 }
 0x3d8   : > { %5401 = vmatmul.bf16.gmra.mxu3 %v6032_v57  ;;  %v11420_v57 = vld [vmem:[#allocation81_spill] sm:$0xff]  ;;  %11422 = vst [vmem:[#allocation3_spill] sm:$0xff] %v10230_v7 }
 0x3d9   : > { %3678 = vrot.lane.b32.xlu2 %v11415_v6, %s7303_s29  ;;  %v2991_v15 = vmul.f32 %v6881_v10, %v11418_v13  ;;  %v3024_v31 = vpack.c.bf16 %v2992_v14, %v2992_v14  ;;  %v6437_v14 = vld [vmem:[#allocation2 + $0x130] sm:$0xf0] }
 0x3da   : > { %3237 = vrot.lane.b32.xlu1 %v11416_v39, %s7302_s11  ;;  %v6994_v39 = vunpack.c.h.bf16 %v7209_v27 }
 0x3db   : > { %3235 = vrot.lane.b32.xlu0 %v11417_v54, %s7302_s11  ;;  %v4159_v37 = vpop.permute.xlu1 %4158  ;;  %v6424_v26 = vld [vmem:[#allocation2 + $0xcc] sm:$0xf]  ;;  %v6993_v54 = vunpack.c.l.bf16 %v7209_v27  ;;  %v10244_v27 = vpop.f32.mrf.mxu1 }
 0x3dc   : > { %v3511_v46 = vpop.permute.xlu2 %3510  ;;  %4243 = vst.msk [vmem:[#allocation2 + $0xec] sm:$0xf] %vm575_vm3, %v4159_v37  ;;  %v6946_v37 = vunpack.c.h.bf16 %v10219_v61 }
 0x3dd   : > { %3594 = vst.msk [vmem:[#allocation2 + $0xfc] sm:$0xf] %vm2089_vm9, %v3511_v46  ;;  %v4157_v29 = vpop.permute.xlu0 %4156  ;;  %v3023_v46 = vpack.c.bf16 %v2991_v15, %v2991_v15 }
 0x3de   : > { %4242 = vst.msk [vmem:[#allocation2 + $0xd8] sm:$0xf] %vm575_vm3, %v4157_v29  ;;  %v6021_v32 = vld [vmem:[#allocation2 + $0xdc] sm:$0xf0]  ;;  %v3850_v29 = vmul.f32 %v6994_v39, %v11300_v56  ;;  %v10240_v56 = vpop.f32.mrf.mxu0 }
 0x3df   : > { %v6024_v40 = vor.u32 %v6424_v26, %v6021_v32  ;;  %v11421_v26 = vld [vmem:[#allocation99_spill] sm:$0xff]  ;;  %v10233_v32 = vpop.f32.mrf.mxu2 }
 0x3e0   : > { %v3882_v9 = vpack.c.bf16 %v3850_v29, %v3850_v29 }
 0x3e1   : > { %5223 = vmatmul.bf16.gmra.mxu1 %v6024_v40  ;;  %3105 = vrot.lane.b32.xlu2 %v3021_v43, %s7302_s11  ;;  %v3849_v43 = vmul.f32 %v6993_v54, %v11421_v26  ;;  %v10253_v54 = vld [vmem:[%s10772_s3] ss:$0 sm:$0xff] }
 0x3e2   : > { %4176 = vrot.lane.b32.xlu1 %v4092_v1, %s7301_s28  ;;  %v3413_v1 = vmul.f32 %v6946_v37, %v11337_v22  ;;  %3914 = vst.msk [vmem:[#allocation2 + $0x13c] sm:$0xf] %vm254_vm4, %v3882_v9  ;;  %v10275_v37 = vld [vmem:[%s10771_s2 + $0x458] sm:$0xff]   ;;  %v5111_v29 = vadd.f32 %v10253_v54, %v10068_v51 }
 0x3e3   : > { %3682 = vrot.lane.b32.xlu0 %v11420_v57, %s7303_s29  ;;  %v3220_v25 = vpop.permute.xlu1 %3219  ;;  %v6428_v19 = vld [vmem:[#allocation2 + $0xe8] sm:$0xf0]  ;;  %v3881_v10 = vpack.c.bf16 %v3849_v43, %v3849_v43 }
 0x3e4   : > { %v3222_v5 = vpop.permute.xlu2 %3221  ;;  %3303 = vst.msk [vmem:[#allocation2 + $0xf4] sm:$0xf] %vm1444_vm8, %v3220_v25  ;;  %v6430_v22 = vld [vmem:[#allocation2 + $0xfc] sm:$0xf]  ;;  %v3445_v39 = vpack.c.bf16 %v3413_v1, %v3413_v1 }
 0x3e5   : > { %3304 = vst.msk [vmem:[#allocation2 + $0x108] sm:$0xf] %vm1444_vm8, %v3222_v5  ;;  %v3513_v6 = vpop.permute.xlu0 %3512  ;;  %v6035_v13 = vld [vmem:[#allocation2 + $0xd8] sm:$0xf]  ;;  %v6068_v5 = vor.u32 %v6437_v14, %v6067_v62 }
 0x3e6   : > { %3595 = vst.msk [vmem:[#allocation2 + $0x110] sm:$0xf] %vm2089_vm9, %v3513_v6  ;;  %v6036_v47 = vor.u32 %v6428_v19, %v6035_v13  ;;  %v7070_v6 = vunpack.c.h.bf16 %v10171_v33  ;;  %v10255_v13 = vpop.f32.mrf.mxu3  ;;  %v10281_v1 = vpop.f32.mrf.mxu0 }
 0x3e7   : > { %3913 = vst.msk [vmem:[#allocation2 + $0x128] sm:$0xf] %vm254_vm4, %v3881_v10  ;;  %5322 = vmatmul.bf16.gmra.mxu2 %v6068_v5  ;;  %v6945_v10 = vunpack.c.l.bf16 %v10219_v61 }
 0x3e8   : > { %6386 = vmatmul.msk.bf16.gmra.mxu0 %vm5052_vm10, %v6036_v47  ;;  %11423 = vst [vmem:[#allocation6_spill] sm:$0xff] %v10255_v13  ;;  %v4061_v33 = vmul.f32 %v7070_v6, %v11419_v38  ;;  %v10270_v47 = vld [vmem:[%s10771_s2 + $0x2e0] sm:$0xff]   ;;  %v11427_v6 = vld [vmem:[#allocation136_spill] sm:$0xff] }
 0x3e9   : > { %3528 = vrot.lane.b32.xlu2 %v3443_v4, %s7303_s29  ;;  %v11424_v4 = vld [vmem:[#allocation79_spill] sm:$0xff]  ;;  %v3412_v61 = vmul.f32 %v6945_v10, %v11338_v35 }
 0x3ea   : > { %3111 = vrot.lane.b32.xlu1 %v3024_v31, %s7302_s11  ;;  %v5288_v31 = vpop.f32.mrf.mxu2  ;;  %v4093_v14 = vpack.c.bf16 %v4061_v33, %v4061_v33  ;;  %v11429_v33 = vld [vmem:[#allocation82_spill] sm:$0xff]  ;;  %v7210_v13 = vld [vmem:[%s10771_s2 + $0x3c0] sm:$0xff]  }
 0x3eb   : > { %3109 = vrot.lane.b32.xlu0 %v3023_v46, %s7302_s11  ;;  %v3667_v15 = vpop.permute.xlu1 %3666  ;;  %v11425_v46 = vld [vmem:[#allocation44_spill] sm:$0xff]  ;;  %v6997_v7 = vunpack.c.l.bf16 %v7210_v13 }
 0x3ec   : > { %v4161_v40 = vpop.permute.xlu2 %4160  ;;  %3749 = vst.msk [vmem:[#allocation2 + $0x108] sm:$0xf] %vm2089_vm9, %v3667_v15  ;;  %v6885_v15 = vunpack.c.l.bf16 %v10270_v47 }
 0x3ed   : > { %4244 = vst.msk [vmem:[#allocation2 + $0x100] sm:$0xf] %vm575_vm3, %v4161_v40  ;;  %v3665_v57 = vpop.permute.xlu0 %3664  ;;  %v6049_v25 = vld [vmem:[#allocation2 + $0x10c] sm:$0xf0] }
 0x3ee   : > { %3748 = vst.msk [vmem:[#allocation2 + $0xf4] sm:$0xf] %vm2089_vm9, %v3665_v57  ;;  %v6052_v19 = vor.u32 %v6430_v22, %v6049_v25  ;;  %v7074_v57 = vunpack.c.h.bf16 %v10275_v37 }
 0x3f0   : > { %5406 = vmatmul.bf16.gmra.mxu3 %v6052_v19  ;;  %v2993_v19 = vmul.f32 %v6885_v15, %v11427_v6 }
 0x3f1   : > { %3680 = vrot.lane.b32.xlu2 %v11424_v4, %s7303_s29 }
 0x3f2   : > { %3239 = vrot.lane.b32.xlu1 %v11425_v46, %s7302_s11  ;;  %v11430_v46 = vld [vmem:[#allocation80_spill] sm:$0xff]  ;;  %v5290_v35 = vpop.f32.mrf.mxu2 }
 0x3f3   : > { %3532 = vrot.lane.b32.xlu0 %v3445_v39, %s7303_s29  ;;  %v3515_v26 = vpop.permute.xlu1 %3514  ;;  %v6041_v9 = vld [vmem:[#allocation2 + $0x104] sm:$0xf0]  ;;  %v5377_v25 = vpop.f32.mrf.mxu3  ;;  %v11428_v39 = vld [vmem:[#allocation143_spill] sm:$0xff] }
 0x3f4   : > { %v3517_v38 = vpop.permute.xlu2 %3516  ;;  %3596 = vst.msk [vmem:[#allocation2 + $0x124] sm:$0xf] %vm2089_vm9, %v3515_v26  ;;  %v4063_v4 = vmul.f32 %v7074_v57, %v11428_v39  ;;  %v5113_v26 = vadd.f32 %v10253_v54, %v10086_v42  ;;  %v3025_v42 = vpack.c.bf16 %v2993_v19, %v2993_v19  ;;  %v11431_v19 = vld [vmem:[#allocation103_spill] sm:$0xff] }
 0x3f5   : > { %3597 = vst.msk [vmem:[#allocation2 + $0x138] sm:$0xf] %vm2089_vm9, %v3517_v38  ;;  %v4163_v43 = vpop.permute.xlu0 %4162  ;;  %v5199_v40 = vpop.f32.mrf.mxu1  ;;  %v6429_v62 = vld [vmem:[#allocation2 + $0xf4] sm:$0xf] }
 0x3f6   : > { %v5200_v51 = vadd.f32 %v5199_v40, %v5111_v29  ;;  %4245 = vst.msk [vmem:[#allocation2 + $0x114] sm:$0xf] %vm575_vm3, %v4163_v43  ;;  %v6044_v5 = vor.u32 %v6429_v62, %v6041_v9  ;;  %v3444_v62 = vpack.c.bf16 %v3412_v61, %v3412_v61 }
 0x3f8   : > { %v5289_v22 = vadd.f32 %v5288_v31, %v5200_v51  ;;  %5228 = vmatmul.bf16.gmra.mxu1 %v6044_v5  ;;  %v7198_v31 = vld [vmem:[%s10771_s2 + $0x360] sm:$0xff]  }
 0x3f9   : > { %4178 = vrot.lane.b32.xlu2 %v4093_v14, %s7301_s28  ;;  %v6055_v51 = vld [vmem:[#allocation2 + $0x100] sm:$0xf] }
 0x3fa   : > { %3686 = vrot.lane.b32.xlu1 %v11429_v33, %s7303_s29  ;;  %v5378_v10 = vadd.f32 %v5377_v25, %v5289_v22  ;;  %v4095_v33 = vpack.c.bf16 %v4063_v4, %v4063_v4  ;;  %v3851_v4 = vmul.f32 %v6997_v7, %v11431_v19  ;;  %v5116_v19 = vadd.f32 %v10253_v54, %v10119_v28 }
 0x3fb   : > { %3684 = vrot.lane.b32.xlu0 %v11430_v46, %s7303_s29  ;;  %v3226_v43 = vpop.permute.xlu1 %3225  ;;  %v6435_v40 = vld [vmem:[#allocation2 + $0x124] sm:$0xf]  ;;  %v6950_v46 = vunpack.c.h.bf16 %v7198_v31 }
 0x3fc   : > { %v3669_v38 = vpop.permute.xlu2 %3668  ;;  %v6069_v29 = vld [vmem:[#allocation2 + $0x134] sm:$0xf0]  ;;  %3306 = vst.msk [vmem:[#allocation2 + $0x130] sm:$0xf] %vm1444_vm8, %v3226_v43  ;;  %v6949_v43 = vunpack.c.l.bf16 %v7198_v31 }
 0x3fd   : > { %v3224_v9 = vpop.permute.xlu0 %3223  ;;  %v5201_v14 = vpop.f32.mrf.mxu1  ;;  %v6072_v57 = vor.u32 %v6435_v40, %v6069_v29  ;;  %v6433_v5 = vld [vmem:[#allocation2 + $0x110] sm:$0xf0]  ;;  %v3415_v31 = vmul.f32 %v6950_v46, %v11342_v3  ;;  %v6087_v40 = vld [vmem:[#allocation2 + $0x148] sm:$0xf]  ;;  %v6998_v3 = vunpack.c.h.bf16 %v7210_v13  ;;  %v11432_v46 = vld [vmem:[#allocation102_spill] sm:$0xff] }
 0x3fe   : > { %v5466_v15 = vpop.f32.mrf.mxu0  ;;  %v5202_v22 = vadd.f32 %v5201_v14, %v5113_v26  ;;  %3305 = vst.msk [vmem:[#allocation2 + $0x11c] sm:$0xf] %vm1444_vm8, %v3224_v9  ;;  %v6056_v25 = vor.u32 %v6433_v5, %v6055_v51  ;;  %v3414_v26 = vmul.f32 %v6949_v43, %v11335_v23  ;;  %v7073_v51 = vunpack.c.l.bf16 %v10275_v37 }
 0x3ff   : > { %v5467_v61 = vadd.f32 %v5466_v15, %v5378_v10  ;;  %3750 = vst.msk [vmem:[#allocation2 + $0x11c] sm:$0xf] %vm2089_vm9, %v3669_v38  ;;  %v5379_v38 = vpop.f32.mrf.mxu3  ;;  %v3883_v10 = vpack.c.bf16 %v3851_v4, %v3851_v4  ;;  %v3447_v5 = vpack.c.bf16 %v3415_v31, %v3415_v31 }
 0x400   : > { %v5291_v29 = vadd.f32 %v5290_v35, %v5202_v22  ;;  %5411 = vmatmul.bf16.gmra.mxu3 %v6072_v57  ;;  %6387 = vmatmul.msk.bf16.gmra.mxu0 %vm5052_vm10, %v6056_v25  ;;  %v6442_v35 = vld [vmem:[#allocation2 + $0x158] sm:$0xf0]  ;;  %v3852_v22 = vmul.f32 %v6998_v3, %v11432_v46  ;;  %v4062_v25 = vmul.f32 %v7073_v51, %v11427_v6  ;;  %v11436_v46 = vld [vmem:[#allocation139_spill] sm:$0xff] }
 0x401   : > { %5547 = vst.msk [vmem:[%s10306_s30] sm:$0xff] %vm5546_vm11, %v5467_v61  ;;  %3530 = vrot.lane.b32.xlu2 %v3444_v62, %s7303_s29  ;;  %v6088_v7 = vor.u32 %v6442_v35, %v6087_v40  ;;  %v11433_v61 = vld [vmem:[#allocation47_spill] sm:$0xff]  ;;  %v6886_v35 = vunpack.c.h.bf16 %v10270_v47 }
 0x402   : > { %3113 = vrot.lane.b32.xlu1 %v3025_v42, %s7302_s11  ;;  %v5380_v15 = vadd.f32 %v5379_v38, %v5291_v29  ;;  %v3446_v42 = vpack.c.bf16 %v3414_v26, %v3414_v26  ;;  %3915 = vst.msk [vmem:[#allocation2 + $0x150] sm:$0xf] %vm254_vm4, %v3883_v10  ;;  %v3884_v37 = vpack.c.bf16 %v3852_v22, %v3852_v22  ;;  %v7230_v29 = vld [vmem:[%s10771_s2 + $0x460] sm:$0xff]  }
 0x403   : > { %4182 = vrot.lane.b32.xlu0 %v4095_v33, %s7301_s28  ;;  %v4165_v14 = vpop.permute.xlu1 %4164  ;;  %v5293_v33 = vpop.f32.mrf.mxu2  ;;  %5327 = vmatmul.bf16.gmra.mxu2 %v6088_v7  ;;  %v4094_v40 = vpack.c.bf16 %v4062_v25, %v4062_v25  ;;  %v7078_v7 = vunpack.c.h.bf16 %v7230_v29  ;;  %v10357_v25 = vld [vmem:[%s10771_s2 + $0x368] sm:$0xff]  }
 0x404   : > { %v4167_v9 = vpop.permute.xlu2 %4166  ;;  %4246 = vst.msk [vmem:[#allocation2 + $0x128] sm:$0xf] %vm575_vm3, %v4165_v14 }
 0x405   : > { %4247 = vst.msk [vmem:[#allocation2 + $0x13c] sm:$0xf] %vm575_vm3, %v4167_v9  ;;  %v3671_v62 = vpop.permute.xlu0 %3670  ;;  %v4065_v22 = vmul.f32 %v7078_v7, %v11436_v46 }
 0x406   : > { %v5468_v57 = vpop.f32.mrf.mxu0  ;;  %3751 = vst.msk [vmem:[#allocation2 + $0x130] sm:$0xf] %vm2089_vm9, %v3671_v62  ;;  %v6434_v38 = vld [vmem:[#allocation2 + $0x11c] sm:$0xf] }
 0x407   : > { %v5469_v23 = vadd.f32 %v5468_v57, %v5380_v15  ;;  %3916 = vst.msk [vmem:[#allocation2 + $0x164] sm:$0xf] %vm254_vm4, %v3884_v37  ;;  %v5382_v14 = vpop.f32.mrf.mxu3  ;;  %v7077_v57 = vunpack.c.l.bf16 %v7230_v29 }
 0x409   : > { %5548 = vst.msk [vmem:[%s10306_s30 + $0x8] sm:$0xff] %vm5546_vm11, %v5469_v23  ;;  %3241 = vrot.lane.b32.xlu2 %v11433_v61, %s7302_s11  ;;  %v2994_v23 = vmul.f32 %v6886_v35, %v11428_v39  ;;  %v10362_v39 = vld [vmem:[%s10771_s2 + $0x2e8] sm:$0xff]  }
 0x40a   : > { %3536 = vrot.lane.b32.xlu1 %v3447_v5, %s7303_s29  ;;  %v11434_v5 = vld [vmem:[#allocation85_spill] sm:$0xff] }
 0x40b   : > { %3534 = vrot.lane.b32.xlu0 %v3446_v42, %s7303_s29  ;;  %v3100_v4 = vpop.permute.xlu1 %3099  ;;  %v6075_v26 = vld [vmem:[#allocation2 + $0x128] sm:$0xf]  ;;  %v5295_v51 = vpop.f32.mrf.mxu2  ;;  %v11435_v42 = vld [vmem:[#allocation50_spill] sm:$0xff] }
 0x40c   : > { %v3519_v13 = vpop.permute.xlu2 %3518  ;;  %v6438_v43 = vld [vmem:[#allocation2 + $0x138] sm:$0xf0]  ;;  %3178 = vst.msk [vmem:[#allocation2 + $0x160] sm:$0xf] %vm1444_vm8, %v3100_v4 }
 0x40d   : > { %v3098_v31 = vpop.permute.xlu0 %3097  ;;  %v5204_v6 = vpop.f32.mrf.mxu1  ;;  %v6061_v9 = vld [vmem:[#allocation2 + $0x12c] sm:$0xf0]  ;;  %v6076_v10 = vor.u32 %v6438_v43, %v6075_v26  ;;  %v6953_v26 = vunpack.c.l.bf16 %v10357_v25 }
 0x40e   : > { %v5205_v62 = vadd.f32 %v5204_v6, %v5116_v19  ;;  %3177 = vst.msk [vmem:[#allocation2 + $0x14c] sm:$0xf] %vm1444_vm8, %v3098_v31  ;;  %v6064_v15 = vor.u32 %v6434_v38, %v6061_v9  ;;  %v5471_v3 = vpop.f32.mrf.mxu0  ;;  %v3026_v31 = vpack.c.bf16 %v2994_v23, %v2994_v23  ;;  %v4097_v38 = vpack.c.bf16 %v4065_v22, %v4065_v22  ;;  %v7211_v23 = vld [vmem:[%s10771_s2 + $0x3c8] sm:$0xff]  }
 0x40f   : > { %3598 = vst.msk [vmem:[#allocation2 + $0x14c] sm:$0xf] %vm2089_vm9, %v3519_v13  ;;  %v5118_v13 = vadd.f32 %v10253_v54, %v10153_v60  ;;  %v5384_v60 = vpop.f32.mrf.mxu3 }
 0x410   : > { %v5294_v28 = vadd.f32 %v5293_v33, %v5205_v62  ;;  %5233 = vmatmul.bf16.gmra.mxu1 %v6064_v15  ;;  %6388 = vmatmul.msk.bf16.gmra.mxu0 %vm5052_vm10, %v6076_v10  ;;  %v11437_v33 = vld [vmem:[#allocation140_spill] sm:$0xff]  ;;  %v6890_v10 = vunpack.c.h.bf16 %v10362_v39  ;;  %v3416_v62 = vmul.f32 %v6953_v26, %v11341_v24  ;;  %v7002_v24 = vunpack.c.h.bf16 %v7211_v23 }
 0x411   : > { %4180 = vrot.lane.b32.xlu2 %v4094_v40, %s7301_s28  ;;  %v4064_v61 = vmul.f32 %v7077_v57, %v11437_v33 }
 0x412   : > { %v5383_v47 = vadd.f32 %v5382_v14, %v5294_v28  ;;  %3688 = vrot.lane.b32.xlu1 %v11434_v5, %s7303_s29  ;;  %v2996_v15 = vmul.f32 %v6890_v10, %v11436_v46  ;;  %v3448_v22 = vpack.c.bf16 %v3416_v62, %v3416_v62 }
 0x413   : > { %3245 = vrot.lane.b32.xlu0 %v11435_v42, %s7302_s11  ;;  %v4096_v9 = vpack.c.bf16 %v4064_v61, %v4064_v61  ;;  %v5298_v14 = vpop.f32.mrf.mxu2 }
 0x414   : > { %v3230_v37 = vpop.permute.xlu2 %3229  ;;  %v5472_v43 = vadd.f32 %v5471_v3, %v5383_v47  ;;  %v3228_v29 = vpop.permute.xlu1 %3227  ;;  %v5121_v47 = vadd.f32 %v10253_v54, %v10179_v16  ;;  %v3028_v61 = vpack.c.bf16 %v2996_v15, %v2996_v15 }
 0x415   : > { %3308 = vst.msk [vmem:[#allocation2 + $0x158] sm:$0xf] %vm1444_vm8, %v3230_v37  ;;  %v3521_v19 = vpop.permute.xlu0 %3520  ;;  %v5206_v4 = vpop.f32.mrf.mxu1  ;;  %v6107_v37 = vld [vmem:[#allocation2 + $0x170] sm:$0xf] }
 0x416   : > { %3307 = vst.msk [vmem:[#allocation2 + $0x144] sm:$0xf] %vm1444_vm8, %v3228_v29  ;;  %v5207_v6 = vadd.f32 %v5206_v4, %v5118_v13  ;;  %v5473_v7 = vpop.f32.mrf.mxu0  ;;  %v6440_v5 = vld [vmem:[#allocation2 + $0x14c] sm:$0xf]  ;;  %v7001_v13 = vunpack.c.l.bf16 %v7211_v23 }
 0x417   : > { %5549 = vst.msk [vmem:[%s10306_s30 + $0x10] sm:$0xff] %vm5546_vm11, %v5472_v43 }
 0x418   : > { %3599 = vst.msk [vmem:[#allocation2 + $0x160] sm:$0xf] %vm2089_vm9, %v3521_v19  ;;  %v5296_v40 = vadd.f32 %v5295_v51, %v5207_v6  ;;  %v11438_v19 = vld [vmem:[#allocation106_spill] sm:$0xff]  ;;  %v3853_v6 = vmul.f32 %v7001_v13, %v11303_v63  ;;  %v11443_v13 = vld [vmem:[#allocation144_spill] sm:$0xff] }
 0x419   : > { %3115 = vrot.lane.b32.xlu2 %v3026_v31, %s7302_s11  ;;  %v3854_v4 = vmul.f32 %v7002_v24, %v11438_v19  ;;  %v6447_v31 = vld [vmem:[#allocation2 + $0x180] sm:$0xf0] }
 0x41a   : > { %v5385_v35 = vadd.f32 %v5384_v60, %v5296_v40  ;;  %4186 = vrot.lane.b32.xlu1 %v4097_v38, %s7301_s28  ;;  %v6108_v26 = vor.u32 %v6447_v31, %v6107_v37  ;;  %v3885_v63 = vpack.c.bf16 %v3853_v6, %v3853_v6  ;;  %v11442_v37 = vld [vmem:[#allocation52_spill] sm:$0xff] }
 0x41b   : > { %4184 = vrot.lane.b32.xlu0 %v4096_v9, %s7301_s28  ;;  %v5387_v16 = vpop.f32.mrf.mxu3  ;;  %v11439_v9 = vld [vmem:[#allocation46_spill] sm:$0xff]  ;;  %v3886_v10 = vpack.c.bf16 %v3854_v4, %v3854_v4 }
 0x41c   : > { %v4169_v57 = vpop.permute.xlu2 %4168  ;;  %v5474_v28 = vadd.f32 %v5473_v7, %v5385_v35  ;;  %v3675_v3 = vpop.permute.xlu1 %3674  ;;  %v10397_v35 = vld [vmem:[%s10771_s2 + $0x468] sm:$0xff]   ;;  %5332 = vmatmul.bf16.gmra.mxu2 %v6108_v26  ;;  %v5123_v7 = vadd.f32 %v10253_v54, %v10205_v36  ;;  %3917 = vst.msk [vmem:[#allocation2 + $0x178] sm:$0xf] %vm254_vm4, %v3885_v63 }
 0x41d   : > { %4248 = vst.msk [vmem:[#allocation2 + $0x150] sm:$0xf] %vm575_vm3, %v4169_v57  ;;  %v3673_v51 = vpop.permute.xlu0 %3672 }
 0x41e   : > { %3753 = vst.msk [vmem:[#allocation2 + $0x158] sm:$0xf] %vm2089_vm9, %v3675_v3  ;;  %v5209_v42 = vpop.f32.mrf.mxu1 }
 0x41f   : > { %5550 = vst.msk [vmem:[%s10306_s30 + $0x18] sm:$0xff] %vm5546_vm11, %v5474_v28  ;;  %v6089_v46 = vld [vmem:[#allocation2 + $0x15c] sm:$0xf0]  ;;  %v5210_v43 = vadd.f32 %v5209_v42, %v5121_v47  ;;  %v6889_v28 = vunpack.c.l.bf16 %v10362_v39  ;;  %v5300_v47 = vpop.f32.mrf.mxu2 }
 0x420   : > { %3752 = vst.msk [vmem:[#allocation2 + $0x144] sm:$0xf] %vm2089_vm9, %v3673_v51  ;;  %v6092_v29 = vor.u32 %v6440_v5, %v6089_v46  ;;  %v7081_v5 = vunpack.c.l.bf16 %v10397_v35  ;;  %v11440_v46 = vld [vmem:[#allocation84_spill] sm:$0xff] }
 0x421   : > { %v5299_v38 = vadd.f32 %v5298_v14, %v5210_v43  ;;  %3243 = vrot.lane.b32.xlu2 %v11439_v9, %s7302_s11  ;;  %3918 = vst.msk [vmem:[#allocation2 + $0x18c] sm:$0xf] %vm254_vm4, %v3886_v10  ;;  %v2995_v39 = vmul.f32 %v6889_v28, %v11437_v33  ;;  %v6954_v9 = vunpack.c.h.bf16 %v10357_v25  ;;  %v11445_v25 = vld [vmem:[#allocation87_spill] sm:$0xff] }
 0x422   : > { %5416 = vmatmul.bf16.gmra.mxu3 %v6092_v29  ;;  %3538 = vrot.lane.b32.xlu1 %v3448_v22, %s7303_s29  ;;  %v4066_v43 = vmul.f32 %v7081_v5, %v11443_v13  ;;  %v7184_v29 = vld [vmem:[%s10771_s2 + $0x2f0] sm:$0xff]  }
 0x423   : > { %3119 = vrot.lane.b32.xlu0 %v3028_v61, %s7302_s11  ;;  %v5388_v40 = vadd.f32 %v5387_v16, %v5299_v38  ;;  %v5389_v22 = vpop.f32.mrf.mxu3  ;;  %v11441_v61 = vld [vmem:[#allocation51_spill] sm:$0xff]  ;;  %v3027_v38 = vpack.c.bf16 %v2995_v39, %v2995_v39  ;;  %v6894_v10 = vunpack.c.h.bf16 %v7184_v29 }
 0x424   : > { %v3104_v60 = vpop.permute.xlu2 %3103  ;;  %v3102_v14 = vpop.permute.xlu1 %3101  ;;  %v6095_v26 = vld [vmem:[#allocation2 + $0x150] sm:$0xf]  ;;  %v4098_v63 = vpack.c.bf16 %v4066_v43, %v4066_v43 }
 0x425   : > { %3180 = vst.msk [vmem:[#allocation2 + $0x188] sm:$0xf] %vm1444_vm8, %v3104_v60  ;;  %v4171_v62 = vpop.permute.xlu0 %4170  ;;  %v6081_v15 = vld [vmem:[#allocation2 + $0x154] sm:$0xf0]  ;;  %v5476_v57 = vpop.f32.mrf.mxu0 }
 0x426   : > { %3179 = vst.msk [vmem:[#allocation2 + $0x174] sm:$0xf] %vm1444_vm8, %v3102_v14  ;;  %v5477_v3 = vadd.f32 %v5476_v57, %v5388_v40  ;;  %v5211_v51 = vpop.f32.mrf.mxu1  ;;  %v6893_v14 = vunpack.c.l.bf16 %v7184_v29 }
 0x427   : > { %4249 = vst.msk [vmem:[#allocation2 + $0x164] sm:$0xf] %vm575_vm3, %v4171_v62  ;;  %v6439_v23 = vld [vmem:[#allocation2 + $0x144] sm:$0xf]  ;;  %v5212_v24 = vadd.f32 %v5211_v51, %v5123_v7  ;;  %v5303_v62 = vpop.f32.mrf.mxu2  ;;  %v11444_v7 = vld [vmem:[#allocation142_spill] sm:$0xff]  ;;  %v10438_v51 = vld [vmem:[%s10771_s2 + $0x370] sm:$0xff]  }
 0x428   : > { %v6084_v42 = vor.u32 %v6439_v23, %v6081_v15  ;;  %5551 = vst.msk [vmem:[%s10306_s30 + $0x20] sm:$0xff] %vm5546_vm11, %v5477_v3  ;;  %v3417_v15 = vmul.f32 %v6954_v9, %v11340_v53  ;;  %v2998_v57 = vmul.f32 %v6894_v10, %v11444_v7  ;;  %v2997_v28 = vmul.f32 %v6893_v14, %v11443_v13 }
 0x429   : > { %v5301_v36 = vadd.f32 %v5300_v47, %v5212_v24  ;;  %3690 = vrot.lane.b32.xlu2 %v11440_v46, %s7303_s29  ;;  %v5126_v23 = vadd.f32 %v10253_v54, %v10240_v56  ;;  %v7212_v56 = vld [vmem:[%s10771_s2 + $0x3d0] sm:$0xff]  }
 0x42a   : > { %5238 = vmatmul.bf16.gmra.mxu1 %v6084_v42  ;;  %3249 = vrot.lane.b32.xlu1 %v11441_v61, %s7302_s11  ;;  %v3030_v46 = vpack.c.bf16 %v2998_v57, %v2998_v57  ;;  %v3029_v61 = vpack.c.bf16 %v2997_v28, %v2997_v28  ;;  %v7006_v13 = vunpack.c.h.bf16 %v7212_v56  ;;  %v7005_v43 = vunpack.c.l.bf16 %v7212_v56 }
 0x42b   : > { %3247 = vrot.lane.b32.xlu0 %v11442_v37, %s7302_s11  ;;  %v5390_v4 = vadd.f32 %v5389_v22, %v5301_v36  ;;  %v3449_v36 = vpack.c.bf16 %v3417_v15, %v3417_v15  ;;  %v6958_v37 = vunpack.c.h.bf16 %v10438_v51  ;;  %v7082_v57 = vunpack.c.h.bf16 %v10397_v35  ;;  %v10468_v35 = vld [vmem:[%s10771_s2 + $0x2f8] sm:$0xff]  }
 0x42c   : > { %v3232_v19 = vpop.permute.xlu2 %3231  ;;  %v3525_v31 = vpop.permute.xlu1 %3524  ;;  %v6897_v56 = vunpack.c.l.bf16 %v10468_v35 }
 0x42d   : > { %3309 = vst.msk [vmem:[#allocation2 + $0x16c] sm:$0xf] %vm1444_vm8, %v3232_v19  ;;  %v3523_v33 = vpop.permute.xlu0 %3522  ;;  %v5478_v16 = vpop.f32.mrf.mxu0 }
 0x42e   : > { %3601 = vst.msk [vmem:[#allocation2 + $0x188] sm:$0xf] %vm2089_vm9, %v3525_v31  ;;  %v6443_v6 = vld [vmem:[#allocation2 + $0x160] sm:$0xf0]  ;;  %v5479_v60 = vadd.f32 %v5478_v16, %v5390_v4  ;;  %v3856_v4 = vmul.f32 %v7006_v13, %v11306_v30  ;;  %v11446_v31 = vld [vmem:[#allocation105_spill] sm:$0xff]  ;;  %v11447_v16 = vld [vmem:[#allocation58_spill] sm:$0xff] }
 0x42f   : > { %3600 = vst.msk [vmem:[#allocation2 + $0x174] sm:$0xf] %vm2089_vm9, %v3523_v33  ;;  %v6096_v40 = vor.u32 %v6443_v6, %v6095_v26  ;;  %v3855_v33 = vmul.f32 %v7005_v43, %v11446_v31  ;;  %v11448_v26 = vunpack.c.l.bf16 %v11447_v16  ;;  %v5305_v9 = vpop.f32.mrf.mxu2  ;;  %v11450_v13 = vld [vmem:[#allocation113_spill] sm:$0xff]  ;;  %v11451_v31 = vld [vmem:[#allocation107_spill] sm:$0xff] }
 0x430   : > { %5552 = vst.msk [vmem:[%s10306_s30 + $0x28] sm:$0xff] %vm5546_vm11, %v5479_v60  ;;  %v3888_v10 = vpack.c.bf16 %v3856_v4, %v3856_v4  ;;  %v5128_v60 = vadd.f32 %v10253_v54, %v10281_v1  ;;  %v2935_v43 = vunpack.c.l.bf16 %v11450_v13  ;;  %v7233_v13 = vld [vmem:[%s10771_s2 + $0x478] sm:$0xff]  }
 0x431   : > { %6389 = vmatmul.msk.bf16.gmra.mxu0 %vm5052_vm10, %v6096_v40  ;;  %3117 = vrot.lane.b32.xlu2 %v3027_v38, %s7302_s11  ;;  %v3419_v6 = vmul.f32 %v6958_v37, %v11448_v26 }
 0x432   : > { %4188 = vrot.lane.b32.xlu1 %v4098_v63, %s7301_s28  ;;  %3920 = vst.msk [vmem:[#allocation2 + $0x1b4] sm:$0xf] %vm254_vm4, %v3888_v10 }
 0x433   : > { %3694 = vrot.lane.b32.xlu0 %v11445_v25, %s7303_s29  ;;  %v5392_v19 = vpop.f32.mrf.mxu3  ;;  %v3887_v25 = vpack.c.bf16 %v3855_v33, %v3855_v33  ;;  %v2936_v33 = vunpack.c.l.bf16 %v11451_v31 }
 0x434   : > { %v3679_v3 = vpop.permute.xlu2 %3678  ;;  %v3677_v47 = vpop.permute.xlu1 %3676 }
 0x435   : > { %v3234_v53 = vpop.permute.xlu0 %3233  ;;  %v6109_v5 = vld [vmem:[#allocation2 + $0x184] sm:$0xf0]  ;;  %3754 = vst.msk [vmem:[#allocation2 + $0x16c] sm:$0xf] %vm2089_vm9, %v3677_v47  ;;  %v5214_v24 = vpop.f32.mrf.mxu1 }
 0x436   : > { %v6445_v42 = vld [vmem:[#allocation2 + $0x174] sm:$0xf]  ;;  %v5215_v39 = vadd.f32 %v5214_v24, %v5126_v23  ;;  %3310 = vst.msk [vmem:[#allocation2 + $0x180] sm:$0xf] %vm1444_vm8, %v3234_v53  ;;  %v3451_v23 = vpack.c.bf16 %v3419_v6, %v3419_v6  ;;  %v6127_v53 = vld [vmem:[#allocation2 + $0x198] sm:$0xf] }
 0x437   : > { %v6112_v22 = vor.u32 %v6445_v42, %v6109_v5  ;;  %3755 = vst.msk [vmem:[#allocation2 + $0x180] sm:$0xf] %vm2089_vm9, %v3679_v3  ;;  %v6452_v5 = vld [vmem:[#allocation2 + $0x1a8] sm:$0xf0] }
 0x438   : > { %v5304_v29 = vadd.f32 %v5303_v62, %v5215_v39  ;;  %v6128_v42 = vor.u32 %v6452_v5, %v6127_v53  ;;  %3919 = vst.msk [vmem:[#allocation2 + $0x1a0] sm:$0xf] %vm254_vm4, %v3887_v25  ;;  %v10477_v39 = vld [vmem:[%s10771_s2 + $0x470] sm:$0xff]   ;;  %v10507_v25 = vld [vmem:[%s10771_s2 + $0x3d8] sm:$0xff]  }
 0x439   : > { %5421 = vmatmul.bf16.gmra.mxu3 %v6112_v22  ;;  %3540 = vrot.lane.b32.xlu2 %v3449_v36, %s7303_s29  ;;  %v11449_v36 = vld [vmem:[#allocation86_spill] sm:$0xff]  ;;  %v7287_v22 = vld [vmem:[%s7350_s25 + $0xc0] sm:$0xf]  ;;  %v7086_v16 = vunpack.c.h.bf16 %v10477_v39 }
 0x43a   : > { %3123 = vrot.lane.b32.xlu1 %v3030_v46, %s7302_s11  ;;  %v5393_v30 = vadd.f32 %v5392_v19, %v5304_v29  ;;  %v4067_v46 = vmul.f32 %v7082_v57, %v11444_v7  ;;  %5337 = vmatmul.bf16.gmra.mxu2 %v6128_v42  ;;  %v11455_v57 = vld [vmem:[#allocation146_spill] sm:$0xff] }
 0x43b   : > { %3121 = vrot.lane.b32.xlu0 %v3029_v61, %s7302_s11  ;;  %v5394_v61 = vpop.f32.mrf.mxu3 }
 0x43c   : > { %v3106_v38 = vpop.permute.xlu2 %3105  ;;  %v4175_v40 = vpop.permute.xlu1 %4174  ;;  %v6444_v14 = vld [vmem:[#allocation2 + $0x16c] sm:$0xf] }
 0x43d   : > { %3181 = vst.msk [vmem:[#allocation2 + $0x19c] sm:$0xf] %vm1444_vm8, %v3106_v38  ;;  %v4173_v63 = vpop.permute.xlu0 %4172  ;;  %v5216_v62 = vpop.f32.mrf.mxu1  ;;  %v4099_v38 = vpack.c.bf16 %v4067_v46, %v4067_v46 }
 0x43e   : > { %4251 = vst.msk [vmem:[#allocation2 + $0x18c] sm:$0xf] %vm575_vm3, %v4175_v40  ;;  %v5481_v15 = vpop.f32.mrf.mxu0  ;;  %v5217_v28 = vadd.f32 %v5216_v62, %v5128_v60  ;;  %v6101_v1 = vld [vmem:[#allocation2 + $0x17c] sm:$0xf0]  ;;  %v5308_v40 = vpop.f32.mrf.mxu2 }
 0x43f   : > { %4250 = vst.msk [vmem:[#allocation2 + $0x178] sm:$0xf] %vm575_vm3, %v4173_v63  ;;  %v5482_v3 = vadd.f32 %v5481_v15, %v5393_v30  ;;  %v6104_v47 = vor.u32 %v6444_v14, %v6101_v1  ;;  %v2999_v63 = vmul.f32 %v6897_v56, %v2935_v43  ;;  %v4069_v30 = vmul.f32 %v7086_v16, %v2936_v33  ;;  %v11454_v15 = vld [vmem:[#allocation145_spill] sm:$0xff]  ;;  %v10523_v16 = vld [vmem:[%s7350_s25 + $0xcc] sm:$0xf] }
 0x440   : > { %v5306_v24 = vadd.f32 %v5305_v9, %v5217_v28  ;;  %v6957_v9 = vunpack.c.l.bf16 %v10438_v51  ;;  %v11452_v51 = vld [vmem:[#allocation110_spill] sm:$0xff]  ;;  %v7009_v1 = vunpack.c.l.bf16 %v10507_v25 }
 0x441   : > { %5553 = vst.msk [vmem:[%s10306_s30 + $0x30] sm:$0xff] %vm5546_vm11, %v5482_v3  ;;  %5243 = vmatmul.bf16.gmra.mxu1 %v6104_v47  ;;  %3692 = vrot.lane.b32.xlu2 %v11449_v36, %s7303_s29  ;;  %v11453_v14 = vunpack.c.l.bf16 %v11452_v51  ;;  %v7201_v3 = vld [vmem:[%s10771_s2 + $0x378] sm:$0xff]   ;;  %v4101_v36 = vpack.c.bf16 %v4069_v30, %v4069_v30 }
 0x442   : > { %3251 = vrot.lane.b32.xlu1 %v7287_v22, %s7302_s11  ;;  %v5395_v19 = vadd.f32 %v5394_v61, %v5306_v24  ;;  %v3031_v24 = vpack.c.bf16 %v2999_v63, %v2999_v63  ;;  %v10517_v22 = vld [vmem:[%s7350_s25 + $0xd0] sm:$0xf] }
 0x443   : > { %3544 = vrot.lane.b32.xlu0 %v3451_v23, %s7303_s29  ;;  %v3418_v62 = vmul.f32 %v6957_v9, %v11453_v14  ;;  %v5131_v23 = vadd.f32 %v10253_v54, %v10045_v55  ;;  %v3357_v61 = vunpack.c.l.bf16 %v10517_v22  ;;  %v3618_v9 = vshll.u32 %v10523_v16, 16 }
 0x444   : > { %v3529_v37 = vpop.permute.xlu2 %3528  ;;  %v3527_v7 = vpop.permute.xlu1 %3526 }
 0x445   : > { %v3108_v29 = vpop.permute.xlu0 %3107  ;;  %v6448_v4 = vld [vmem:[#allocation2 + $0x188] sm:$0xf0]  ;;  %3602 = vst.msk [vmem:[#allocation2 + $0x19c] sm:$0xf] %vm2089_vm9, %v3527_v7  ;;  %v3450_v46 = vpack.c.bf16 %v3418_v62, %v3418_v62  ;;  %v5397_v7 = vpop.f32.mrf.mxu3 }
 0x446   : > { %v5483_v26 = vpop.f32.mrf.mxu0  ;;  %v6115_v6 = vld [vmem:[#allocation2 + $0x178] sm:$0xf]  ;;  %3182 = vst.msk [vmem:[#allocation2 + $0x1b0] sm:$0xf] %vm1444_vm8, %v3108_v29  ;;  %v5310_v63 = vpop.f32.mrf.mxu2 }
 0x447   : > { %v5484_v10 = vadd.f32 %v5483_v26, %v5395_v19  ;;  %v6116_v60 = vor.u32 %v6448_v4, %v6115_v6  ;;  %3603 = vst.msk [vmem:[#allocation2 + $0x1b0] sm:$0xf] %vm2089_vm9, %v3529_v37  ;;  %v11456_v37 = vld [vmem:[#allocation109_spill] sm:$0xff]  ;;  %v6962_v19 = vunpack.c.h.bf16 %v7201_v3  ;;  %v6961_v4 = vunpack.c.l.bf16 %v7201_v3 }
 0x448   : > { %v3857_v56 = vmul.f32 %v7009_v1, %v11456_v37  ;;  %v3356_v26 = vunpack.c.l.bf16 %v10523_v16  ;;  %v3620_v1 = vrot.slane %v3618_v9, 5 }
 0x449   : > { %5554 = vst.msk [vmem:[%s10306_s30 + $0x38] sm:$0xff] %vm5546_vm11, %v5484_v10  ;;  %6390 = vmatmul.msk.bf16.gmra.mxu0 %vm5052_vm10, %v6116_v60  ;;  %4190 = vrot.lane.b32.xlu2 %v4099_v38, %s7301_s28  ;;  %v3615_v38 = vshrl.u32 %v10523_v16, 16  ;;  %v3421_v14 = vmul.f32 %v6962_v19, %v3357_v61 }
 0x44a   : > { %3698 = vrot.lane.b32.xlu1 %v11454_v15, %s7303_s29  ;;  %v3889_v10 = vpack.c.bf16 %v3857_v56, %v3857_v56  ;;  %v3420_v62 = vmul.f32 %v6961_v4, %v3356_v26 }
 0x44b   : > { %3696 = vrot.lane.b32.xlu0 %v11455_v57, %s7303_s29  ;;  %v3617_v3 = vrot.slane %v3615_v38, 4  ;;  %v3453_v37 = vpack.c.bf16 %v3421_v14, %v3421_v14 }
 0x44c   : > { %v3681_v28 = vpop.permute.xlu2 %3680  ;;  %v3238_v47 = vpop.permute.xlu1 %3237  ;;  %v6450_v5 = vld [vmem:[#allocation2 + $0x19c] sm:$0xf]  ;;  %3921 = vst.msk [vmem:[#allocation2 + $0x1c8] sm:$0xf] %vm254_vm4, %v3889_v10  ;;  %v3452_v56 = vpack.c.bf16 %v3420_v62, %v3420_v62 }
 0x44d   : > { %v3236_v53 = vpop.permute.xlu0 %3235  ;;  %3312 = vst.msk [vmem:[#allocation2 + $0x1a8] sm:$0xf] %vm1444_vm8, %v3238_v47  ;;  %v5219_v42 = vpop.f32.mrf.mxu1  ;;  %v5133_v47 = vadd.f32 %v10253_v54, %v10070_v18  ;;  %v7010_v18 = vunpack.c.h.bf16 %v10507_v25 }
 0x44e   : > { %v5220_v29 = vadd.f32 %v5219_v42, %v5131_v23  ;;  %3311 = vst.msk [vmem:[#allocation2 + $0x194] sm:$0xf] %vm1444_vm8, %v3236_v53  ;;  %v6129_v55 = vld [vmem:[#allocation2 + $0x1ac] sm:$0xf0]  ;;  %v5486_v30 = vpop.f32.mrf.mxu0  ;;  %v6147_v23 = vld [vmem:[#allocation2 + $0x1c0] sm:$0xf]  ;;  %v5313_v25 = vpop.f32.mrf.mxu2 }
 0x44f   : > { %3756 = vst.msk [vmem:[#allocation2 + $0x194] sm:$0xf] %vm2089_vm9, %v3681_v28  ;;  %v6132_v6 = vor.u32 %v6450_v5, %v6129_v55  ;;  %v5399_v55 = vpop.f32.mrf.mxu3 }
 0x450   : > { %v5309_v60 = vadd.f32 %v5308_v40, %v5220_v29  ;;  %v6457_v40 = vld [vmem:[#allocation2 + $0x1d0] sm:$0xf0]  ;;  %v3624_v29 = vshll.u32 %v10517_v22, 16 }
 0x451   : > { %5426 = vmatmul.bf16.gmra.mxu3 %v6132_v6  ;;  %3542 = vrot.lane.b32.xlu2 %v3450_v46, %s7303_s29  ;;  %v6148_v46 = vor.u32 %v6457_v40, %v6147_v23  ;;  %v7290_v6 = vld [vmem:[%s7350_s25 + $0xc4] sm:$0xf] }
 0x452   : > { %v5398_v51 = vadd.f32 %v5397_v7, %v5309_v60  ;;  %3125 = vrot.lane.b32.xlu1 %v3031_v24, %s7302_s11  ;;  %v7085_v24 = vunpack.c.l.bf16 %v10477_v39  ;;  %v3621_v7 = vor.u32 %v3620_v1, %v3617_v3  ;;  %v11457_v39 = vld [vmem:[#allocation108_spill] sm:$0xff]  ;;  %v6898_v3 = vunpack.c.h.bf16 %v10468_v35 }
 0x453   : > { %4194 = vrot.lane.b32.xlu0 %v4101_v36, %s7301_s28  ;;  %5342 = vmatmul.bf16.gmra.mxu2 %v6148_v46  ;;  %v3858_v4 = vmul.f32 %v7010_v18, %v11457_v39  ;;  %v5136_v1 = vadd.f32 %v10253_v54, %v10092_v11 }
 0x454   : > { %v4179_v28 = vpop.permute.xlu2 %4178  ;;  %v5487_v53 = vadd.f32 %v5486_v30, %v5398_v51  ;;  %v4177_v5 = vpop.permute.xlu1 %4176  ;;  %v4068_v26 = vmul.f32 %v7085_v24, %v2935_v43  ;;  %v10550_v51 = vrot.slane %v3624_v29, 5  ;;  %v3000_v29 = vmul.f32 %v6898_v3, %v2936_v33 }
 0x455   : > { %4253 = vst.msk [vmem:[#allocation2 + $0x1b4] sm:$0xf] %vm575_vm3, %v4179_v28  ;;  %v3683_v42 = vpop.permute.xlu0 %3682  ;;  %v5221_v36 = vpop.f32.mrf.mxu1  ;;  %v3890_v9 = vpack.c.bf16 %v3858_v4, %v3858_v4  ;;  %v5138_v33 = vadd.f32 %v10253_v54, %v10133_v50 }
 0x456   : > { %4252 = vst.msk [vmem:[#allocation2 + $0x1a0] sm:$0xf] %vm575_vm3, %v4177_v5  ;;  %v5222_v61 = vadd.f32 %v5221_v36, %v5133_v47  ;;  %v5488_v10 = vpop.f32.mrf.mxu0  ;;  %v4100_v40 = vpack.c.bf16 %v4068_v26, %v4068_v26  ;;  %v11458_v47 = vld [vmem:[#allocation57_spill] sm:$0xff]  ;;  %v11459_v5 = vld [vmem:[#allocation114_spill] sm:$0xff] }
 0x457   : > { %5555 = vst.msk [vmem:[%s10306_s30 + $0x40] sm:$0xff] %vm5546_vm11, %v5487_v53  ;;  %v4006_v53 = vunpack.c.l.bf16 %v11458_v47  ;;  %v6449_v24 = vld [vmem:[#allocation2 + $0x194] sm:$0xf] }
 0x458   : > { %3757 = vst.msk [vmem:[#allocation2 + $0x1a8] sm:$0xf] %vm2089_vm9, %v3683_v42  ;;  %v5311_v19 = vadd.f32 %v5310_v63, %v5222_v61  ;;  %v3622_v63 = vrot.slane %v3621_v7, 4  ;;  %v4007_v42 = vunpack.c.l.bf16 %v11459_v5  ;;  %v7090_v61 = vunpack.c.h.bf16 %v7233_v13 }
 0x459   : > { %3253 = vrot.lane.b32.xlu2 %v7290_v6, %s7302_s11  ;;  %3922 = vst.msk [vmem:[#allocation2 + $0x1dc] sm:$0xf] %vm254_vm4, %v3890_v9 }
 0x45a   : > { %v5400_v38 = vadd.f32 %v5399_v55, %v5311_v19  ;;  %3548 = vrot.lane.b32.xlu1 %v3453_v37, %s7303_s29  ;;  %v7089_v37 = vunpack.c.l.bf16 %v7233_v13  ;;  %v10569_v18 = vsel %vm7655_vm2, %v3622_v63, %v10550_v51  ;;  %v4071_v19 = vmul.f32 %v7090_v61, %v4007_v42  ;;  %v6167_v61 = vld [vmem:[#allocation2 + $0x1e8] sm:$0xf] }
 0x45b   : > { %3546 = vrot.lane.b32.xlu0 %v3452_v56, %s7303_s29  ;;  %v5402_v7 = vpop.f32.mrf.mxu3  ;;  %v3628_v13 = vshrl.u32 %v10517_v22, 16 }
 0x45c   : > { %v3531_v60 = vpop.permute.xlu2 %3530  ;;  %v6453_v30 = vld [vmem:[#allocation2 + $0x1b0] sm:$0xf0]  ;;  %v5489_v43 = vadd.f32 %v5488_v10, %v5400_v38  ;;  %v3112_v14 = vpop.permute.xlu1 %3111  ;;  %v4070_v39 = vmul.f32 %v7089_v37, %v4006_v53  ;;  %v6462_v37 = vld [vmem:[#allocation2 + $0x1f8] sm:$0xf0] }
 0x45d   : > { %v3110_v62 = vpop.permute.xlu0 %3109  ;;  %v6135_v28 = vld [vmem:[#allocation2 + $0x1a0] sm:$0xf]  ;;  %3184 = vst.msk [vmem:[#allocation2 + $0x1d8] sm:$0xf] %vm1444_vm8, %v3112_v14  ;;  %v3630_v54 = vrot.slane %v3628_v13, 4 }
 0x45e   : > { %v6136_v23 = vor.u32 %v6453_v30, %v6135_v28  ;;  %5556 = vst.msk [vmem:[%s10306_s30 + $0x48] sm:$0xff] %vm5546_vm11, %v5489_v43  ;;  %v5224_v46 = vpop.f32.mrf.mxu1  ;;  %v4103_v30 = vpack.c.bf16 %v4071_v19, %v4071_v19  ;;  %v4102_v63 = vpack.c.bf16 %v4070_v39, %v4070_v39 }
 0x45f   : > { %v6121_v36 = vld [vmem:[#allocation2 + $0x1a4] sm:$0xf0]  ;;  %3183 = vst.msk [vmem:[#allocation2 + $0x1c4] sm:$0xf] %vm1444_vm8, %v3110_v62  ;;  %v5225_v35 = vadd.f32 %v5224_v46, %v5136_v1 }
 0x460   : > { %v6124_v56 = vor.u32 %v6449_v24, %v6121_v36  ;;  %6391 = vmatmul.msk.bf16.gmra.mxu0 %vm5052_vm10, %v6136_v23  ;;  %3604 = vst.msk [vmem:[#allocation2 + $0x1c4] sm:$0xf] %vm2089_vm9, %v3531_v60  ;;  %v5315_v60 = vpop.f32.mrf.mxu2  ;;  %v7291_v23 = vld [vmem:[%s7350_s25 + $0xd4] sm:$0x1]  ;;  %v3631_v36 = vor.u32 %v3630_v54, %v10550_v51 }
 0x461   : > { %v5314_v55 = vadd.f32 %v5313_v25, %v5225_v35  ;;  %4192 = vrot.lane.b32.xlu2 %v4100_v40, %s7301_s28  ;;  %v3032_v25 = vpack.c.bf16 %v3000_v29, %v3000_v29  ;;  %v7214_v40 = vld [vmem:[%s10771_s2 + $0x3e0] sm:$0xff]   ;;  %v6168_v29 = vor.u32 %v6462_v37, %v6167_v61  ;;  %v7215_v37 = vld [vmem:[%s10771_s2 + $0x3e8] sm:$0xff]  }
 0x462   : > { %5248 = vmatmul.bf16.gmra.mxu1 %v6124_v56  ;;  %3700 = vrot.lane.b32.xlu1 %v10569_v18, %s7303_s29  ;;  %v7014_v42 = vunpack.c.h.bf16 %v7214_v40  ;;  %v7013_v35 = vunpack.c.l.bf16 %v7214_v40  ;;  %v11461_v56 = vld [vmem:[#allocation112_spill] sm:$0xff] }
 0x463   : > { %3257 = vrot.lane.b32.xlu0 %v10517_v22, %s7302_s11  ;;  %v5403_v26 = vadd.f32 %v5402_v7, %v5314_v55  ;;  %v5404_v50 = vpop.f32.mrf.mxu3  ;;  %v3634_v22 = vshll.u32 %v7291_v23, 16  ;;  %v11462_v55 = vld [vmem:[#allocation115_spill] sm:$0xff]  ;;  %5347 = vmatmul.bf16.gmra.mxu2 %v6168_v29  ;;  %v7017_v29 = vunpack.c.l.bf16 %v7215_v37 }
 0x464   : > { %v3242_v4 = vpop.permute.xlu2 %3241  ;;  %v3240_v6 = vpop.permute.xlu1 %3239  ;;  %v3860_v7 = vmul.f32 %v7014_v42, %v11461_v56  ;;  %v3859_v19 = vmul.f32 %v7013_v35, %v11462_v55 }
 0x465   : > { %3314 = vst.msk [vmem:[#allocation2 + $0x1d0] sm:$0xf] %vm1444_vm8, %v3242_v4  ;;  %v3533_v31 = vpop.permute.xlu0 %3532  ;;  %v5491_v38 = vpop.f32.mrf.mxu0 }
 0x466   : > { %3313 = vst.msk [vmem:[#allocation2 + $0x1bc] sm:$0xf] %vm1444_vm8, %v3240_v6  ;;  %v5492_v9 = vadd.f32 %v5491_v38, %v5403_v26  ;;  %v5226_v10 = vpop.f32.mrf.mxu1  ;;  %v3892_v4 = vpack.c.bf16 %v3860_v7, %v3860_v7  ;;  %v3632_v26 = vrot.slane %v3631_v36, 4  ;;  %v3636_v6 = vrot.slane %v3634_v22, 5 }
 0x467   : > { %3605 = vst.msk [vmem:[#allocation2 + $0x1d8] sm:$0xf] %vm2089_vm9, %v3533_v31  ;;  %v5227_v43 = vadd.f32 %v5226_v10, %v5138_v33  ;;  %v6455_v53 = vld [vmem:[#allocation2 + $0x1c4] sm:$0xf]  ;;  %v3891_v31 = vpack.c.bf16 %v3859_v19, %v3859_v19  ;;  %v10608_v33 = vld [vmem:[%s10772_s3] ss:$0 sm:$0xff]  ;;  %v7018_v7 = vunpack.c.h.bf16 %v7215_v37 }
 0x468   : > { %5557 = vst.msk [vmem:[%s10306_s30 + $0x50] sm:$0xff] %vm5546_vm11, %v5492_v9  ;;  %v5318_v39 = vpop.f32.mrf.mxu2  ;;  %v5141_v38 = vadd.f32 %v10608_v33, %v10158_v58  ;;  %v10617_v13 = vsel %vm7655_vm2, %v3632_v26, %v3636_v6  ;;  %v5143_v54 = vadd.f32 %v10608_v33, %v10183_v0  ;;  %v11464_v26 = vld [vmem:[#allocation111_spill] sm:$0xff] }
 0x469   : > { %v5316_v14 = vadd.f32 %v5315_v60, %v5227_v43  ;;  %3127 = vrot.lane.b32.xlu2 %v3032_v25, %s7302_s11  ;;  %3924 = vst.msk [vmem:[#allocation2 + $0x204] sm:$0xf] %vm254_vm4, %v3892_v4  ;;  %v3861_v6 = vmul.f32 %v7017_v29, %v11464_v26  ;;  %v11465_v26 = vunpack.c.l.bf16 %v11455_v57 }
 0x46a   : > { %4198 = vrot.lane.b32.xlu1 %v4103_v30, %s7301_s28  ;;  %3923 = vst.msk [vmem:[#allocation2 + $0x1f0] sm:$0xf] %vm254_vm4, %v3891_v31 }
 0x46b   : > { %4196 = vrot.lane.b32.xlu0 %v4102_v63, %s7301_s28  ;;  %v5405_v28 = vadd.f32 %v5404_v50, %v5316_v14 }
 0x46c   : > { %v4181_v62 = vpop.permute.xlu2 %4180  ;;  %v3687_v3 = vpop.permute.xlu1 %3686 }
 0x46d   : > { %4254 = vst.msk [vmem:[#allocation2 + $0x1c8] sm:$0xf] %vm575_vm3, %v4181_v62  ;;  %v3685_v1 = vpop.permute.xlu0 %3684  ;;  %v5493_v47 = vpop.f32.mrf.mxu0 }
 0x46e   : > { %3759 = vst.msk [vmem:[#allocation2 + $0x1d0] sm:$0xf] %vm2089_vm9, %v3687_v3  ;;  %v6149_v5 = vld [vmem:[#allocation2 + $0x1d4] sm:$0xf0]  ;;  %v5494_v46 = vadd.f32 %v5493_v47, %v5405_v28 }
 0x46f   : > { %3758 = vst.msk [vmem:[#allocation2 + $0x1bc] sm:$0xf] %vm2089_vm9, %v3685_v1  ;;  %v6152_v24 = vor.u32 %v6455_v53, %v6149_v5 }
 0x470   : > { %5558 = vst.msk [vmem:[%s10306_s30 + $0x58] sm:$0xff] %vm5546_vm11, %v5494_v46  ;;  %v5320_v50 = vpop.f32.mrf.mxu2 }
 0x471   : > { %5431 = vmatmul.bf16.gmra.mxu3 %v6152_v24  ;;  %3255 = vrot.lane.b32.xlu2 %v10523_v16, %s7302_s11 }
 0x473   : > { %v5407_v43 = vpop.f32.mrf.mxu3 }
 0x474   : > { %v3116_v51 = vpop.permute.xlu2 %3115  ;;  %v3114_v16 = vpop.permute.xlu1 %3113  ;;  %v6155_v23 = vld [vmem:[#allocation2 + $0x1c8] sm:$0xf] }
 0x475   : > { %3186 = vst.msk [vmem:[#allocation2 + $0x200] sm:$0xf] %vm1444_vm8, %v3116_v51  ;;  %v4183_v25 = vpop.permute.xlu0 %4182  ;;  %v6141_v9 = vld [vmem:[#allocation2 + $0x1cc] sm:$0xf0]  ;;  %v5229_v10 = vpop.f32.mrf.mxu1 }
 0x476   : > { %3185 = vst.msk [vmem:[#allocation2 + $0x1ec] sm:$0xf] %vm1444_vm8, %v3114_v16  ;;  %v6454_v60 = vld [vmem:[#allocation2 + $0x1bc] sm:$0xf]  ;;  %v5230_v30 = vadd.f32 %v5229_v10, %v5141_v38  ;;  %v3893_v16 = vpack.c.bf16 %v3861_v6, %v3861_v6 }
 0x477   : > { %4255 = vst.msk [vmem:[#allocation2 + $0x1dc] sm:$0xf] %vm575_vm3, %v4183_v25  ;;  %v6144_v63 = vor.u32 %v6454_v60, %v6141_v9  ;;  %v5146_v25 = vadd.f32 %v10608_v33, %v10214_v20 }
 0x478   : > { %v5319_v58 = vadd.f32 %v5318_v39, %v5230_v30  ;;  %v11463_v39 = vld [vmem:[#allocation116_spill] sm:$0xff]  ;;  %v5323_v38 = vpop.f32.mrf.mxu2  ;;  %v6187_v30 = vld [vmem:[#allocation2 + $0x210] sm:$0xf]  ;;  %3925 = vst.msk [vmem:[#allocation2 + $0x218] sm:$0xf] %vm254_vm4, %v3893_v16 }
 0x479   : > { %5253 = vmatmul.bf16.gmra.mxu1 %v6144_v63  ;;  %3702 = vrot.lane.b32.xlu2 %v10617_v13, %s7303_s29  ;;  %v3862_v4 = vmul.f32 %v7018_v7, %v11463_v39  ;;  %v6472_v16 = vld [vmem:[#allocation2 + $0x248] sm:$0xf0] }
 0x47a   : > { %v5408_v28 = vadd.f32 %v5407_v43, %v5319_v58  ;;  %v6467_v58 = vld [vmem:[#allocation2 + $0x220] sm:$0xf0] }
 0x47b   : > { %v5409_v0 = vpop.f32.mrf.mxu3  ;;  %v3894_v51 = vpack.c.bf16 %v3862_v4, %v3862_v4 }
 0x47c   : > { %v3244_v14 = vpop.permute.xlu2 %3243  ;;  %v3537_v62 = vpop.permute.xlu1 %3536 }
 0x47d   : > { %3315 = vst.msk [vmem:[#allocation2 + $0x1e4] sm:$0xf] %vm1444_vm8, %v3244_v14  ;;  %v3535_v11 = vpop.permute.xlu0 %3534  ;;  %v5231_v3 = vpop.f32.mrf.mxu1 }
 0x47e   : > { %3607 = vst.msk [vmem:[#allocation2 + $0x200] sm:$0xf] %vm2089_vm9, %v3537_v62  ;;  %v5496_v1 = vpop.f32.mrf.mxu0  ;;  %v6458_v22 = vld [vmem:[#allocation2 + $0x1d8] sm:$0xf0]  ;;  %v5232_v40 = vadd.f32 %v5231_v3, %v5143_v54 }
 0x47f   : > { %3606 = vst.msk [vmem:[#allocation2 + $0x1ec] sm:$0xf] %vm2089_vm9, %v3535_v11  ;;  %v5497_v47 = vadd.f32 %v5496_v1, %v5408_v28  ;;  %v6156_v53 = vor.u32 %v6458_v22, %v6155_v23  ;;  %v5148_v1 = vadd.f32 %v10608_v33, %v10244_v27 }
 0x480   : > { %v5321_v5 = vadd.f32 %v5320_v50, %v5232_v40  ;;  %3926 = vst.msk [vmem:[#allocation2 + $0x22c] sm:$0xf] %vm254_vm4, %v3894_v51  ;;  %v6188_v50 = vor.u32 %v6467_v58, %v6187_v30 }
 0x481   : > { %5559 = vst.msk [vmem:[%s10306_s30 + $0x60] sm:$0xff] %vm5546_vm11, %v5497_v47  ;;  %6392 = vmatmul.msk.bf16.gmra.mxu0 %vm5052_vm10, %v6156_v53 }
 0x482   : > { %v5410_v36 = vadd.f32 %v5409_v0, %v5321_v5  ;;  %5352 = vmatmul.bf16.gmra.mxu2 %v6188_v50  ;;  %v5325_v5 = vpop.f32.mrf.mxu2 }
 0x483   : > { %v5412_v54 = vpop.f32.mrf.mxu3 }
 0x484   : > { %v3691_v42 = vpop.permute.xlu2 %3690  ;;  %v3689_v46 = vpop.permute.xlu1 %3688 }
 0x485   : > { %v3246_v24 = vpop.permute.xlu0 %3245  ;;  %v6169_v61 = vld [vmem:[#allocation2 + $0x1fc] sm:$0xf0]  ;;  %3760 = vst.msk [vmem:[#allocation2 + $0x1e4] sm:$0xf] %vm2089_vm9, %v3689_v46 }
 0x486   : > { %v5498_v35 = vpop.f32.mrf.mxu0  ;;  %v6460_v56 = vld [vmem:[#allocation2 + $0x1ec] sm:$0xf]  ;;  %3316 = vst.msk [vmem:[#allocation2 + $0x1f8] sm:$0xf] %vm1444_vm8, %v3246_v24 }
 0x487   : > { %v5499_v55 = vadd.f32 %v5498_v35, %v5410_v36  ;;  %v6172_v19 = vor.u32 %v6460_v56, %v6169_v61  ;;  %3761 = vst.msk [vmem:[#allocation2 + $0x1f8] sm:$0xf] %vm2089_vm9, %v3691_v42 }
 0x489   : > { %5560 = vst.msk [vmem:[%s10306_s30 + $0x68] sm:$0xff] %vm5546_vm11, %v5499_v55  ;;  %5436 = vmatmul.bf16.gmra.mxu3 %v6172_v19  ;;  %v7216_v55 = vld [vmem:[%s10771_s2 + $0x3f0] sm:$0xff]  }
 0x48a   : > { %v7021_v39 = vunpack.c.l.bf16 %v7216_v55 }
 0x48b   : > { %v5414_v27 = vpop.f32.mrf.mxu3 }
 0x48c   : > { %v3118_v31 = vpop.permute.xlu2 %3117  ;;  %v4187_v9 = vpop.permute.xlu1 %4186  ;;  %v6459_v60 = vld [vmem:[#allocation2 + $0x1e4] sm:$0xf]  ;;  %v3863_v6 = vmul.f32 %v7021_v39, %v11465_v26 }
 0x48d   : > { %3187 = vst.msk [vmem:[#allocation2 + $0x214] sm:$0xf] %vm1444_vm8, %v3118_v31  ;;  %v4185_v10 = vpop.permute.xlu0 %4184  ;;  %v5234_v63 = vpop.f32.mrf.mxu1 }
 0x48e   : > { %4257 = vst.msk [vmem:[#allocation2 + $0x204] sm:$0xf] %vm575_vm3, %v4187_v9  ;;  %v5235_v43 = vadd.f32 %v5234_v63, %v5146_v25  ;;  %v6161_v14 = vld [vmem:[#allocation2 + $0x1f4] sm:$0xf0]  ;;  %v5501_v11 = vpop.f32.mrf.mxu0  ;;  %v3895_v31 = vpack.c.bf16 %v3863_v6, %v3863_v6  ;;  %v5328_v9 = vpop.f32.mrf.mxu2  ;;  %v7022_v63 = vunpack.c.h.bf16 %v7216_v55 }
 0x48f   : > { %4256 = vst.msk [vmem:[#allocation2 + $0x1f0] sm:$0xf] %vm575_vm3, %v4185_v10  ;;  %v6164_v62 = vor.u32 %v6459_v60, %v6161_v14  ;;  %v5151_v60 = vadd.f32 %v10608_v33, %v10030_v41  ;;  %v7217_v6 = vld [vmem:[%s10771_s2 + $0x3f8] sm:$0xff]  }
 0x490   : > { %v5324_v20 = vadd.f32 %v5323_v38, %v5235_v43  ;;  %v6207_v38 = vld [vmem:[#allocation2 + $0x238] sm:$0xf]  ;;  %3927 = vst.msk [vmem:[#allocation2 + $0x240] sm:$0xf] %vm254_vm4, %v3895_v31  ;;  %v11466_v43 = vunpack.c.l.bf16 %v11454_v15  ;;  %v3801_v31 = vunpack.c.l.bf16 %v10569_v18 }
 0x491   : > { %5258 = vmatmul.bf16.gmra.mxu1 %v6164_v62  ;;  %v6208_v10 = vor.u32 %v6472_v16, %v6207_v38 }
 0x492   : > { %v5413_v28 = vadd.f32 %v5412_v54, %v5324_v20  ;;  %v3864_v14 = vmul.f32 %v7022_v63, %v11466_v43  ;;  %v7025_v63 = vunpack.c.l.bf16 %v7217_v6 }
 0x493   : > { %5357 = vmatmul.bf16.gmra.mxu2 %v6208_v10 }
 0x494   : > { %v3541_v3 = vpop.permute.xlu2 %3540  ;;  %v5502_v23 = vadd.f32 %v5501_v11, %v5413_v28  ;;  %v3539_v22 = vpop.permute.xlu1 %3538  ;;  %v3896_v62 = vpack.c.bf16 %v3864_v14, %v3864_v14 }
 0x495   : > { %v3120_v40 = vpop.permute.xlu0 %3119  ;;  %v6463_v47 = vld [vmem:[#allocation2 + $0x200] sm:$0xf0]  ;;  %3608 = vst.msk [vmem:[#allocation2 + $0x214] sm:$0xf] %vm2089_vm9, %v3539_v22  ;;  %v5236_v53 = vpop.f32.mrf.mxu1 }
 0x496   : > { %v6175_v0 = vld [vmem:[#allocation2 + $0x1f0] sm:$0xf]  ;;  %5561 = vst.msk [vmem:[%s10306_s30 + $0x70] sm:$0xff] %vm5546_vm11, %v5502_v23  ;;  %v5237_v42 = vadd.f32 %v5236_v53, %v5148_v1  ;;  %v5503_v61 = vpop.f32.mrf.mxu0  ;;  %v5153_v1 = vadd.f32 %v10608_v33, %v10064_v48 }
 0x497   : > { %v6176_v46 = vor.u32 %v6463_v47, %v6175_v0  ;;  %3188 = vst.msk [vmem:[#allocation2 + $0x228] sm:$0xf] %vm1444_vm8, %v3120_v40  ;;  %v5330_v0 = vpop.f32.mrf.mxu2 }
 0x498   : > { %3609 = vst.msk [vmem:[#allocation2 + $0x228] sm:$0xf] %vm2089_vm9, %v3541_v3  ;;  %v5326_v24 = vadd.f32 %v5325_v5, %v5237_v42 }
 0x499   : > { %6393 = vmatmul.msk.bf16.gmra.mxu0 %vm5052_vm10, %v6176_v46  ;;  %3928 = vst.msk [vmem:[#allocation2 + $0x254] sm:$0xf] %vm254_vm4, %v3896_v62 }
 0x49a   : > { %v5415_v36 = vadd.f32 %v5414_v27, %v5326_v24 }
 0x49c   : > { %v3693_v37 = vpop.permute.xlu2 %3692  ;;  %v5504_v35 = vadd.f32 %v5503_v61, %v5415_v36  ;;  %v3250_v56 = vpop.permute.xlu1 %3249  ;;  %v6465_v29 = vld [vmem:[#allocation2 + $0x214] sm:$0xf] }
 0x49d   : > { %v3248_v7 = vpop.permute.xlu0 %3247  ;;  %3318 = vst.msk [vmem:[#allocation2 + $0x220] sm:$0xf] %vm1444_vm8, %v3250_v56 }
 0x49e   : > { %5562 = vst.msk [vmem:[%s10306_s30 + $0x78] sm:$0xff] %vm5546_vm11, %v5504_v35 }
 0x49f   : > { %3317 = vst.msk [vmem:[#allocation2 + $0x20c] sm:$0xf] %vm1444_vm8, %v3248_v7  ;;  %v6189_v19 = vld [vmem:[#allocation2 + $0x224] sm:$0xf0]  ;;  %v6227_v7 = vld [vmem:[#allocation2 + $0x260] sm:$0xf]  ;;  %v5333_v26 = vpop.f32.mrf.mxu2 }
 0x4a0   : > { %3762 = vst.msk [vmem:[#allocation2 + $0x20c] sm:$0xf] %vm2089_vm9, %v3693_v37  ;;  %v6192_v4 = vor.u32 %v6465_v29, %v6189_v19  ;;  %v6477_v29 = vld [vmem:[#allocation2 + $0x270] sm:$0xf0]  ;;  %v3802_v19 = vunpack.c.l.bf16 %v10617_v13  ;;  %v7026_v13 = vunpack.c.h.bf16 %v7217_v6 }
 0x4a1   : > { %v6228_v55 = vor.u32 %v6477_v29, %v6227_v7 }
 0x4a2   : > { %5441 = vmatmul.bf16.gmra.mxu3 %v6192_v4 }
 0x4a3   : > { %5362 = vmatmul.bf16.gmra.mxu2 %v6228_v55 }
 0x4a4   : > { %v4191_v51 = vpop.permute.xlu2 %4190  ;;  %v4189_v25 = vpop.permute.xlu1 %4188 }
 0x4a5   : > { %4259 = vst.msk [vmem:[#allocation2 + $0x22c] sm:$0xf] %vm575_vm3, %v4191_v51  ;;  %v3695_v30 = vpop.permute.xlu0 %3694  ;;  %v5417_v50 = vpop.f32.mrf.mxu3  ;;  %v5156_v51 = vadd.f32 %v10608_v33, %v10083_v59  ;;  %v3865_v59 = vmul.f32 %v7025_v63, %v3801_v31 }
 0x4a6   : > { %4258 = vst.msk [vmem:[#allocation2 + $0x218] sm:$0xf] %vm575_vm3, %v4189_v25 }
 0x4a7   : > { %v5239_v58 = vpop.f32.mrf.mxu1  ;;  %3763 = vst.msk [vmem:[#allocation2 + $0x220] sm:$0xf] %vm2089_vm9, %v3695_v30  ;;  %v6464_v15 = vld [vmem:[#allocation2 + $0x20c] sm:$0xf]  ;;  %v3866_v30 = vmul.f32 %v7026_v13, %v3802_v19 }
 0x4a8   : > { %v5240_v57 = vadd.f32 %v5239_v58, %v5151_v60 }
 0x4a9   : > { %v3898_v43 = vpack.c.bf16 %v3866_v30, %v3866_v30 }
 0x4aa   : > { %v5329_v54 = vadd.f32 %v5328_v9, %v5240_v57 }
 0x4ab   : > { %3930 = vst.msk [vmem:[#allocation2 + $0x27c] sm:$0xf] %vm254_vm4, %v3898_v43 }
 0x4ac   : > { %v3543_v20 = vpop.permute.xlu2 %3542  ;;  %v6468_v11 = vld [vmem:[#allocation2 + $0x228] sm:$0xf0]  ;;  %v3124_v41 = vpop.permute.xlu1 %3123  ;;  %v5418_v28 = vadd.f32 %v5417_v50, %v5329_v54  ;;  %v3897_v50 = vpack.c.bf16 %v3865_v59, %v3865_v59 }
 0x4ad   : > { %v6195_v3 = vld [vmem:[#allocation2 + $0x218] sm:$0xf]  ;;  %3190 = vst.msk [vmem:[#allocation2 + $0x250] sm:$0xf] %vm1444_vm8, %v3124_v41  ;;  %v3122_v23 = vpop.permute.xlu0 %3121  ;;  %v5419_v24 = vpop.f32.mrf.mxu3 }
 0x4ae   : > { %v5506_v22 = vpop.f32.mrf.mxu0  ;;  %v6181_v40 = vld [vmem:[#allocation2 + $0x21c] sm:$0xf0]  ;;  %v6196_v47 = vor.u32 %v6468_v11, %v6195_v3  ;;  %3189 = vst.msk [vmem:[#allocation2 + $0x23c] sm:$0xf] %vm1444_vm8, %v3122_v23 }
 0x4af   : > { %v5241_v53 = vpop.f32.mrf.mxu1  ;;  %v5507_v5 = vadd.f32 %v5506_v22, %v5418_v28  ;;  %v6184_v42 = vor.u32 %v6464_v15, %v6181_v40  ;;  %3610 = vst.msk [vmem:[#allocation2 + $0x23c] sm:$0xf] %vm2089_vm9, %v3543_v20  ;;  %v5158_v20 = vadd.f32 %v10608_v33, %v10109_v17  ;;  %v5335_v22 = vpop.f32.mrf.mxu2 }
 0x4b0   : > { %v5242_v46 = vadd.f32 %v5241_v53, %v5153_v1  ;;  %6394 = vmatmul.msk.bf16.gmra.mxu0 %vm5052_vm10, %v6196_v47  ;;  %3929 = vst.msk [vmem:[#allocation2 + $0x268] sm:$0xf] %vm254_vm4, %v3897_v50 }
 0x4b1   : > { %5563 = vst.msk [vmem:[%s10306_s30 + $0x80] sm:$0xff] %vm5546_vm11, %v5507_v5  ;;  %5263 = vmatmul.bf16.gmra.mxu1 %v6184_v42 }
 0x4b2   : > { %v5331_v48 = vadd.f32 %v5330_v0, %v5242_v46 }
 0x4b4   : > { %v3254_v27 = vpop.permute.xlu2 %3253  ;;  %v3252_v36 = vpop.permute.xlu1 %3251  ;;  %v5420_v61 = vadd.f32 %v5419_v24, %v5331_v48 }
 0x4b5   : > { %3320 = vst.msk [vmem:[#allocation2 + $0x248] sm:$0xf] %vm1444_vm8, %v3254_v27  ;;  %v3545_v37 = vpop.permute.xlu0 %3544 }
 0x4b6   : > { %3319 = vst.msk [vmem:[#allocation2 + $0x234] sm:$0xf] %vm1444_vm8, %v3252_v36  ;;  %v5508_v35 = vpop.f32.mrf.mxu0  ;;  %v6470_v16 = vld [vmem:[#allocation2 + $0x23c] sm:$0xf] }
 0x4b7   : > { %3611 = vst.msk [vmem:[#allocation2 + $0x250] sm:$0xf] %vm2089_vm9, %v3545_v37  ;;  %v5509_v56 = vadd.f32 %v5508_v35, %v5420_v61 }
 0x4b9   : > { %5564 = vst.msk [vmem:[%s10306_s30 + $0x88] sm:$0xff] %vm5546_vm11, %v5509_v56 }
 0x4bc   : > { %v4193_v39 = vpop.permute.xlu2 %4192  ;;  %v3699_v4 = vpop.permute.xlu1 %3698 }
 0x4bd   : > { %4260 = vst.msk [vmem:[#allocation2 + $0x240] sm:$0xf] %vm575_vm3, %v4193_v39  ;;  %v3697_v38 = vpop.permute.xlu0 %3696  ;;  %v5422_v58 = vpop.f32.mrf.mxu3  ;;  %v5161_v39 = vadd.f32 %v10608_v33, %v10150_v8  ;;  %v5163_v8 = vadd.f32 %v10608_v33, %v10173_v2  ;;  %v5166_v2 = vadd.f32 %v10608_v33, %v10202_v49 }
 0x4be   : > { %3765 = vst.msk [vmem:[#allocation2 + $0x248] sm:$0xf] %vm2089_vm9, %v3699_v4  ;;  %v6209_v25 = vld [vmem:[#allocation2 + $0x24c] sm:$0xf0]  ;;  %v5244_v9 = vpop.f32.mrf.mxu1  ;;  %v5338_v55 = vpop.f32.mrf.mxu2 }
 0x4bf   : > { %3764 = vst.msk [vmem:[#allocation2 + $0x234] sm:$0xf] %vm2089_vm9, %v3697_v38  ;;  %v6212_v10 = vor.u32 %v6470_v16, %v6209_v25  ;;  %v5245_v60 = vadd.f32 %v5244_v9, %v5156_v51 }
 0x4c1   : > { %5446 = vmatmul.bf16.gmra.mxu3 %v6212_v10  ;;  %v5334_v57 = vadd.f32 %v5333_v26, %v5245_v60 }
 0x4c3   : > { %v5423_v14 = vadd.f32 %v5422_v58, %v5334_v57 }
 0x4c4   : > { %v3128_v18 = vpop.permute.xlu2 %3127  ;;  %v3126_v54 = vpop.permute.xlu1 %3125  ;;  %v6215_v46 = vld [vmem:[#allocation2 + $0x240] sm:$0xf] }
 0x4c5   : > { %3192 = vst.msk [vmem:[#allocation2 + $0x278] sm:$0xf] %vm1444_vm8, %v3128_v18  ;;  %v6201_v62 = vld [vmem:[#allocation2 + $0x244] sm:$0xf0]  ;;  %v4195_v11 = vpop.permute.xlu0 %4194  ;;  %v5424_v17 = vpop.f32.mrf.mxu3 }
 0x4c6   : > { %3191 = vst.msk [vmem:[#allocation2 + $0x264] sm:$0xf] %vm1444_vm8, %v3126_v54  ;;  %v5511_v41 = vpop.f32.mrf.mxu0  ;;  %v6469_v28 = vld [vmem:[#allocation2 + $0x234] sm:$0xf]  ;;  %v5246_v1 = vpop.f32.mrf.mxu1 }
 0x4c7   : > { %4261 = vst.msk [vmem:[#allocation2 + $0x254] sm:$0xf] %vm575_vm3, %v4195_v11  ;;  %v5512_v3 = vadd.f32 %v5511_v41, %v5423_v14  ;;  %v6204_v23 = vor.u32 %v6469_v28, %v6201_v62  ;;  %v5247_v15 = vadd.f32 %v5246_v1, %v5158_v20  ;;  %v5340_v63 = vpop.f32.mrf.mxu2  ;;  %v5168_v28 = vadd.f32 %v10608_v33, %v10233_v32 }
 0x4c8   : > { %v5171_v32 = vadd.f32 %v10608_v33, %v10058_v44 }
 0x4c9   : > { %5565 = vst.msk [vmem:[%s10306_s30 + $0x90] sm:$0xff] %vm5546_vm11, %v5512_v3  ;;  %5268 = vmatmul.bf16.gmra.mxu1 %v6204_v23  ;;  %v5336_v40 = vadd.f32 %v5335_v22, %v5247_v15 }
 0x4cb   : > { %v5425_v47 = vadd.f32 %v5424_v17, %v5336_v40 }
 0x4cc   : > { %v3256_v53 = vpop.permute.xlu2 %3255  ;;  %v3549_v5 = vpop.permute.xlu1 %3548 }
 0x4cd   : > { %3321 = vst.msk [vmem:[#allocation2 + $0x25c] sm:$0xf] %vm1444_vm8, %v3256_v53  ;;  %v3547_v0 = vpop.permute.xlu0 %3546 }
 0x4ce   : > { %3613 = vst.msk [vmem:[#allocation2 + $0x278] sm:$0xf] %vm2089_vm9, %v3549_v5  ;;  %v5513_v42 = vpop.f32.mrf.mxu0  ;;  %v6473_v48 = vld [vmem:[#allocation2 + $0x250] sm:$0xf0] }
 0x4cf   : > { %3612 = vst.msk [vmem:[#allocation2 + $0x264] sm:$0xf] %vm2089_vm9, %v3547_v0  ;;  %v5514_v24 = vadd.f32 %v5513_v42, %v5425_v47  ;;  %v6216_v27 = vor.u32 %v6473_v48, %v6215_v46 }
 0x4d1   : > { %5566 = vst.msk [vmem:[%s10306_s30 + $0x98] sm:$0xff] %vm5546_vm11, %v5514_v24  ;;  %6395 = vmatmul.msk.bf16.gmra.mxu0 %vm5052_vm10, %v6216_v27 }
 0x4d4   : > { %v3701_v36 = vpop.permute.xlu1 %3700  ;;  %v3703_v61 = vpop.permute.xlu2 %3702 }
 0x4d5   : > { %v6229_v37 = vld [vmem:[#allocation2 + $0x274] sm:$0xf0]  ;;  %3766 = vst.msk [vmem:[#allocation2 + $0x25c] sm:$0xf] %vm2089_vm9, %v3701_v36  ;;  %v3258_v35 = vpop.permute.xlu0 %3257  ;;  %v5427_v38 = vpop.f32.mrf.mxu3  ;;  %v5173_v36 = vadd.f32 %v10608_v33, %v10079_v34 }
 0x4d6   : > { %v6475_v56 = vld [vmem:[#allocation2 + $0x264] sm:$0xf]  ;;  %3322 = vst.msk [vmem:[#allocation2 + $0x270] sm:$0xf] %vm1444_vm8, %v3258_v35  ;;  %v5343_v54 = vpop.f32.mrf.mxu2 }
 0x4d7   : > { %v6232_v7 = vor.u32 %v6475_v56, %v6229_v37  ;;  %3767 = vst.msk [vmem:[#allocation2 + $0x270] sm:$0xf] %vm2089_vm9, %v3703_v61 }
 0x4d9   : > { %5451 = vmatmul.bf16.gmra.mxu3 %v6232_v7 }
 0x4dc   : > { %v4199_v29 = vpop.permute.xlu1 %4198  ;;  %v6474_v19 = vld [vmem:[#allocation2 + $0x25c] sm:$0xf] }
 0x4dd   : > { %4263 = vst.msk [vmem:[#allocation2 + $0x27c] sm:$0xf] %vm575_vm3, %v4199_v29  ;;  %v4197_v4 = vpop.permute.xlu0 %4196  ;;  %v5516_v25 = vpop.f32.mrf.mxu0 }
 0x4de   : > { %4262 = vst.msk [vmem:[#allocation2 + $0x268] sm:$0xf] %vm575_vm3, %v4197_v4  ;;  %v6221_v6 = vld [vmem:[#allocation2 + $0x26c] sm:$0xf0]  ;;  %v5429_v59 = vpop.f32.mrf.mxu3  ;;  %v5345_v1 = vpop.f32.mrf.mxu2 }
 0x4df   : > { %v5249_v26 = vpop.f32.mrf.mxu1  ;;  %v6224_v31 = vor.u32 %v6474_v19, %v6221_v6 }
 0x4e0   : > { %v5250_v51 = vadd.f32 %v5249_v26, %v5161_v39  ;;  %v5176_v26 = vadd.f32 %v10608_v33, %v10103_v45 }
 0x4e1   : > { %5273 = vmatmul.bf16.gmra.mxu1 %v6224_v31 }
 0x4e2   : > { %v5339_v16 = vadd.f32 %v5338_v55, %v5250_v51 }
 0x4e4   : > { %v5428_v13 = vadd.f32 %v5427_v38, %v5339_v16  ;;  %v6478_v9 = vld [vmem:[#allocation2 + $0x278] sm:$0xf0] }
 0x4e5   : > { %v6235_v60 = vld [vmem:[#allocation2 + $0x268] sm:$0xf]  ;;  %v5518_v18 = vpop.f32.mrf.mxu0 }
 0x4e6   : > { %v5517_v10 = vadd.f32 %v5516_v25, %v5428_v13  ;;  %v6236_v58 = vor.u32 %v6478_v9, %v6235_v60  ;;  %v5348_v0 = vpop.f32.mrf.mxu2  ;;  %v5178_v25 = vadd.f32 %v10608_v33, %v10140_v52 }
 0x4e7   : > { %v5251_v30 = vpop.f32.mrf.mxu1 }
 0x4e8   : > { %5567 = vst.msk [vmem:[%s10306_s30 + $0xa0] sm:$0xff] %vm5546_vm11, %v5517_v10  ;;  %v5252_v57 = vadd.f32 %v5251_v30, %v5163_v8  ;;  %6396 = vmatmul.msk.bf16.gmra.mxu0 %vm5052_vm10, %v6236_v58 }
 0x4ea   : > { %v5341_v43 = vadd.f32 %v5340_v63, %v5252_v57 }
 0x4ec   : > { %v5430_v14 = vadd.f32 %v5429_v59, %v5341_v43  ;;  %v5181_v43 = vadd.f32 %v10608_v33, %v10166_v21 }
 0x4ee   : > { %v5519_v50 = vadd.f32 %v5518_v18, %v5430_v14  ;;  %v5350_v56 = vpop.f32.mrf.mxu2 }
 0x4f0   : > { %5568 = vst.msk [vmem:[%s10306_s30 + $0xa8] sm:$0xff] %vm5546_vm11, %v5519_v50  ;;  %v5183_v50 = vadd.f32 %v10608_v33, %v10197_v12 }
 0x4f4   : > { %v5432_v41 = vpop.f32.mrf.mxu3 }
 0x4f6   : > { %v5254_v62 = vpop.f32.mrf.mxu1 }
 0x4f7   : > { %v5255_v20 = vadd.f32 %v5254_v62, %v5166_v2 }
 0x4f9   : > { %v5344_v11 = vadd.f32 %v5343_v54, %v5255_v20 }
 0x4fb   : > { %v5433_v3 = vadd.f32 %v5432_v41, %v5344_v11 }
 0x4fc   : > { %v5434_v47 = vpop.f32.mrf.mxu3 }
 0x4fe   : > { %v5256_v23 = vpop.f32.mrf.mxu1  ;;  %v5521_v22 = vpop.f32.mrf.mxu0 }
 0x4ff   : > { %v5257_v15 = vadd.f32 %v5256_v23, %v5168_v28  ;;  %v5522_v40 = vadd.f32 %v5521_v22, %v5433_v3  ;;  %v11467_v22 = vld [vmem:[#allocation3_spill] sm:$0xff] }
 0x501   : > { %5569 = vst.msk [vmem:[%s10306_s30 + $0xb0] sm:$0xff] %vm5546_vm11, %v5522_v40  ;;  %v5346_v17 = vadd.f32 %v5345_v1, %v5257_v15  ;;  %v5186_v15 = vadd.f32 %v10608_v33, %v11467_v22 }
 0x503   : > { %v5435_v53 = vadd.f32 %v5434_v47, %v5346_v17 }
 0x505   : > { %v5353_v4 = vpop.f32.mrf.mxu2 }
 0x506   : > { %v5523_v49 = vpop.f32.mrf.mxu0 }
 0x507   : > { %v5524_v5 = vadd.f32 %v5523_v49, %v5435_v53 }
 0x509   : > { %5570 = vst.msk [vmem:[%s10306_s30 + $0xb8] sm:$0xff] %vm5546_vm11, %v5524_v5  ;;  %v11468_v5 = vld [vmem:[#allocation6_spill] sm:$0xff] }
 0x50c   : > { %v5437_v48 = vpop.f32.mrf.mxu3 }
 0x50d   : > { %v5355_v8 = vpop.f32.mrf.mxu2 }
 0x50e   : > { %v5259_v42 = vpop.f32.mrf.mxu1 }
 0x50f   : > { %v5260_v46 = vadd.f32 %v5259_v42, %v5171_v32 }
 0x511   : > { %v5349_v24 = vadd.f32 %v5348_v0, %v5260_v46  ;;  %v5188_v0 = vadd.f32 %v10608_v33, %v11468_v5 }
 0x513   : > { %v5438_v27 = vadd.f32 %v5437_v48, %v5349_v24 }
 0x514   : > { %v5439_v55 = vpop.f32.mrf.mxu3 }
 0x516   : > { %v5526_v61 = vpop.f32.mrf.mxu0  ;;  %v5261_v35 = vpop.f32.mrf.mxu1 }
 0x517   : > { %v5527_v37 = vadd.f32 %v5526_v61, %v5438_v27  ;;  %v5262_v7 = vadd.f32 %v5261_v35, %v5173_v36  ;;  %v5358_v57 = vpop.f32.mrf.mxu2 }
 0x519   : > { %5571 = vst.msk [vmem:[%s10306_s30 + $0xc0] sm:$0xff] %vm5546_vm11, %v5527_v37  ;;  %v5351_v29 = vadd.f32 %v5350_v56, %v5262_v7 }
 0x51b   : > { %v5440_v19 = vadd.f32 %v5439_v55, %v5351_v29 }
 0x51e   : > { %v5528_v44 = vpop.f32.mrf.mxu0 }
 0x51f   : > { %v5529_v39 = vadd.f32 %v5528_v44, %v5440_v19  ;;  %v5360_v2 = vpop.f32.mrf.mxu2 }
 0x521   : > { %5572 = vst.msk [vmem:[%s10306_s30 + $0xc8] sm:$0xff] %vm5546_vm11, %v5529_v39 }
 0x525   : > { %v5442_v51 = vpop.f32.mrf.mxu3 }
 0x527   : > { %v5363_v12 = vpop.f32.mrf.mxu2 }
 0x52d   : > { %v5531_v38 = vpop.f32.mrf.mxu0  ;;  %v5444_v30 = vpop.f32.mrf.mxu3 }
 0x52e   : > { %v5264_v34 = vpop.f32.mrf.mxu1 }
 0x52f   : > { %v5265_v6 = vadd.f32 %v5264_v34, %v5176_v26  ;;  %v5365_v24 = vpop.f32.mrf.mxu2 }
 0x531   : > { %v5354_v31 = vadd.f32 %v5353_v4, %v5265_v6 }
 0x533   : > { %v5443_v16 = vadd.f32 %v5442_v51, %v5354_v31 }
 0x535   : > { %v5532_v13 = vadd.f32 %v5531_v38, %v5443_v16  ;;  %v5533_v45 = vpop.f32.mrf.mxu0 }
 0x536   : > { %v5266_v9 = vpop.f32.mrf.mxu1 }
 0x537   : > { %5573 = vst.msk [vmem:[%s10306_s30 + $0xd0] sm:$0xff] %vm5546_vm11, %v5532_v13  ;;  %v5267_v10 = vadd.f32 %v5266_v9, %v5178_v25 }
 0x539   : > { %v5356_v60 = vadd.f32 %v5355_v8, %v5267_v10 }
 0x53b   : > { %v5445_v63 = vadd.f32 %v5444_v30, %v5356_v60 }
 0x53d   : > { %v5534_v58 = vadd.f32 %v5533_v45, %v5445_v63 }
 0x53f   : > { %5574 = vst.msk [vmem:[%s10306_s30 + $0xd8] sm:$0xff] %vm5546_vm11, %v5534_v58 }
 0x544   : > { %v5447_v18 = vpop.f32.mrf.mxu3 }
 0x546   : > { %v5269_v59 = vpop.f32.mrf.mxu1 }
 0x547   : > { %v5270_v52 = vadd.f32 %v5269_v59, %v5181_v43 }
 0x549   : > { %v5359_v14 = vadd.f32 %v5358_v57, %v5270_v52 }
 0x54b   : > { %v5448_v54 = vadd.f32 %v5447_v18, %v5359_v14 }
 0x54c   : > { %v5449_v3 = vpop.f32.mrf.mxu3 }
 0x54e   : > { %v5271_v62 = vpop.f32.mrf.mxu1  ;;  %v5536_v20 = vpop.f32.mrf.mxu0 }
 0x54f   : > { %v5272_v11 = vadd.f32 %v5271_v62, %v5183_v50  ;;  %v5537_v41 = vadd.f32 %v5536_v20, %v5448_v54 }
 0x551   : > { %5575 = vst.msk [vmem:[%s10306_s30 + $0xe0] sm:$0xff] %vm5546_vm11, %v5537_v41  ;;  %v5361_v28 = vadd.f32 %v5360_v2, %v5272_v11 }
 0x553   : > { %v5450_v1 = vadd.f32 %v5449_v3, %v5361_v28 }
 0x556   : > { %v5538_v21 = vpop.f32.mrf.mxu0 }
 0x557   : > { %v5539_v23 = vadd.f32 %v5538_v21, %v5450_v1 }
 0x559   : > { %5576 = vst.msk [vmem:[%s10306_s30 + $0xe8] sm:$0xff] %vm5546_vm11, %v5539_v23 }
 0x55c   : > { %v5452_v47 = vpop.f32.mrf.mxu3 }
 0x55e   : > { %v5274_v40 = vpop.f32.mrf.mxu1 }
 0x55f   : > { %v5275_v17 = vadd.f32 %v5274_v40, %v5186_v15 }
 0x561   : > { %v5364_v53 = vadd.f32 %v5363_v12, %v5275_v17 }
 0x563   : > { %v5453_v49 = vadd.f32 %v5452_v47, %v5364_v53 }
 0x564   : > { %v5454_v36 = vpop.f32.mrf.mxu3 }
 0x565   : > { %v5541_v32 = vpop.f32.mrf.mxu0 }
 0x566   : > { %v5542_v42 = vadd.f32 %v5541_v32, %v5453_v49  ;;  %v5276_v46 = vpop.f32.mrf.mxu1 }
 0x567   : > { %v5277_v48 = vadd.f32 %v5276_v46, %v5188_v0 }
 0x568   : > { %5577 = vst.msk [vmem:[%s10306_s30 + $0xf0] sm:$0xff] %vm5546_vm11, %v5542_v42 }
 0x569   : > { %v5366_v27 = vadd.f32 %v5365_v24, %v5277_v48 }
 0x56b   : > { %v5455_v61 = vadd.f32 %v5454_v36, %v5366_v27 }
 0x56d   : > { %v5543_v37 = vpop.f32.mrf.mxu0 }
 0x56e   : > { %v5544_v35 = vadd.f32 %v5543_v37, %v5455_v61 }
 0x570   : > { %5578 = vst.msk [vmem:[%s10306_s30 + $0xf8] sm:$0xff] %vm5546_vm11, %v5544_v35 }
 0x571 PF: > { %s14_s15 = sadd.s32 1, %s7299_s15  }
 0x572   : > { %p11_p5 = scmp.ge.s32.totalorder %s14_s15, 4  }
 0x574   :  { %13 = sbr.rel (!%p11_p5) target bundleno = 1 (0x1), region = 74 }

</bundles_post_ra>
